<compile_context>
chip_gen: v5e
topology: v5e:2x2
jax: 0.10.0
libtpu: 0.0.40
codegen_flags: <defaults>
</compile_context>

<pallas_src>
import functools

import jax
import jax.numpy as jnp
import numpy as np
from jax.experimental import pallas as pl
from jax.experimental.pallas import tpu as pltpu


def _round_up(x, m):
    return ((x + m - 1) // m) * m


# ----------------------------------------------------------------------------
# Pallas kernel: fused conv (space-to-depth form) + bias + ReLU.
#   x_ref : (1, rows_in, Wa, C4p)  bf16   rows_in = tile_ho + q - 1 (halo'd tile)
#   w_ref : (q*q*C4p, Cout)        bf16   resident across the grid
#   b_ref : (1, Cout)              f32
#   o_ref : (1, tile_ho*Wo, Cout)  bf16   dense (unpadded) channel dim
# The q*q shifted windows are concatenated along the (128-aligned) channel axis in
# VMEM, giving one lane-dense patch matrix and a single MXU matmul per grid step.
# ----------------------------------------------------------------------------
def _conv_s2d_kernel(x_ref, w_ref, b_ref, o_ref, *, q, tile_ho, wo, relu):
    cols = []
    for qi in range(q):
        for qj in range(q):
            cols.append(x_ref[0, qi:qi + tile_ho, qj:qj + wo, :])
    patches = jnp.concatenate(cols, axis=-1)                  # (tile_ho, wo, Kp)
    patches = patches.reshape(tile_ho * wo, patches.shape[-1])
    acc = jnp.dot(patches, w_ref[...], preferred_element_type=jnp.float32)
    acc = acc + b_ref[...]
    if relu:
        acc = jnp.maximum(acc, 0.0)
    o_ref[0] = acc.astype(o_ref.dtype)


def _pick_tile_ho(ho, wo, kp, c4p, wa, q, budget=6 * 1024 * 1024):
    """Adaptive output-row tile: cap the bf16 patch matrix and the halo'd input block."""
    rows = max(1, budget // (2 * kp))                 # patch-matrix rows within budget
    tile = max(1, min(ho, rows // max(wo, 1)))
    while tile > 1 and (tile + q - 1) * wa * c4p * 2 > budget:
        tile -= 1
    return tile


def conv2d_relu(x, w_eff, b, *, ksize, cout, relu=True):
    """Stride-2 Conv2d(k, pad=(k-1)//2) + ReLU.  x: (N,H,W,C) bf16, w_eff pre-packed."""
    N, H, W, C = x.shape
    p = (ksize - 1) // 2
    q = (ksize + 1) // 2                              # taps per axis after parity split
    Ho = (H + 2 * p - ksize) // 2 + 1
    Wo = (W + 2 * p - ksize) // 2 + 1
    C4 = 4 * C                                        # (ri, rj, c) packed channels
    C4p = _round_up(C4, 128)                          # lane-aligned in-kernel concat
    Kp = q * q * C4p
    assert w_eff.shape == (Kp, cout)

    Wa = Wo + q - 1
    tile_ho = _pick_tile_ho(Ho, Wo, Kp, C4p, Wa, q)
    T = -(-Ho // tile_ho)
    Ho_pad = T * tile_ho
    rows_in = tile_ho + q - 1
    Ha = Ho_pad + q - 1

    # Zero-pad so the (2*Ha, 2*Wa) space-to-depth grid is fully in-bounds.
    xp = jnp.pad(x, ((0, 0), (p, 2 * Ha - H - p), (p, 2 * Wa - W - p), (0, 0)))

    # Halo'd row tiles: tile t needs the 2*rows_in consecutive input rows starting at
    # 2*t*tile_ho (duplication ~(tile_ho+q-1)/tile_ho of input-sized data, not k*k).
    if T > 1:
        rows = (np.arange(T)[:, None] * (2 * tile_ho)
                + np.arange(2 * rows_in)[None, :]).reshape(-1)
        xt = jnp.take(xp, jnp.asarray(rows), axis=1)  # (N, T*2*rows_in, 2*Wa, C)
    else:
        xt = xp

    # Space-to-depth: stride-2 handled once here, so the kernel only does contiguous,
    # lane-aligned static slices.
    xt = xt.reshape(N, T, rows_in, 2, Wa, 2, C)
    xt = xt.transpose(0, 1, 2, 4, 3, 5, 6).reshape(N * T, rows_in, Wa, C4)
    if C4p != C4:
        xt = jnp.pad(xt, ((0, 0), (0, 0), (0, 0), (0, C4p - C4)))

    M = tile_ho * Wo
    cost = pl.CostEstimate(
        flops=2 * N * T * M * Kp * cout,
        transcendentals=0,
        bytes_accessed=(xt.size * xt.dtype.itemsize
                        + w_eff.size * w_eff.dtype.itemsize
                        + N * T * M * cout * 2 + cout * 4),
    )
    out = pl.pallas_call(
        functools.partial(_conv_s2d_kernel, q=q, tile_ho=tile_ho, wo=Wo, relu=relu),
        out_shape=jax.ShapeDtypeStruct((N * T, M, cout), jnp.bfloat16),
        grid=(N * T,),
        in_specs=[
            pl.BlockSpec((1, rows_in, Wa, C4p), lambda i: (i, 0, 0, 0)),
            pl.BlockSpec((Kp, cout), lambda i: (0, 0)),     # resident weight
            pl.BlockSpec((1, cout), lambda i: (0, 0)),      # resident bias
        ],
        out_specs=pl.BlockSpec((1, M, cout), lambda i: (i, 0, 0)),
        compiler_params=pltpu.CompilerParams(
            dimension_semantics=("parallel",),              # megacore split on v7x
            vmem_limit_bytes=48 * 1024 * 1024,
        ),
        cost_estimate=cost,
    )(xt, w_eff, b)
    return out.reshape(N, Ho_pad, Wo, cout)[:, :Ho]


# ----------------------------------------------------------------------------
# Pallas kernel: fused pose head — spatial mean, then (B,C)@(C,P), scale 0.01.
# Exact because pose_pred is a 1x1 conv with no activation: mean(xW+b) == mean(x)W+b.
# ----------------------------------------------------------------------------
def _pose_kernel(x_ref, w_ref, b_ref, o_ref):
    xm = jnp.mean(x_ref[...].astype(jnp.float32), axis=1)          # (B, C)
    y = jnp.dot(xm, w_ref[...], preferred_element_type=jnp.float32) + b_ref[...]
    o_ref[...] = (0.01 * y).astype(o_ref.dtype)


def pose_pred_mean(x_bhwc, w, b):
    B, H, W, C = x_bhwc.shape
    P = w.shape[1]
    x = x_bhwc.reshape(B, H * W, C)
    return pl.pallas_call(
        _pose_kernel,
        out_shape=jax.ShapeDtypeStruct((B, P), jnp.float32),
        grid=(1,),
        in_specs=[
            pl.BlockSpec((B, H * W, C), lambda i: (0, 0, 0)),
            pl.BlockSpec((C, P), lambda i: (0, 0)),
            pl.BlockSpec((1, P), lambda i: (0, 0)),
        ],
        out_specs=pl.BlockSpec((B, P), lambda i: (0, 0)),
    )(x, w, b)


# ----------------------------------------------------------------------------
# Parameters: deterministic xavier-uniform, zero bias, packed/cast once (review item).
# ----------------------------------------------------------------------------
def _xavier_conv(key, kh, kw, cin, cout):
    fan_in = cin * kh * kw
    fan_out = cout * kh * kw
    limit = (6.0 / (fan_in + fan_out)) ** 0.5
    return jax.random.uniform(key, (kh, kw, cin, cout), jnp.float32, -limit, limit)


def _pack_conv_weight(w):
    """(k,k,Cin,Cout) -> (q*q*C4p, Cout), matching the kernel's tap/concat order."""
    kh, kw, cin, cout = w.shape
    q = (kh + 1) // 2
    c4p = _round_up(4 * cin, 128)
    wp = jnp.pad(w, ((0, 2 * q - kh), (0, 2 * q - kw), (0, 0), (0, 0)))
    wp = wp.reshape(q, 2, q, 2, cin, cout).transpose(0, 2, 1, 3, 4, 5)
    wp = wp.reshape(q, q, 4 * cin, cout)
    wp = jnp.pad(wp, ((0, 0), (0, 0), (0, c4p - 4 * cin), (0, 0)))
    return wp.reshape(q * q * c4p, cout)


def make_params(nb_ref_imgs=2, seed=0):
    conv_planes = [16, 32, 64, 128, 256, 256, 256]
    ksizes = [7, 5, 3, 3, 3, 3, 3]
    key = jax.random.PRNGKey(seed)
    params = {}
    cin = 3 * (1 + nb_ref_imgs)
    for idx, (cout, k) in enumerate(zip(conv_planes, ksizes), start=1):
        key, sub = jax.random.split(key)
        w = _xavier_conv(sub, k, k, cin, cout)
        params[f"conv{idx}"] = (
            _pack_conv_weight(w).astype(jnp.bfloat16),      # packed + bf16 once
            jnp.zeros((1, cout), jnp.float32),
        )
        cin = cout
    key, sub = jax.random.split(key)
    wp = _xavier_conv(sub, 1, 1, conv_planes[6], 6 * nb_ref_imgs)
    params["pose_pred"] = (wp.reshape(conv_planes[6], 6 * nb_ref_imgs),
                           jnp.zeros((1, 6 * nb_ref_imgs), jnp.float32))
    return params


# ----------------------------------------------------------------------------
# PoseExpNet forward (default flags -> only the pose branch is active, eval mode).
# bf16 activations / weights with f32 accumulation: small drift vs an f32 reference.
# ----------------------------------------------------------------------------
def pose_exp_net_forward(params, target_image_nchw, ref_imgs_nchw, nb_ref_imgs=2):
    assert len(ref_imgs_nchw) == nb_ref_imgs
    x = jnp.concatenate([target_image_nchw] + list(ref_imgs_nchw), axis=1)
    x = jnp.transpose(x, (0, 2, 3, 1)).astype(jnp.bfloat16)          # NCHW -> NHWC

    ksizes = [7, 5, 3, 3, 3, 3, 3]
    conv_planes = [16, 32, 64, 128, 256, 256, 256]
    out = x
    for idx, (k, cout) in enumerate(zip(ksizes, conv_planes), start=1):
        w, b = params[f"conv{idx}"]
        out = conv2d_relu(out, w, b, ksize=k, cout=cout, relu=True)

    wp, bp = params["pose_pred"]
    pose_flat = pose_pred_mean(out, wp, bp)                          # (B, 6*nb_ref)
    pose = pose_flat.reshape(pose_flat.shape[0], nb_ref_imgs, 6)

    # eval-mode return of the module (output_exp/pixel_pose/disp are False):
    # (exp_mask1, exp2_mask1, pixel_pose1, disp1, pose)
    # TODO(synk): upconv / mask / pixel-pose / disp branches are only built when the
    # corresponding output_* flags are True; the default config skips them.
    return None, None, None, None, pose


# ----------------------------------------------------------------------------
if __name__ == "__main__":
    B, H, W = 2, 16, 16
    nb_ref = 2

    key = jax.random.PRNGKey(0)
    k_t, k_r0, k_r1 = jax.random.split(key, 3)
    target = jax.random.normal(k_t, (B, 3, H, W), jnp.float32)
    refs = [
        jax.random.normal(k_r0, (B, 3, H, W), jnp.float32),
        jax.random.normal(k_r1, (B, 3, H, W), jnp.float32),
    ]

    params = make_params(nb_ref_imgs=nb_ref, seed=0)

    fwd = jax.jit(functools.partial(pose_exp_net_forward, nb_ref_imgs=nb_ref))
    _, _, _, _, pose = fwd(params, target, refs)
    pose = jax.block_until_ready(pose)
    assert pose.shape == (B, nb_ref, 6)
    assert pose.dtype == jnp.float32
    print("KERNEL_OK")
</pallas_src>

<mosaic_0001>
module attributes {stable_mosaic.version = 11 : i64} {
  func.func @_conv_s2d_kernel(%arg0: i32, %arg1: memref<1x11x11x128xbf16, #tpu.memory_space<vmem>>, %arg2: memref<2048x16xbf16, #tpu.memory_space<vmem>>, %arg3: memref<1x16xf32, #tpu.memory_space<vmem>>, %arg4: memref<1x64x16xbf16, #tpu.memory_space<vmem>>) attributes {dimension_semantics = [#tpu.dimension_semantics<parallel>], iteration_bounds = array<i64: 2>, scalar_prefetch = 0 : i64, scratch_operands = 0 : i64, tpu.core_type = #tpu.core_type<tc>, window_params = [{transform_indices = @transform_0, window_bounds = array<i64: 1, 11, 11, 128>}, {pipeline_mode = #tpu.pipeline_mode<synchronous>, transform_indices = @transform_1, window_bounds = array<i64: 2048, 16>}, {pipeline_mode = #tpu.pipeline_mode<synchronous>, transform_indices = @transform_2, window_bounds = array<i64: 1, 16>}, {transform_indices = @transform_3, window_bounds = array<i64: 1, 64, 16>}]} {
    %c0 = arith.constant 0 : index
    %c0_0 = arith.constant 0 : index
    %c0_1 = arith.constant 0 : index
    %c0_2 = arith.constant 0 : index
    %0 = vector.load %arg1[%c0, %c0_0, %c0_1, %c0_2] : memref<1x11x11x128xbf16, #tpu.memory_space<vmem>>, vector<1x8x8x128xbf16>
    %1 = vector.shape_cast %0 : vector<1x8x8x128xbf16> to vector<8x8x128xbf16>
    %c0_3 = arith.constant 0 : index
    %c0_4 = arith.constant 0 : index
    %c1 = arith.constant 1 : index
    %c0_5 = arith.constant 0 : index
    %2 = vector.load %arg1[%c0_3, %c0_4, %c1, %c0_5] : memref<1x11x11x128xbf16, #tpu.memory_space<vmem>>, vector<1x8x8x128xbf16>
    %3 = vector.shape_cast %2 : vector<1x8x8x128xbf16> to vector<8x8x128xbf16>
    %c0_6 = arith.constant 0 : index
    %c0_7 = arith.constant 0 : index
    %c2 = arith.constant 2 : index
    %c0_8 = arith.constant 0 : index
    %4 = vector.load %arg1[%c0_6, %c0_7, %c2, %c0_8] : memref<1x11x11x128xbf16, #tpu.memory_space<vmem>>, vector<1x8x8x128xbf16>
    %5 = vector.shape_cast %4 : vector<1x8x8x128xbf16> to vector<8x8x128xbf16>
    %c0_9 = arith.constant 0 : index
    %c0_10 = arith.constant 0 : index
    %c3 = arith.constant 3 : index
    %c0_11 = arith.constant 0 : index
    %6 = vector.load %arg1[%c0_9, %c0_10, %c3, %c0_11] : memref<1x11x11x128xbf16, #tpu.memory_space<vmem>>, vector<1x8x8x128xbf16>
    %7 = vector.shape_cast %6 : vector<1x8x8x128xbf16> to vector<8x8x128xbf16>
    %c0_12 = arith.constant 0 : index
    %c1_13 = arith.constant 1 : index
    %c0_14 = arith.constant 0 : index
    %c0_15 = arith.constant 0 : index
    %8 = vector.load %arg1[%c0_12, %c1_13, %c0_14, %c0_15] : memref<1x11x11x128xbf16, #tpu.memory_space<vmem>>, vector<1x8x8x128xbf16>
    %9 = vector.shape_cast %8 : vector<1x8x8x128xbf16> to vector<8x8x128xbf16>
    %c0_16 = arith.constant 0 : index
    %c1_17 = arith.constant 1 : index
    %c1_18 = arith.constant 1 : index
    %c0_19 = arith.constant 0 : index
    %10 = vector.load %arg1[%c0_16, %c1_17, %c1_18, %c0_19] : memref<1x11x11x128xbf16, #tpu.memory_space<vmem>>, vector<1x8x8x128xbf16>
    %11 = vector.shape_cast %10 : vector<1x8x8x128xbf16> to vector<8x8x128xbf16>
    %c0_20 = arith.constant 0 : index
    %c1_21 = arith.constant 1 : index
    %c2_22 = arith.constant 2 : index
    %c0_23 = arith.constant 0 : index
    %12 = vector.load %arg1[%c0_20, %c1_21, %c2_22, %c0_23] : memref<1x11x11x128xbf16, #tpu.memory_space<vmem>>, vector<1x8x8x128xbf16>
    %13 = vector.shape_cast %12 : vector<1x8x8x128xbf16> to vector<8x8x128xbf16>
    %c0_24 = arith.constant 0 : index
    %c1_25 = arith.constant 1 : index
    %c3_26 = arith.constant 3 : index
    %c0_27 = arith.constant 0 : index
    %14 = vector.load %arg1[%c0_24, %c1_25, %c3_26, %c0_27] : memref<1x11x11x128xbf16, #tpu.memory_space<vmem>>, vector<1x8x8x128xbf16>
    %15 = vector.shape_cast %14 : vector<1x8x8x128xbf16> to vector<8x8x128xbf16>
    %c0_28 = arith.constant 0 : index
    %c2_29 = arith.constant 2 : index
    %c0_30 = arith.constant 0 : index
    %c0_31 = arith.constant 0 : index
    %16 = vector.load %arg1[%c0_28, %c2_29, %c0_30, %c0_31] : memref<1x11x11x128xbf16, #tpu.memory_space<vmem>>, vector<1x8x8x128xbf16>
    %17 = vector.shape_cast %16 : vector<1x8x8x128xbf16> to vector<8x8x128xbf16>
    %c0_32 = arith.constant 0 : index
    %c2_33 = arith.constant 2 : index
    %c1_34 = arith.constant 1 : index
    %c0_35 = arith.constant 0 : index
    %18 = vector.load %arg1[%c0_32, %c2_33, %c1_34, %c0_35] : memref<1x11x11x128xbf16, #tpu.memory_space<vmem>>, vector<1x8x8x128xbf16>
    %19 = vector.shape_cast %18 : vector<1x8x8x128xbf16> to vector<8x8x128xbf16>
    %c0_36 = arith.constant 0 : index
    %c2_37 = arith.constant 2 : index
    %c2_38 = arith.constant 2 : index
    %c0_39 = arith.constant 0 : index
    %20 = vector.load %arg1[%c0_36, %c2_37, %c2_38, %c0_39] : memref<1x11x11x128xbf16, #tpu.memory_space<vmem>>, vector<1x8x8x128xbf16>
    %21 = vector.shape_cast %20 : vector<1x8x8x128xbf16> to vector<8x8x128xbf16>
    %c0_40 = arith.constant 0 : index
    %c2_41 = arith.constant 2 : index
    %c3_42 = arith.constant 3 : index
    %c0_43 = arith.constant 0 : index
    %22 = vector.load %arg1[%c0_40, %c2_41, %c3_42, %c0_43] : memref<1x11x11x128xbf16, #tpu.memory_space<vmem>>, vector<1x8x8x128xbf16>
    %23 = vector.shape_cast %22 : vector<1x8x8x128xbf16> to vector<8x8x128xbf16>
    %c0_44 = arith.constant 0 : index
    %c3_45 = arith.constant 3 : index
    %c0_46 = arith.constant 0 : index
    %c0_47 = arith.constant 0 : index
    %24 = vector.load %arg1[%c0_44, %c3_45, %c0_46, %c0_47] : memref<1x11x11x128xbf16, #tpu.memory_space<vmem>>, vector<1x8x8x128xbf16>
    %25 = vector.shape_cast %24 : vector<1x8x8x128xbf16> to vector<8x8x128xbf16>
    %c0_48 = arith.constant 0 : index
    %c3_49 = arith.constant 3 : index
    %c1_50 = arith.constant 1 : index
    %c0_51 = arith.constant 0 : index
    %26 = vector.load %arg1[%c0_48, %c3_49, %c1_50, %c0_51] : memref<1x11x11x128xbf16, #tpu.memory_space<vmem>>, vector<1x8x8x128xbf16>
    %27 = vector.shape_cast %26 : vector<1x8x8x128xbf16> to vector<8x8x128xbf16>
    %c0_52 = arith.constant 0 : index
    %c3_53 = arith.constant 3 : index
    %c2_54 = arith.constant 2 : index
    %c0_55 = arith.constant 0 : index
    %28 = vector.load %arg1[%c0_52, %c3_53, %c2_54, %c0_55] : memref<1x11x11x128xbf16, #tpu.memory_space<vmem>>, vector<1x8x8x128xbf16>
    %29 = vector.shape_cast %28 : vector<1x8x8x128xbf16> to vector<8x8x128xbf16>
    %c0_56 = arith.constant 0 : index
    %c3_57 = arith.constant 3 : index
    %c3_58 = arith.constant 3 : index
    %c0_59 = arith.constant 0 : index
    %30 = vector.load %arg1[%c0_56, %c3_57, %c3_58, %c0_59] : memref<1x11x11x128xbf16, #tpu.memory_space<vmem>>, vector<1x8x8x128xbf16>
    %31 = vector.shape_cast %30 : vector<1x8x8x128xbf16> to vector<8x8x128xbf16>
    %32 = tpu.concatenate %1, %3, %5, %7, %9, %11, %13, %15, %17, %19, %21, %23, %25, %27, %29, %31 in 2 : vector<8x8x128xbf16>, vector<8x8x128xbf16>, vector<8x8x128xbf16>, vector<8x8x128xbf16>, vector<8x8x128xbf16>, vector<8x8x128xbf16>, vector<8x8x128xbf16>, vector<8x8x128xbf16>, vector<8x8x128xbf16>, vector<8x8x128xbf16>, vector<8x8x128xbf16>, vector<8x8x128xbf16>, vector<8x8x128xbf16>, vector<8x8x128xbf16>, vector<8x8x128xbf16>, vector<8x8x128xbf16> -> vector<8x8x2048xbf16>
    %33 = vector.shape_cast %32 : vector<8x8x2048xbf16> to vector<64x2048xbf16>
    %c0_60 = arith.constant 0 : index
    %c0_61 = arith.constant 0 : index
    %34 = vector.load %arg2[%c0_60, %c0_61] : memref<2048x16xbf16, #tpu.memory_space<vmem>>, vector<2048x16xbf16>
    %cst = arith.constant dense<0.000000e+00> : vector<64x16xf32>
    %35 = tpu.matmul %33, %34, %cst {dimension_numbers = #tpu.dot_dimension_numbers<[1], [0], [0], [1], [0, 0, 1, 1], [], []>} : vector<64x2048xbf16>, vector<2048x16xbf16>, vector<64x16xf32> -> vector<64x16xf32>
    %c0_62 = arith.constant 0 : index
    %c0_63 = arith.constant 0 : index
    %36 = vector.load %arg3[%c0_62, %c0_63] : memref<1x16xf32, #tpu.memory_space<vmem>>, vector<1x16xf32>
    %37 = vector.broadcast %36 : vector<1x16xf32> to vector<64x16xf32>
    %38 = arith.addf %35, %37 : vector<64x16xf32>
    %cst_64 = arith.constant 0.000000e+00 : f32
    %39 = vector.broadcast %cst_64 : f32 to vector<64x16xf32>
    %40 = arith.maximumf %38, %39 : vector<64x16xf32>
    %41 = arith.truncf %40 : vector<64x16xf32> to vector<64x16xbf16>
    %c0_65 = arith.constant 0 : index
    %c0_66 = arith.constant 0 : index
    %c0_67 = arith.constant 0 : index
    %42 = vector.load %arg4[%c0_65, %c0_66, %c0_67] : memref<1x64x16xbf16, #tpu.memory_space<vmem>>, vector<1x64x16xbf16>
    %43 = vector.shape_cast %42 : vector<1x64x16xbf16> to vector<64x16xbf16>
    %44 = vector.shape_cast %41 : vector<64x16xbf16> to vector<1x64x16xbf16>
    tpu.vector_store %arg4[%c0_65, %c0_66, %c0_67], %44 {strides = array<i32>} : memref<1x64x16xbf16, #tpu.memory_space<vmem>>, vector<1x64x16xbf16>,
    return
  }
  func.func @transform_0(%arg0: i32) -> (i32, i32, i32, i32) {
    %c0_i32 = arith.constant 0 : i32
    %c0_i32_0 = arith.constant 0 : i32
    %c0_i32_1 = arith.constant 0 : i32
    %c0_i32_2 = arith.constant 0 : i32
    return %arg0, %c0_i32, %c0_i32_0, %c0_i32_1 : i32, i32, i32, i32
  }
  func.func @transform_1(%arg0: i32) -> (i32, i32) {
    %c0_i32 = arith.constant 0 : i32
    %c0_i32_0 = arith.constant 0 : i32
    %c0_i32_1 = arith.constant 0 : i32
    return %c0_i32, %c0_i32_0 : i32, i32
  }
  func.func @transform_2(%arg0: i32) -> (i32, i32) {
    %c0_i32 = arith.constant 0 : i32
    %c0_i32_0 = arith.constant 0 : i32
    %c0_i32_1 = arith.constant 0 : i32
    return %c0_i32, %c0_i32_0 : i32, i32
  }
  func.func @transform_3(%arg0: i32) -> (i32, i32, i32) {
    %c0_i32 = arith.constant 0 : i32
    %c0_i32_0 = arith.constant 0 : i32
    %c0_i32_1 = arith.constant 0 : i32
    return %arg0, %c0_i32, %c0_i32_0 : i32, i32, i32
  }
}

module attributes {stable_mosaic.version = 11 : i64} {
  func.func @_conv_s2d_kernel(%arg0: i32, %arg1: memref<1x6x6x128xbf16, #tpu.memory_space<vmem>>, %arg2: memref<1152x32xbf16, #tpu.memory_space<vmem>>, %arg3: memref<1x32xf32, #tpu.memory_space<vmem>>, %arg4: memref<1x16x32xbf16, #tpu.memory_space<vmem>>) attributes {dimension_semantics = [#tpu.dimension_semantics<parallel>], iteration_bounds = array<i64: 2>, scalar_prefetch = 0 : i64, scratch_operands = 0 : i64, tpu.core_type = #tpu.core_type<tc>, window_params = [{transform_indices = @transform_0, window_bounds = array<i64: 1, 6, 6, 128>}, {pipeline_mode = #tpu.pipeline_mode<synchronous>, transform_indices = @transform_1, window_bounds = array<i64: 1152, 32>}, {pipeline_mode = #tpu.pipeline_mode<synchronous>, transform_indices = @transform_2, window_bounds = array<i64: 1, 32>}, {transform_indices = @transform_3, window_bounds = array<i64: 1, 16, 32>}]} {
    %c0 = arith.constant 0 : index
    %c0_0 = arith.constant 0 : index
    %c0_1 = arith.constant 0 : index
    %c0_2 = arith.constant 0 : index
    %0 = vector.load %arg1[%c0, %c0_0, %c0_1, %c0_2] : memref<1x6x6x128xbf16, #tpu.memory_space<vmem>>, vector<1x4x4x128xbf16>
    %1 = vector.shape_cast %0 : vector<1x4x4x128xbf16> to vector<4x4x128xbf16>
    %c0_3 = arith.constant 0 : index
    %c0_4 = arith.constant 0 : index
    %c1 = arith.constant 1 : index
    %c0_5 = arith.constant 0 : index
    %2 = vector.load %arg1[%c0_3, %c0_4, %c1, %c0_5] : memref<1x6x6x128xbf16, #tpu.memory_space<vmem>>, vector<1x4x4x128xbf16>
    %3 = vector.shape_cast %2 : vector<1x4x4x128xbf16> to vector<4x4x128xbf16>
    %c0_6 = arith.constant 0 : index
    %c0_7 = arith.constant 0 : index
    %c2 = arith.constant 2 : index
    %c0_8 = arith.constant 0 : index
    %4 = vector.load %arg1[%c0_6, %c0_7, %c2, %c0_8] : memref<1x6x6x128xbf16, #tpu.memory_space<vmem>>, vector<1x4x4x128xbf16>
    %5 = vector.shape_cast %4 : vector<1x4x4x128xbf16> to vector<4x4x128xbf16>
    %c0_9 = arith.constant 0 : index
    %c1_10 = arith.constant 1 : index
    %c0_11 = arith.constant 0 : index
    %c0_12 = arith.constant 0 : index
    %6 = vector.load %arg1[%c0_9, %c1_10, %c0_11, %c0_12] : memref<1x6x6x128xbf16, #tpu.memory_space<vmem>>, vector<1x4x4x128xbf16>
    %7 = vector.shape_cast %6 : vector<1x4x4x128xbf16> to vector<4x4x128xbf16>
    %c0_13 = arith.constant 0 : index
    %c1_14 = arith.constant 1 : index
    %c1_15 = arith.constant 1 : index
    %c0_16 = arith.constant 0 : index
    %8 = vector.load %arg1[%c0_13, %c1_14, %c1_15, %c0_16] : memref<1x6x6x128xbf16, #tpu.memory_space<vmem>>, vector<1x4x4x128xbf16>
    %9 = vector.shape_cast %8 : vector<1x4x4x128xbf16> to vector<4x4x128xbf16>
    %c0_17 = arith.constant 0 : index
    %c1_18 = arith.constant 1 : index
    %c2_19 = arith.constant 2 : index
    %c0_20 = arith.constant 0 : index
    %10 = vector.load %arg1[%c0_17, %c1_18, %c2_19, %c0_20] : memref<1x6x6x128xbf16, #tpu.memory_space<vmem>>, vector<1x4x4x128xbf16>
    %11 = vector.shape_cast %10 : vector<1x4x4x128xbf16> to vector<4x4x128xbf16>
    %c0_21 = arith.constant 0 : index
    %c2_22 = arith.constant 2 : index
    %c0_23 = arith.constant 0 : index
    %c0_24 = arith.constant 0 : index
    %12 = vector.load %arg1[%c0_21, %c2_22, %c0_23, %c0_24] : memref<1x6x6x128xbf16, #tpu.memory_space<vmem>>, vector<1x4x4x128xbf16>
    %13 = vector.shape_cast %12 : vector<1x4x4x128xbf16> to vector<4x4x128xbf16>
    %c0_25 = arith.constant 0 : index
    %c2_26 = arith.constant 2 : index
    %c1_27 = arith.constant 1 : index
    %c0_28 = arith.constant 0 : index
    %14 = vector.load %arg1[%c0_25, %c2_26, %c1_27, %c0_28] : memref<1x6x6x128xbf16, #tpu.memory_space<vmem>>, vector<1x4x4x128xbf16>
    %15 = vector.shape_cast %14 : vector<1x4x4x128xbf16> to vector<4x4x128xbf16>
    %c0_29 = arith.constant 0 : index
    %c2_30 = arith.constant 2 : index
    %c2_31 = arith.constant 2 : index
    %c0_32 = arith.constant 0 : index
    %16 = vector.load %arg1[%c0_29, %c2_30, %c2_31, %c0_32] : memref<1x6x6x128xbf16, #tpu.memory_space<vmem>>, vector<1x4x4x128xbf16>
    %17 = vector.shape_cast %16 : vector<1x4x4x128xbf16> to vector<4x4x128xbf16>
    %18 = tpu.concatenate %1, %3, %5, %7, %9, %11, %13, %15, %17 in 2 : vector<4x4x128xbf16>, vector<4x4x128xbf16>, vector<4x4x128xbf16>, vector<4x4x128xbf16>, vector<4x4x128xbf16>, vector<4x4x128xbf16>, vector<4x4x128xbf16>, vector<4x4x128xbf16>, vector<4x4x128xbf16> -> vector<4x4x1152xbf16>
    %19 = vector.shape_cast %18 : vector<4x4x1152xbf16> to vector<16x1152xbf16>
    %c0_33 = arith.constant 0 : index
    %c0_34 = arith.constant 0 : index
    %20 = vector.load %arg2[%c0_33, %c0_34] : memref<1152x32xbf16, #tpu.memory_space<vmem>>, vector<1152x32xbf16>
    %cst = arith.constant dense<0.000000e+00> : vector<16x32xf32>
    %21 = tpu.matmul %19, %20, %cst {dimension_numbers = #tpu.dot_dimension_numbers<[1], [0], [0], [1], [0, 0, 1, 1], [], []>} : vector<16x1152xbf16>, vector<1152x32xbf16>, vector<16x32xf32> -> vector<16x32xf32>
    %c0_35 = arith.constant 0 : index
    %c0_36 = arith.constant 0 : index
    %22 = vector.load %arg3[%c0_35, %c0_36] : memref<1x32xf32, #tpu.memory_space<vmem>>, vector<1x32xf32>
    %23 = vector.broadcast %22 : vector<1x32xf32> to vector<16x32xf32>
    %24 = arith.addf %21, %23 : vector<16x32xf32>
    %cst_37 = arith.constant 0.000000e+00 : f32
    %25 = vector.broadcast %cst_37 : f32 to vector<16x32xf32>
    %26 = arith.maximumf %24, %25 : vector<16x32xf32>
    %27 = arith.truncf %26 : vector<16x32xf32> to vector<16x32xbf16>
    %c0_38 = arith.constant 0 : index
    %c0_39 = arith.constant 0 : index
    %c0_40 = arith.constant 0 : index
    %28 = vector.load %arg4[%c0_38, %c0_39, %c0_40] : memref<1x16x32xbf16, #tpu.memory_space<vmem>>, vector<1x16x32xbf16>
    %29 = vector.shape_cast %28 : vector<1x16x32xbf16> to vector<16x32xbf16>
    %30 = vector.shape_cast %27 : vector<16x32xbf16> to vector<1x16x32xbf16>
    tpu.vector_store %arg4[%c0_38, %c0_39, %c0_40], %30 {strides = array<i32>} : memref<1x16x32xbf16, #tpu.memory_space<vmem>>, vector<1x16x32xbf16>,
    return
  }
  func.func @transform_0(%arg0: i32) -> (i32, i32, i32, i32) {
    %c0_i32 = arith.constant 0 : i32
    %c0_i32_0 = arith.constant 0 : i32
    %c0_i32_1 = arith.constant 0 : i32
    %c0_i32_2 = arith.constant 0 : i32
    return %arg0, %c0_i32, %c0_i32_0, %c0_i32_1 : i32, i32, i32, i32
  }
  func.func @transform_1(%arg0: i32) -> (i32, i32) {
    %c0_i32 = arith.constant 0 : i32
    %c0_i32_0 = arith.constant 0 : i32
    %c0_i32_1 = arith.constant 0 : i32
    return %c0_i32, %c0_i32_0 : i32, i32
  }
  func.func @transform_2(%arg0: i32) -> (i32, i32) {
    %c0_i32 = arith.constant 0 : i32
    %c0_i32_0 = arith.constant 0 : i32
    %c0_i32_1 = arith.constant 0 : i32
    return %c0_i32, %c0_i32_0 : i32, i32
  }
  func.func @transform_3(%arg0: i32) -> (i32, i32, i32) {
    %c0_i32 = arith.constant 0 : i32
    %c0_i32_0 = arith.constant 0 : i32
    %c0_i32_1 = arith.constant 0 : i32
    return %arg0, %c0_i32, %c0_i32_0 : i32, i32, i32
  }
}

module attributes {stable_mosaic.version = 11 : i64} {
  func.func @_conv_s2d_kernel(%arg0: i32, %arg1: memref<1x3x3x128xbf16, #tpu.memory_space<vmem>>, %arg2: memref<512x64xbf16, #tpu.memory_space<vmem>>, %arg3: memref<1x64xf32, #tpu.memory_space<vmem>>, %arg4: memref<1x4x64xbf16, #tpu.memory_space<vmem>>) attributes {dimension_semantics = [#tpu.dimension_semantics<parallel>], iteration_bounds = array<i64: 2>, scalar_prefetch = 0 : i64, scratch_operands = 0 : i64, tpu.core_type = #tpu.core_type<tc>, window_params = [{transform_indices = @transform_0, window_bounds = array<i64: 1, 3, 3, 128>}, {pipeline_mode = #tpu.pipeline_mode<synchronous>, transform_indices = @transform_1, window_bounds = array<i64: 512, 64>}, {pipeline_mode = #tpu.pipeline_mode<synchronous>, transform_indices = @transform_2, window_bounds = array<i64: 1, 64>}, {transform_indices = @transform_3, window_bounds = array<i64: 1, 4, 64>}]} {
    %c0 = arith.constant 0 : index
    %c0_0 = arith.constant 0 : index
    %c0_1 = arith.constant 0 : index
    %c0_2 = arith.constant 0 : index
    %0 = vector.load %arg1[%c0, %c0_0, %c0_1, %c0_2] : memref<1x3x3x128xbf16, #tpu.memory_space<vmem>>, vector<1x2x2x128xbf16>
    %1 = vector.shape_cast %0 : vector<1x2x2x128xbf16> to vector<2x2x128xbf16>
    %c0_3 = arith.constant 0 : index
    %c0_4 = arith.constant 0 : index
    %c1 = arith.constant 1 : index
    %c0_5 = arith.constant 0 : index
    %2 = vector.load %arg1[%c0_3, %c0_4, %c1, %c0_5] : memref<1x3x3x128xbf16, #tpu.memory_space<vmem>>, vector<1x2x2x128xbf16>
    %3 = vector.shape_cast %2 : vector<1x2x2x128xbf16> to vector<2x2x128xbf16>
    %c0_6 = arith.constant 0 : index
    %c1_7 = arith.constant 1 : index
    %c0_8 = arith.constant 0 : index
    %c0_9 = arith.constant 0 : index
    %4 = vector.load %arg1[%c0_6, %c1_7, %c0_8, %c0_9] : memref<1x3x3x128xbf16, #tpu.memory_space<vmem>>, vector<1x2x2x128xbf16>
    %5 = vector.shape_cast %4 : vector<1x2x2x128xbf16> to vector<2x2x128xbf16>
    %c0_10 = arith.constant 0 : index
    %c1_11 = arith.constant 1 : index
    %c1_12 = arith.constant 1 : index
    %c0_13 = arith.constant 0 : index
    %6 = vector.load %arg1[%c0_10, %c1_11, %c1_12, %c0_13] : memref<1x3x3x128xbf16, #tpu.memory_space<vmem>>, vector<1x2x2x128xbf16>
    %7 = vector.shape_cast %6 : vector<1x2x2x128xbf16> to vector<2x2x128xbf16>
    %8 = tpu.concatenate %1, %3, %5, %7 in 2 : vector<2x2x128xbf16>, vector<2x2x128xbf16>, vector<2x2x128xbf16>, vector<2x2x128xbf16> -> vector<2x2x512xbf16>
    %9 = vector.shape_cast %8 : vector<2x2x512xbf16> to vector<4x512xbf16>
    %c0_14 = arith.constant 0 : index
    %c0_15 = arith.constant 0 : index
    %10 = vector.load %arg2[%c0_14, %c0_15] : memref<512x64xbf16, #tpu.memory_space<vmem>>, vector<512x64xbf16>
    %cst = arith.constant dense<0.000000e+00> : vector<4x64xf32>
    %11 = tpu.matmul %9, %10, %cst {dimension_numbers = #tpu.dot_dimension_numbers<[1], [0], [0], [1], [0, 0, 1, 1], [], []>} : vector<4x512xbf16>, vector<512x64xbf16>, vector<4x64xf32> -> vector<4x64xf32>
    %c0_16 = arith.constant 0 : index
    %c0_17 = arith.constant 0 : index
    %12 = vector.load %arg3[%c0_16, %c0_17] : memref<1x64xf32, #tpu.memory_space<vmem>>, vector<1x64xf32>
    %13 = vector.broadcast %12 : vector<1x64xf32> to vector<4x64xf32>
    %14 = arith.addf %11, %13 : vector<4x64xf32>
    %cst_18 = arith.constant 0.000000e+00 : f32
    %15 = vector.broadcast %cst_18 : f32 to vector<4x64xf32>
    %16 = arith.maximumf %14, %15 : vector<4x64xf32>
    %17 = arith.truncf %16 : vector<4x64xf32> to vector<4x64xbf16>
    %c0_19 = arith.constant 0 : index
    %c0_20 = arith.constant 0 : index
    %c0_21 = arith.constant 0 : index
    %18 = vector.load %arg4[%c0_19, %c0_20, %c0_21] : memref<1x4x64xbf16, #tpu.memory_space<vmem>>, vector<1x4x64xbf16>
    %19 = vector.shape_cast %18 : vector<1x4x64xbf16> to vector<4x64xbf16>
    %20 = vector.shape_cast %17 : vector<4x64xbf16> to vector<1x4x64xbf16>
    tpu.vector_store %arg4[%c0_19, %c0_20, %c0_21], %20 {strides = array<i32>} : memref<1x4x64xbf16, #tpu.memory_space<vmem>>, vector<1x4x64xbf16>,
    return
  }
  func.func @transform_0(%arg0: i32) -> (i32, i32, i32, i32) {
    %c0_i32 = arith.constant 0 : i32
    %c0_i32_0 = arith.constant 0 : i32
    %c0_i32_1 = arith.constant 0 : i32
    %c0_i32_2 = arith.constant 0 : i32
    return %arg0, %c0_i32, %c0_i32_0, %c0_i32_1 : i32, i32, i32, i32
  }
  func.func @transform_1(%arg0: i32) -> (i32, i32) {
    %c0_i32 = arith.constant 0 : i32
    %c0_i32_0 = arith.constant 0 : i32
    %c0_i32_1 = arith.constant 0 : i32
    return %c0_i32, %c0_i32_0 : i32, i32
  }
  func.func @transform_2(%arg0: i32) -> (i32, i32) {
    %c0_i32 = arith.constant 0 : i32
    %c0_i32_0 = arith.constant 0 : i32
    %c0_i32_1 = arith.constant 0 : i32
    return %c0_i32, %c0_i32_0 : i32, i32
  }
  func.func @transform_3(%arg0: i32) -> (i32, i32, i32) {
    %c0_i32 = arith.constant 0 : i32
    %c0_i32_0 = arith.constant 0 : i32
    %c0_i32_1 = arith.constant 0 : i32
    return %arg0, %c0_i32, %c0_i32_0 : i32, i32, i32
  }
}

module attributes {stable_mosaic.version = 11 : i64} {
  func.func @_conv_s2d_kernel(%arg0: i32, %arg1: memref<1x2x2x256xbf16, #tpu.memory_space<vmem>>, %arg2: memref<1024x128xbf16, #tpu.memory_space<vmem>>, %arg3: memref<1x128xf32, #tpu.memory_space<vmem>>, %arg4: memref<1x1x128xbf16, #tpu.memory_space<vmem>>) attributes {dimension_semantics = [#tpu.dimension_semantics<parallel>], iteration_bounds = array<i64: 2>, scalar_prefetch = 0 : i64, scratch_operands = 0 : i64, tpu.core_type = #tpu.core_type<tc>, window_params = [{transform_indices = @transform_0, window_bounds = array<i64: 1, 2, 2, 256>}, {pipeline_mode = #tpu.pipeline_mode<synchronous>, transform_indices = @transform_1, window_bounds = array<i64: 1024, 128>}, {pipeline_mode = #tpu.pipeline_mode<synchronous>, transform_indices = @transform_2, window_bounds = array<i64: 1, 128>}, {transform_indices = @transform_3, window_bounds = array<i64: 1, 1, 128>}]} {
    %c0 = arith.constant 0 : index
    %c0_0 = arith.constant 0 : index
    %c0_1 = arith.constant 0 : index
    %c0_2 = arith.constant 0 : index
    %0 = vector.load %arg1[%c0, %c0_0, %c0_1, %c0_2] : memref<1x2x2x256xbf16, #tpu.memory_space<vmem>>, vector<1x1x1x256xbf16>
    %1 = vector.shape_cast %0 : vector<1x1x1x256xbf16> to vector<1x1x256xbf16>
    %c0_3 = arith.constant 0 : index
    %c0_4 = arith.constant 0 : index
    %c1 = arith.constant 1 : index
    %c0_5 = arith.constant 0 : index
    %2 = vector.load %arg1[%c0_3, %c0_4, %c1, %c0_5] : memref<1x2x2x256xbf16, #tpu.memory_space<vmem>>, vector<1x1x1x256xbf16>
    %3 = vector.shape_cast %2 : vector<1x1x1x256xbf16> to vector<1x1x256xbf16>
    %c0_6 = arith.constant 0 : index
    %c1_7 = arith.constant 1 : index
    %c0_8 = arith.constant 0 : index
    %c0_9 = arith.constant 0 : index
    %4 = vector.load %arg1[%c0_6, %c1_7, %c0_8, %c0_9] : memref<1x2x2x256xbf16, #tpu.memory_space<vmem>>, vector<1x1x1x256xbf16>
    %5 = vector.shape_cast %4 : vector<1x1x1x256xbf16> to vector<1x1x256xbf16>
    %c0_10 = arith.constant 0 : index
    %c1_11 = arith.constant 1 : index
    %c1_12 = arith.constant 1 : index
    %c0_13 = arith.constant 0 : index
    %6 = vector.load %arg1[%c0_10, %c1_11, %c1_12, %c0_13] : memref<1x2x2x256xbf16, #tpu.memory_space<vmem>>, vector<1x1x1x256xbf16>
    %7 = vector.shape_cast %6 : vector<1x1x1x256xbf16> to vector<1x1x256xbf16>
    %8 = tpu.concatenate %1, %3, %5, %7 in 2 : vector<1x1x256xbf16>, vector<1x1x256xbf16>, vector<1x1x256xbf16>, vector<1x1x256xbf16> -> vector<1x1x1024xbf16>
    %9 = vector.shape_cast %8 : vector<1x1x1024xbf16> to vector<1x1024xbf16>
    %c0_14 = arith.constant 0 : index
    %c0_15 = arith.constant 0 : index
    %10 = vector.load %arg2[%c0_14, %c0_15] : memref<1024x128xbf16, #tpu.memory_space<vmem>>, vector<1024x128xbf16>
    %cst = arith.constant dense<0.000000e+00> : vector<1x128xf32>
    %11 = tpu.matmul %9, %10, %cst {dimension_numbers = #tpu.dot_dimension_numbers<[1], [0], [0], [1], [0, 0, 1, 1], [], []>} : vector<1x1024xbf16>, vector<1024x128xbf16>, vector<1x128xf32> -> vector<1x128xf32>
    %c0_16 = arith.constant 0 : index
    %c0_17 = arith.constant 0 : index
    %12 = vector.load %arg3[%c0_16, %c0_17] : memref<1x128xf32, #tpu.memory_space<vmem>>, vector<1x128xf32>
    %13 = arith.addf %11, %12 : vector<1x128xf32>
    %cst_18 = arith.constant 0.000000e+00 : f32
    %14 = vector.broadcast %cst_18 : f32 to vector<1x128xf32>
    %15 = arith.maximumf %13, %14 : vector<1x128xf32>
    %16 = arith.truncf %15 : vector<1x128xf32> to vector<1x128xbf16>
    %c0_19 = arith.constant 0 : index
    %c0_20 = arith.constant 0 : index
    %c0_21 = arith.constant 0 : index
    %17 = vector.load %arg4[%c0_19, %c0_20, %c0_21] : memref<1x1x128xbf16, #tpu.memory_space<vmem>>, vector<1x1x128xbf16>
    %18 = vector.shape_cast %17 : vector<1x1x128xbf16> to vector<1x128xbf16>
    %19 = vector.shape_cast %16 : vector<1x128xbf16> to vector<1x1x128xbf16>
    tpu.vector_store %arg4[%c0_19, %c0_20, %c0_21], %19 {strides = array<i32>} : memref<1x1x128xbf16, #tpu.memory_space<vmem>>, vector<1x1x128xbf16>,
    return
  }
  func.func @transform_0(%arg0: i32) -> (i32, i32, i32, i32) {
    %c0_i32 = arith.constant 0 : i32
    %c0_i32_0 = arith.constant 0 : i32
    %c0_i32_1 = arith.constant 0 : i32
    %c0_i32_2 = arith.constant 0 : i32
    return %arg0, %c0_i32, %c0_i32_0, %c0_i32_1 : i32, i32, i32, i32
  }
  func.func @transform_1(%arg0: i32) -> (i32, i32) {
    %c0_i32 = arith.constant 0 : i32
    %c0_i32_0 = arith.constant 0 : i32
    %c0_i32_1 = arith.constant 0 : i32
    return %c0_i32, %c0_i32_0 : i32, i32
  }
  func.func @transform_2(%arg0: i32) -> (i32, i32) {
    %c0_i32 = arith.constant 0 : i32
    %c0_i32_0 = arith.constant 0 : i32
    %c0_i32_1 = arith.constant 0 : i32
    return %c0_i32, %c0_i32_0 : i32, i32
  }
  func.func @transform_3(%arg0: i32) -> (i32, i32, i32) {
    %c0_i32 = arith.constant 0 : i32
    %c0_i32_0 = arith.constant 0 : i32
    %c0_i32_1 = arith.constant 0 : i32
    return %arg0, %c0_i32, %c0_i32_0 : i32, i32, i32
  }
}

module attributes {stable_mosaic.version = 11 : i64} {
  func.func @_conv_s2d_kernel(%arg0: i32, %arg1: memref<1x2x2x512xbf16, #tpu.memory_space<vmem>>, %arg2: memref<2048x256xbf16, #tpu.memory_space<vmem>>, %arg3: memref<1x256xf32, #tpu.memory_space<vmem>>, %arg4: memref<1x1x256xbf16, #tpu.memory_space<vmem>>) attributes {dimension_semantics = [#tpu.dimension_semantics<parallel>], iteration_bounds = array<i64: 2>, scalar_prefetch = 0 : i64, scratch_operands = 0 : i64, tpu.core_type = #tpu.core_type<tc>, window_params = [{transform_indices = @transform_0, window_bounds = array<i64: 1, 2, 2, 512>}, {pipeline_mode = #tpu.pipeline_mode<synchronous>, transform_indices = @transform_1, window_bounds = array<i64: 2048, 256>}, {pipeline_mode = #tpu.pipeline_mode<synchronous>, transform_indices = @transform_2, window_bounds = array<i64: 1, 256>}, {transform_indices = @transform_3, window_bounds = array<i64: 1, 1, 256>}]} {
    %c0 = arith.constant 0 : index
    %c0_0 = arith.constant 0 : index
    %c0_1 = arith.constant 0 : index
    %c0_2 = arith.constant 0 : index
    %0 = vector.load %arg1[%c0, %c0_0, %c0_1, %c0_2] : memref<1x2x2x512xbf16, #tpu.memory_space<vmem>>, vector<1x1x1x512xbf16>
    %1 = vector.shape_cast %0 : vector<1x1x1x512xbf16> to vector<1x1x512xbf16>
    %c0_3 = arith.constant 0 : index
    %c0_4 = arith.constant 0 : index
    %c1 = arith.constant 1 : index
    %c0_5 = arith.constant 0 : index
    %2 = vector.load %arg1[%c0_3, %c0_4, %c1, %c0_5] : memref<1x2x2x512xbf16, #tpu.memory_space<vmem>>, vector<1x1x1x512xbf16>
    %3 = vector.shape_cast %2 : vector<1x1x1x512xbf16> to vector<1x1x512xbf16>
    %c0_6 = arith.constant 0 : index
    %c1_7 = arith.constant 1 : index
    %c0_8 = arith.constant 0 : index
    %c0_9 = arith.constant 0 : index
    %4 = vector.load %arg1[%c0_6, %c1_7, %c0_8, %c0_9] : memref<1x2x2x512xbf16, #tpu.memory_space<vmem>>, vector<1x1x1x512xbf16>
    %5 = vector.shape_cast %4 : vector<1x1x1x512xbf16> to vector<1x1x512xbf16>
    %c0_10 = arith.constant 0 : index
    %c1_11 = arith.constant 1 : index
    %c1_12 = arith.constant 1 : index
    %c0_13 = arith.constant 0 : index
    %6 = vector.load %arg1[%c0_10, %c1_11, %c1_12, %c0_13] : memref<1x2x2x512xbf16, #tpu.memory_space<vmem>>, vector<1x1x1x512xbf16>
    %7 = vector.shape_cast %6 : vector<1x1x1x512xbf16> to vector<1x1x512xbf16>
    %8 = tpu.concatenate %1, %3, %5, %7 in 2 : vector<1x1x512xbf16>, vector<1x1x512xbf16>, vector<1x1x512xbf16>, vector<1x1x512xbf16> -> vector<1x1x2048xbf16>
    %9 = vector.shape_cast %8 : vector<1x1x2048xbf16> to vector<1x2048xbf16>
    %c0_14 = arith.constant 0 : index
    %c0_15 = arith.constant 0 : index
    %10 = vector.load %arg2[%c0_14, %c0_15] : memref<2048x256xbf16, #tpu.memory_space<vmem>>, vector<2048x256xbf16>
    %cst = arith.constant dense<0.000000e+00> : vector<1x256xf32>
    %11 = tpu.matmul %9, %10, %cst {dimension_numbers = #tpu.dot_dimension_numbers<[1], [0], [0], [1], [0, 0, 1, 1], [], []>} : vector<1x2048xbf16>, vector<2048x256xbf16>, vector<1x256xf32> -> vector<1x256xf32>
    %c0_16 = arith.constant 0 : index
    %c0_17 = arith.constant 0 : index
    %12 = vector.load %arg3[%c0_16, %c0_17] : memref<1x256xf32, #tpu.memory_space<vmem>>, vector<1x256xf32>
    %13 = arith.addf %11, %12 : vector<1x256xf32>
    %cst_18 = arith.constant 0.000000e+00 : f32
    %14 = vector.broadcast %cst_18 : f32 to vector<1x256xf32>
    %15 = arith.maximumf %13, %14 : vector<1x256xf32>
    %16 = arith.truncf %15 : vector<1x256xf32> to vector<1x256xbf16>
    %c0_19 = arith.constant 0 : index
    %c0_20 = arith.constant 0 : index
    %c0_21 = arith.constant 0 : index
    %17 = vector.load %arg4[%c0_19, %c0_20, %c0_21] : memref<1x1x256xbf16, #tpu.memory_space<vmem>>, vector<1x1x256xbf16>
    %18 = vector.shape_cast %17 : vector<1x1x256xbf16> to vector<1x256xbf16>
    %19 = vector.shape_cast %16 : vector<1x256xbf16> to vector<1x1x256xbf16>
    tpu.vector_store %arg4[%c0_19, %c0_20, %c0_21], %19 {strides = array<i32>} : memref<1x1x256xbf16, #tpu.memory_space<vmem>>, vector<1x1x256xbf16>,
    return
  }
  func.func @transform_0(%arg0: i32) -> (i32, i32, i32, i32) {
    %c0_i32 = arith.constant 0 : i32
    %c0_i32_0 = arith.constant 0 : i32
    %c0_i32_1 = arith.constant 0 : i32
    %c0_i32_2 = arith.constant 0 : i32
    return %arg0, %c0_i32, %c0_i32_0, %c0_i32_1 : i32, i32, i32, i32
  }
  func.func @transform_1(%arg0: i32) -> (i32, i32) {
    %c0_i32 = arith.constant 0 : i32
    %c0_i32_0 = arith.constant 0 : i32
    %c0_i32_1 = arith.constant 0 : i32
    return %c0_i32, %c0_i32_0 : i32, i32
  }
  func.func @transform_2(%arg0: i32) -> (i32, i32) {
    %c0_i32 = arith.constant 0 : i32
    %c0_i32_0 = arith.constant 0 : i32
    %c0_i32_1 = arith.constant 0 : i32
    return %c0_i32, %c0_i32_0 : i32, i32
  }
  func.func @transform_3(%arg0: i32) -> (i32, i32, i32) {
    %c0_i32 = arith.constant 0 : i32
    %c0_i32_0 = arith.constant 0 : i32
    %c0_i32_1 = arith.constant 0 : i32
    return %arg0, %c0_i32, %c0_i32_0 : i32, i32, i32
  }
}

module attributes {stable_mosaic.version = 11 : i64} {
  func.func @_conv_s2d_kernel(%arg0: i32, %arg1: memref<1x2x2x1024xbf16, #tpu.memory_space<vmem>>, %arg2: memref<4096x256xbf16, #tpu.memory_space<vmem>>, %arg3: memref<1x256xf32, #tpu.memory_space<vmem>>, %arg4: memref<1x1x256xbf16, #tpu.memory_space<vmem>>) attributes {dimension_semantics = [#tpu.dimension_semantics<parallel>], iteration_bounds = array<i64: 2>, scalar_prefetch = 0 : i64, scratch_operands = 0 : i64, tpu.core_type = #tpu.core_type<tc>, window_params = [{transform_indices = @transform_0, window_bounds = array<i64: 1, 2, 2, 1024>}, {pipeline_mode = #tpu.pipeline_mode<synchronous>, transform_indices = @transform_1, window_bounds = array<i64: 4096, 256>}, {pipeline_mode = #tpu.pipeline_mode<synchronous>, transform_indices = @transform_2, window_bounds = array<i64: 1, 256>}, {transform_indices = @transform_3, window_bounds = array<i64: 1, 1, 256>}]} {
    %c0 = arith.constant 0 : index
    %c0_0 = arith.constant 0 : index
    %c0_1 = arith.constant 0 : index
    %c0_2 = arith.constant 0 : index
    %0 = vector.load %arg1[%c0, %c0_0, %c0_1, %c0_2] : memref<1x2x2x1024xbf16, #tpu.memory_space<vmem>>, vector<1x1x1x1024xbf16>
    %1 = vector.shape_cast %0 : vector<1x1x1x1024xbf16> to vector<1x1x1024xbf16>
    %c0_3 = arith.constant 0 : index
    %c0_4 = arith.constant 0 : index
    %c1 = arith.constant 1 : index
    %c0_5 = arith.constant 0 : index
    %2 = vector.load %arg1[%c0_3, %c0_4, %c1, %c0_5] : memref<1x2x2x1024xbf16, #tpu.memory_space<vmem>>, vector<1x1x1x1024xbf16>
    %3 = vector.shape_cast %2 : vector<1x1x1x1024xbf16> to vector<1x1x1024xbf16>
    %c0_6 = arith.constant 0 : index
    %c1_7 = arith.constant 1 : index
    %c0_8 = arith.constant 0 : index
    %c0_9 = arith.constant 0 : index
    %4 = vector.load %arg1[%c0_6, %c1_7, %c0_8, %c0_9] : memref<1x2x2x1024xbf16, #tpu.memory_space<vmem>>, vector<1x1x1x1024xbf16>
    %5 = vector.shape_cast %4 : vector<1x1x1x1024xbf16> to vector<1x1x1024xbf16>
    %c0_10 = arith.constant 0 : index
    %c1_11 = arith.constant 1 : index
    %c1_12 = arith.constant 1 : index
    %c0_13 = arith.constant 0 : index
    %6 = vector.load %arg1[%c0_10, %c1_11, %c1_12, %c0_13] : memref<1x2x2x1024xbf16, #tpu.memory_space<vmem>>, vector<1x1x1x1024xbf16>
    %7 = vector.shape_cast %6 : vector<1x1x1x1024xbf16> to vector<1x1x1024xbf16>
    %8 = tpu.concatenate %1, %3, %5, %7 in 2 : vector<1x1x1024xbf16>, vector<1x1x1024xbf16>, vector<1x1x1024xbf16>, vector<1x1x1024xbf16> -> vector<1x1x4096xbf16>
    %9 = vector.shape_cast %8 : vector<1x1x4096xbf16> to vector<1x4096xbf16>
    %c0_14 = arith.constant 0 : index
    %c0_15 = arith.constant 0 : index
    %10 = vector.load %arg2[%c0_14, %c0_15] : memref<4096x256xbf16, #tpu.memory_space<vmem>>, vector<4096x256xbf16>
    %cst = arith.constant dense<0.000000e+00> : vector<1x256xf32>
    %11 = tpu.matmul %9, %10, %cst {dimension_numbers = #tpu.dot_dimension_numbers<[1], [0], [0], [1], [0, 0, 1, 1], [], []>} : vector<1x4096xbf16>, vector<4096x256xbf16>, vector<1x256xf32> -> vector<1x256xf32>
    %c0_16 = arith.constant 0 : index
    %c0_17 = arith.constant 0 : index
    %12 = vector.load %arg3[%c0_16, %c0_17] : memref<1x256xf32, #tpu.memory_space<vmem>>, vector<1x256xf32>
    %13 = arith.addf %11, %12 : vector<1x256xf32>
    %cst_18 = arith.constant 0.000000e+00 : f32
    %14 = vector.broadcast %cst_18 : f32 to vector<1x256xf32>
    %15 = arith.maximumf %13, %14 : vector<1x256xf32>
    %16 = arith.truncf %15 : vector<1x256xf32> to vector<1x256xbf16>
    %c0_19 = arith.constant 0 : index
    %c0_20 = arith.constant 0 : index
    %c0_21 = arith.constant 0 : index
    %17 = vector.load %arg4[%c0_19, %c0_20, %c0_21] : memref<1x1x256xbf16, #tpu.memory_space<vmem>>, vector<1x1x256xbf16>
    %18 = vector.shape_cast %17 : vector<1x1x256xbf16> to vector<1x256xbf16>
    %19 = vector.shape_cast %16 : vector<1x256xbf16> to vector<1x1x256xbf16>
    tpu.vector_store %arg4[%c0_19, %c0_20, %c0_21], %19 {strides = array<i32>} : memref<1x1x256xbf16, #tpu.memory_space<vmem>>, vector<1x1x256xbf16>,
    return
  }
  func.func @transform_0(%arg0: i32) -> (i32, i32, i32, i32) {
    %c0_i32 = arith.constant 0 : i32
    %c0_i32_0 = arith.constant 0 : i32
    %c0_i32_1 = arith.constant 0 : i32
    %c0_i32_2 = arith.constant 0 : i32
    return %arg0, %c0_i32, %c0_i32_0, %c0_i32_1 : i32, i32, i32, i32
  }
  func.func @transform_1(%arg0: i32) -> (i32, i32) {
    %c0_i32 = arith.constant 0 : i32
    %c0_i32_0 = arith.constant 0 : i32
    %c0_i32_1 = arith.constant 0 : i32
    return %c0_i32, %c0_i32_0 : i32, i32
  }
  func.func @transform_2(%arg0: i32) -> (i32, i32) {
    %c0_i32 = arith.constant 0 : i32
    %c0_i32_0 = arith.constant 0 : i32
    %c0_i32_1 = arith.constant 0 : i32
    return %c0_i32, %c0_i32_0 : i32, i32
  }
  func.func @transform_3(%arg0: i32) -> (i32, i32, i32) {
    %c0_i32 = arith.constant 0 : i32
    %c0_i32_0 = arith.constant 0 : i32
    %c0_i32_1 = arith.constant 0 : i32
    return %arg0, %c0_i32, %c0_i32_0 : i32, i32, i32
  }
}

module attributes {stable_mosaic.version = 11 : i64} {
  func.func @_pose_kernel(%arg0: i32, %arg1: memref<2x1x256xbf16, #tpu.memory_space<vmem>>, %arg2: memref<256x12xf32, #tpu.memory_space<vmem>>, %arg3: memref<1x12xf32, #tpu.memory_space<vmem>>, %arg4: memref<2x12xf32, #tpu.memory_space<vmem>>) attributes {dimension_semantics = [#tpu.dimension_semantics<arbitrary>], iteration_bounds = array<i64: 1>, scalar_prefetch = 0 : i64, scratch_operands = 0 : i64, tpu.core_type = #tpu.core_type<tc>, window_params = [{pipeline_mode = #tpu.pipeline_mode<synchronous>, transform_indices = @transform_0, window_bounds = array<i64: 2, 1, 256>}, {pipeline_mode = #tpu.pipeline_mode<synchronous>, transform_indices = @transform_1, window_bounds = array<i64: 256, 12>}, {pipeline_mode = #tpu.pipeline_mode<synchronous>, transform_indices = @transform_2, window_bounds = array<i64: 1, 12>}, {pipeline_mode = #tpu.pipeline_mode<synchronous>, transform_indices = @transform_3, window_bounds = array<i64: 2, 12>}]} {
    %c0 = arith.constant 0 : index
    %c0_0 = arith.constant 0 : index
    %c0_1 = arith.constant 0 : index
    %0 = vector.load %arg1[%c0, %c0_0, %c0_1] : memref<2x1x256xbf16, #tpu.memory_space<vmem>>, vector<2x1x256xbf16>
    %1 = arith.extf %0 : vector<2x1x256xbf16> to vector<2x1x256xf32>
    %cst = arith.constant dense<0.000000e+00> : vector<2x256xf32>
    %2 = vector.multi_reduction <add>, %1, %cst [1] : vector<2x1x256xf32> to vector<2x256xf32>
    %cst_2 = arith.constant 1.000000e+00 : f32
    %3 = vector.broadcast %cst_2 : f32 to vector<2x256xf32>
    %4 = arith.divf %2, %3 : vector<2x256xf32>
    %c0_3 = arith.constant 0 : index
    %c0_4 = arith.constant 0 : index
    %5 = vector.load %arg2[%c0_3, %c0_4] : memref<256x12xf32, #tpu.memory_space<vmem>>, vector<256x12xf32>
    %cst_5 = arith.constant dense<0.000000e+00> : vector<2x12xf32>
    %6 = tpu.matmul %4, %5, %cst_5 {dimension_numbers = #tpu.dot_dimension_numbers<[1], [0], [0], [1], [0, 0, 1, 1], [], []>} : vector<2x256xf32>, vector<256x12xf32>, vector<2x12xf32> -> vector<2x12xf32>
    %c0_6 = arith.constant 0 : index
    %c0_7 = arith.constant 0 : index
    %7 = vector.load %arg3[%c0_6, %c0_7] : memref<1x12xf32, #tpu.memory_space<vmem>>, vector<1x12xf32>
    %8 = vector.broadcast %7 : vector<1x12xf32> to vector<2x12xf32>
    %9 = arith.addf %6, %8 : vector<2x12xf32>
    %cst_8 = arith.constant 0.00999999977 : f32
    %10 = vector.broadcast %cst_8 : f32 to vector<2x12xf32>
    %11 = arith.mulf %10, %9 : vector<2x12xf32>
    %c0_9 = arith.constant 0 : index
    %c0_10 = arith.constant 0 : index
    %12 = vector.load %arg4[%c0_9, %c0_10] : memref<2x12xf32, #tpu.memory_space<vmem>>, vector<2x12xf32>
    tpu.vector_store %arg4[%c0_9, %c0_10], %11 {strides = array<i32>} : memref<2x12xf32, #tpu.memory_space<vmem>>, vector<2x12xf32>,
    return
  }
  func.func @transform_0(%arg0: i32) -> (i32, i32, i32) {
    %c0_i32 = arith.constant 0 : i32
    %c0_i32_0 = arith.constant 0 : i32
    %c0_i32_1 = arith.constant 0 : i32
    %c0_i32_2 = arith.constant 0 : i32
    return %c0_i32, %c0_i32_0, %c0_i32_1 : i32, i32, i32
  }
  func.func @transform_1(%arg0: i32) -> (i32, i32) {
    %c0_i32 = arith.constant 0 : i32
    %c0_i32_0 = arith.constant 0 : i32
    %c0_i32_1 = arith.constant 0 : i32
    return %c0_i32, %c0_i32_0 : i32, i32
  }
  func.func @transform_2(%arg0: i32) -> (i32, i32) {
    %c0_i32 = arith.constant 0 : i32
    %c0_i32_0 = arith.constant 0 : i32
    %c0_i32_1 = arith.constant 0 : i32
    return %c0_i32, %c0_i32_0 : i32, i32
  }
  func.func @transform_3(%arg0: i32) -> (i32, i32) {
    %c0_i32 = arith.constant 0 : i32
    %c0_i32_0 = arith.constant 0 : i32
    %c0_i32_1 = arith.constant 0 : i32
    return %c0_i32, %c0_i32_0 : i32, i32
  }
}

</mosaic_0001>

<bundles_post_ra>
// kernel: pose_exp_net_forward.8
= control target key start
LH: loop header
LB: loop body
LE: loop exit
PB: predicated region body
PF: predicated region fallthrough
CT: control target
= control target key end

     0   :  { %s3747_s12 = smov 0   ;;  %s4916_s0 = inlined_call_operand.vmem [shape: bf16[2,11,11,128], index: 0, kind: input, shape index: {}]   ;;  %s4917_s1 = inlined_call_operand.vmem [shape: bf16[2048,16], index: 1, kind: input, shape index: {}]   ;;  %s4918_s2 = inlined_call_operand.vmem [shape: f32[1,16], index: 2, kind: input, shape index: {}]   ;;  %s4919_s3 = inlined_call_operand.vmem [shape: bf16[2,64,16], index: 3, kind: output, shape index: {}]  }
   0x1 LB: > { %s2962_s13 = sadd.s32 4294967295, %s3725_s12   ;;  %p2966_p0 = scmp.ge.s32.totalorder %s3725_s12, 1  ;;  %s3725_s12 = sphi %s3747_s12, %s13_s12  }
   0x2   : > { %p137_p1 = scmp.lt.s32.totalorder %s3725_s12, 3 }
   0x4   : > { %p138_p2 = pnand %p2966_p0, %p137_p1 }
   0x5   : > { %p161_p3 = scmp.lt.s32.totalorder (!%p138_p2), %s2962_s13, 1 }
   0x6   : > { %141 = sbr.rel (%p138_p2) target bundleno = 434 (0x1b2), region = 32 }
   0xb   : > { %v3588_v0 = vld [vmem:[%s4917_s1 + $0x38] sm:$0xff]  ;;  %v3587_v4 = vld [vmem:[%s4917_s1 + $0x30] sm:$0xff]  ;;  %s4921_s13 = smov (!%p161_p3, %s2962_s13), 1  ;;  %v3586_v8 = vld [vmem:[%s4917_s1 + $0x28] sm:$0xff]  ;;  %vm2898_vm0 = vcmask 125952  }
   0xc   : > { %v3596_v1 = vld [vmem:[%s4917_s1 + $0x78] sm:$0xff]  ;;  %2418 = vmatpush.bf16.msra.mxu0 %v3588_v0  ;;  %v3595_v5 = vld [vmem:[%s4917_s1 + $0x70] sm:$0xff]  ;;  %s3709_s30 = smul.u32 88, %s4921_s13  ;;  %v3594_v9 = vld [vmem:[%s4917_s1 + $0x68] sm:$0xff] }
   0xd   : > { %v3604_v2 = vld [vmem:[%s4917_s1 + $0xb8] sm:$0xff]  ;;  %2447 = vmatpush.bf16.msra.mxu1 %v3596_v1  ;;  %v3603_v6 = vld [vmem:[%s4917_s1 + $0xb0] sm:$0xff]  ;;  %v3602_v10 = vld [vmem:[%s4917_s1 + $0xa8] sm:$0xff] }
   0xe   : > { %v3612_v3 = vld [vmem:[%s4917_s1 + $0xf8] sm:$0xff]  ;;  %2476 = vmatpush.bf16.msra.mxu2 %v3604_v2  ;;  %v3611_v7 = vld [vmem:[%s4917_s1 + $0xf0] sm:$0xff]  ;;  %v3610_v11 = vld [vmem:[%s4917_s1 + $0xe8] sm:$0xff]  ;;  %s3797_s16 = scalar_lea.vmem %s4916_s0, %s3709_s30 }
   0xf   : > { %2505 = vmatpush.bf16.msra.mxu3 %v3612_v3  ;;  %v3585_v12 = vld [vmem:[%s4917_s1 + $0x20] sm:$0xff]  ;;  %v3815_v17 = vld [vmem:[%s3797_s16 + $0x8] sm:$0xf]  ;;  %v180_v19 = vld [vmem:[%s3797_s16 + $0xc] sm:$0x1] }
  0x10   : > { %2419 = vmatpush.bf16.msra.mxu0 %v3587_v4  ;;  %v3593_v13 = vld [vmem:[%s4917_s1 + $0x60] sm:$0xff]  ;;  %v320_v22 = vunpack.c.l.b16 %v3815_v17  ;;  %v321_v23 = vunpack.c.l.b16 %v180_v19  ;;  %v188_v25 = vld [vmem:[%s3797_s16 + $0x8] sm:$0xe]  ;;  %v196_v29 = vld [vmem:[%s3797_s16 + $0xc] sm:$0x3] }
  0x11   : > { %2448 = vmatpush.bf16.msra.mxu1 %v3595_v5  ;;  %v3601_v14 = vld [vmem:[%s4917_s1 + $0xa0] sm:$0xff]  ;;  %v407_v28 = vunpack.c.l.b16 %v188_v25  ;;  %v3584_v31 = vld [vmem:[%s4917_s1 + $0x18] sm:$0xff]  ;;  %v439_v35 = vunpack.c.l.b16 %v196_v29  ;;  %v3583_v41 = vld [vmem:[%s4917_s1 + $0x10] sm:$0xff] }
  0x12   : > { %2477 = vmatpush.bf16.msra.mxu2 %v3603_v6  ;;  %v3609_v15 = vld [vmem:[%s4917_s1 + $0xe0] sm:$0xff]  ;;  %v3592_v32 = vld [vmem:[%s4917_s1 + $0x58] sm:$0xff]  ;;  %v335_v34 = vpack.c.b16 %v321_v23, %v320_v22  ;;  %v3845_v48 = vld [vmem:[%s3797_s16 + $0x10] sm:$0xf] }
  0x13   : > { %2506 = vmatpush.bf16.msra.mxu3 %v3611_v7  ;;  %v3812_v16 = vld [vmem:[%s3797_s16] sm:$0xf]  ;;  %v179_v18 = vld [vmem:[%s3797_s16 + $0x4] sm:$0x1]  ;;  %v3600_v36 = vld [vmem:[%s4917_s1 + $0x98] sm:$0xff]  ;;  %v415_v39 = vpack.c.b16 %v321_v23, %v407_v28  ;;  %v447_v46 = vpack.c.b16 %v439_v35, %v407_v28  ;;  %v322_v1 = vunpack.c.l.b16 %v3845_v48 }
  0x14   : > { %2420 = vmatpush.bf16.msra.mxu0 %v3586_v8  ;;  %v318_v20 = vunpack.c.l.b16 %v3812_v16  ;;  %v319_v21 = vunpack.c.l.b16 %v179_v18  ;;  %v187_v24 = vld [vmem:[%s3797_s16] sm:$0xe]  ;;  %v195_v26 = vld [vmem:[%s3797_s16 + $0x4] sm:$0x3]  ;;  %v3608_v37 = vld [vmem:[%s4917_s1 + $0xd8] sm:$0xff]  ;;  %v352_v44 = vshll.u32 %v335_v34, 16 }
  0x15   : > { %2449 = vmatpush.bf16.msra.mxu1 %v3594_v9  ;;  %v406_v27 = vunpack.c.l.b16 %v187_v24  ;;  %v438_v30 = vunpack.c.l.b16 %v195_v26  ;;  %v350_v45 = vshrl.u32 %v335_v34, 16  ;;  %v3848_v49 = vld [vmem:[%s3797_s16 + $0x18] sm:$0xf]  ;;  %v3591_v50 = vld [vmem:[%s4917_s1 + $0x50] sm:$0xff]  ;;  %v423_v58 = vrot.slane %v415_v39, 1  ;;  %v3582_v8 = vld [vmem:[%s4917_s1 + $0x8] sm:$0xff] }
  0x16   : > { %2478 = vmatpush.bf16.msra.mxu2 %v3602_v10  ;;  %v334_v33 = vpack.c.b16 %v319_v21, %v318_v20  ;;  %v354_v52 = vrot.slane %v352_v44, 1  ;;  %v3854_v54 = vld [vmem:[%s3797_s16 + $0x14] sm:$0x1]  ;;  %v463_v60 = vshrl.u32 %v447_v46, 16  ;;  %v466_v63 = vshll.u32 %v447_v46, 16  ;;  %v3590_v9 = vld [vmem:[%s4917_s1 + $0x48] sm:$0xff] }
  0x17   : > { %2507 = vmatpush.bf16.msra.mxu3 %v3610_v11  ;;  %v414_v38 = vpack.c.b16 %v319_v21, %v406_v27  ;;  %v446_v40 = vpack.c.b16 %v438_v30, %v406_v27  ;;  %v3599_v55 = vld [vmem:[%s4917_s1 + $0x90] sm:$0xff]  ;;  %v3863_v0 = vld [vmem:[%s3797_s16 + $0x1c] sm:$0x1]  ;;  %v323_v4 = vunpack.c.l.b16 %v3854_v54  ;;  %v324_v5 = vunpack.c.l.b16 %v3848_v49  ;;  %v190_v7 = vld [vmem:[%s3797_s16 + $0x18] sm:$0xe] }
  0x18   : > { %2421 = vmatpush.bf16.msra.mxu0 %v3585_v12  ;;  %v343_v42 = vshrl.u32 %v334_v33, 16  ;;  %v345_v43 = vshll.u32 %v334_v33, 16  ;;  %v3607_v56 = vld [vmem:[%s4917_s1 + $0xd0] sm:$0xff]  ;;  %v355_v2 = vor.u32 %v354_v52, %v350_v45  ;;  %v465_v3 = vrot.slane %v463_v60, 1  ;;  %v3598_v10 = vld [vmem:[%s4917_s1 + $0x88] sm:$0xff]  ;;  %v3581_v30 = vld [vmem:[%s4917_s1] sm:$0xff] }
  0x19   : > { %2450 = vmatpush.bf16.msra.mxu1 %v3593_v13  ;;  %v455_v47 = vshrl.u32 %v446_v40, 16  ;;  %v458_v53 = vshll.u32 %v446_v40, 16  ;;  %v422_v57 = vrot.slane %v414_v38, 1  ;;  %v189_v6 = vld [vmem:[%s3797_s16 + $0x10] sm:$0xe]  ;;  %v468_v12 = vrot.slane %v466_v63, 2 }
  0x1a   : > { %2479 = vmatpush.bf16.msra.mxu2 %v3601_v14  ;;  %v347_v51 = vrot.slane %v345_v43, 1  ;;  %v3606_v13 = vld [vmem:[%s4917_s1 + $0xc8] sm:$0xff]  ;;  %v197_v18 = vld [vmem:[%s3797_s16 + $0x14] sm:$0x3]  ;;  %v198_v19 = vld [vmem:[%s3797_s16 + $0x1c] sm:$0x3]  ;;  %v3889_v23 = vpack.c.b16 %v323_v4, %v322_v1  ;;  %v408_v24 = vunpack.c.l.b16 %v189_v6  ;;  %v409_v25 = vunpack.c.l.b16 %v190_v7 }
  0x1b   : > { %2508 = vmatpush.bf16.msra.mxu3 %v3609_v15  ;;  %v457_v59 = vrot.slane %v455_v47, 1  ;;  %v460_v62 = vrot.slane %v458_v53, 2  ;;  %v3882_v14 = vunpack.c.l.b16 %v422_v57  ;;  %v325_v15 = vunpack.c.l.b16 %v3863_v0  ;;  %v3636_v38 = vld [vmem:[%s4917_s1 + $0x1b8] sm:$0xff]  ;;  %v3627_v63 = vld [vmem:[%s4917_s1 + $0x170] sm:$0xff]  ;;  %v3947_v6 = vld [vmem:[%s3797_s16 + $0x24] sm:$0x1] }
  0x1c   : > { %2422 = vmatpush.bf16.msra.mxu0 %v3584_v31  ;;  %v348_v61 = vor.u32 %v347_v51, %v343_v42  ;;  %v469_v21 = vor.u32 %v468_v12, %v465_v3  ;;  %v1178_v27 = vunpack.c.l.b16 %v355_v2  ;;  %v1179_v28 = vunpack.c.l.b16 %v423_v58  ;;  %v3589_v31 = vld [vmem:[%s4917_s1 + $0x40] sm:$0xff]  ;;  %v3620_v39 = vld [vmem:[%s4917_s1 + $0x138] sm:$0xff]  ;;  %v3950_v7 = vld [vmem:[%s3797_s16 + $0x2c] sm:$0x1] }
  0x1d   : > { %2451 = vmatpush.bf16.msra.mxu1 %v3592_v32  ;;  %v461_v11 = vor.u32 %v460_v62, %v457_v59  ;;  %v3893_v29 = vpack.c.b16 %v325_v15, %v324_v5  ;;  %v440_v34 = vunpack.c.l.b16 %v197_v18  ;;  %v441_v35 = vunpack.c.l.b16 %v198_v19  ;;  %v3628_v51 = vld [vmem:[%s4917_s1 + $0x178] sm:$0xff]  ;;  %v3643_v62 = vld [vmem:[%s4917_s1 + $0x1f0] sm:$0xff]  ;;  %v199_v12 = vld [vmem:[%s3797_s16 + $0x24] sm:$0x3] }
  0x1e   : > { %2480 = vmatpush.bf16.msra.mxu2 %v3600_v36  ;;  %v1166_v26 = vunpack.c.l.b16 %v348_v61  ;;  %v1180_v33 = vunpack.c.l.b16 %v469_v21  ;;  %v3597_v36 = vld [vmem:[%s4917_s1 + $0x80] sm:$0xff]  ;;  %v359_v40 = vshll.u32 %v3889_v23, 16  ;;  %v1522_v44 = vpack.c.b16 %v320_v22, %v318_v20  ;;  %v3635_v20 = vld [vmem:[%s4917_s1 + $0x1b0] sm:$0xff]  ;;  %v3938_v61 = vld [vmem:[%s3797_s16 + $0x28] sm:$0xf] }
  0x1f   : > { %2509 = vmatpush.bf16.msra.mxu3 %v3608_v37  ;;  %v1168_v32 = vunpack.c.l.b16 %v461_v11  ;;  %v3605_v37 = vld [vmem:[%s4917_s1 + $0xc0] sm:$0xff]  ;;  %v448_v42 = vpack.c.b16 %v440_v34, %v408_v24  ;;  %v449_v43 = vpack.c.b16 %v441_v35, %v409_v25  ;;  %v1524_v46 = vpack.c.b16 %v1179_v28, %v3882_v14  ;;  %v3619_v22 = vld [vmem:[%s4917_s1 + $0x130] sm:$0xff]  ;;  %v3634_v18 = vld [vmem:[%s4917_s1 + $0x1a8] sm:$0xff] }
  0x20   : > { %2423 = vmatpush.bf16.msra.mxu0 %v3583_v41  ;;  %v366_v41 = vshll.u32 %v3893_v29, 16  ;;  %v1523_v45 = vpack.c.b16 %v1178_v27, %v1166_v26  ;;  %v416_v53 = vpack.c.b16 %v323_v4, %v408_v24  ;;  %v417_v54 = vpack.c.b16 %v325_v15, %v409_v25  ;;  %v3618_v19 = vld [vmem:[%s4917_s1 + $0x128] sm:$0xff] }
  0x21   : > { %2452 = vmatpush.bf16.msra.mxu1 %v3591_v50  ;;  %v1525_v47 = vpack.c.b16 %v1180_v33, %v1168_v32  ;;  %v3644_v50 = vld [vmem:[%s4917_s1 + $0x1f8] sm:$0xff]  ;;  %v471_v52 = vshrl.u32 %v448_v42, 16  ;;  %v474_v16 = vshll.u32 %v448_v42, 16  ;;  %v479_v17 = vshrl.u32 %v449_v43, 16  ;;  %v3642_v32 = vld [vmem:[%s4917_s1 + $0x1e8] sm:$0xff] }
  0x22   : > { %2481 = vmatpush.bf16.msra.mxu2 %v3599_v55  ;;  %v482_v55 = vshll.u32 %v449_v43, 16  ;;  %v357_v57 = vshrl.u32 %v3889_v23, 16  ;;  %v361_v58 = vrot.slane %v359_v40, 1  ;;  %v364_v59 = vshrl.u32 %v3893_v29, 16  ;;  %v3626_v33 = vld [vmem:[%s4917_s1 + $0x168] sm:$0xff] }
  0x23   : > { %2510 = vmatpush.bf16.msra.mxu3 %v3607_v56  ;;  %v3933_v56 = vld [vmem:[%s3797_s16 + $0x20] sm:$0xf]  ;;  %v368_v60 = vrot.slane %v366_v41, 1  ;;  %v473_v0 = vrot.slane %v471_v52, 1  ;;  %v476_v2 = vrot.slane %v474_v16, 2  ;;  %v481_v3 = vrot.slane %v479_v17, 1 }
  0x24   : > { %2424 = vmatpush.bf16.msra.mxu0 %v3582_v8  ;;  %v484_v4 = vrot.slane %v482_v55, 2  ;;  %v3953_v8 = vld [vmem:[%s3797_s16 + $0x20] sm:$0xe]  ;;  %v425_v11 = vrot.slane %v417_v54, 1  ;;  %v362_v14 = vor.u32 %v361_v58, %v357_v57  ;;  %v326_v21 = vunpack.c.l.b16 %v3933_v56  ;;  %v3632_v52 = vld [vmem:[%s4917_s1 + $0x198] sm:$0xff] }
  0x25   : > { %2453 = vmatpush.bf16.msra.mxu1 %v3590_v9  ;;  %v3956_v9 = vld [vmem:[%s3797_s16 + $0x28] sm:$0xe]  ;;  %v369_v15 = vor.u32 %v368_v60, %v364_v59  ;;  %v327_v23 = vunpack.c.l.b16 %v3947_v6  ;;  %v477_v24 = vor.u32 %v476_v2, %v473_v0  ;;  %v328_v26 = vunpack.c.l.b16 %v3938_v61  ;;  %v3616_v16 = vld [vmem:[%s4917_s1 + $0x118] sm:$0xff]  ;;  %v3631_v59 = vld [vmem:[%s4917_s1 + $0x190] sm:$0xff] }
  0x26   : > { %2482 = vmatpush.bf16.msra.mxu2 %v3598_v10  ;;  %v424_v10 = vrot.slane %v416_v53, 1  ;;  %v485_v25 = vor.u32 %v484_v4, %v481_v3  ;;  %v329_v27 = vunpack.c.l.b16 %v3950_v7  ;;  %v410_v28 = vunpack.c.l.b16 %v3953_v8  ;;  %v3640_v54 = vld [vmem:[%s4917_s1 + $0x1d8] sm:$0xff]  ;;  %v3615_v60 = vld [vmem:[%s4917_s1 + $0x110] sm:$0xff]  ;;  %v4110_v56 = vld [vmem:[%s3797_s16 + $0xc] sm:$0x1] }
  0x27   : > { %2511 = vmatpush.bf16.msra.mxu3 %v3606_v13  ;;  %v200_v13 = vld [vmem:[%s3797_s16 + $0x2c] sm:$0x3]  ;;  %v411_v29 = vunpack.c.l.b16 %v3956_v9  ;;  %v1190_v34 = vunpack.c.l.b16 %v362_v14  ;;  %v1202_v35 = vunpack.c.l.b16 %v369_v15  ;;  %v1192_v40 = vunpack.c.l.b16 %v477_v24  ;;  %v3624_v55 = vld [vmem:[%s4917_s1 + $0x158] sm:$0xff]  ;;  %v4033_v0 = vld [vmem:[%s3797_s16 + $0x34] sm:$0x1] }
  0x28   : > { %2425 = vmatpush.bf16.msra.mxu0 %v3581_v30  ;;  %v442_v30 = vunpack.c.l.b16 %v199_v12  ;;  %v1204_v41 = vunpack.c.l.b16 %v485_v25  ;;  %v3988_v42 = vpack.c.b16 %v327_v23, %v326_v21  ;;  %v3992_v43 = vpack.c.b16 %v329_v27, %v328_v26  ;;  %v4036_v2 = vld [vmem:[%s3797_s16 + $0x3c] sm:$0x1]  ;;  %v4041_v9 = vld [vmem:[%s3797_s16 + $0x30] sm:$0xe]  ;;  %v4113_v61 = vld [vmem:[%s3797_s16 + $0x14] sm:$0x1] }
  0x29   : > { %2454 = vmatpush.bf16.msra.mxu1 %v3589_v31  ;;  %v443_v31 = vunpack.c.l.b16 %v200_v13  ;;  %v1539_v17 = vpack.c.b16 %v1202_v35, %v1190_v34  ;;  %v418_v7 = vpack.c.b16 %v327_v23, %v410_v28  ;;  %v419_v8 = vpack.c.b16 %v329_v27, %v411_v29  ;;  %v3639_v15 = vld [vmem:[%s4917_s1 + $0x1d0] sm:$0xff]  ;;  %v4053_v23 = vld [vmem:[%s3797_s16 + $0x38] sm:$0xe]  ;;  %v202_v24 = vld [vmem:[%s3797_s16 + $0x3c] sm:$0x3] }
  0x2a   : > { %2483 = vmatpush.bf16.msra.mxu2 %v3597_v36  ;;  %v1191_v36 = vunpack.c.l.b16 %v424_v10  ;;  %v380_v48 = vshll.u32 %v3992_v43, 16  ;;  %v371_v57 = vshrl.u32 %v3988_v42, 16  ;;  %v378_v58 = vshrl.u32 %v3992_v43, 16  ;;  %v201_v10 = vld [vmem:[%s3797_s16 + $0x34] sm:$0x3] }
  0x2b   : > { %2512 = vmatpush.bf16.msra.mxu3 %v3605_v37  ;;  %2426 = vmatmul.bf16.vlgmr.msra.gmra.mxu0 %v1522_v44  ;;  %v1203_v37 = vunpack.c.l.b16 %v425_v11  ;;  %v450_v44 = vpack.c.b16 %v442_v30, %v410_v28  ;;  %v3623_v6 = vld [vmem:[%s4917_s1 + $0x150] sm:$0xff]  ;;  %v333_v27 = vunpack.c.l.b16 %v4036_v2  ;;  %v412_v28 = vunpack.c.l.b16 %v4041_v9  ;;  %v3630_v30 = vld [vmem:[%s4917_s1 + $0x188] sm:$0xff]  ;;  %v3652_v2 = vld [vmem:[%s4917_s1 + $0x238] sm:$0xff] }
  0x2c   : > { %2534 = vmatpush.bf16.msrb.mxu0 %v3620_v39  ;;  %2455 = vmatmul.bf16.vlgmr.msra.gmra.mxu1 %v1523_v45  ;;  %v3617_v39 = vld [vmem:[%s4917_s1 + $0x120] sm:$0xff]  ;;  %v451_v45 = vpack.c.b16 %v443_v31, %v411_v29  ;;  %v382_v4 = vrot.slane %v380_v48, 1  ;;  %v444_v29 = vunpack.c.l.b16 %v201_v10  ;;  %v3614_v31 = vld [vmem:[%s4917_s1 + $0x108] sm:$0xff]  ;;  %v426_v34 = vrot.slane %v418_v7, 1 }
  0x2d   : > { %2484 = vmatmul.bf16.vlgmr.msra.gmra.mxu2 %v1524_v46  ;;  %2563 = vmatpush.bf16.msrb.mxu1 %v3628_v51  ;;  %v3641_v46 = vld [vmem:[%s4917_s1 + $0x1e0] sm:$0xff]  ;;  %v1540_v51 = vpack.c.b16 %v1203_v37, %v1191_v36  ;;  %v487_v49 = vshrl.u32 %v450_v44, 16  ;;  %v427_v35 = vrot.slane %v419_v8, 1 }
  0x2e   : > { %2592 = vmatpush.bf16.msrb.mxu2 %v3636_v38  ;;  %2513 = vmatmul.bf16.vlgmr.msra.gmra.mxu3 %v1525_v47  ;;  %v3633_v38 = vld [vmem:[%s4917_s1 + $0x1a0] sm:$0xff]  ;;  %v498_v53 = vshll.u32 %v451_v45, 16 }
  0x2f   : > { %2621 = vmatpush.bf16.msrb.mxu3 %v3644_v50  ;;  %v3625_v47 = vld [vmem:[%s4917_s1 + $0x160] sm:$0xff]  ;;  %v1538_v50 = vpack.c.b16 %v324_v5, %v322_v1  ;;  %v490_v1 = vshll.u32 %v450_v44, 16  ;;  %v495_v5 = vshrl.u32 %v451_v45, 16  ;;  %v489_v11 = vrot.slane %v487_v49, 1 }
  0x30   : > { %2535 = vmatpush.bf16.msrb.mxu0 %v3619_v22  ;;  %v373_v22 = vshll.u32 %v3988_v42, 16  ;;  %v500_v14 = vrot.slane %v498_v53, 2  ;;  %v3622_v42 = vld [vmem:[%s4917_s1 + $0x148] sm:$0xff]  ;;  %v452_v44 = vpack.c.b16 %v444_v29, %v412_v28  ;;  %v3629_v45 = vld [vmem:[%s4917_s1 + $0x180] sm:$0xff] }
  0x31   : > { %2564 = vmatpush.bf16.msrb.mxu1 %v3627_v63  ;;  %v4030_v63 = vld [vmem:[%s3797_s16 + $0x38] sm:$0xf]  ;;  %v492_v12 = vrot.slane %v490_v1, 2  ;;  %v497_v13 = vrot.slane %v495_v5, 1  ;;  %v3637_v48 = vld [vmem:[%s4917_s1 + $0x1c0] sm:$0xff] }
  0x32   : > { %2593 = vmatpush.bf16.msrb.mxu2 %v3635_v20  ;;  %v1541_v20 = vpack.c.b16 %v1204_v41, %v1192_v40  ;;  %v375_v3 = vrot.slane %v373_v22, 1  ;;  %v332_v25 = vunpack.c.l.b16 %v4030_v63  ;;  %v3638_v41 = vld [vmem:[%s4917_s1 + $0x1c8] sm:$0xff]  ;;  %v3621_v49 = vld [vmem:[%s4917_s1 + $0x140] sm:$0xff]  ;;  %v503_v5 = vshrl.u32 %v452_v44, 16 }
  0x33   : > { %2622 = vmatpush.bf16.msrb.mxu3 %v3643_v62  ;;  %v4027_v62 = vld [vmem:[%s3797_s16 + $0x30] sm:$0xf]  ;;  %v493_v36 = vor.u32 %v492_v12, %v489_v11  ;;  %v501_v37 = vor.u32 %v500_v14, %v497_v13  ;;  %v506_v53 = vshll.u32 %v452_v44, 16  ;;  %v4117_v11 = vld [vmem:[%s3797_s16 + $0x8] sm:$0xe] }
  0x34   : > { %2536 = vmatpush.bf16.msrb.mxu0 %v3618_v19  ;;  %v331_v19 = vunpack.c.l.b16 %v4033_v0  ;;  %v4082_v43 = vpack.c.b16 %v333_v27, %v332_v25  ;;  %v505_v9 = vrot.slane %v503_v5, 1  ;;  %v3668_v0 = vld [vmem:[%s4917_s1 + $0x2b8] sm:$0xff]  ;;  %v4173_v63 = vld [vmem:[%s3797_s16 + $0x24] sm:$0x1] }
  0x35   : > { %2565 = vmatpush.bf16.msrb.mxu1 %v3626_v33  ;;  %v383_v33 = vor.u32 %v382_v4, %v378_v58  ;;  %v4106_v4 = vld [vmem:[%s3797_s16 + $0x10] sm:$0xf]  ;;  %v508_v10 = vrot.slane %v506_v53, 2 }
  0x36   : > { %2594 = vmatpush.bf16.msrb.mxu2 %v3634_v18  ;;  %v330_v18 = vunpack.c.l.b16 %v4027_v62  ;;  %v394_v1 = vshll.u32 %v4082_v43, 16  ;;  %v420_v12 = vpack.c.b16 %v331_v19, %v412_v28  ;;  %v622_v28 = vunpack.c.l.b16 %v4117_v11  ;;  %v4170_v62 = vld [vmem:[%s3797_s16 + $0x1c] sm:$0x1] }
  0x37   : > { %2623 = vmatpush.bf16.msrb.mxu3 %v3642_v32  ;;  %v376_v32 = vor.u32 %v375_v3, %v371_v57  ;;  %v4103_v3 = vld [vmem:[%s3797_s16 + $0x8] sm:$0xf]  ;;  %v509_v44 = vor.u32 %v508_v10, %v505_v9  ;;  %v4167_v10 = vld [vmem:[%s3797_s16 + $0x20] sm:$0xf] }
  0x38   : > { %2537 = vmatpush.bf16.msrb.mxu0 %v3617_v39  ;;  %v445_v39 = vunpack.c.l.b16 %v202_v24  ;;  %v4070_v40 = vpack.c.b16 %v331_v19, %v330_v18  ;;  %v534_v14 = vunpack.c.l.b16 %v4103_v3  ;;  %v2995_v24 = vld [vmem:[%s3797_s16 + $0x14] sm:$0x3]  ;;  %v3676_v19 = vld [vmem:[%s4917_s1 + $0x2f8] sm:$0xff]  ;;  %v4229_v3 = vld [vmem:[%s3797_s16 + $0x30] sm:$0xf] }
  0x39   : > { %2566 = vmatpush.bf16.msrb.mxu1 %v3625_v47  ;;  %v1214_v47 = vunpack.c.l.b16 %v376_v32  ;;  %v537_v32 = vunpack.c.l.b16 %v4113_v61 }
  0x3a   : > { %2595 = vmatpush.bf16.msrb.mxu2 %v3633_v38  ;;  %v413_v38 = vunpack.c.l.b16 %v4053_v23  ;;  %v387_v22 = vshll.u32 %v4070_v40, 16  ;;  %v385_v7 = vshrl.u32 %v4070_v40, 16  ;;  %v2994_v23 = vld [vmem:[%s3797_s16 + $0xc] sm:$0x3]  ;;  %v428_v40 = vrot.slane %v420_v12, 1 }
  0x3b   : > { %2624 = vmatpush.bf16.msrb.mxu3 %v3641_v46  ;;  %2431 = vmatmul.bf16.gmra.mxu0 %v1538_v50  ;;  %v3613_v46 = vld [vmem:[%s4917_s1 + $0x100] sm:$0xff]  ;;  %v1226_v50 = vunpack.c.l.b16 %v383_v33 }
  0x3c   : > { %2538 = vmatpush.bf16.msrb.mxu0 %v3616_v16  ;;  %2460 = vmatmul.bf16.gmra.mxu1 %v1539_v17  ;;  %v1216_v16 = vunpack.c.l.b16 %v493_v36  ;;  %v1228_v17 = vunpack.c.l.b16 %v501_v37  ;;  %v389_v8 = vrot.slane %v387_v22, 1  ;;  %v421_v13 = vpack.c.b16 %v333_v27, %v413_v38  ;;  %v3660_v27 = vld [vmem:[%s4917_s1 + $0x278] sm:$0xff]  ;;  %v3667_v36 = vld [vmem:[%s4917_s1 + $0x2b0] sm:$0xff] }
  0x3d   : > { %2489 = vmatmul.bf16.gmra.mxu2 %v1540_v51  ;;  %2567 = vmatpush.bf16.msrb.mxu1 %v3624_v55  ;;  %v1215_v51 = vunpack.c.l.b16 %v426_v34  ;;  %v1555_v55 = vpack.c.b16 %v1226_v50, %v1214_v47  ;;  %v654_v34 = vunpack.c.l.b16 %v2994_v23  ;;  %v3651_v37 = vld [vmem:[%s4917_s1 + $0x230] sm:$0xff]  ;;  %v1240_v22 = vunpack.c.l.b16 %v509_v44  ;;  %v2996_v23 = vld [vmem:[%s3797_s16 + $0x1c] sm:$0x3]  ;;  %v3673_v44 = vld [vmem:[%s4917_s1 + $0x2e0] sm:$0xff] }
  0x3e   : > { %2596 = vmatpush.bf16.msrb.mxu2 %v3632_v52  ;;  %2518 = vmatmul.bf16.gmra.mxu3 %v1541_v20  ;;  %v1227_v52 = vunpack.c.l.b16 %v427_v35  ;;  %v453_v20 = vpack.c.b16 %v445_v39, %v413_v38  ;;  %v1557_v58 = vpack.c.b16 %v1228_v17, %v1216_v16  ;;  %v655_v35 = vunpack.c.l.b16 %v2995_v24  ;;  %v2997_v24 = vld [vmem:[%s3797_s16 + $0x24] sm:$0x3] }
  0x3f   : > { %2625 = vmatpush.bf16.msrb.mxu3 %v3640_v54  ;;  %v1554_v54 = vpack.c.b16 %v328_v26, %v326_v21  ;;  %v392_v21 = vshrl.u32 %v4082_v43, 16  ;;  %v396_v26 = vrot.slane %v394_v1, 1  ;;  %v390_v38 = vor.u32 %v389_v8, %v385_v7  ;;  %v3659_v43 = vld [vmem:[%s4917_s1 + $0x270] sm:$0xff] }
  0x40   : > { %2539 = vmatpush.bf16.msrb.mxu0 %v3615_v60  ;;  %v1556_v57 = vpack.c.b16 %v1227_v52, %v1215_v51  ;;  %v514_v60 = vshll.u32 %v453_v20, 16  ;;  %v662_v50 = vpack.c.b16 %v654_v34, %v622_v28  ;;  %v1239_v17 = vunpack.c.l.b16 %v428_v40  ;;  %v3658_v34 = vld [vmem:[%s4917_s1 + $0x268] sm:$0xff] }
  0x41   : > { %2568 = vmatpush.bf16.msrb.mxu1 %v3623_v6  ;;  %v2987_v6 = vld [vmem:[%s3797_s16 + $0x10] sm:$0xe]  ;;  %v397_v39 = vor.u32 %v396_v26, %v392_v21  ;;  %v1238_v52 = vunpack.c.l.b16 %v390_v38  ;;  %v4164_v21 = vld [vmem:[%s3797_s16 + $0x18] sm:$0xf]  ;;  %v3665_v38 = vld [vmem:[%s4917_s1 + $0x2a0] sm:$0xff] }
  0x42   : > { %2597 = vmatpush.bf16.msrb.mxu2 %v3631_v59  ;;  %v511_v59 = vshrl.u32 %v453_v20, 16  ;;  %v623_v33 = vunpack.c.l.b16 %v2987_v6  ;;  %v671_v5 = vshrl.u32 %v662_v50, 16  ;;  %v674_v53 = vshll.u32 %v662_v50, 16  ;;  %v4179_v6 = vld [vmem:[%s3797_s16 + $0x20] sm:$0xe] }
  0x43   : > { %2626 = vmatpush.bf16.msrb.mxu3 %v3639_v15  ;;  %v536_v15 = vunpack.c.l.b16 %v4106_v4  ;;  %v1250_v16 = vunpack.c.l.b16 %v397_v39  ;;  %v3649_v39 = vld [vmem:[%s4917_s1 + $0x220] sm:$0xff]  ;;  %v4232_v4 = vld [vmem:[%s3797_s16 + $0x2c] sm:$0x1] }
  0x44   : > { %2540 = vmatpush.bf16.msrb.mxu0 %v3614_v31  ;;  %v513_v29 = vrot.slane %v511_v59, 1  ;;  %v535_v31 = vunpack.c.l.b16 %v4110_v56  ;;  %v663_v51 = vpack.c.b16 %v655_v35, %v623_v33  ;;  %v631_v9 = vpack.c.b16 %v537_v32, %v623_v33 }
  0x45   : > { %2569 = vmatpush.bf16.msrb.mxu1 %v3622_v42  ;;  %v3675_v42 = vld [vmem:[%s4917_s1 + $0x2f0] sm:$0xff]  ;;  %v551_v47 = vpack.c.b16 %v537_v32, %v536_v15  ;;  %v541_v32 = vunpack.c.l.b16 %v4173_v63  ;;  %v2998_v63 = vld [vmem:[%s3797_s16 + $0x2c] sm:$0x3] }
  0x46   : > { %2598 = vmatpush.bf16.msrb.mxu2 %v3630_v30  ;;  %v516_v30 = vrot.slane %v514_v60, 2  ;;  %v630_v26 = vpack.c.b16 %v535_v31, %v622_v28  ;;  %v639_v33 = vrot.slane %v631_v9, 1  ;;  %v4235_v9 = vld [vmem:[%s3797_s16 + $0x34] sm:$0x1] }
  0x47   : > { %2627 = vmatpush.bf16.msrb.mxu3 %v3638_v41  ;;  %v429_v41 = vrot.slane %v421_v13, 1  ;;  %v568_v1 = vshll.u32 %v551_v47, 16  ;;  %v566_v56 = vshrl.u32 %v551_v47, 16  ;;  %v4176_v13 = vld [vmem:[%s3797_s16 + $0x18] sm:$0xe] }
  0x48   : > { %2541 = vmatpush.bf16.msrb.mxu0 %v3613_v46  ;;  %v550_v46 = vpack.c.b16 %v535_v31, %v534_v14  ;;  %v540_v31 = vunpack.c.l.b16 %v4167_v10  ;;  %v638_v28 = vrot.slane %v630_v26, 1  ;;  %v624_v40 = vunpack.c.l.b16 %v4176_v13  ;;  %v4226_v26 = vld [vmem:[%s3797_s16 + $0x28] sm:$0xf]  ;;  %v4296_v10 = vld [vmem:[%s3797_s16 + $0x38] sm:$0xf] }
  0x49   : > { %2570 = vmatpush.bf16.msrb.mxu1 %v3621_v49  ;;  %v1251_v20 = vunpack.c.l.b16 %v429_v41  ;;  %v570_v61 = vrot.slane %v568_v1, 1  ;;  %v625_v41 = vunpack.c.l.b16 %v4179_v6  ;;  %v542_v13 = vunpack.c.l.b16 %v4226_v26 }
  0x4a   : > { %2599 = vmatpush.bf16.msrb.mxu2 %v3629_v45  ;;  %v517_v45 = vor.u32 %v516_v30, %v513_v29  ;;  %v561_v49 = vshll.u32 %v550_v46, 16  ;;  %v559_v60 = vshrl.u32 %v550_v46, 16  ;;  %v538_v29 = vunpack.c.l.b16 %v4164_v21 }
  0x4b   : > { %2628 = vmatpush.bf16.msrb.mxu3 %v3637_v48  ;;  %2436 = vmatmul.bf16.gmra.mxu0 %v1554_v54  ;;  %v679_v54 = vshrl.u32 %v663_v51, 16  ;;  %v1572_v59 = vpack.c.b16 %v1251_v20, %v1239_v17  ;;  %v539_v30 = vunpack.c.l.b16 %v4170_v62  ;;  %v571_v35 = vor.u32 %v570_v61, %v566_v56  ;;  %v4238_v62 = vld [vmem:[%s3797_s16 + $0x28] sm:$0xe] }
  0x4c   : > { %2465 = vmatmul.bf16.gmra.mxu1 %v1555_v55  ;;  %2650 = vmatpush.bf16.msra.mxu0 %v3652_v2  ;;  %v1252_v48 = vunpack.c.l.b16 %v517_v45  ;;  %v682_v55 = vshll.u32 %v663_v51, 16  ;;  %v563_v8 = vrot.slane %v561_v49, 1  ;;  %v3650_v2 = vld [vmem:[%s4917_s1 + $0x228] sm:$0xff]  ;;  %v3657_v45 = vld [vmem:[%s4917_s1 + $0x260] sm:$0xff]  ;;  %v4217_v47 = vpack.c.b16 %v541_v32, %v540_v31 }
  0x4d   : > { %2494 = vmatmul.bf16.gmra.mxu2 %v1556_v57  ;;  %2679 = vmatpush.bf16.msra.mxu1 %v3660_v27  ;;  %v1570_v57 = vpack.c.b16 %v332_v25, %v330_v18  ;;  %v673_v18 = vrot.slane %v671_v5, 1  ;;  %v676_v25 = vrot.slane %v674_v53, 2  ;;  %v681_v11 = vrot.slane %v679_v54, 1 }
  0x4e   : > { %2523 = vmatmul.bf16.gmra.mxu3 %v1557_v58  ;;  %2708 = vmatpush.bf16.msra.mxu2 %v3668_v0  ;;  %v1571_v58 = vpack.c.b16 %v1250_v16, %v1238_v52  ;;  %v1573_v7 = vpack.c.b16 %v1252_v48, %v1240_v22  ;;  %v684_v12 = vrot.slane %v682_v55, 2  ;;  %v3666_v0 = vld [vmem:[%s4917_s1 + $0x2a8] sm:$0xff]  ;;  %v564_v27 = vor.u32 %v563_v8, %v559_v60 }
  0x4f   : > { %2737 = vmatpush.bf16.msra.mxu3 %v3676_v19  ;;  %v3674_v19 = vld [vmem:[%s4917_s1 + $0x2e8] sm:$0xff]  ;;  %v552_v46 = vpack.c.b16 %v539_v30, %v538_v29  ;;  %v1170_v50 = vunpack.c.l.b16 %v638_v28  ;;  %v1182_v51 = vunpack.c.l.b16 %v639_v33  ;;  %v1181_v16 = vunpack.c.l.b16 %v571_v35  ;;  %v3656_v33 = vld [vmem:[%s4917_s1 + $0x258] sm:$0xff] }
  0x50   : > { %2651 = vmatpush.bf16.msra.mxu0 %v3651_v37  ;;  %v685_v37 = vor.u32 %v684_v12, %v681_v11  ;;  %v1169_v52 = vunpack.c.l.b16 %v564_v27  ;;  %v582_v1 = vshll.u32 %v4217_v47, 16  ;;  %v1526_v5 = vpack.c.b16 %v536_v15, %v534_v14  ;;  %v2999_v27 = vld [vmem:[%s3797_s16 + $0x34] sm:$0x3] }
  0x51   : > { %2680 = vmatpush.bf16.msra.mxu1 %v3659_v43  ;;  %v657_v43 = vunpack.c.l.b16 %v2997_v24  ;;  %v575_v49 = vshll.u32 %v552_v46, 16  ;;  %v1528_v54 = vpack.c.b16 %v1182_v51, %v1170_v50  ;;  %v580_v56 = vshrl.u32 %v4217_v47, 16  ;;  %v3648_v24 = vld [vmem:[%s4917_s1 + $0x218] sm:$0xff] }
  0x52   : > { %2709 = vmatpush.bf16.msra.mxu2 %v3667_v36  ;;  %v677_v36 = vor.u32 %v676_v25, %v673_v18  ;;  %v1183_v20 = vunpack.c.l.b16 %v685_v37  ;;  %v1527_v53 = vpack.c.b16 %v1181_v16, %v1169_v52  ;;  %v584_v61 = vrot.slane %v582_v1, 1  ;;  %v3663_v37 = vld [vmem:[%s4917_s1 + $0x290] sm:$0xff] }
  0x53   : > { %2738 = vmatpush.bf16.msra.mxu3 %v3675_v42  ;;  %v656_v42 = vunpack.c.l.b16 %v2996_v23  ;;  %v665_v48 = vpack.c.b16 %v657_v43, %v625_v41  ;;  %v577_v8 = vrot.slane %v575_v49, 1  ;;  %v632_v14 = vpack.c.b16 %v539_v30, %v624_v40  ;;  %v3664_v23 = vld [vmem:[%s4917_s1 + $0x298] sm:$0xff]  ;;  %v3655_v43 = vld [vmem:[%s4917_s1 + $0x250] sm:$0xff] }
  0x54   : > { %2652 = vmatpush.bf16.msra.mxu0 %v3650_v2  ;;  %v1171_v17 = vunpack.c.l.b16 %v677_v36  ;;  %v633_v15 = vpack.c.b16 %v541_v32, %v625_v41  ;;  %v543_v6 = vunpack.c.l.b16 %v4232_v4  ;;  %v3672_v30 = vld [vmem:[%s4917_s1 + $0x2d8] sm:$0xff]  ;;  %v544_v32 = vunpack.c.l.b16 %v4229_v3  ;;  %v4255_v2 = vld [vmem:[%s3797_s16 + $0x30] sm:$0xe]  ;;  %v3646_v4 = vld [vmem:[%s4917_s1 + $0x208] sm:$0xff] }
  0x55   : > { %2681 = vmatpush.bf16.msra.mxu1 %v3658_v34  ;;  %v664_v22 = vpack.c.b16 %v656_v42, %v624_v40  ;;  %v698_v60 = vshll.u32 %v665_v48, 16  ;;  %v658_v28 = vunpack.c.l.b16 %v2998_v63  ;;  %v640_v35 = vrot.slane %v632_v14, 1  ;;  %v3671_v42 = vld [vmem:[%s4917_s1 + $0x2d0] sm:$0xff]  ;;  %v4305_v14 = vld [vmem:[%s3797_s16 + $0x44] sm:$0x1] }
  0x56   : > { %2710 = vmatpush.bf16.msra.mxu2 %v3666_v0  ;;  %v1529_v55 = vpack.c.b16 %v1183_v20, %v1171_v17  ;;  %v545_v0 = vunpack.c.l.b16 %v4235_v9  ;;  %v641_v36 = vrot.slane %v633_v15, 1  ;;  %v4308_v15 = vld [vmem:[%s3797_s16 + $0x38] sm:$0xe]  ;;  %v4313_v63 = vld [vmem:[%s3797_s16 + $0x40] sm:$0xe] }
  0x57   : > { %2739 = vmatpush.bf16.msra.mxu3 %v3674_v19  ;;  %v700_v12 = vrot.slane %v698_v60, 2  ;;  %v626_v19 = vunpack.c.l.b16 %v4238_v62  ;;  %v1194_v51 = vunpack.c.l.b16 %v640_v35 }
  0x58   : > { %2653 = vmatpush.bf16.msra.mxu0 %v3649_v39  ;;  %v585_v39 = vor.u32 %v584_v61, %v580_v56  ;;  %v4285_v47 = vpack.c.b16 %v545_v0, %v544_v32  ;;  %v1206_v52 = vunpack.c.l.b16 %v641_v36  ;;  %v3661_v36 = vld [vmem:[%s4917_s1 + $0x280] sm:$0xff] }
  0x59   : > { %2682 = vmatpush.bf16.msra.mxu1 %v3657_v45  ;;  %v627_v45 = vunpack.c.l.b16 %v4255_v2  ;;  %v666_v50 = vpack.c.b16 %v658_v28, %v626_v19  ;;  %v634_v62 = vpack.c.b16 %v543_v6, %v626_v19  ;;  %v546_v2 = vunpack.c.l.b16 %v4296_v10 }
  0x5a   : > { %2711 = vmatpush.bf16.msra.mxu2 %v3665_v38  ;;  %v3647_v38 = vld [vmem:[%s4917_s1 + $0x210] sm:$0xff]  ;;  %v1205_v17 = vunpack.c.l.b16 %v585_v39  ;;  %v596_v1 = vshll.u32 %v4285_v47, 16  ;;  %v549_v19 = vunpack.c.l.b16 %v4305_v14  ;;  %v628_v28 = vunpack.c.l.b16 %v4308_v15 }
  0x5b   : > { %2441 = vmatmul.bf16.gmra.mxu0 %v1570_v57  ;;  %2740 = vmatpush.bf16.msra.mxu3 %v3673_v44  ;;  %v687_v57 = vshrl.u32 %v664_v22, 16  ;;  %v4278_v44 = vpack.c.b16 %v543_v6, %v542_v13  ;;  %v3670_v6 = vld [vmem:[%s4917_s1 + $0x2c8] sm:$0xff]  ;;  %v4358_v14 = vld [vmem:[%s3797_s16 + $0x10] sm:$0xf]  ;;  %v4361_v15 = vld [vmem:[%s3797_s16 + $0x14] sm:$0x1] }
  0x5c   : > { %2470 = vmatmul.bf16.gmra.mxu1 %v1571_v58  ;;  %v690_v58 = vshll.u32 %v664_v22, 16  ;;  %2654 = vmatpush.bf16.msra.mxu0 %v3648_v24  ;;  %v598_v21 = vrot.slane %v596_v1, 1 }
  0x5d   : > { %2499 = vmatmul.bf16.gmra.mxu2 %v1572_v59  ;;  %v695_v59 = vshrl.u32 %v665_v48, 16  ;;  %v689_v18 = vrot.slane %v687_v57, 1  ;;  %2683 = vmatpush.bf16.msra.mxu1 %v3656_v33  ;;  %v589_v48 = vshll.u32 %v4278_v44, 16  ;;  %v629_v33 = vunpack.c.l.b16 %v4313_v63  ;;  %v4367_v63 = vld [vmem:[%s3797_s16 + $0x1c] sm:$0x1] }
  0x5e   : > { %2528 = vmatmul.bf16.gmra.mxu3 %v1573_v7  ;;  %v573_v7 = vshrl.u32 %v552_v46, 16  ;;  %v692_v25 = vrot.slane %v690_v58, 2  ;;  %2712 = vmatpush.bf16.msra.mxu2 %v3664_v23  ;;  %v659_v46 = vunpack.c.l.b16 %v2999_v27  ;;  %v587_v58 = vshrl.u32 %v4278_v44, 16  ;;  %v3654_v27 = vld [vmem:[%s4917_s1 + $0x248] sm:$0xff] }
  0x5f   : > { %v697_v11 = vrot.slane %v695_v59, 1  ;;  %2741 = vmatpush.bf16.msra.mxu3 %v3672_v30  ;;  %v594_v59 = vshrl.u32 %v4285_v47, 16  ;;  %v591_v60 = vrot.slane %v589_v48, 1  ;;  %v3662_v30 = vld [vmem:[%s4917_s1 + $0x288] sm:$0xff] }
  0x60   : > { %v578_v34 = vor.u32 %v577_v8, %v573_v7  ;;  %v693_v40 = vor.u32 %v692_v25, %v689_v18  ;;  %2655 = vmatpush.bf16.msra.mxu0 %v3647_v38  ;;  %v667_v49 = vpack.c.b16 %v659_v46, %v627_v45  ;;  %v706_v7 = vshll.u32 %v666_v50, 16  ;;  %v3000_v18 = vld [vmem:[%s3797_s16 + $0x3c] sm:$0x3]  ;;  %v3001_v25 = vld [vmem:[%s3797_s16 + $0x44] sm:$0x3] }
  0x61   : > { %v701_v41 = vor.u32 %v700_v12, %v697_v11  ;;  %2684 = vmatpush.bf16.msra.mxu1 %v3655_v43  ;;  %v635_v11 = vpack.c.b16 %v545_v0, %v627_v45  ;;  %v661_v35 = vunpack.c.l.b16 %v3001_v25  ;;  %v592_v38 = vor.u32 %v591_v60, %v587_v58  ;;  %v3026_v25 = vld [vmem:[%s3797_s16 + $0x14] sm:$0x3] }
  0x62   : > { %2713 = vmatpush.bf16.msra.mxu2 %v3663_v37  ;;  %v1193_v16 = vunpack.c.l.b16 %v578_v34  ;;  %v1195_v20 = vunpack.c.l.b16 %v693_v40  ;;  %v711_v8 = vshrl.u32 %v667_v49, 16  ;;  %v714_v56 = vshll.u32 %v667_v49, 16  ;;  %v3645_v37 = vld [vmem:[%s4917_s1 + $0x200] sm:$0xff] }
  0x63   : > { %v1207_v22 = vunpack.c.l.b16 %v701_v41  ;;  %2742 = vmatpush.bf16.msra.mxu3 %v3671_v42  ;;  %v708_v12 = vrot.slane %v706_v7, 2  ;;  %v660_v34 = vunpack.c.l.b16 %v3000_v18  ;;  %v599_v39 = vor.u32 %v598_v21, %v594_v59  ;;  %v3669_v40 = vld [vmem:[%s4917_s1 + $0x2c0] sm:$0xff]  ;;  %v4370_v18 = vld [vmem:[%s3797_s16 + $0x10] sm:$0xe] }
  0x64   : > { %v713_v23 = vrot.slane %v711_v8, 1  ;;  %v716_v24 = vrot.slane %v714_v56, 2  ;;  %2656 = vmatpush.bf16.msra.mxu0 %v3646_v4  ;;  %v3653_v41 = vld [vmem:[%s4917_s1 + $0x240] sm:$0xff]  ;;  %v642_v42 = vrot.slane %v634_v62, 1  ;;  %v643_v43 = vrot.slane %v635_v11, 1 }
  0x65   : > { %v1545_v57 = vpack.c.b16 %v1207_v22, %v1195_v20  ;;  %2685 = vmatpush.bf16.msra.mxu1 %v3654_v27  ;;  %v4364_v62 = vld [vmem:[%s3797_s16 + $0x18] sm:$0xf]  ;;  %v750_v11 = vunpack.c.l.b16 %v4358_v14  ;;  %v4484_v14 = vld [vmem:[%s3797_s16 + $0x34] sm:$0x1] }
  0x66   : > { %2714 = vmatpush.bf16.msra.mxu2 %v3662_v30  ;;  %v717_v45 = vor.u32 %v716_v24, %v713_v23  ;;  %v1230_v20 = vunpack.c.l.b16 %v643_v43  ;;  %v3700_v23 = vld [vmem:[%s4917_s1 + $0x3b8] sm:$0xff] }
  0x67   : > { %2743 = vmatpush.bf16.msra.mxu3 %v3670_v6  ;;  %v3684_v24 = vld [vmem:[%s4917_s1 + $0x338] sm:$0xff] }
  0x68   : > { %2657 = vmatpush.bf16.msra.mxu0 %v3645_v37  ;;  %v1231_v48 = vunpack.c.l.b16 %v717_v45  ;;  %v3708_v30 = vld [vmem:[%s4917_s1 + $0x3f8] sm:$0xff]  ;;  %v838_v37 = vunpack.c.l.b16 %v4370_v18 }
  0x69   : > { %2686 = vmatpush.bf16.msra.mxu1 %v3653_v41 }
  0x6a   : > { %2715 = vmatpush.bf16.msra.mxu2 %v3661_v36 }
  0x6b   : > { %2542 = vmatmul.bf16.vlgmr.msrb.gmra.mxu0 %v1526_v5  ;;  %v703_v5 = vshrl.u32 %v666_v50, 16  ;;  %v668_v50 = vpack.c.b16 %v660_v34, %v628_v28  ;;  %2744 = vmatpush.bf16.msra.mxu3 %v3669_v40  ;;  %v753_v34 = vunpack.c.l.b16 %v4367_v63  ;;  %v3029_v63 = vld [vmem:[%s3797_s16 + $0x2c] sm:$0x3] }
  0x6c   : > { %2571 = vmatmul.bf16.vlgmr.msrb.gmra.mxu1 %v1527_v53  ;;  %v1542_v53 = vpack.c.b16 %v540_v31, %v538_v29  ;;  %v4299_v29 = vld [vmem:[%s3797_s16 + $0x40] sm:$0xf]  ;;  %v4302_v31 = vld [vmem:[%s3797_s16 + $0x3c] sm:$0x1]  ;;  %2766 = vmatpush.bf16.msrb.mxu0 %v3684_v24 }
  0x6d   : > { %2600 = vmatmul.bf16.vlgmr.msrb.gmra.mxu2 %v1528_v54  ;;  %v1544_v54 = vpack.c.b16 %v1206_v52, %v1194_v51  ;;  %v705_v61 = vrot.slane %v703_v5, 1  ;;  %v547_v9 = vunpack.c.l.b16 %v4302_v31  ;;  %v548_v0 = vunpack.c.l.b16 %v4299_v29  ;;  %v4414_v29 = vld [vmem:[%s3797_s16 + $0x20] sm:$0xf] }
  0x6e   : > { %2629 = vmatmul.bf16.vlgmr.msrb.gmra.mxu3 %v1529_v55  ;;  %v1543_v55 = vpack.c.b16 %v1205_v17, %v1193_v16  ;;  %v669_v51 = vpack.c.b16 %v661_v35, %v629_v33  ;;  %v1217_v52 = vunpack.c.l.b16 %v592_v38  ;;  %v1229_v16 = vunpack.c.l.b16 %v599_v39  ;;  %2824 = vmatpush.bf16.msrb.mxu2 %v3700_v23 }
  0x6f   : > { %v709_v44 = vor.u32 %v708_v12, %v705_v61  ;;  %v556_v46 = vpack.c.b16 %v547_v9, %v546_v2  ;;  %v557_v47 = vpack.c.b16 %v549_v19, %v548_v0  ;;  %v1218_v17 = vunpack.c.l.b16 %v642_v42  ;;  %2853 = vmatpush.bf16.msrb.mxu3 %v3708_v30  ;;  %v3698_v30 = vld [vmem:[%s4917_s1 + $0x3a8] sm:$0xff] }
  0x70   : > { %v719_v5 = vshrl.u32 %v668_v50, 16  ;;  %v1559_v58 = vpack.c.b16 %v1229_v16, %v1217_v52  ;;  %v636_v61 = vpack.c.b16 %v547_v9, %v628_v28  ;;  %v637_v31 = vpack.c.b16 %v549_v19, %v629_v33  ;;  %v3019_v9 = vld [vmem:[%s3797_s16 + $0x18] sm:$0xe]  ;;  %v3027_v19 = vld [vmem:[%s3797_s16 + $0x1c] sm:$0x3]  ;;  %v3699_v16 = vld [vmem:[%s4917_s1 + $0x3b0] sm:$0xff] }
  0x71   : > { %v1219_v22 = vunpack.c.l.b16 %v709_v44  ;;  %v603_v49 = vshll.u32 %v556_v46, 16  ;;  %v610_v1 = vshll.u32 %v557_v47, 16  ;;  %v1560_v59 = vpack.c.b16 %v1230_v20, %v1218_v17  ;;  %v3683_v17 = vld [vmem:[%s4917_s1 + $0x330] sm:$0xff] }
  0x72   : > { %v601_v7 = vshrl.u32 %v556_v46, 16  ;;  %v608_v8 = vshrl.u32 %v557_v47, 16  ;;  %v721_v26 = vrot.slane %v719_v5, 1  ;;  %v751_v12 = vunpack.c.l.b16 %v4361_v15  ;;  %v3692_v47 = vld [vmem:[%s4917_s1 + $0x378] sm:$0xff]  ;;  %v3707_v20 = vld [vmem:[%s4917_s1 + $0x3f0] sm:$0xff]  ;;  %2825 = vmatpush.bf16.msrb.mxu2 %v3699_v16  ;;  %2767 = vmatpush.bf16.msrb.mxu0 %v3683_v17  ;;  %v3681_v16 = vld [vmem:[%s4917_s1 + $0x320] sm:$0xff] }
  0x73   : > { %v1561_v60 = vpack.c.b16 %v1231_v48, %v1219_v22  ;;  %v605_v56 = vrot.slane %v603_v49, 1  ;;  %v612_v21 = vrot.slane %v610_v1, 1  ;;  %v644_v4 = vrot.slane %v636_v61, 1  ;;  %2795 = vmatpush.bf16.msrb.mxu1 %v3692_v47  ;;  %2854 = vmatpush.bf16.msrb.mxu3 %v3707_v20  ;;  %v4429_v61 = vld [vmem:[%s3797_s16 + $0x20] sm:$0xe] }
  0x74   : > { %v645_v6 = vrot.slane %v637_v31, 1  ;;  %v752_v33 = vunpack.c.l.b16 %v4364_v62  ;;  %v870_v38 = vunpack.c.l.b16 %v3026_v25  ;;  %v4391_v39 = vpack.c.b16 %v751_v12, %v750_v11  ;;  %v3028_v31 = vld [vmem:[%s3797_s16 + $0x24] sm:$0x3] }
  0x75   : > { %v606_v27 = vor.u32 %v605_v56, %v601_v7  ;;  %v613_v28 = vor.u32 %v612_v21, %v608_v8  ;;  %v839_v40 = vunpack.c.l.b16 %v3019_v9  ;;  %v871_v41 = vunpack.c.l.b16 %v3027_v19  ;;  %v4423_v8 = vld [vmem:[%s3797_s16 + $0x2c] sm:$0x1]  ;;  %v3691_v21 = vld [vmem:[%s4917_s1 + $0x370] sm:$0xff]  ;;  %v3705_v17 = vld [vmem:[%s4917_s1 + $0x3e0] sm:$0xff] }
  0x76   : > { %v1242_v42 = vunpack.c.l.b16 %v644_v4  ;;  %v1254_v45 = vunpack.c.l.b16 %v645_v6  ;;  %v767_v46 = vpack.c.b16 %v753_v34, %v752_v33  ;;  %v878_v52 = vpack.c.b16 %v870_v38, %v838_v37  ;;  %v3706_v4 = vld [vmem:[%s4917_s1 + $0x3e8] sm:$0xff]  ;;  %2826 = vmatpush.bf16.msrb.mxu2 %v3698_v30  ;;  %v4499_v30 = vld [vmem:[%s3797_s16 + $0x30] sm:$0xe] }
  0x77   : > { %v1241_v43 = vunpack.c.l.b16 %v606_v27  ;;  %v1253_v44 = vunpack.c.l.b16 %v613_v28  ;;  %v777_v22 = vshll.u32 %v4391_v39, 16  ;;  %v879_v48 = vpack.c.b16 %v871_v41, %v839_v40  ;;  %2796 = vmatpush.bf16.msrb.mxu1 %v3691_v21  ;;  %2855 = vmatpush.bf16.msrb.mxu3 %v3706_v4  ;;  %v3696_v4 = vld [vmem:[%s4917_s1 + $0x398] sm:$0xff] }
  0x78   : > { %v1574_v49 = vpack.c.b16 %v548_v0, %v546_v2  ;;  %v1576_v5 = vpack.c.b16 %v1254_v45, %v1242_v42  ;;  %v4417_v2 = vld [vmem:[%s3797_s16 + $0x28] sm:$0xf]  ;;  %v4420_v0 = vld [vmem:[%s3797_s16 + $0x24] sm:$0x1]  ;;  %v846_v15 = vpack.c.b16 %v751_v12, %v838_v37  ;;  %v754_v23 = vunpack.c.l.b16 %v4414_v29 }
  0x79   : > { %v1575_v1 = vpack.c.b16 %v1253_v44, %v1241_v43  ;;  %v895_v7 = vshrl.u32 %v879_v48, 16  ;;  %v898_v10 = vshll.u32 %v879_v48, 16  ;;  %v755_v24 = vunpack.c.l.b16 %v4420_v0  ;;  %v3682_v12 = vld [vmem:[%s4917_s1 + $0x328] sm:$0xff] }
  0x7a   : > { %v756_v6 = vunpack.c.l.b16 %v4417_v2  ;;  %v757_v9 = vunpack.c.l.b16 %v4423_v8  ;;  %v840_v19 = vunpack.c.l.b16 %v4429_v61  ;;  %v872_v27 = vunpack.c.l.b16 %v3028_v31  ;;  %2768 = vmatpush.bf16.msrb.mxu0 %v3682_v12  ;;  %v3690_v45 = vld [vmem:[%s4917_s1 + $0x368] sm:$0xff]  ;;  %v4481_v61 = vld [vmem:[%s3797_s16 + $0x30] sm:$0xf]  ;;  %v3030_v12 = vld [vmem:[%s3797_s16 + $0x34] sm:$0x3] }
  0x7b   : > { %2547 = vmatmul.bf16.gmra.mxu0 %v1542_v53  ;;  %v722_v53 = vshll.u32 %v668_v50, 16  ;;  %v897_v18 = vrot.slane %v895_v7, 1  ;;  %v900_v25 = vrot.slane %v898_v10, 2  ;;  %v854_v37 = vrot.slane %v846_v15, 1  ;;  %2797 = vmatpush.bf16.msrb.mxu1 %v3690_v45 }
  0x7c   : > { %2576 = vmatmul.bf16.gmra.mxu1 %v1543_v55  ;;  %v730_v55 = vshll.u32 %v669_v51, 16  ;;  %v768_v41 = vpack.c.b16 %v755_v24, %v754_v23  ;;  %v4455_v42 = vpack.c.b16 %v757_v9, %v756_v6  ;;  %v880_v43 = vpack.c.b16 %v872_v27, %v840_v19  ;;  %2856 = vmatpush.bf16.msrb.mxu3 %v3705_v17 }
  0x7d   : > { %2605 = vmatmul.bf16.gmra.mxu2 %v1544_v54  ;;  %v727_v54 = vshrl.u32 %v669_v51, 16  ;;  %v724_v3 = vrot.slane %v722_v53, 2  ;;  %v784_v53 = vshll.u32 %v767_v46, 16  ;;  %v848_v21 = vpack.c.b16 %v755_v24, %v840_v19  ;;  %v3704_v19 = vld [vmem:[%s4917_s1 + $0x3d8] sm:$0xff] }
  0x7e   : > { %2634 = vmatmul.bf16.gmra.mxu3 %v1545_v57  ;;  %v1558_v57 = vpack.c.b16 %v544_v32, %v542_v13  ;;  %v732_v32 = vrot.slane %v730_v55, 2  ;;  %v775_v55 = vshrl.u32 %v4391_v39, 16  ;;  %v791_v48 = vshll.u32 %v768_v41, 16  ;;  %2769 = vmatpush.bf16.msrb.mxu0 %v3681_v16 }
  0x7f   : > { %v729_v13 = vrot.slane %v727_v54, 1  ;;  %v725_v35 = vor.u32 %v724_v3, %v721_v26  ;;  %v786_v56 = vrot.slane %v784_v53, 1  ;;  %v847_v26 = vpack.c.b16 %v753_v34, %v839_v40 }
  0x80   : > { %v873_v34 = vunpack.c.l.b16 %v3029_v63  ;;  %v901_v40 = vor.u32 %v900_v25, %v897_v18  ;;  %v906_v53 = vshll.u32 %v880_v43, 16  ;;  %v793_v8 = vrot.slane %v791_v48, 1  ;;  %2857 = vmatpush.bf16.msrb.mxu3 %v3704_v19 }
  0x81   : > { %v733_v36 = vor.u32 %v732_v32, %v729_v13  ;;  %v1243_v50 = vunpack.c.l.b16 %v725_v35  ;;  %v4433_v32 = vld [vmem:[%s3797_s16 + $0x28] sm:$0xe]  ;;  %v855_v38 = vrot.slane %v847_v26, 1  ;;  %v758_v25 = vunpack.c.l.b16 %v4481_v61  ;;  %v4658_v61 = vld [vmem:[%s3797_s16 + $0x18] sm:$0xe] }
  0x82   : > { %v841_v28 = vunpack.c.l.b16 %v4433_v32  ;;  %v908_v31 = vrot.slane %v906_v53, 2  ;;  %v4494_v32 = vld [vmem:[%s3797_s16 + $0x3c] sm:$0x1]  ;;  %v759_v24 = vunpack.c.l.b16 %v4484_v14  ;;  %v3678_v14 = vld [vmem:[%s4917_s1 + $0x308] sm:$0xff] }
  0x83   : > { %v1255_v51 = vunpack.c.l.b16 %v733_v36 }
  0x84   : > { %v881_v44 = vpack.c.b16 %v873_v34, %v841_v28  ;;  %v849_v15 = vpack.c.b16 %v757_v9, %v841_v28  ;;  %v3680_v9 = vld [vmem:[%s4917_s1 + $0x318] sm:$0xff]  ;;  %v856_v28 = vrot.slane %v848_v21, 1  ;;  %v1546_v21 = vpack.c.b16 %v756_v6, %v754_v23 }
  0x85   : > { %v1577_v54 = vpack.c.b16 %v1255_v51, %v1243_v50  ;;  %v1173_v50 = vunpack.c.l.b16 %v854_v37  ;;  %v1185_v51 = vunpack.c.l.b16 %v855_v38  ;;  %v3031_v37 = vld [vmem:[%s3797_s16 + $0x3c] sm:$0x3]  ;;  %2770 = vmatpush.bf16.msrb.mxu0 %v3680_v9 }
  0x86   : > { %v875_v16 = vunpack.c.l.b16 %v3031_v37 }
  0x8b   : > { %2552 = vmatmul.bf16.gmra.mxu0 %v1558_v57  ;;  %v887_v57 = vshrl.u32 %v878_v52, 16 }
  0x8c   : > { %2581 = vmatmul.bf16.gmra.mxu1 %v1559_v58  ;;  %v890_v58 = vshll.u32 %v878_v52, 16  ;;  %v3697_v52 = vld [vmem:[%s4917_s1 + $0x3a0] sm:$0xff] }
  0x8d   : > { %2610 = vmatmul.bf16.gmra.mxu2 %v1560_v59  ;;  %v779_v59 = vrot.slane %v777_v22, 1  ;;  %v889_v3 = vrot.slane %v887_v57, 1  ;;  %v1186_v22 = vunpack.c.l.b16 %v901_v40  ;;  %v842_v40 = vunpack.c.l.b16 %v4499_v30 }
  0x8e   : > { %2639 = vmatmul.bf16.gmra.mxu3 %v1561_v60  ;;  %v782_v60 = vshrl.u32 %v767_v46, 16  ;;  %v892_v13 = vrot.slane %v890_v58, 2  ;;  %2827 = vmatpush.bf16.msrb.mxu2 %v3697_v52  ;;  %v1532_v58 = vpack.c.b16 %v1185_v51, %v1173_v50 }
  0x8f   : > { %v780_v35 = vor.u32 %v779_v59, %v775_v55  ;;  %v911_v55 = vshrl.u32 %v881_v44, 16  ;;  %v789_v59 = vshrl.u32 %v768_v41, 16  ;;  %v874_v41 = vunpack.c.l.b16 %v3030_v12 }
  0x90   : > { %v787_v36 = vor.u32 %v786_v56, %v782_v60  ;;  %v893_v39 = vor.u32 %v892_v13, %v889_v3  ;;  %v914_v60 = vshll.u32 %v881_v44, 16  ;;  %v796_v56 = vshrl.u32 %v4455_v42, 16  ;;  %v3689_v3 = vld [vmem:[%s4917_s1 + $0x360] sm:$0xff]  ;;  %v4491_v13 = vld [vmem:[%s3797_s16 + $0x38] sm:$0xf] }
  0x91   : > { %v1172_v46 = vunpack.c.l.b16 %v780_v35  ;;  %v913_v26 = vrot.slane %v911_v55, 1  ;;  %v794_v27 = vor.u32 %v793_v8, %v789_v59  ;;  %2798 = vmatpush.bf16.msrb.mxu1 %v3689_v3  ;;  %v760_v34 = vunpack.c.l.b16 %v4491_v13  ;;  %v3688_v55 = vld [vmem:[%s4917_s1 + $0x358] sm:$0xff] }
  0x92   : > { %v1184_v47 = vunpack.c.l.b16 %v787_v36  ;;  %v1174_v20 = vunpack.c.l.b16 %v893_v39  ;;  %v916_v18 = vrot.slane %v914_v60, 2  ;;  %v761_v35 = vunpack.c.l.b16 %v4494_v32  ;;  %v4514_v36 = vld [vmem:[%s3797_s16 + $0x38] sm:$0xe]  ;;  %2828 = vmatpush.bf16.msrb.mxu2 %v3696_v4  ;;  %v3058_v13 = vld [vmem:[%s3797_s16 + $0x1c] sm:$0x3] }
  0x93   : > { %v857_v39 = vrot.slane %v849_v15, 1  ;;  %v843_v52 = vunpack.c.l.b16 %v4514_v36  ;;  %v4558_v15 = vld [vmem:[%s3797_s16 + $0x44] sm:$0x1]  ;;  %v4564_v36 = vld [vmem:[%s3797_s16 + $0x48] sm:$0xf] }
  0x94   : > { %v1531_v57 = vpack.c.b16 %v1184_v47, %v1172_v46  ;;  %v1533_v0 = vpack.c.b16 %v1186_v22, %v1174_v20  ;;  %v917_v45 = vor.u32 %v916_v18, %v913_v26  ;;  %v4522_v46 = vpack.c.b16 %v759_v24, %v758_v25 }
  0x95   : > { %v1196_v20 = vunpack.c.l.b16 %v794_v27  ;;  %v1197_v22 = vunpack.c.l.b16 %v856_v28  ;;  %v4530_v48 = vpack.c.b16 %v761_v35, %v760_v34  ;;  %v1209_v53 = vunpack.c.l.b16 %v857_v39  ;;  %2799 = vmatpush.bf16.msrb.mxu1 %v3688_v55 }
  0x96   : > { %v1210_v59 = vunpack.c.l.b16 %v917_v45  ;;  %v805_v60 = vshll.u32 %v4522_v46, 16  ;;  %v883_v8 = vpack.c.b16 %v875_v16, %v843_v52  ;;  %v803_v18 = vshrl.u32 %v4522_v46, 16 }
  0x97   : > { %v810_v29 = vshrl.u32 %v4530_v48, 16  ;;  %v850_v46 = vpack.c.b16 %v759_v24, %v842_v40  ;;  %v851_v16 = vpack.c.b16 %v761_v35, %v843_v52  ;;  %v3702_v24 = vld [vmem:[%s4917_s1 + $0x3c8] sm:$0xff]  ;;  %v764_v30 = vunpack.c.l.b16 %v4564_v36 }
  0x98   : > { %v807_v12 = vrot.slane %v805_v60, 1  ;;  %v927_v9 = vshrl.u32 %v883_v8, 16  ;;  %v930_v19 = vshll.u32 %v883_v8, 16 }
  0x9b   : > { %2557 = vmatmul.bf16.gmra.mxu0 %v1574_v49  ;;  %v4472_v49 = vld [vmem:[%s4918_s2] ss:$0 sm:$0xff] }
  0x9c   : > { %2586 = vmatmul.bf16.gmra.mxu1 %v1575_v1  ;;  %v798_v1 = vshll.u32 %v4455_v42, 16 }
  0x9d   : > { %2615 = vmatmul.bf16.gmra.mxu2 %v1576_v5  ;;  %v903_v5 = vshrl.u32 %v880_v43, 16 }
  0x9e   : > { %2644 = vmatmul.bf16.gmra.mxu3 %v1577_v54  ;;  %v1530_v54 = vpack.c.b16 %v752_v33, %v750_v11  ;;  %v800_v11 = vrot.slane %v798_v1, 1 }
  0x9f   : > { %v905_v33 = vrot.slane %v903_v5, 1 }
  0xa0   : > { %v801_v38 = vor.u32 %v800_v11, %v796_v56  ;;  %v812_v56 = vshll.u32 %v4530_v48, 16  ;;  %v1548_v11 = vpack.c.b16 %v1209_v53, %v1197_v22  ;;  %v932_v22 = vrot.slane %v930_v19, 2  ;;  %v3694_v48 = vld [vmem:[%s4917_s1 + $0x388] sm:$0xff] }
  0xa1   : > { %v909_v44 = vor.u32 %v908_v31, %v905_v33  ;;  %v4555_v31 = vld [vmem:[%s3797_s16 + $0x40] sm:$0xf] }
  0xa2   : > { %v1208_v5 = vunpack.c.l.b16 %v801_v38  ;;  %v814_v28 = vrot.slane %v812_v56, 1  ;;  %v762_v37 = vunpack.c.l.b16 %v4555_v31  ;;  %v763_v38 = vunpack.c.l.b16 %v4558_v15 }
  0xa4   : > { %v4605_v35 = vpack.c.b16 %v763_v38, %v762_v37 }
  0xa8   : > { %v2427_v7 = vpop.f32.mrf.mxu0 }
  0xa9   : > { %v2456_v10 = vpop.f32.mrf.mxu1  ;;  %v2428_v62 = vadd.f32 %v4472_v49, %v2427_v7  ;;  %v3695_v7 = vld [vmem:[%s4917_s1 + $0x390] sm:$0xff] }
  0xaa   : > { %2829 = vmatpush.bf16.msrb.mxu2 %v3695_v7 }
  0xab   : > { %v2457_v63 = vadd.f32 %v2456_v10, %v2428_v62  ;;  %2658 = vmatmul.bf16.vlgmr.msra.gmra.mxu0 %v1530_v54  ;;  %v882_v54 = vpack.c.b16 %v874_v41, %v842_v40  ;;  %v3679_v10 = vld [vmem:[%s4917_s1 + $0x310] sm:$0xff]  ;;  %v1547_v62 = vpack.c.b16 %v1208_v5, %v1196_v20  ;;  %v929_v20 = vrot.slane %v927_v9, 1 }
  0xac   : > { %2687 = vmatmul.bf16.vlgmr.msra.gmra.mxu1 %v1531_v57  ;;  %2771 = vmatpush.bf16.msrb.mxu0 %v3679_v10 }
  0xad   : > { %2716 = vmatmul.bf16.vlgmr.msra.gmra.mxu2 %v1532_v58  ;;  %v1198_v58 = vunpack.c.l.b16 %v909_v44  ;;  %v919_v33 = vshrl.u32 %v882_v54, 16  ;;  %v922_v4 = vshll.u32 %v882_v54, 16  ;;  %v4577_v44 = vld [vmem:[%s3797_s16 + $0x40] sm:$0xe]  ;;  %v933_v56 = vor.u32 %v932_v22, %v929_v20 }
  0xae   : > { %2745 = vmatmul.bf16.vlgmr.msra.gmra.mxu3 %v1533_v0  ;;  %v3703_v0 = vld [vmem:[%s4917_s1 + $0x3d0] sm:$0xff]  ;;  %v844_v40 = vunpack.c.l.b16 %v4577_v44  ;;  %2830 = vmatpush.bf16.msrb.mxu2 %v3694_v48  ;;  %v1562_v22 = vpack.c.b16 %v760_v34, %v758_v25  ;;  %v1054_v44 = vunpack.c.l.b16 %v4658_v61 }
  0xaf   : > { %2858 = vmatpush.bf16.msrb.mxu3 %v3703_v0  ;;  %v921_v41 = vrot.slane %v919_v33, 1  ;;  %v859_v0 = vrot.slane %v851_v16, 1  ;;  %v4639_v16 = vld [vmem:[%s3797_s16 + $0x18] sm:$0xf] }
  0xb0   : > { %v2485_v42 = vpop.f32.mrf.mxu2  ;;  %v2429_v50 = vpop.f32.mrf.mxu0  ;;  %2772 = vmatpush.bf16.msrb.mxu0 %v3678_v14 }
  0xb1   : > { %v2514_v43 = vpop.f32.mrf.mxu3  ;;  %v2486_v47 = vadd.f32 %v2485_v42, %v2457_v63  ;;  %v2458_v51 = vpop.f32.mrf.mxu1  ;;  %v2430_v17 = vadd.f32 %v4472_v49, %v2429_v50  ;;  %v1549_v63 = vpack.c.b16 %v1210_v59, %v1198_v58  ;;  %v3687_v42 = vld [vmem:[%s4917_s1 + $0x350] sm:$0xff]  ;;  %v3032_v50 = vld [vmem:[%s3797_s16 + $0x44] sm:$0x3]  ;;  %v815_v58 = vor.u32 %v814_v28, %v810_v29 }
  0xb2   : > { %2800 = vmatpush.bf16.msrb.mxu1 %v3687_v42  ;;  %v876_v5 = vunpack.c.l.b16 %v3032_v50  ;;  %v858_v59 = vrot.slane %v850_v46, 1  ;;  %v1233_v9 = vunpack.c.l.b16 %v859_v0  ;;  %v817_v28 = vshrl.u32 %v4605_v35, 16 }
  0xb3   : > { %v4532_v1 = vadd.f32 %v2514_v43, %v2486_v47  ;;  %v2459_v57 = vadd.f32 %v2458_v51, %v2430_v17  ;;  %v4574_v43 = vld [vmem:[%s3797_s16 + $0x4c] sm:$0x1]  ;;  %v4584_v47 = vld [vmem:[%s3797_s16 + $0x48] sm:$0xe]  ;;  %v924_v17 = vrot.slane %v922_v4, 2  ;;  %2859 = vmatpush.bf16.msrb.mxu3 %v3702_v24  ;;  %v1232_v29 = vunpack.c.l.b16 %v815_v58  ;;  %v3685_v24 = vld [vmem:[%s4917_s1 + $0x340] sm:$0xff] }
  0xb4   : > { %v3033_v51 = vld [vmem:[%s3797_s16 + $0x4c] sm:$0x3]  ;;  %v765_v32 = vunpack.c.l.b16 %v4574_v43  ;;  %v845_v52 = vunpack.c.l.b16 %v4584_v47  ;;  %v1221_v4 = vunpack.c.l.b16 %v858_v59  ;;  %v4655_v59 = vld [vmem:[%s3797_s16 + $0x24] sm:$0x1]  ;;  %v966_v0 = vunpack.c.l.b16 %v4639_v16 }
  0xb5   : > { %v877_v53 = vunpack.c.l.b16 %v3033_v51  ;;  %v925_v8 = vor.u32 %v924_v17, %v921_v41  ;;  %v969_v15 = vunpack.c.l.b16 %v4655_v59  ;;  %v3059_v47 = vld [vmem:[%s3797_s16 + $0x24] sm:$0x3]  ;;  %v1086_v43 = vunpack.c.l.b16 %v3058_v13 }
  0xb7   : > { %v1222_v19 = vunpack.c.l.b16 %v925_v8 }
  0xb8   : > { %v2487_v26 = vpop.f32.mrf.mxu2  ;;  %v2432_v23 = vpop.f32.mrf.mxu0 }
  0xb9   : > { %v2516_v3 = vpop.f32.mrf.mxu3  ;;  %v2488_v2 = vadd.f32 %v2487_v26, %v2459_v57  ;;  %v2461_v6 = vpop.f32.mrf.mxu1  ;;  %v2433_v27 = vadd.f32 %v4472_v49, %v2432_v23  ;;  %v808_v57 = vor.u32 %v807_v12, %v803_v18  ;;  %v884_v26 = vpack.c.b16 %v876_v5, %v844_v40  ;;  %v3677_v23 = vld [vmem:[%s4917_s1 + $0x300] sm:$0xff]  ;;  %v4652_v5 = vld [vmem:[%s3797_s16 + $0x1c] sm:$0x1] }
  0xba   : > { %2773 = vmatpush.bf16.msrb.mxu0 %v3677_v23  ;;  %v967_v8 = vunpack.c.l.b16 %v4652_v5 }
  0xbb   : > { %v4568_v39 = vadd.f32 %v2516_v3, %v2488_v2  ;;  %v2462_v45 = vadd.f32 %v2461_v6, %v2433_v27  ;;  %2663 = vmatmul.bf16.gmra.mxu0 %v1546_v21  ;;  %v885_v3 = vpack.c.b16 %v877_v53, %v845_v52  ;;  %v1220_v12 = vunpack.c.l.b16 %v808_v57  ;;  %v3693_v2 = vld [vmem:[%s4917_s1 + $0x380] sm:$0xff] }
  0xbc   : > { %2692 = vmatmul.bf16.gmra.mxu1 %v1547_v62  ;;  %v4614_v62 = vpack.c.b16 %v765_v32, %v764_v30  ;;  %v3701_v6 = vld [vmem:[%s4917_s1 + $0x3c0] sm:$0xff]  ;;  %v1234_v27 = vunpack.c.l.b16 %v933_v56  ;;  %2831 = vmatpush.bf16.msrb.mxu2 %v3693_v2  ;;  %v935_v46 = vshrl.u32 %v884_v26, 16  ;;  %v938_v50 = vshll.u32 %v884_v26, 16 }
  0xbd   : > { %2721 = vmatmul.bf16.gmra.mxu2 %v1548_v11  ;;  %v819_v11 = vshll.u32 %v4605_v35, 16  ;;  %v943_v51 = vshrl.u32 %v885_v3, 16  ;;  %2860 = vmatpush.bf16.msrb.mxu3 %v3701_v6  ;;  %v1563_v48 = vpack.c.b16 %v1232_v29, %v1220_v12  ;;  %v946_v14 = vshll.u32 %v885_v3, 16  ;;  %v4649_v35 = vld [vmem:[%s3797_s16 + $0x20] sm:$0xf] }
  0xbe   : > { %2750 = vmatmul.bf16.gmra.mxu3 %v1549_v63  ;;  %v3686_v63 = vld [vmem:[%s4917_s1 + $0x348] sm:$0xff]  ;;  %v826_v42 = vshll.u32 %v4614_v62, 16  ;;  %v1564_v57 = vpack.c.b16 %v1233_v9, %v1221_v4  ;;  %v1565_v58 = vpack.c.b16 %v1234_v27, %v1222_v19  ;;  %v968_v56 = vunpack.c.l.b16 %v4649_v35 }
  0xbf   : > { %2801 = vmatpush.bf16.msrb.mxu1 %v3686_v63  ;;  %v821_v41 = vrot.slane %v819_v11, 1  ;;  %v1087_v63 = vunpack.c.l.b16 %v3059_v47  ;;  %v4683_v2 = vpack.c.b16 %v967_v8, %v966_v0  ;;  %v1094_v6 = vpack.c.b16 %v1086_v43, %v1054_v44  ;;  %v4701_v43 = vld [vmem:[%s3797_s16 + $0x28] sm:$0xf] }
  0xc0   : > { %v2490_v54 = vpop.f32.mrf.mxu2  ;;  %v2434_v7 = vpop.f32.mrf.mxu0  ;;  %v828_v34 = vrot.slane %v826_v42, 1  ;;  %v4687_v23 = vpack.c.b16 %v969_v15, %v968_v56 }
  0xc1   : > { %v2519_v55 = vpop.f32.mrf.mxu3  ;;  %v2491_v60 = vadd.f32 %v2490_v54, %v2462_v45  ;;  %v2463_v10 = vpop.f32.mrf.mxu1  ;;  %v2435_v21 = vadd.f32 %v4472_v49, %v2434_v7  ;;  %v824_v45 = vshrl.u32 %v4614_v62, 16  ;;  %v853_v7 = vpack.c.b16 %v765_v32, %v845_v52 }
  0xc2   : > { %v937_v32 = vrot.slane %v935_v46, 1  ;;  %v945_v52 = vrot.slane %v943_v51, 1  ;;  %v948_v62 = vrot.slane %v946_v14, 2  ;;  %v822_v11 = vor.u32 %v821_v41, %v817_v28 }
  0xc3   : > { %v4617_v33 = vadd.f32 %v2519_v55, %v2491_v60  ;;  %v2464_v18 = vadd.f32 %v2463_v10, %v2435_v21  ;;  %v852_v60 = vpack.c.b16 %v763_v38, %v844_v40  ;;  %2802 = vmatpush.bf16.msrb.mxu1 %v3685_v24  ;;  %v3051_v38 = vld [vmem:[%s3797_s16 + $0x20] sm:$0xe]  ;;  %v940_v40 = vrot.slane %v938_v50, 2 }
  0xc4   : > { %v829_v26 = vor.u32 %v828_v34, %v824_v45  ;;  %v1055_v3 = vunpack.c.l.b16 %v3051_v38  ;;  %v861_v27 = vrot.slane %v853_v7, 1  ;;  %v949_v41 = vor.u32 %v948_v62, %v945_v52 }
  0xc5   : > { %v860_v29 = vrot.slane %v852_v60, 1  ;;  %v941_v28 = vor.u32 %v940_v40, %v937_v32  ;;  %v1244_v45 = vunpack.c.l.b16 %v822_v11  ;;  %v1106_v59 = vshll.u32 %v1094_v6, 16  ;;  %v4704_v32 = vld [vmem:[%s3797_s16 + $0x30] sm:$0xf]  ;;  %v4707_v40 = vld [vmem:[%s3797_s16 + $0x2c] sm:$0x1] }
  0xc6   : > { %v1256_v46 = vunpack.c.l.b16 %v829_v26  ;;  %v1095_v51 = vpack.c.b16 %v1087_v63, %v1055_v3  ;;  %v1257_v24 = vunpack.c.l.b16 %v861_v27  ;;  %v998_v7 = vshrl.u32 %v4687_v23, 16  ;;  %v4713_v26 = vld [vmem:[%s3797_s16 + $0x34] sm:$0x1]  ;;  %v4716_v63 = vld [vmem:[%s3797_s16 + $0x28] sm:$0xe] }
  0xc7   : > { %v1245_v14 = vunpack.c.l.b16 %v860_v29  ;;  %v1062_v62 = vpack.c.b16 %v967_v8, %v1054_v44  ;;  %v1063_v11 = vpack.c.b16 %v969_v15, %v1055_v3  ;;  %v1108_v29 = vrot.slane %v1106_v59, 2  ;;  %v4726_v44 = vld [vmem:[%s3797_s16 + $0x30] sm:$0xe] }
  0xc8   : > { %v2492_v17 = vpop.f32.mrf.mxu2  ;;  %v2437_v54 = vpop.f32.mrf.mxu0  ;;  %v1111_v61 = vshrl.u32 %v1095_v51, 16  ;;  %v1114_v13 = vshll.u32 %v1095_v51, 16  ;;  %v971_v5 = vunpack.c.l.b16 %v4707_v40  ;;  %v972_v8 = vunpack.c.l.b16 %v4704_v32 }
  0xc9   : > { %v2521_v20 = vpop.f32.mrf.mxu3  ;;  %v2493_v53 = vadd.f32 %v2492_v17, %v2464_v18  ;;  %v2466_v55 = vpop.f32.mrf.mxu1  ;;  %v2438_v25 = vadd.f32 %v4472_v49, %v2437_v54  ;;  %v1258_v54 = vunpack.c.l.b16 %v949_v41  ;;  %v1580_v38 = vpack.c.b16 %v1257_v24, %v1245_v14 }
  0xca   : > { %v973_v15 = vunpack.c.l.b16 %v4713_v26  ;;  %v1056_v3 = vunpack.c.l.b16 %v4716_v63  ;;  %v1070_v41 = vrot.slane %v1062_v62, 1 }
  0xcb   : > { %v4670_v10 = vadd.f32 %v2521_v20, %v2493_v53  ;;  %v2467_v21 = vadd.f32 %v2466_v55, %v2438_v25  ;;  %2668 = vmatmul.bf16.gmra.mxu0 %v1562_v22  ;;  %v993_v20 = vshll.u32 %v4683_v2, 16  ;;  %v1000_v22 = vshll.u32 %v4687_v23, 16 }
  0xcc   : > { %2697 = vmatmul.bf16.gmra.mxu1 %v1563_v48  ;;  %v1103_v48 = vshrl.u32 %v1094_v6, 16  ;;  %v1246_v53 = vunpack.c.l.b16 %v941_v28  ;;  %v1578_v55 = vpack.c.b16 %v764_v30, %v762_v37  ;;  %v1116_v23 = vrot.slane %v1114_v13, 2 }
  0xcd   : > { %2726 = vmatmul.bf16.gmra.mxu2 %v1564_v57  ;;  %v1579_v57 = vpack.c.b16 %v1256_v46, %v1244_v45  ;;  %v995_v60 = vrot.slane %v993_v20, 1  ;;  %v1002_v31 = vrot.slane %v1000_v22, 1  ;;  %v1057_v22 = vunpack.c.l.b16 %v4726_v44 }
  0xce   : > { %2755 = vmatmul.bf16.gmra.mxu3 %v1565_v58  ;;  %v991_v58 = vshrl.u32 %v4683_v2, 16  ;;  %v1105_v36 = vrot.slane %v1103_v48, 1  ;;  %v1581_v47 = vpack.c.b16 %v1258_v54, %v1246_v53  ;;  %v1113_v2 = vrot.slane %v1111_v61, 1 }
  0xcf   : > { %v1003_v28 = vor.u32 %v1002_v31, %v998_v7  ;;  %v985_v54 = vpack.c.b16 %v973_v15, %v972_v8  ;;  %v1176_v61 = vunpack.c.l.b16 %v1070_v41  ;;  %v1064_v41 = vpack.c.b16 %v971_v5, %v1056_v3 }
  0xd0   : > { %v2495_v18 = vpop.f32.mrf.mxu2  ;;  %v2439_v9 = vpop.f32.mrf.mxu0  ;;  %v996_v27 = vor.u32 %v995_v60, %v991_v58  ;;  %v1109_v45 = vor.u32 %v1108_v29, %v1105_v36  ;;  %v1117_v46 = vor.u32 %v1116_v23, %v1113_v2 }
  0xd1   : > { %v2524_v12 = vpop.f32.mrf.mxu3  ;;  %v2496_v4 = vadd.f32 %v2495_v18, %v2467_v21  ;;  %v2468_v19 = vpop.f32.mrf.mxu1  ;;  %v2440_v42 = vadd.f32 %v4472_v49, %v2439_v9  ;;  %v3060_v18 = vld [vmem:[%s3797_s16 + $0x2c] sm:$0x3]  ;;  %v3061_v9 = vld [vmem:[%s3797_s16 + $0x34] sm:$0x3]  ;;  %v1187_v59 = vunpack.c.l.b16 %v1003_v28 }
  0xd2   : > { %v1089_v48 = vunpack.c.l.b16 %v3061_v9  ;;  %v1175_v58 = vunpack.c.l.b16 %v996_v27  ;;  %v1189_v60 = vunpack.c.l.b16 %v1117_v46  ;;  %v4746_v9 = vld [vmem:[%s3797_s16 + $0x38] sm:$0xf]  ;;  %v4752_v27 = vld [vmem:[%s3797_s16 + $0x3c] sm:$0x1] }
  0xd3   : > { %v4690_v50 = vadd.f32 %v2524_v12, %v2496_v4  ;;  %v2469_v17 = vadd.f32 %v2468_v19, %v2440_v42  ;;  %v970_v4 = vunpack.c.l.b16 %v4701_v43  ;;  %v1088_v19 = vunpack.c.l.b16 %v3060_v18  ;;  %v3062_v46 = vld [vmem:[%s3797_s16 + $0x3c] sm:$0x3] }
  0xd4   : > { %v1071_v42 = vrot.slane %v1063_v11, 1  ;;  %v1097_v36 = vpack.c.b16 %v1089_v48, %v1057_v22  ;;  %v1012_v18 = vshrl.u32 %v985_v54, 16  ;;  %v3055_v48 = vld [vmem:[%s3797_s16 + $0x40] sm:$0xe] }
  0xd5   : > { %v984_v20 = vpack.c.b16 %v971_v5, %v970_v4  ;;  %v974_v5 = vunpack.c.l.b16 %v4746_v9 }
  0xd6   : > { %v1127_v29 = vshrl.u32 %v1097_v36, 16  ;;  %v1130_v2 = vshll.u32 %v1097_v36, 16 }
  0xd7   : > { %v1007_v31 = vshll.u32 %v984_v20, 16 }
  0xd8   : > { %v2497_v25 = vpop.f32.mrf.mxu2  ;;  %v2442_v30 = vpop.f32.mrf.mxu0 }
  0xd9   : > { %v2526_v34 = vpop.f32.mrf.mxu3  ;;  %v2498_v37 = vadd.f32 %v2497_v25, %v2469_v17  ;;  %v2471_v21 = vpop.f32.mrf.mxu1  ;;  %v2443_v52 = vadd.f32 %v4472_v49, %v2442_v30  ;;  %v1188_v25 = vunpack.c.l.b16 %v1071_v42  ;;  %v1009_v63 = vrot.slane %v1007_v31, 1  ;;  %v4757_v42 = vld [vmem:[%s3797_s16 + $0x44] sm:$0x1] }
  0xdb   : > { %v4719_v12 = vadd.f32 %v2526_v34, %v2498_v37  ;;  %v2472_v6 = vadd.f32 %v2471_v21, %v2443_v52  ;;  %2673 = vmatmul.bf16.gmra.mxu0 %v1578_v55  ;;  %v1096_v55 = vpack.c.b16 %v1088_v19, %v1056_v3  ;;  %v1177_v34 = vunpack.c.l.b16 %v1109_v45  ;;  %v4749_v19 = vld [vmem:[%s3797_s16 + $0x40] sm:$0xf]  ;;  %v4760_v45 = vld [vmem:[%s3797_s16 + $0x38] sm:$0xe] }
  0xdc   : > { %2702 = vmatmul.bf16.gmra.mxu1 %v1579_v57  ;;  %v1014_v37 = vshll.u32 %v985_v54, 16  ;;  %v1005_v52 = vshrl.u32 %v984_v20, 16  ;;  %v1132_v20 = vrot.slane %v1130_v2, 2  ;;  %v975_v3 = vunpack.c.l.b16 %v4752_v27 }
  0xdd   : > { %2731 = vmatmul.bf16.gmra.mxu2 %v1580_v38  ;;  %v1119_v30 = vshrl.u32 %v1096_v55, 16  ;;  %v1122_v21 = vshll.u32 %v1096_v55, 16  ;;  %v1534_v38 = vpack.c.b16 %v968_v56, %v966_v0  ;;  %v1537_v40 = vpack.c.b16 %v1189_v60, %v1177_v34 }
  0xde   : > { %2760 = vmatmul.bf16.gmra.mxu3 %v1581_v47  ;;  %v1536_v47 = vpack.c.b16 %v1188_v25, %v1176_v61  ;;  %v1016_v0 = vrot.slane %v1014_v37, 1  ;;  %v977_v54 = vunpack.c.l.b16 %v4757_v42  ;;  %v1058_v55 = vunpack.c.l.b16 %v4760_v45 }
  0xdf   : > { %v1121_v56 = vrot.slane %v1119_v30, 1  ;;  %v986_v37 = vpack.c.b16 %v975_v3, %v974_v5 }
  0xe0   : > { %v2500_v51 = vpop.f32.mrf.mxu2  ;;  %v2444_v24 = vpop.f32.mrf.mxu0  ;;  %v1017_v26 = vor.u32 %v1016_v0, %v1012_v18 }
  0xe1   : > { %v2529_v17 = vpop.f32.mrf.mxu3  ;;  %v2501_v14 = vadd.f32 %v2500_v51, %v2472_v6  ;;  %v2473_v53 = vpop.f32.mrf.mxu1  ;;  %v2445_v57 = vadd.f32 %v4472_v49, %v2444_v24  ;;  %v1535_v49 = vpack.c.b16 %v1187_v59, %v1175_v58  ;;  %v1124_v6 = vrot.slane %v1122_v21, 2 }
  0xe2   : > { %v1010_v24 = vor.u32 %v1009_v63, %v1005_v52  ;;  %v1021_v2 = vshll.u32 %v986_v37, 16  ;;  %v1019_v45 = vshrl.u32 %v986_v37, 16 }
  0xe3   : > { %v4738_v13 = vadd.f32 %v2529_v17, %v2501_v14  ;;  %v2474_v7 = vadd.f32 %v2473_v53, %v2445_v57  ;;  %v1129_v17 = vrot.slane %v1127_v29, 1  ;;  %v3063_v14 = vld [vmem:[%s3797_s16 + $0x44] sm:$0x3]  ;;  %v976_v53 = vunpack.c.l.b16 %v4749_v19 }
  0xe4   : > { %v1090_v57 = vunpack.c.l.b16 %v3062_v46  ;;  %v1091_v58 = vunpack.c.l.b16 %v3063_v14  ;;  %v1125_v34 = vor.u32 %v1124_v6, %v1121_v56  ;;  %v1199_v21 = vunpack.c.l.b16 %v1010_v24 }
  0xe5   : > { %v1133_v60 = vor.u32 %v1132_v20, %v1129_v17  ;;  %v1023_v17 = vrot.slane %v1021_v2, 1  ;;  %v1066_v20 = vpack.c.b16 %v975_v3, %v1058_v55  ;;  %v4790_v3 = vld [vmem:[%s3797_s16 + $0x50] sm:$0xf] }
  0xe6   : > { %v1201_v18 = vunpack.c.l.b16 %v1125_v34 }
  0xe7   : > { %v1213_v29 = vunpack.c.l.b16 %v1133_v60  ;;  %v3057_v60 = vld [vmem:[%s3797_s16 + $0x50] sm:$0xe] }
  0xe8   : > { %v2502_v62 = vpop.f32.mrf.mxu2  ;;  %v2543_v23 = vpop.f32.mrf.mxu0 }
  0xe9   : > { %v2531_v11 = vpop.f32.mrf.mxu3  ;;  %v2503_v16 = vadd.f32 %v2502_v62, %v2474_v7  ;;  %v2572_v35 = vpop.f32.mrf.mxu1  ;;  %v2544_v44 = vadd.f32 %v2543_v23, %v4532_v1  ;;  %v1065_v1 = vpack.c.b16 %v973_v15, %v1057_v22  ;;  %v1072_v15 = vrot.slane %v1064_v41, 1 }
  0xea   : > { %v1059_v22 = vunpack.c.l.b16 %v3055_v48  ;;  %v1553_v42 = vpack.c.b16 %v1213_v29, %v1201_v18  ;;  %v1061_v29 = vunpack.c.l.b16 %v3057_v60 }
  0xeb   : > { %v4754_v28 = vadd.f32 %v2531_v11, %v2503_v16  ;;  %v2573_v51 = vadd.f32 %v2572_v35, %v2544_v44  ;;  %2774 = vmatmul.bf16.vlgmr.msrb.gmra.mxu0 %v1534_v38  ;;  %v1073_v25 = vrot.slane %v1065_v1, 1  ;;  %v987_v38 = vpack.c.b16 %v977_v54, %v976_v53 }
  0xec   : > { %2803 = vmatmul.bf16.vlgmr.msrb.gmra.mxu1 %v1535_v49  ;;  %v1098_v49 = vpack.c.b16 %v1090_v57, %v1058_v55  ;;  %v1200_v52 = vunpack.c.l.b16 %v1072_v15  ;;  %v1099_v62 = vpack.c.b16 %v1091_v58, %v1059_v22  ;;  %v4787_v58 = vld [vmem:[%s3797_s16 + $0x48] sm:$0xf] }
  0xed   : > { %2832 = vmatmul.bf16.vlgmr.msrb.gmra.mxu2 %v1536_v47  ;;  %v1212_v63 = vunpack.c.l.b16 %v1073_v25  ;;  %v1028_v16 = vshll.u32 %v987_v38, 16  ;;  %v1026_v43 = vshrl.u32 %v987_v38, 16  ;;  %v3056_v55 = vld [vmem:[%s3797_s16 + $0x48] sm:$0xe]  ;;  %v1074_v25 = vrot.slane %v1066_v20, 1 }
  0xee   : > { %2861 = vmatmul.bf16.vlgmr.msrb.gmra.mxu3 %v1537_v40  ;;  %v1211_v40 = vunpack.c.l.b16 %v1017_v26  ;;  %v1135_v23 = vshrl.u32 %v1098_v49, 16  ;;  %v1138_v35 = vshll.u32 %v1098_v49, 16  ;;  %v1143_v0 = vshrl.u32 %v1099_v62, 16 }
  0xef   : > { %v1146_v56 = vshll.u32 %v1099_v62, 16  ;;  %v1552_v41 = vpack.c.b16 %v1212_v63, %v1200_v52  ;;  %v978_v37 = vunpack.c.l.b16 %v4787_v58  ;;  %v980_v49 = vunpack.c.l.b16 %v4790_v3 }
  0xf0   : > { %v2601_v59 = vpop.f32.mrf.mxu2  ;;  %v2545_v31 = vpop.f32.mrf.mxu0  ;;  %v1551_v27 = vpack.c.b16 %v1211_v40, %v1199_v21  ;;  %v1137_v48 = vrot.slane %v1135_v23, 1  ;;  %v1140_v24 = vrot.slane %v1138_v35, 2  ;;  %v1145_v57 = vrot.slane %v1143_v0, 1 }
  0xf1   : > { %v2630_v61 = vpop.f32.mrf.mxu3  ;;  %v2602_v7 = vadd.f32 %v2601_v59, %v2573_v51  ;;  %v2574_v36 = vpop.f32.mrf.mxu1  ;;  %v2546_v30 = vadd.f32 %v2545_v31, %v4568_v39  ;;  %v1550_v39 = vpack.c.b16 %v972_v8, %v970_v4  ;;  %v1030_v4 = vrot.slane %v1028_v16, 1 }
  0xf2   : > { %v1067_v8 = vpack.c.b16 %v977_v54, %v1059_v22  ;;  %v1148_v26 = vrot.slane %v1146_v56, 2  ;;  %v4796_v54 = vld [vmem:[%s3797_s16 + $0x54] sm:$0x1]  ;;  %v3064_v22 = vld [vmem:[%s3797_s16 + $0x4c] sm:$0x3]  ;;  %v1024_v59 = vor.u32 %v1023_v17, %v1019_v45  ;;  %v1141_v31 = vor.u32 %v1140_v24, %v1137_v48 }
  0xf3   : > { %v4777_v47 = vadd.f32 %v2630_v61, %v2602_v7  ;;  %v2575_v11 = vadd.f32 %v2574_v36, %v2546_v30  ;;  %v1031_v61 = vor.u32 %v1030_v4, %v1026_v43  ;;  %v3065_v7 = vld [vmem:[%s3797_s16 + $0x54] sm:$0x3]  ;;  %v981_v40 = vunpack.c.l.b16 %v4796_v54 }
  0xf4   : > { %v1075_v34 = vrot.slane %v1067_v8, 1  ;;  %v1149_v36 = vor.u32 %v1148_v26, %v1145_v57  ;;  %v1060_v52 = vunpack.c.l.b16 %v3056_v55  ;;  %v1092_v62 = vunpack.c.l.b16 %v3064_v22 }
  0xf5   : > { %v1093_v2 = vunpack.c.l.b16 %v3065_v7  ;;  %v1223_v23 = vunpack.c.l.b16 %v1024_v59  ;;  %v1224_v35 = vunpack.c.l.b16 %v1074_v25 }
  0xf6   : > { %v1236_v56 = vunpack.c.l.b16 %v1075_v34  ;;  %v1100_v45 = vpack.c.b16 %v1092_v62, %v1060_v52 }
  0xf8   : > { %v2603_v6 = vpop.f32.mrf.mxu2  ;;  %v2548_v51 = vpop.f32.mrf.mxu0  ;;  %v1568_v20 = vpack.c.b16 %v1236_v56, %v1224_v35  ;;  %v1151_v8 = vshrl.u32 %v1100_v45, 16  ;;  %v1154_v26 = vshll.u32 %v1100_v45, 16 }
  0xf9   : > { %v2632_v44 = vpop.f32.mrf.mxu3  ;;  %v2604_v46 = vadd.f32 %v2603_v6, %v2575_v11  ;;  %v2577_v1 = vpop.f32.mrf.mxu1  ;;  %v2549_v32 = vadd.f32 %v2548_v51, %v4617_v33  ;;  %v4793_v33 = vld [vmem:[%s3797_s16 + $0x4c] sm:$0x1]  ;;  %v1225_v6 = vunpack.c.l.b16 %v1141_v31  ;;  %s3580_s16 = sshll.u32 %s4921_s13, 5 }
  0xfa   : > { %v979_v30 = vunpack.c.l.b16 %v4793_v33  ;;  %v1153_v25 = vrot.slane %v1151_v8, 1  ;;  %v1156_v34 = vrot.slane %v1154_v26, 2  ;;  %s4874_s10 = scalar_lea.vmem %s4919_s3, %s3580_s16 }
  0xfb   : > { %v4784_v14 = vadd.f32 %v2632_v44, %v2604_v46  ;;  %v2578_v15 = vadd.f32 %v2577_v1, %v2549_v32  ;;  %2779 = vmatmul.bf16.gmra.mxu0 %v1550_v39  ;;  %v1235_v39 = vunpack.c.l.b16 %v1031_v61  ;;  %v1101_v46 = vpack.c.b16 %v1093_v2, %v1061_v29 }
  0xfc   : > { %2808 = vmatmul.bf16.gmra.mxu1 %v1551_v27  ;;  %v988_v44 = vpack.c.b16 %v979_v30, %v978_v37  ;;  %v1068_v59 = vpack.c.b16 %v979_v30, %v1060_v52  ;;  %v1069_v61 = vpack.c.b16 %v981_v40, %v1061_v29  ;;  %v1157_v2 = vor.u32 %v1156_v34, %v1153_v25 }
  0xfd   : > { %2837 = vmatmul.bf16.gmra.mxu2 %v1552_v41  ;;  %v1237_v41 = vunpack.c.l.b16 %v1149_v36  ;;  %v1567_v51 = vpack.c.b16 %v1235_v39, %v1223_v23  ;;  %v1162_v33 = vshll.u32 %v1101_v46, 16 }
  0xfe   : > { %2866 = vmatmul.bf16.gmra.mxu3 %v1553_v42  ;;  %v989_v42 = vpack.c.b16 %v981_v40, %v980_v49  ;;  %v1035_v1 = vshll.u32 %v988_v44, 16  ;;  %v1033_v19 = vshrl.u32 %v988_v44, 16  ;;  %v1249_v56 = vunpack.c.l.b16 %v1157_v2 }
  0xff   : > { %v1569_v32 = vpack.c.b16 %v1237_v41, %v1225_v6  ;;  %v1164_v7 = vrot.slane %v1162_v33, 2  ;;  %v1582_v41 = vpack.c.b16 %v980_v49, %v978_v37 }
 0x100   : > { %v2606_v21 = vpop.f32.mrf.mxu2  ;;  %v2550_v63 = vpop.f32.mrf.mxu0  ;;  %v1042_v4 = vshll.u32 %v989_v42, 16 }
 0x101   : > { %v2635_v38 = vpop.f32.mrf.mxu3  ;;  %v2607_v11 = vadd.f32 %v2606_v21, %v2578_v15  ;;  %v2579_v18 = vpop.f32.mrf.mxu1  ;;  %v2551_v16 = vadd.f32 %v2550_v63, %v4670_v10  ;;  %v1566_v10 = vpack.c.b16 %v976_v53, %v974_v5  ;;  %v1159_v15 = vshrl.u32 %v1101_v46, 16 }
 0x102   : > { %v1037_v5 = vrot.slane %v1035_v1, 1  ;;  %v1040_v53 = vshrl.u32 %v989_v42, 16  ;;  %v1044_v22 = vrot.slane %v1042_v4, 1 }
 0x103   : > { %v4807_v0 = vadd.f32 %v2635_v38, %v2607_v11  ;;  %v2580_v27 = vadd.f32 %v2579_v18, %v2551_v16  ;;  %v1161_v60 = vrot.slane %v1159_v15, 1  ;;  %v1076_v38 = vrot.slane %v1068_v59, 1 }
 0x104   : > { %v1045_v21 = vor.u32 %v1044_v22, %v1040_v53  ;;  %v1077_v18 = vrot.slane %v1069_v61, 1 }
 0x105   : > { %v1165_v16 = vor.u32 %v1164_v7, %v1161_v60  ;;  %v1248_v39 = vunpack.c.l.b16 %v1076_v38 }
 0x106   : > { %v1259_v23 = vunpack.c.l.b16 %v1045_v21  ;;  %v1260_v35 = vunpack.c.l.b16 %v1077_v18 }
 0x107   : > { %v1261_v6 = vunpack.c.l.b16 %v1165_v16 }
 0x108   : > { %v2608_v17 = vpop.f32.mrf.mxu2  ;;  %v2553_v24 = vpop.f32.mrf.mxu0 }
 0x109   : > { %v2637_v43 = vpop.f32.mrf.mxu3  ;;  %v2609_v48 = vadd.f32 %v2608_v17, %v2580_v27  ;;  %v2582_v57 = vpop.f32.mrf.mxu1  ;;  %v2554_v54 = vadd.f32 %v2553_v24, %v4690_v50  ;;  %v1038_v50 = vor.u32 %v1037_v5, %v1033_v19 }
 0x10b   : > { %v4818_v9 = vadd.f32 %v2637_v43, %v2609_v48  ;;  %v2583_v55 = vadd.f32 %v2582_v57, %v2554_v54  ;;  %2784 = vmatmul.bf16.gmra.mxu0 %v1566_v10  ;;  %v1247_v29 = vunpack.c.l.b16 %v1038_v50  ;;  %v1584_v10 = vpack.c.b16 %v1260_v35, %v1248_v39 }
 0x10c   : > { %2813 = vmatmul.bf16.gmra.mxu1 %v1567_v51  ;;  %v1585_v51 = vpack.c.b16 %v1261_v6, %v1249_v56 }
 0x10d   : > { %2842 = vmatmul.bf16.gmra.mxu2 %v1568_v20  ;;  %v1583_v42 = vpack.c.b16 %v1259_v23, %v1247_v29 }
 0x10e   : > { %2871 = vmatmul.bf16.gmra.mxu3 %v1569_v32 }
 0x110   : > { %v2611_v31 = vpop.f32.mrf.mxu2  ;;  %v2555_v11 = vpop.f32.mrf.mxu0 }
 0x111   : > { %v2640_v36 = vpop.f32.mrf.mxu3  ;;  %v2612_v62 = vadd.f32 %v2611_v31, %v2583_v55  ;;  %v2584_v63 = vpop.f32.mrf.mxu1  ;;  %v2556_v30 = vadd.f32 %v2555_v11, %v4719_v12 }
 0x113   : > { %v4821_v40 = vadd.f32 %v2640_v36, %v2612_v62  ;;  %v2585_v52 = vadd.f32 %v2584_v63, %v2556_v30 }
 0x118   : > { %v2613_v44 = vpop.f32.mrf.mxu2  ;;  %v2558_v46 = vpop.f32.mrf.mxu0 }
 0x119   : > { %v2642_v27 = vpop.f32.mrf.mxu3  ;;  %v2614_v45 = vadd.f32 %v2613_v44, %v2585_v52  ;;  %v2587_v12 = vpop.f32.mrf.mxu1  ;;  %v2559_v1 = vadd.f32 %v2558_v46, %v4738_v13 }
 0x11b   : > { %v4828_v17 = vadd.f32 %v2642_v27, %v2614_v45  ;;  %v2588_v43 = vadd.f32 %v2587_v12, %v2559_v1  ;;  %2789 = vmatmul.bf16.gmra.mxu0 %v1582_v41 }
 0x11c   : > { %2818 = vmatmul.bf16.gmra.mxu1 %v1583_v42 }
 0x11d   : > { %2847 = vmatmul.bf16.gmra.mxu2 %v1584_v10 }
 0x11e   : > { %2876 = vmatmul.bf16.gmra.mxu3 %v1585_v51 }
 0x120   : > { %v2616_v20 = vpop.f32.mrf.mxu2  ;;  %v2560_v3 = vpop.f32.mrf.mxu0 }
 0x121   : > { %v2645_v58 = vpop.f32.mrf.mxu3  ;;  %v2617_v32 = vadd.f32 %v2616_v20, %v2588_v43  ;;  %v2589_v37 = vpop.f32.mrf.mxu1  ;;  %v2561_v49 = vadd.f32 %v2560_v3, %v4754_v28 }
 0x123   : > { %v4831_v4 = vadd.f32 %v2645_v58, %v2617_v32  ;;  %v2590_v8 = vadd.f32 %v2589_v37, %v2561_v49 }
 0x128   : > { %v2618_v48 = vpop.f32.mrf.mxu2  ;;  %v2659_v57 = vpop.f32.mrf.mxu0 }
 0x129   : > { %v2647_v24 = vpop.f32.mrf.mxu3  ;;  %v2619_v13 = vadd.f32 %v2618_v48, %v2590_v8  ;;  %v2688_v26 = vpop.f32.mrf.mxu1  ;;  %v2660_v16 = vadd.f32 %v2659_v57, %v4777_v47 }
 0x12b   : > { %v4833_v15 = vadd.f32 %v2647_v24, %v2619_v13  ;;  %v2689_v39 = vadd.f32 %v2688_v26, %v2660_v16 }
 0x130   : > { %v2717_v33 = vpop.f32.mrf.mxu2  ;;  %v2661_v19 = vpop.f32.mrf.mxu0 }
 0x131   : > { %v2746_v54 = vpop.f32.mrf.mxu3  ;;  %v2690_v5 = vpop.f32.mrf.mxu1  ;;  %v2718_v35 = vadd.f32 %v2717_v33, %v2689_v39  ;;  %v2662_v56 = vadd.f32 %v2661_v19, %v4784_v14 }
 0x133   : > { %v2747_v27 = vadd.f32 %v2746_v54, %v2718_v35  ;;  %v2691_v42 = vadd.f32 %v2690_v5, %v2662_v56 }
 0x138   : > { %v2719_v53 = vpop.f32.mrf.mxu2  ;;  %v2664_v22 = vpop.f32.mrf.mxu0 }
 0x139   : > { %v2748_v55 = vpop.f32.mrf.mxu3  ;;  %v2693_v59 = vpop.f32.mrf.mxu1  ;;  %v2720_v46 = vadd.f32 %v2719_v53, %v2691_v42  ;;  %v2665_v12 = vadd.f32 %v2664_v22, %v4807_v0 }
 0x13b   : > { %v2749_v43 = vadd.f32 %v2748_v55, %v2720_v46  ;;  %v2694_v32 = vadd.f32 %v2693_v59, %v2665_v12 }
 0x140   : > { %v2722_v61 = vpop.f32.mrf.mxu2  ;;  %v2666_v25 = vpop.f32.mrf.mxu0 }
 0x141   : > { %v2751_v28 = vpop.f32.mrf.mxu3  ;;  %v2695_v34 = vpop.f32.mrf.mxu1  ;;  %v2723_v49 = vadd.f32 %v2722_v61, %v2694_v32  ;;  %v2667_v0 = vadd.f32 %v2666_v25, %v4818_v9 }
 0x143   : > { %v2752_v26 = vadd.f32 %v2751_v28, %v2723_v49  ;;  %v2696_v5 = vadd.f32 %v2695_v34, %v2667_v0 }
 0x148   : > { %v2724_v60 = vpop.f32.mrf.mxu2  ;;  %v2669_v31 = vpop.f32.mrf.mxu0 }
 0x149   : > { %v4835_v7 = vpop.f32.mrf.mxu3  ;;  %v4837_v36 = vpop.f32.mrf.mxu1  ;;  %v2725_v22 = vadd.f32 %v2724_v60, %v2696_v5  ;;  %v2670_v61 = vadd.f32 %v2669_v31, %v4821_v40 }
 0x14b   : > { %v2754_v35 = vadd.f32 %v4835_v7, %v2725_v22  ;;  %v2699_v34 = vadd.f32 %v4837_v36, %v2670_v61 }
 0x150   : > { %v4839_v50 = vpop.f32.mrf.mxu2  ;;  %v4843_v38 = vpop.f32.mrf.mxu0 }
 0x151   : > { %v4841_v21 = vpop.f32.mrf.mxu3  ;;  %v4845_v62 = vpop.f32.mrf.mxu1  ;;  %v2728_v60 = vadd.f32 %v4839_v50, %v2699_v34  ;;  %v2672_v40 = vadd.f32 %v4843_v38, %v4828_v17 }
 0x153   : > { %v2757_v12 = vadd.f32 %v4841_v21, %v2728_v60 }
 0x158   : > { %v4847_v11 = vpop.f32.mrf.mxu2  ;;  %v4851_v18 = vpop.f32.mrf.mxu0 }
 0x159   : > { %v4849_v63 = vpop.f32.mrf.mxu3  ;;  %v4853_v2 = vpop.f32.mrf.mxu1  ;;  %v2675_v17 = vadd.f32 %v4851_v18, %v4831_v4 }
 0x160   : > { %v4856_v30 = vpop.f32.mrf.mxu2  ;;  %v4860_v29 = vpop.f32.mrf.mxu0 }
 0x161   : > { %v4858_v52 = vpop.f32.mrf.mxu3  ;;  %v4862_v23 = vpop.f32.mrf.mxu1  ;;  %v2677_v4 = vadd.f32 %v4860_v29, %v4833_v15 }
 0x168   : > { %v4865_v6 = vpop.f32.mrf.mxu2  ;;  %v2775_v41 = vpop.f32.mrf.mxu0 }
 0x169   : > { %v4867_v44 = vpop.f32.mrf.mxu3  ;;  %v2804_v47 = vpop.f32.mrf.mxu1  ;;  %v2776_v45 = vadd.f32 %v2775_v41, %v2747_v27 }
 0x16b   : > { %v2805_v10 = vadd.f32 %v2804_v47, %v2776_v45 }
 0x170   : > { %v2833_v51 = vpop.f32.mrf.mxu2  ;;  %v2777_v58 = vpop.f32.mrf.mxu0 }
 0x171   : > { %v2862_v1 = vpop.f32.mrf.mxu3  ;;  %v2834_v20 = vadd.f32 %v2833_v51, %v2805_v10  ;;  %v2806_v14 = vpop.f32.mrf.mxu1  ;;  %v2778_v37 = vadd.f32 %v2777_v58, %v2749_v43 }
 0x173   : > { %v2863_v3 = vadd.f32 %v2862_v1, %v2834_v20  ;;  %v2807_v24 = vadd.f32 %v2806_v14, %v2778_v37  ;;  %v2701_v1 = vadd.f32 %v4845_v62, %v2672_v40 }
 0x175   : > { %v2882_v8 = vmax.f32 %v2863_v3, 0.0  ;;  %v2730_v20 = vadd.f32 %v4847_v11, %v2701_v1 }
 0x177   : > { %v2890_v48 = vpack.c.bf16 %v2882_v8, %v2882_v8  ;;  %v2759_v3 = vadd.f32 %v4849_v63, %v2730_v20  ;;  %v2704_v8 = vadd.f32 %v4853_v2, %v2675_v17  ;;  %v2706_v2 = vadd.f32 %v4862_v23, %v2677_v4 }
 0x178   : > { %v2835_v13 = vpop.f32.mrf.mxu2  ;;  %v2780_v54 = vpop.f32.mrf.mxu0 }
 0x179   : > { %v2864_v57 = vpop.f32.mrf.mxu3  ;;  %2899 = vst.msk [vmem:[%s4874_s10] sm:$0xf] %vm2898_vm0, %v2890_v48  ;;  %v2836_v33 = vadd.f32 %v2835_v13, %v2807_v24  ;;  %v2809_v19 = vpop.f32.mrf.mxu1  ;;  %v2781_v55 = vadd.f32 %v2780_v54, %v2752_v26  ;;  %v2733_v48 = vadd.f32 %v4856_v30, %v2704_v8 }
 0x17b   : > { %v2865_v53 = vadd.f32 %v2864_v57, %v2836_v33  ;;  %v2810_v9 = vadd.f32 %v2809_v19, %v2781_v55  ;;  %v2762_v26 = vadd.f32 %v4858_v52, %v2733_v48 }
 0x17d   : > { %v2883_v59 = vmax.f32 %v2865_v53, 0.0  ;;  %v2735_v53 = vadd.f32 %v4865_v6, %v2706_v2 }
 0x17f   : > { %v2891_v16 = vpack.c.bf16 %v2883_v59, %v2883_v59  ;;  %v2764_v61 = vadd.f32 %v4867_v44, %v2735_v53 }
 0x180   : > { %v2838_v25 = vpop.f32.mrf.mxu2  ;;  %v2782_v56 = vpop.f32.mrf.mxu0 }
 0x181   : > { %v2867_v39 = vpop.f32.mrf.mxu3  ;;  %2900 = vst.msk [vmem:[%s4874_s10 + $0x4] sm:$0xf] %vm2898_vm0, %v2891_v16  ;;  %v2839_v28 = vadd.f32 %v2838_v25, %v2810_v9  ;;  %v2811_v27 = vpop.f32.mrf.mxu1  ;;  %v2783_v47 = vadd.f32 %v2782_v56, %v2754_v35 }
 0x183   : > { %v2868_v41 = vadd.f32 %v2867_v39, %v2839_v28  ;;  %v2812_v45 = vadd.f32 %v2811_v27, %v2783_v47 }
 0x185   : > { %v2884_v42 = vmax.f32 %v2868_v41, 0.0 }
 0x187   : > { %v2892_v31 = vpack.c.bf16 %v2884_v42, %v2884_v42 }
 0x188   : > { %v2840_v46 = vpop.f32.mrf.mxu2  ;;  %v2785_v51 = vpop.f32.mrf.mxu0 }
 0x189   : > { %v2869_v7 = vpop.f32.mrf.mxu3  ;;  %2901 = vst.msk [vmem:[%s4874_s10 + $0x8] sm:$0xf] %vm2898_vm0, %v2892_v31  ;;  %v2841_v10 = vadd.f32 %v2840_v46, %v2812_v45  ;;  %v2814_v36 = vpop.f32.mrf.mxu1  ;;  %v2786_v50 = vadd.f32 %v2785_v51, %v2757_v12 }
 0x18b   : > { %v2870_v43 = vadd.f32 %v2869_v7, %v2841_v10  ;;  %v2815_v14 = vadd.f32 %v2814_v36, %v2786_v50 }
 0x18d   : > { %v2885_v58 = vmax.f32 %v2870_v43, 0.0 }
 0x18f   : > { %v2893_v38 = vpack.c.bf16 %v2885_v58, %v2885_v58 }
 0x190   : > { %v2843_v32 = vpop.f32.mrf.mxu2  ;;  %v2787_v49 = vpop.f32.mrf.mxu0 }
 0x191   : > { %v2872_v21 = vpop.f32.mrf.mxu3  ;;  %2902 = vst.msk [vmem:[%s4874_s10 + $0xc] sm:$0xf] %vm2898_vm0, %v2893_v38  ;;  %v2844_v37 = vadd.f32 %v2843_v32, %v2815_v14  ;;  %v2816_v62 = vpop.f32.mrf.mxu1  ;;  %v2788_v11 = vadd.f32 %v2787_v49, %v2759_v3 }
 0x193   : > { %v2873_v0 = vadd.f32 %v2872_v21, %v2844_v37  ;;  %v2817_v13 = vadd.f32 %v2816_v62, %v2788_v11 }
 0x195   : > { %v2886_v24 = vmax.f32 %v2873_v0, 0.0 }
 0x197   : > { %v2894_v18 = vpack.c.bf16 %v2886_v24, %v2886_v24 }
 0x198   : > { %v2845_v57 = vpop.f32.mrf.mxu2  ;;  %v2790_v54 = vpop.f32.mrf.mxu0 }
 0x199   : > { %v2874_v63 = vpop.f32.mrf.mxu3  ;;  %2903 = vst.msk [vmem:[%s4874_s10 + $0x10] sm:$0xf] %vm2898_vm0, %v2894_v18  ;;  %v2846_v33 = vadd.f32 %v2845_v57, %v2817_v13  ;;  %v2791_v5 = vadd.f32 %v2790_v54, %v2762_v26  ;;  %v2819_v30 = vpop.f32.mrf.mxu1 }
 0x19b   : > { %v2875_v19 = vadd.f32 %v2874_v63, %v2846_v33  ;;  %v2820_v29 = vadd.f32 %v2819_v30, %v2791_v5 }
 0x19d   : > { %v2887_v55 = vmax.f32 %v2875_v19, 0.0 }
 0x19f   : > { %v2895_v15 = vpack.c.bf16 %v2887_v55, %v2887_v55 }
 0x1a0   : > { %v2848_v22 = vpop.f32.mrf.mxu2  ;;  %v2792_v16 = vpop.f32.mrf.mxu0 }
 0x1a1   : > { %v2877_v59 = vpop.f32.mrf.mxu3  ;;  %2904 = vst.msk [vmem:[%s4874_s10 + $0x14] sm:$0xf] %vm2898_vm0, %v2895_v15  ;;  %v2849_v52 = vadd.f32 %v2848_v22, %v2820_v29  ;;  %v2793_v23 = vadd.f32 %v2792_v16, %v2764_v61  ;;  %v2821_v39 = vpop.f32.mrf.mxu1 }
 0x1a3   : > { %v2878_v9 = vadd.f32 %v2877_v59, %v2849_v52  ;;  %v2822_v28 = vadd.f32 %v2821_v39, %v2793_v23 }
 0x1a5   : > { %v2888_v25 = vmax.f32 %v2878_v9, 0.0 }
 0x1a7   : > { %v2896_v35 = vpack.c.bf16 %v2888_v25, %v2888_v25 }
 0x1a8   : > { %v2850_v6 = vpop.f32.mrf.mxu2 }
 0x1a9   : > { %2905 = vst.msk [vmem:[%s4874_s10 + $0x18] sm:$0xf] %vm2898_vm0, %v2896_v35  ;;  %v2851_v56 = vadd.f32 %v2850_v6, %v2822_v28  ;;  %v2879_v27 = vpop.f32.mrf.mxu3 }
 0x1ab   : > { %v2880_v34 = vadd.f32 %v2879_v27, %v2851_v56 }
 0x1ad   : > { %v2889_v41 = vmax.f32 %v2880_v34, 0.0 }
 0x1af   : > { %v2897_v47 = vpack.c.bf16 %v2889_v41, %v2889_v41 }
 0x1b1   : > { %2906 = vst.msk [vmem:[%s4874_s10 + $0x1c] sm:$0xf] %vm2898_vm0, %v2897_v47 }
 0x1b2 PF: > { %s13_s12 = sadd.s32 1, %s3725_s12  }
 0x1b3   : > { %p10_p4 = scmp.ge.s32.totalorder %s13_s12, 4  }
 0x1b5   :  { %12 = sbr.rel (!%p10_p4) target bundleno = 1 (0x1), region = 65 }

// kernel: pose_exp_net_forward.9
= control target key start
LH: loop header
LB: loop body
LE: loop exit
PB: predicated region body
PF: predicated region fallthrough
CT: control target
= control target key end

     0   :  { %s1718_s12 = smov 0   ;;  %s2053_s0 = inlined_call_operand.vmem [shape: bf16[2,6,6,128], index: 0, kind: input, shape index: {}]   ;;  %s2054_s1 = inlined_call_operand.vmem [shape: bf16[1152,32], index: 1, kind: input, shape index: {}]   ;;  %s2055_s2 = inlined_call_operand.vmem [shape: f32[1,32], index: 2, kind: input, shape index: {}]   ;;  %s2056_s3 = inlined_call_operand.vmem [shape: bf16[2,16,32], index: 3, kind: output, shape index: {}]  }
   0x1 LB: > { %s1277_s13 = sadd.s32 4294967295, %s1696_s12   ;;  %p1281_p0 = scmp.ge.s32.totalorder %s1696_s12, 1  ;;  %s1696_s12 = sphi %s1718_s12, %s13_s12  }
   0x2   : > { %p137_p1 = scmp.lt.s32.totalorder %s1696_s12, 3 }
   0x4   : > { %p138_p2 = pnand %p1281_p0, %p137_p1 }
   0x5   : > { %p161_p3 = scmp.lt.s32.totalorder (!%p138_p2), %s1277_s13, 1 }
   0x6   : > { %141 = sbr.rel (%p138_p2) target bundleno = 248 (0xf8), region = 32 }
   0xb   : > { %v1615_v0 = vld [vmem:[%s2054_s1 + $0x38] sm:$0xff]  ;;  %v1614_v4 = vld [vmem:[%s2054_s1 + $0x30] sm:$0xff]  ;;  %v1613_v8 = vld [vmem:[%s2054_s1 + $0x28] sm:$0xff]  ;;  %s2058_s13 = smov (!%p161_p3, %s1277_s13), 1  ;;  %vm413_vm0 = vcmask 1045508   ;;  %vm409_vm1 = vcmask 1041408  }
   0xc   : > { %v1631_v1 = vld [vmem:[%s2054_s1 + $0xb8] sm:$0xff]  ;;  %1089 = vmatpush.bf16.msra.mxu0 %v1615_v0  ;;  %v1630_v5 = vld [vmem:[%s2054_s1 + $0xb0] sm:$0xff]  ;;  %v1629_v9 = vld [vmem:[%s2054_s1 + $0xa8] sm:$0xff]  ;;  %s1680_s17 = smul.u32 24, %s2058_s13  ;;  %vm417_vm2 = vcmask 1043456   ;;  %s1607_s16 = sshll.u32 %s2058_s13, 3 }
   0xd   : > { %v1623_v2 = vld [vmem:[%s2054_s1 + $0x78] sm:$0xff]  ;;  %1117 = vmatpush.bf16.msra.mxu2 %v1631_v1  ;;  %v1622_v6 = vld [vmem:[%s2054_s1 + $0x70] sm:$0xff]  ;;  %v1621_v10 = vld [vmem:[%s2054_s1 + $0x68] sm:$0xff]  ;;  %s170_s19 = scalar_lea.vmem %s2056_s3, %s1607_s16  ;;  %vm1219_vm3 = vcmask 257024  }
   0xe   : > { %v1639_v3 = vld [vmem:[%s2054_s1 + $0xf8] sm:$0xff]  ;;  %1103 = vmatpush.bf16.msra.mxu1 %v1623_v2  ;;  %v1638_v7 = vld [vmem:[%s2054_s1 + $0xf0] sm:$0xff]  ;;  %v1637_v11 = vld [vmem:[%s2054_s1 + $0xe8] sm:$0xff]  ;;  %s1786_s28 = scalar_lea.vmem %s2053_s0, %s1680_s17 }
   0xf   : > { %1131 = vmatpush.bf16.msra.mxu3 %v1639_v3  ;;  %v1612_v12 = vld [vmem:[%s2054_s1 + $0x20] sm:$0xff]  ;;  %v1611_v16 = vld [vmem:[%s2054_s1 + $0x18] sm:$0xff]  ;;  %v1610_v20 = vld [vmem:[%s2054_s1 + $0x10] sm:$0xff] }
  0x10   : > { %1090 = vmatpush.bf16.msra.mxu0 %v1614_v4  ;;  %v1628_v13 = vld [vmem:[%s2054_s1 + $0xa0] sm:$0xff]  ;;  %v1627_v17 = vld [vmem:[%s2054_s1 + $0x98] sm:$0xff]  ;;  %v1626_v21 = vld [vmem:[%s2054_s1 + $0x90] sm:$0xff] }
  0x11   : > { %1118 = vmatpush.bf16.msra.mxu2 %v1630_v5  ;;  %v1620_v14 = vld [vmem:[%s2054_s1 + $0x60] sm:$0xff]  ;;  %v1619_v18 = vld [vmem:[%s2054_s1 + $0x58] sm:$0xff]  ;;  %v1618_v22 = vld [vmem:[%s2054_s1 + $0x50] sm:$0xff] }
  0x12   : > { %1104 = vmatpush.bf16.msra.mxu1 %v1622_v6  ;;  %v1636_v15 = vld [vmem:[%s2054_s1 + $0xe0] sm:$0xff]  ;;  %v1635_v19 = vld [vmem:[%s2054_s1 + $0xd8] sm:$0xff]  ;;  %v1634_v23 = vld [vmem:[%s2054_s1 + $0xd0] sm:$0xff] }
  0x13   : > { %1132 = vmatpush.bf16.msra.mxu3 %v1638_v7  ;;  %v175_v24 = vld [vmem:[%s1786_s28] sm:$0x7]  ;;  %v176_v25 = vld [vmem:[%s1786_s28 + $0x4] sm:$0x7]  ;;  %v177_v26 = vld [vmem:[%s1786_s28 + $0x8] sm:$0x7] }
  0x14   : > { %1091 = vmatpush.bf16.msra.mxu0 %v1613_v8  ;;  %v178_v27 = vld [vmem:[%s1786_s28 + $0xc] sm:$0x7]  ;;  %v179_v28 = vld [vmem:[%s1786_s28] sm:$0x6]  ;;  %v213_v29 = vunpack.c.l.b16 %v175_v24  ;;  %v214_v30 = vunpack.c.l.b16 %v176_v25  ;;  %v180_v31 = vld [vmem:[%s1786_s28 + $0x4] sm:$0x6]  ;;  %v215_v34 = vunpack.c.l.b16 %v177_v26 }
  0x15   : > { %1119 = vmatpush.bf16.msra.mxu2 %v1629_v9  ;;  %v181_v32 = vld [vmem:[%s1786_s28 + $0x8] sm:$0x6]  ;;  %v182_v33 = vld [vmem:[%s1786_s28 + $0xc] sm:$0x6]  ;;  %v216_v35 = vunpack.c.l.b16 %v178_v27  ;;  %v253_v36 = vunpack.c.l.b16 %v179_v28  ;;  %v254_v39 = vunpack.c.l.b16 %v180_v31  ;;  %v1285_v53 = vld [vmem:[%s1786_s28 + $0x4] sm:$0x3] }
  0x16   : > { %1105 = vmatpush.bf16.msra.mxu1 %v1621_v10  ;;  %v217_v37 = vpack.c.b16 %v213_v29, %v213_v29  ;;  %v218_v38 = vpack.c.b16 %v214_v30, %v214_v30  ;;  %v255_v40 = vunpack.c.l.b16 %v181_v32  ;;  %v1609_v41 = vld [vmem:[%s2054_s1 + $0x8] sm:$0xff]  ;;  %v219_v43 = vpack.c.b16 %v215_v34, %v215_v34  ;;  %v1608_v58 = vld [vmem:[%s2054_s1] sm:$0xff]  ;;  %v1647_v1 = vld [vmem:[%s2054_s1 + $0x138] sm:$0xff] }
  0x17   : > { %1133 = vmatpush.bf16.msra.mxu3 %v1637_v11  ;;  %v1625_v42 = vld [vmem:[%s2054_s1 + $0x88] sm:$0xff]  ;;  %v220_v44 = vpack.c.b16 %v216_v35, %v216_v35  ;;  %v256_v45 = vunpack.c.l.b16 %v182_v33  ;;  %v257_v46 = vpack.c.b16 %v253_v36, %v253_v36  ;;  %v1624_v59 = vld [vmem:[%s2054_s1 + $0x80] sm:$0xff]  ;;  %v258_v63 = vpack.c.b16 %v254_v39, %v254_v39  ;;  %v1663_v2 = vld [vmem:[%s2054_s1 + $0x1b8] sm:$0xff] }
  0x18   : > { %1092 = vmatpush.bf16.msra.mxu0 %v1612_v12  ;;  %v1617_v47 = vld [vmem:[%s2054_s1 + $0x48] sm:$0xff]  ;;  %v222_v49 = vshrl.u32 %v217_v37, 16  ;;  %v224_v50 = vshll.u32 %v217_v37, 16  ;;  %v229_v51 = vshrl.u32 %v218_v38, 16  ;;  %v231_v52 = vshll.u32 %v218_v38, 16  ;;  %v1616_v9 = vld [vmem:[%s2054_s1 + $0x40] sm:$0xff] }
  0x19   : > { %1120 = vmatpush.bf16.msra.mxu2 %v1628_v13  ;;  %v1633_v48 = vld [vmem:[%s2054_s1 + $0xc8] sm:$0xff]  ;;  %v236_v54 = vshrl.u32 %v219_v43, 16  ;;  %v238_v55 = vshll.u32 %v219_v43, 16  ;;  %v243_v56 = vshrl.u32 %v220_v44, 16  ;;  %v245_v57 = vshll.u32 %v220_v44, 16  ;;  %v1632_v10 = vld [vmem:[%s2054_s1 + $0xc0] sm:$0xff] }
  0x1a   : > { %1106 = vmatpush.bf16.msra.mxu1 %v1620_v14  ;;  %v1286_v60 = vld [vmem:[%s1786_s28 + $0x8] sm:$0x3]  ;;  %v226_v61 = vrot.slane %v224_v50, 1  ;;  %v233_v62 = vrot.slane %v231_v52, 1  ;;  %v259_v0 = vpack.c.b16 %v255_v40, %v255_v40  ;;  %v171_v3 = vld [vmem:[%s1786_s28] sm:$0x3]  ;;  %v260_v7 = vpack.c.b16 %v256_v45, %v256_v45 }
  0x1b   : > { %1134 = vmatpush.bf16.msra.mxu3 %v1636_v15  ;;  %v1287_v4 = vld [vmem:[%s1786_s28 + $0xc] sm:$0x3]  ;;  %v240_v5 = vrot.slane %v238_v55, 1  ;;  %v247_v6 = vrot.slane %v245_v57, 1  ;;  %v1309_v8 = vrot.slane %v257_v46, 5  ;;  %v387_v15 = vrot.slane %v1285_v53, 2 }
  0x1c   : > { %1093 = vmatpush.bf16.msra.mxu0 %v1611_v16  ;;  %v172_v11 = vld [vmem:[%s1786_s28 + $0x4] sm:$0x3]  ;;  %v1288_v12 = vld [vmem:[%s1786_s28 + $0x10] sm:$0x3]  ;;  %v227_v13 = vor.u32 %v226_v61, %v222_v49  ;;  %v234_v14 = vor.u32 %v233_v62, %v229_v51  ;;  %v1311_v16 = vrot.slane %v258_v63, 5  ;;  %v399_v26 = vrot.slane %v1287_v4, 2 }
  0x1d   : > { %1121 = vmatpush.bf16.msra.mxu2 %v1627_v17  ;;  %v1655_v17 = vld [vmem:[%s2054_s1 + $0x178] sm:$0xff]  ;;  %v1315_v27 = vrot.slane %v260_v7, 5  ;;  %v1306_v28 = vld [vmem:[%s1786_s28 + $0xc] sm:$0x6]  ;;  %v405_v33 = vrot.slane %v1288_v12, 2  ;;  %v416_v34 = vsel %vm413_vm0, %v1309_v8, %v387_v15  ;;  %v1646_v35 = vld [vmem:[%s2054_s1 + $0x130] sm:$0xff] }
  0x1e   : > { %1107 = vmatpush.bf16.msra.mxu1 %v1619_v18  ;;  %v173_v18 = vld [vmem:[%s1786_s28 + $0x8] sm:$0x3]  ;;  %v385_v24 = vrot.slane %v227_v13, 6  ;;  %v391_v25 = vrot.slane %v234_v14, 6  ;;  %v1671_v29 = vld [vmem:[%s2054_s1 + $0x1f8] sm:$0xff]  ;;  %v366_v46 = vunpack.c.l.b16 %v1306_v28  ;;  %v1670_v55 = vld [vmem:[%s2054_s1 + $0x1f0] sm:$0xff] }
  0x1f   : > { %1135 = vmatpush.bf16.msra.mxu3 %v1635_v19  ;;  %v241_v19 = vor.u32 %v240_v5, %v236_v54  ;;  %v174_v30 = vld [vmem:[%s1786_s28 + $0xc] sm:$0x3]  ;;  %v1307_v39 = vld [vmem:[%s1786_s28 + $0x10] sm:$0x6]  ;;  %v1308_v40 = vld [vmem:[%s1786_s28 + $0x14] sm:$0x6]  ;;  %v459_v51 = vsel %vm413_vm0, %v1315_v27, %v405_v33 }
  0x20   : > { %1094 = vmatpush.bf16.msra.mxu0 %v1610_v20  ;;  %v248_v20 = vor.u32 %v247_v6, %v243_v56  ;;  %v412_v36 = vsel %vm409_vm1, %v171_v3, %v385_v24  ;;  %v428_v37 = vsel %vm409_vm1, %v172_v11, %v391_v25  ;;  %v1291_v52 = vld [vmem:[%s1786_s28 + $0xc] sm:$0x7]  ;;  %v1292_v53 = vld [vmem:[%s1786_s28 + $0x10] sm:$0x7]  ;;  %v1892_v61 = vpack.c.b16 %v366_v46, %v366_v46  ;;  %v1644_v13 = vld [vmem:[%s2054_s1 + $0x120] sm:$0xff] }
  0x21   : > { %1122 = vmatpush.bf16.msra.mxu2 %v1626_v21  ;;  %v393_v21 = vrot.slane %v1286_v60, 2  ;;  %v397_v31 = vrot.slane %v241_v19, 6  ;;  %v418_v43 = vsel %vm417_vm2, %v412_v36, %v416_v34  ;;  %v1654_v54 = vld [vmem:[%s2054_s1 + $0x170] sm:$0xff]  ;;  %v271_v5 = vunpack.c.l.b16 %v1291_v52  ;;  %v1669_v7 = vld [vmem:[%s2054_s1 + $0x1e8] sm:$0xff]  ;;  %v1660_v14 = vld [vmem:[%s2054_s1 + $0x1a0] sm:$0xff] }
  0x22   : > { %1108 = vmatpush.bf16.msra.mxu1 %v1618_v22  ;;  %v1313_v22 = vrot.slane %v259_v0, 5  ;;  %v403_v32 = vrot.slane %v248_v20, 6  ;;  %616 = vst [vmem:[#allocation1] ss:$4 sm:$0xff] %v418_v43  ;;  %v1645_v0 = vld [vmem:[%s2054_s1 + $0x128] sm:$0xff]  ;;  %v272_v6 = vunpack.c.l.b16 %v1292_v53  ;;  %v374_v15 = vrot.slane %v1892_v61, 1 }
  0x23   : > { %1136 = vmatpush.bf16.msra.mxu3 %v1634_v23  ;;  %v1305_v23 = vld [vmem:[%s1786_s28 + $0x8] sm:$0x6]  ;;  %v431_v38 = vsel %vm413_vm0, %v1311_v16, %v393_v21  ;;  %v442_v45 = vsel %vm409_vm1, %v173_v18, %v397_v31  ;;  %v1923_v18 = vld [vmem:[%s1786_s28 + $0x10] sm:$0x6]  ;;  %v275_v19 = vpack.c.b16 %v271_v5, %v271_v5  ;;  %v1668_v27 = vld [vmem:[%s2054_s1 + $0x1e0] sm:$0xff] }
  0x24   : > { %1095 = vmatpush.bf16.msra.mxu0 %v1609_v41  ;;  %v365_v41 = vunpack.c.l.b16 %v1305_v23  ;;  %v432_v44 = vsel %vm417_vm2, %v428_v37, %v431_v38  ;;  %v445_v49 = vsel %vm413_vm0, %v1313_v22, %v399_v26  ;;  %v456_v50 = vsel %vm409_vm1, %v174_v30, %v403_v32  ;;  %v1301_v22 = vld [vmem:[%s1786_s28 + $0x8] sm:$0x7]  ;;  %v1652_v26 = vld [vmem:[%s2054_s1 + $0x160] sm:$0xff]  ;;  %v1302_v32 = vld [vmem:[%s1786_s28 + $0xc] sm:$0x7] }
  0x25   : > { %1123 = vmatpush.bf16.msra.mxu2 %v1625_v42  ;;  %v1662_v42 = vld [vmem:[%s2054_s1 + $0x1b0] sm:$0xff]  ;;  %v446_v56 = vsel %vm417_vm2, %v442_v45, %v445_v49  ;;  %v460_v57 = vsel %vm417_vm2, %v456_v50, %v459_v51  ;;  %618 = vst [vmem:[#allocation1 + $0x1] ss:$4 sm:$0xff] %v432_v44  ;;  %v1925_v20 = vpack.c.b16 %v272_v6, %v272_v6  ;;  %v294_v30 = vshll.u32 %v275_v19, 16  ;;  %v1643_v38 = vld [vmem:[%s2054_s1 + $0x118] sm:$0xff] }
  0x26   : > { %1109 = vmatpush.bf16.msra.mxu1 %v1617_v47  ;;  %v1289_v47 = vld [vmem:[%s1786_s28 + $0x4] sm:$0x7]  ;;  %620 = vst [vmem:[#allocation1 + $0x2] ss:$4 sm:$0xff] %v446_v56  ;;  %v1890_v60 = vpack.c.b16 %v365_v41, %v365_v41  ;;  %v1303_v33 = vld [vmem:[%s1786_s28 + $0x10] sm:$0x7]  ;;  %v325_v53 = vunpack.c.l.b16 %v1301_v22 }
  0x27   : > { %1137 = vmatpush.bf16.msra.mxu3 %v1633_v48  ;;  %v1290_v48 = vld [vmem:[%s1786_s28 + $0x8] sm:$0x7]  ;;  %v269_v62 = vunpack.c.l.b16 %v1289_v47  ;;  %622 = vst [vmem:[#allocation1 + $0x3] ss:$4 sm:$0xff] %v460_v57  ;;  %v301_v31 = vshll.u32 %v1925_v20, 16  ;;  %v296_v41 = vrot.slane %v294_v30, 1  ;;  %v312_v47 = vunpack.c.l.b16 %v1923_v18 }
  0x28   : > { %1096 = vmatpush.bf16.msra.mxu0 %v1608_v58  ;;  %v367_v58 = vunpack.c.l.b16 %v1307_v39  ;;  %v270_v63 = vunpack.c.l.b16 %v1290_v48  ;;  %v373_v8 = vrot.slane %v1890_v60, 1  ;;  %v1659_v39 = vld [vmem:[%s2054_s1 + $0x198] sm:$0xff]  ;;  %v327_v56 = vunpack.c.l.b16 %v1303_v33  ;;  %v1650_v5 = vld [vmem:[%s2054_s1 + $0x150] sm:$0xff] }
  0x29   : > { %1124 = vmatpush.bf16.msra.mxu2 %v1624_v59  ;;  %v368_v59 = vunpack.c.l.b16 %v1308_v40  ;;  %v273_v11 = vpack.c.b16 %v269_v62, %v269_v62  ;;  %v1304_v40 = vld [vmem:[%s1786_s28 + $0x14] sm:$0x7]  ;;  %v303_v43 = vrot.slane %v301_v31, 1  ;;  %v329_v62 = vpack.c.b16 %v325_v53, %v325_v53 }
  0x2a   : > { %1110 = vmatpush.bf16.msra.mxu1 %v1616_v9  ;;  %v1903_v3 = vpack.c.b16 %v367_v58, %v367_v58  ;;  %v1293_v9 = vld [vmem:[%s1786_s28 + $0x4] sm:$0x6]  ;;  %v274_v12 = vpack.c.b16 %v270_v63, %v270_v63  ;;  %v328_v57 = vunpack.c.l.b16 %v1304_v40  ;;  %v1651_v58 = vld [vmem:[%s2054_s1 + $0x158] sm:$0xff]  ;;  %v1642_v63 = vld [vmem:[%s2054_s1 + $0x110] sm:$0xff] }
  0x2b   : > { %1138 = vmatpush.bf16.msra.mxu3 %v1632_v10  ;;  %v1905_v4 = vpack.c.b16 %v368_v59, %v368_v59  ;;  %v1294_v10 = vld [vmem:[%s1786_s28 + $0x8] sm:$0x6]  ;;  %v278_v23 = vshrl.u32 %v273_v11, 16  ;;  %v280_v24 = vshll.u32 %v273_v11, 16  ;;  %v309_v36 = vunpack.c.l.b16 %v1293_v9  ;;  %v1667_v59 = vld [vmem:[%s2054_s1 + $0x1d8] sm:$0xff]  ;;  %v1666_v6 = vld [vmem:[%s2054_s1 + $0x1d0] sm:$0xff] }
  0x2c   : > { %1145 = vmatpush.bf16.msrb.mxu0 %v1647_v1  ;;  %v1661_v1 = vld [vmem:[%s2054_s1 + $0x1a8] sm:$0xff]  ;;  %v375_v16 = vrot.slane %v1903_v3, 1  ;;  %v287_v25 = vshll.u32 %v274_v12, 16  ;;  %v285_v28 = vshrl.u32 %v274_v12, 16  ;;  %v310_v37 = vunpack.c.l.b16 %v1294_v10 }
  0x2d   : > { %1173 = vmatpush.bf16.msrb.mxu2 %v1663_v2  ;;  %v1653_v2 = vld [vmem:[%s2054_s1 + $0x168] sm:$0xff]  ;;  %v376_v21 = vrot.slane %v1905_v4, 1  ;;  %v282_v34 = vrot.slane %v280_v24, 1  ;;  %v1951_v52 = vpack.c.b16 %v309_v36, %v309_v36  ;;  %v332_v3 = vpack.c.b16 %v328_v57, %v328_v57 }
  0x2e   : > { %1159 = vmatpush.bf16.msrb.mxu1 %v1655_v17  ;;  %v1295_v17 = vld [vmem:[%s1786_s28 + $0xc] sm:$0x6]  ;;  %v631_v45 = vld.sshfl [vmem:[#allocation1] sm:$0xff pattern:$0x73625140]  ;;  %v316_v9 = vpack.c.b16 %v312_v47, %v312_v47  ;;  %v334_v10 = vshrl.u32 %v329_v62, 16 }
  0x2f   : > { %1187 = vmatpush.bf16.msrb.mxu3 %v1671_v29  ;;  %v292_v29 = vshrl.u32 %v275_v19, 16  ;;  %v311_v44 = vunpack.c.l.b16 %v1295_v17  ;;  %v633_v46 = vld.sshfl [vmem:[#allocation1 + $0x10] sm:$0xff pattern:$0x73625140]  ;;  %v1947_v50 = vor.u32 %v282_v34, %v278_v23  ;;  %1097 = vmatmul.bf16.vlgmr.msra.gmra.mxu0 %v631_v45  ;;  %v336_v11 = vshll.u32 %v329_v62, 16  ;;  %v1649_v36 = vld [vmem:[%s2054_s1 + $0x148] sm:$0xff] }
  0x30   : > { %1146 = vmatpush.bf16.msrb.mxu0 %v1646_v35  ;;  %v289_v35 = vrot.slane %v287_v25, 1  ;;  %v632_v48 = vld.sshfl [vmem:[#allocation1 + $0x8] sm:$0xff pattern:$0x73625140]  ;;  %1125 = vmatmul.bf16.vlgmr.msra.gmra.mxu2 %v633_v46  ;;  %v355_v18 = vshrl.u32 %v332_v3, 16  ;;  %v357_v19 = vshll.u32 %v332_v3, 16 }
  0x31   : > { %1174 = vmatpush.bf16.msrb.mxu2 %v1662_v42  ;;  %v299_v42 = vshrl.u32 %v1925_v20, 16  ;;  %v634_v49 = vld.sshfl [vmem:[#allocation1 + $0x18] sm:$0xff pattern:$0x73625140]  ;;  %v297_v60 = vor.u32 %v296_v41, %v292_v29  ;;  %v315_v61 = vpack.c.b16 %v311_v44, %v311_v44  ;;  %1111 = vmatmul.bf16.vlgmr.msra.gmra.mxu1 %v632_v48  ;;  %v1298_v12 = vld [vmem:[%s1786_s28 + $0xc] sm:$0x3] }
  0x32   : > { %1160 = vmatpush.bf16.msrb.mxu1 %v1654_v54  ;;  %v1949_v51 = vor.u32 %v289_v35, %v285_v28  ;;  %640 = vst [vmem:[#allocation1] ss:$4 sm:$0xff] %v373_v8  ;;  %v1953_v54 = vpack.c.b16 %v310_v37, %v310_v37  ;;  %1139 = vmatmul.bf16.vlgmr.msra.gmra.mxu3 %v634_v49  ;;  %v338_v17 = vrot.slane %v336_v11, 1  ;;  %v1310_v20 = vrot.slane %v1951_v52, 7  ;;  %v1665_v37 = vld [vmem:[%s2054_s1 + $0x1c8] sm:$0xff]  ;;  %v1640_v46 = vld [vmem:[%s2054_s1 + $0x100] sm:$0xff] }
  0x33   : > { %1188 = vmatpush.bf16.msrb.mxu3 %v1670_v55  ;;  %v326_v55 = vunpack.c.l.b16 %v1302_v32  ;;  %642 = vst [vmem:[#allocation1 + $0x1] ss:$4 sm:$0xff] %v374_v15  ;;  %v304_v8 = vor.u32 %v303_v43, %v299_v42  ;;  %v1314_v25 = vrot.slane %v315_v61, 7  ;;  %v359_v29 = vrot.slane %v357_v19, 1  ;;  %v1656_v47 = vld [vmem:[%s2054_s1 + $0x180] sm:$0xff]  ;;  %v1678_v61 = vld [vmem:[%s2054_s1 + $0x230] sm:$0xff] }
  0x34   : > { %1147 = vmatpush.bf16.msrb.mxu0 %v1645_v0  ;;  %644 = vst [vmem:[#allocation1 + $0x2] ss:$4 sm:$0xff] %v375_v16  ;;  %v1658_v0 = vld [vmem:[%s2054_s1 + $0x190] sm:$0xff]  ;;  %v1312_v24 = vrot.slane %v1953_v54, 7  ;;  %v339_v28 = vor.u32 %v338_v17, %v334_v10  ;;  %v1316_v31 = vrot.slane %v316_v9, 7  ;;  %v395_v34 = vrot.slane %v1298_v12, 4 }
  0x35   : > { %1175 = vmatpush.bf16.msrb.mxu2 %v1661_v1  ;;  %v330_v1 = vpack.c.b16 %v326_v55, %v326_v55  ;;  %646 = vst [vmem:[#allocation1 + $0x3] ss:$4 sm:$0xff] %v376_v21  ;;  %v1299_v16 = vld [vmem:[%s1786_s28 + $0x10] sm:$0x3]  ;;  %v1300_v21 = vld [vmem:[%s1786_s28 + $0x14] sm:$0x3]  ;;  %v421_v41 = vsel %vm409_vm1, %v1947_v50, %v1310_v20  ;;  %v449_v45 = vsel %vm409_vm1, %v297_v60, %v1314_v25 }
  0x36   : > { %1161 = vmatpush.bf16.msrb.mxu1 %v1653_v2  ;;  %v331_v2 = vpack.c.b16 %v327_v56, %v327_v56  ;;  %v401_v35 = vrot.slane %v1299_v16, 4  ;;  %v407_v40 = vrot.slane %v1300_v21, 4  ;;  %v435_v44 = vsel %vm409_vm1, %v1949_v51, %v1312_v24  ;;  %v1679_v51 = vld [vmem:[%s2054_s1 + $0x238] sm:$0xff]  ;;  %v1648_v55 = vld [vmem:[%s2054_s1 + $0x140] sm:$0xff]  ;;  %v1677_v62 = vld [vmem:[%s2054_s1 + $0x228] sm:$0xff] }
  0x37   : > { %1189 = vmatpush.bf16.msrb.mxu3 %v1669_v7  ;;  %v1297_v7 = vld [vmem:[%s1786_s28 + $0x8] sm:$0x3]  ;;  %v463_v50 = vsel %vm409_vm1, %v304_v8, %v1316_v31  ;;  %v1664_v56 = vld [vmem:[%s2054_s1 + $0x1c0] sm:$0xff] }
  0x38   : > { %1148 = vmatpush.bf16.msrb.mxu0 %v1644_v13  ;;  %v341_v13 = vshrl.u32 %v330_v1, 16  ;;  %v348_v4 = vshrl.u32 %v331_v2, 16  ;;  %v350_v15 = vshll.u32 %v331_v2, 16  ;;  %v389_v30 = vrot.slane %v1297_v7, 4  ;;  %v1676_v3 = vld [vmem:[%s2054_s1 + $0x220] sm:$0xff]  ;;  %v1673_v7 = vld [vmem:[%s2054_s1 + $0x208] sm:$0xff] }
  0x39   : > { %1176 = vmatpush.bf16.msrb.mxu2 %v1660_v14  ;;  %v343_v14 = vshll.u32 %v330_v1, 16  ;;  %v1672_v8 = vld [vmem:[%s2054_s1 + $0x200] sm:$0xff] }
  0x3a   : > { %1162 = vmatpush.bf16.msrb.mxu1 %v1652_v26  ;;  %v352_v23 = vrot.slane %v350_v15, 1  ;;  %v1641_v26 = vld [vmem:[%s2054_s1 + $0x108] sm:$0xff]  ;;  %v1689_v11 = vld [vmem:[%s2055_s2] ss:$0 sm:$0xff] }
  0x3b   : > { %1190 = vmatpush.bf16.msrb.mxu3 %v1668_v27  ;;  %v345_v22 = vrot.slane %v343_v14, 1  ;;  %v1657_v27 = vld [vmem:[%s2054_s1 + $0x188] sm:$0xff] }
  0x3c   : > { %1149 = vmatpush.bf16.msrb.mxu0 %v1643_v38  ;;  %v353_v33 = vor.u32 %v352_v23, %v348_v4  ;;  %v360_v38 = vor.u32 %v359_v29, %v355_v18  ;;  %v647_v9 = vld.sshfl [vmem:[#allocation1] sm:$0xff pattern:$0x73625140] }
  0x3d   : > { %1177 = vmatpush.bf16.msrb.mxu2 %v1659_v39  ;;  %v346_v32 = vor.u32 %v345_v22, %v341_v13  ;;  %v390_v39 = vrot.slane %v339_v28, 2 }
  0x3e   : > { %1163 = vmatpush.bf16.msrb.mxu1 %v1651_v58  ;;  %v402_v43 = vrot.slane %v353_v33, 2  ;;  %v408_v48 = vrot.slane %v360_v38, 2 }
  0x3f   : > { %1191 = vmatpush.bf16.msrb.mxu3 %v1667_v59  ;;  %v396_v42 = vrot.slane %v346_v32, 2  ;;  %v424_v49 = vsel %vm413_vm0, %v389_v30, %v390_v39 }
  0x40   : > { %1150 = vmatpush.bf16.msrb.mxu0 %v1642_v63  ;;  %v425_v52 = vsel %vm417_vm2, %v421_v41, %v424_v49  ;;  %v452_v54 = vsel %vm413_vm0, %v401_v35, %v402_v43  ;;  %v466_v59 = vsel %vm413_vm0, %v407_v40, %v408_v48 }
  0x41   : > { %1178 = vmatpush.bf16.msrb.mxu2 %v1658_v0  ;;  %v438_v53 = vsel %vm413_vm0, %v395_v34, %v396_v42  ;;  %v453_v58 = vsel %vm417_vm2, %v449_v45, %v452_v54  ;;  %624 = vst [vmem:[#allocation1 + $0x20] ss:$4 sm:$0xff] %v425_v52  ;;  %v467_v60 = vsel %vm417_vm2, %v463_v50, %v466_v59 }
  0x42   : > { %1164 = vmatpush.bf16.msrb.mxu1 %v1650_v5  ;;  %v439_v57 = vsel %vm417_vm2, %v435_v44, %v438_v53  ;;  %628 = vst [vmem:[#allocation1 + $0x22] ss:$4 sm:$0xff] %v453_v58  ;;  %v1675_v5 = vld [vmem:[%s2054_s1 + $0x218] sm:$0xff] }
  0x43   : > { %1192 = vmatpush.bf16.msrb.mxu3 %v1666_v6  ;;  %626 = vst [vmem:[#allocation1 + $0x21] ss:$4 sm:$0xff] %v439_v57  ;;  %v1674_v6 = vld [vmem:[%s2054_s1 + $0x210] sm:$0xff] }
  0x44   : > { %1151 = vmatpush.bf16.msrb.mxu0 %v1641_v26  ;;  %630 = vst [vmem:[#allocation1 + $0x23] ss:$4 sm:$0xff] %v467_v60 }
  0x45   : > { %1179 = vmatpush.bf16.msrb.mxu2 %v1657_v27 }
  0x46   : > { %1165 = vmatpush.bf16.msrb.mxu1 %v1649_v36 }
  0x47   : > { %1193 = vmatpush.bf16.msrb.mxu3 %v1665_v37 }
  0x48   : > { %1152 = vmatpush.bf16.msrb.mxu0 %v1640_v46 }
  0x49   : > { %1180 = vmatpush.bf16.msrb.mxu2 %v1656_v47 }
  0x4a   : > { %1166 = vmatpush.bf16.msrb.mxu1 %v1648_v55 }
  0x4b   : > { %1194 = vmatpush.bf16.msrb.mxu3 %v1664_v56  ;;  %v635_v63 = vld.sshfl [vmem:[#allocation1 + $0x20] sm:$0xff pattern:$0x73625140]  ;;  %v637_v0 = vld.sshfl [vmem:[#allocation1 + $0x30] sm:$0xff pattern:$0x73625140] }
  0x4c   : > { %1201 = vmatpush.bf16.msra.mxu0 %v1679_v51  ;;  %1181 = vmatmul.bf16.vlgmr.msrb.gmra.mxu2 %v637_v0  ;;  %v636_v1 = vld.sshfl [vmem:[#allocation1 + $0x28] sm:$0xff pattern:$0x73625140]  ;;  %v638_v2 = vld.sshfl [vmem:[#allocation1 + $0x38] sm:$0xff pattern:$0x73625140] }
  0x4d   : > { %1153 = vmatmul.bf16.vlgmr.msrb.gmra.mxu0 %v635_v63  ;;  %1167 = vmatmul.bf16.vlgmr.msrb.gmra.mxu1 %v636_v1 }
  0x4e   : > { %1195 = vmatmul.bf16.vlgmr.msrb.gmra.mxu3 %v638_v2 }
  0x50   : > { %1202 = vmatpush.bf16.msra.mxu0 %v1678_v61 }
  0x54   : > { %1203 = vmatpush.bf16.msra.mxu0 %v1677_v62 }
  0x58   : > { %1204 = vmatpush.bf16.msra.mxu0 %v1676_v3 }
  0x5c   : > { %1205 = vmatpush.bf16.msra.mxu0 %v1675_v5 }
  0x60   : > { %1206 = vmatpush.bf16.msra.mxu0 %v1674_v6 }
  0x64   : > { %1207 = vmatpush.bf16.msra.mxu0 %v1673_v7 }
  0x68   : > { %1208 = vmatpush.bf16.msra.mxu0 %v1672_v8 }
  0x6b   : > { %1209 = vmatmul.bf16.vlgmr.msra.gmra.mxu0 %v647_v9 }
  0xac   : > { %v1098_v10 = vpop.f32.mrf.mxu0 }
  0xad   : > { %v1099_v14 = vadd.f32 %v1689_v11, %v1098_v10 }
  0xae   : > { %v1112_v12 = vpop.f32.mrf.mxu1 }
  0xaf   : > { %v1113_v16 = vadd.f32 %v1112_v12, %v1099_v14 }
  0xb3   : > { %v1126_v13 = vpop.f32.mrf.mxu2 }
  0xb4   : > { %v1100_v4 = vpop.f32.mrf.mxu0  ;;  %v1127_v18 = vadd.f32 %v1126_v13, %v1113_v16 }
  0xb5   : > { %v1140_v15 = vpop.f32.mrf.mxu3  ;;  %v1101_v21 = vadd.f32 %v1689_v11, %v1100_v4 }
  0xb6   : > { %v1114_v17 = vpop.f32.mrf.mxu1  ;;  %v1141_v22 = vadd.f32 %v1140_v15, %v1127_v18 }
  0xb7   : > { %v1115_v24 = vadd.f32 %v1114_v17, %v1101_v21 }
  0xbb   : > { %v1128_v19 = vpop.f32.mrf.mxu2 }
  0xbc   : > { %v1129_v28 = vadd.f32 %v1128_v19, %v1115_v24 }
  0xbd   : > { %v1142_v23 = vpop.f32.mrf.mxu3 }
  0xbe   : > { %v1143_v32 = vadd.f32 %v1142_v23, %v1129_v28 }
  0xca   : > { %v1154_v20 = vpop.f32.mrf.mxu0  ;;  %v1168_v26 = vpop.f32.mrf.mxu1 }
  0xcb   : > { %v1155_v25 = vadd.f32 %v1154_v20, %v1141_v22 }
  0xcd   : > { %v1169_v29 = vadd.f32 %v1168_v26, %v1155_v25 }
  0xcf   : > { %v1182_v27 = vpop.f32.mrf.mxu2 }
  0xd0   : > { %v1183_v33 = vadd.f32 %v1182_v27, %v1169_v29 }
  0xd1   : > { %v1196_v31 = vpop.f32.mrf.mxu3 }
  0xd2   : > { %v1156_v30 = vpop.f32.mrf.mxu0  ;;  %v1170_v35 = vpop.f32.mrf.mxu1  ;;  %v1197_v36 = vadd.f32 %v1196_v31, %v1183_v33 }
  0xd3   : > { %v1157_v34 = vadd.f32 %v1156_v30, %v1143_v32 }
  0xd5   : > { %v1171_v39 = vadd.f32 %v1170_v35, %v1157_v34 }
  0xd7   : > { %v1184_v37 = vpop.f32.mrf.mxu2 }
  0xd8   : > { %v1185_v41 = vadd.f32 %v1184_v37, %v1171_v39 }
  0xd9   : > { %v1198_v43 = vpop.f32.mrf.mxu3 }
  0xda   : > { %v1199_v45 = vadd.f32 %v1198_v43, %v1185_v41 }
  0xe8   : > { %v1210_v38 = vpop.f32.mrf.mxu0 }
  0xe9   : > { %v1211_v40 = vadd.f32 %v1210_v38, %v1197_v36 }
  0xeb   : > { %v1215_v42 = vmax.f32 %v1211_v40, 0.0 }
  0xed   : > { %v1217_v44 = vpack.c.bf16 %v1215_v42, %v1215_v42 }
  0xef   : > { %1220 = vst.msk [vmem:[%s170_s19] sm:$0xf] %vm1219_vm3, %v1217_v44 }
  0xf0   : > { %v1212_v46 = vpop.f32.mrf.mxu0 }
  0xf1   : > { %v1213_v47 = vadd.f32 %v1212_v46, %v1199_v45 }
  0xf3   : > { %v1216_v48 = vmax.f32 %v1213_v47, 0.0 }
  0xf5   : > { %v1218_v49 = vpack.c.bf16 %v1216_v48, %v1216_v48 }
  0xf7   : > { %1221 = vst.msk [vmem:[%s170_s19 + $0x4] sm:$0xf] %vm1219_vm3, %v1218_v49 }
  0xf8 PF: > { %s13_s12 = sadd.s32 1, %s1696_s12  }
  0xf9   : > { %p10_p4 = scmp.ge.s32.totalorder %s13_s12, 4  }
  0xfb   :  { %12 = sbr.rel (!%p10_p4) target bundleno = 1 (0x1), region = 71 }

// kernel: pose_exp_net_forward.10
= control target key start
LH: loop header
LB: loop body
LE: loop exit
PB: predicated region body
PF: predicated region fallthrough
CT: control target
= control target key end

     0   :  { %s832_s12 = smov 0   ;;  %s962_s0 = inlined_call_operand.vmem [shape: bf16[2,3,3,128], index: 0, kind: input, shape index: {}]   ;;  %s963_s1 = inlined_call_operand.vmem [shape: bf16[512,64], index: 1, kind: input, shape index: {}]   ;;  %s964_s2 = inlined_call_operand.vmem [shape: f32[1,64], index: 2, kind: input, shape index: {}]   ;;  %s965_s3 = inlined_call_operand.vmem [shape: bf16[2,4,64], index: 3, kind: output, shape index: {}]  }
   0x1 LB: > { %s621_s13 = sadd.s32 4294967295, %s810_s12   ;;  %p625_p0 = scmp.ge.s32.totalorder %s810_s12, 1  ;;  %s810_s12 = sphi %s832_s12, %s13_s12  }
   0x2   : > { %p137_p1 = scmp.lt.s32.totalorder %s810_s12, 3 }
   0x4   : > { %p138_p2 = pnand %p625_p0, %p137_p1 }
   0x5   : > { %p160_p3 = scmp.lt.s32.totalorder (!%p138_p2), %s621_s13, 1 }
   0x6   : > { %141 = sbr.rel (%p138_p2) target bundleno = 197 (0xc5), region = 32 }
   0xb   : > { %v769_v0 = vld [vmem:[%s963_s1 + $0x38] sm:$0xff]  ;;  %v768_v4 = vld [vmem:[%s963_s1 + $0x30] sm:$0xff]  ;;  %s967_s13 = smov (!%p160_p3, %s621_s13), 1  ;;  %v767_v8 = vld [vmem:[%s963_s1 + $0x28] sm:$0xff]  ;;  %vm224_vm0 = vcmask 1040384   ;;  %vm228_vm1 = vcmask 1042434  }
   0xc   : > { %v777_v1 = vld [vmem:[%s963_s1 + $0x78] sm:$0xff]  ;;  %512 = vmatpush.bf16.msra.mxu0 %v769_v0  ;;  %v776_v5 = vld [vmem:[%s963_s1 + $0x70] sm:$0xff]  ;;  %s794_s30 = smul.u32 6, %s967_s13  ;;  %v775_v9 = vld [vmem:[%s963_s1 + $0x68] sm:$0xff]  ;;  %vm232_vm2 = vcmask 1041408   ;;  %s627_s7 = sshll.u32 %s967_s13, 1 }
   0xd   : > { %v785_v2 = vld [vmem:[%s963_s1 + $0xb8] sm:$0xff]  ;;  %525 = vmatpush.bf16.msra.mxu1 %v777_v1  ;;  %v784_v6 = vld [vmem:[%s963_s1 + $0xb0] sm:$0xff]  ;;  %v783_v10 = vld [vmem:[%s963_s1 + $0xa8] sm:$0xff]  ;;  %s168_s10 = scalar_lea.vmem %s965_s3, %s627_s7  ;;  %vm566_vm3 = vcmask 517120  }
   0xe   : > { %v793_v3 = vld [vmem:[%s963_s1 + $0xf8] sm:$0xff]  ;;  %538 = vmatpush.bf16.msra.mxu2 %v785_v2  ;;  %v792_v7 = vld [vmem:[%s963_s1 + $0xf0] sm:$0xff]  ;;  %v791_v11 = vld [vmem:[%s963_s1 + $0xe8] sm:$0xff]  ;;  %s882_s16 = scalar_lea.vmem %s962_s0, %s794_s30 }
   0xf   : > { %551 = vmatpush.bf16.msra.mxu3 %v793_v3  ;;  %v766_v12 = vld [vmem:[%s963_s1 + $0x20] sm:$0xff]  ;;  %v765_v18 = vld [vmem:[%s963_s1 + $0x18] sm:$0xff]  ;;  %v764_v22 = vld [vmem:[%s963_s1 + $0x10] sm:$0xff] }
  0x10   : > { %513 = vmatpush.bf16.msra.mxu0 %v768_v4  ;;  %v774_v13 = vld [vmem:[%s963_s1 + $0x60] sm:$0xff]  ;;  %v773_v19 = vld [vmem:[%s963_s1 + $0x58] sm:$0xff]  ;;  %v772_v23 = vld [vmem:[%s963_s1 + $0x50] sm:$0xff] }
  0x11   : > { %526 = vmatpush.bf16.msra.mxu1 %v776_v5  ;;  %v782_v14 = vld [vmem:[%s963_s1 + $0xa0] sm:$0xff]  ;;  %v781_v20 = vld [vmem:[%s963_s1 + $0x98] sm:$0xff]  ;;  %v780_v24 = vld [vmem:[%s963_s1 + $0x90] sm:$0xff] }
  0x12   : > { %539 = vmatpush.bf16.msra.mxu2 %v784_v6  ;;  %v790_v15 = vld [vmem:[%s963_s1 + $0xe0] sm:$0xff]  ;;  %v789_v21 = vld [vmem:[%s963_s1 + $0xd8] sm:$0xff]  ;;  %v788_v25 = vld [vmem:[%s963_s1 + $0xd0] sm:$0xff] }
  0x13   : > { %552 = vmatpush.bf16.msra.mxu3 %v792_v7  ;;  %v171_v16 = vld [vmem:[%s882_s16] sm:$0x3]  ;;  %v172_v17 = vld [vmem:[%s882_s16 + $0x2] sm:$0x3]  ;;  %v631_v27 = vld [vmem:[%s882_s16 + $0x4] sm:$0x3] }
  0x14   : > { %514 = vmatpush.bf16.msra.mxu0 %v767_v8  ;;  %179 = vst [vmem:[#allocation1] ss:$4 sm:$0xff] %v171_v16  ;;  %v630_v26 = vld [vmem:[%s882_s16 + $0x2] sm:$0x3]  ;;  %v763_v31 = vld [vmem:[%s963_s1 + $0x8] sm:$0xff] }
  0x15   : > { %527 = vmatpush.bf16.msra.mxu1 %v775_v9  ;;  %183 = vst [vmem:[#allocation1 + $0x20] ss:$4 sm:$0xff] %v172_v17  ;;  %v771_v32 = vld [vmem:[%s963_s1 + $0x48] sm:$0xff]  ;;  %v762_v40 = vld [vmem:[%s963_s1] sm:$0xff] }
  0x16   : > { %540 = vmatpush.bf16.msra.mxu2 %v783_v10  ;;  %v779_v34 = vld [vmem:[%s963_s1 + $0x88] sm:$0xff]  ;;  %v770_v41 = vld [vmem:[%s963_s1 + $0x40] sm:$0xff] }
  0x17   : > { %553 = vmatpush.bf16.msra.mxu3 %v791_v11  ;;  %v787_v35 = vld [vmem:[%s963_s1 + $0xc8] sm:$0xff]  ;;  %v778_v42 = vld [vmem:[%s963_s1 + $0x80] sm:$0xff] }
  0x18   : > { %515 = vmatpush.bf16.msra.mxu0 %v766_v12  ;;  %v786_v43 = vld [vmem:[%s963_s1 + $0xc0] sm:$0xff] }
  0x19   : > { %528 = vmatpush.bf16.msra.mxu1 %v774_v13  ;;  %v628_v50 = vld [vmem:[%s882_s16 + $0x2] sm:$0x1]  ;;  %v629_v53 = vld [vmem:[%s882_s16 + $0x4] sm:$0x1]  ;;  %v169_v56 = vld [vmem:[%s882_s16] sm:$0x1] }
  0x1a   : > { %541 = vmatpush.bf16.msra.mxu2 %v782_v14  ;;  %v170_v59 = vld [vmem:[%s882_s16 + $0x2] sm:$0x1]  ;;  %v219_v61 = vrot.slane %v628_v50, 6  ;;  %v222_v63 = vrot.slane %v629_v53, 6  ;;  %v803_v12 = vld [vmem:[%s964_s2] ss:$0 sm:$0xff] }
  0x1b   : > { %554 = vmatpush.bf16.msra.mxu3 %v790_v15  ;;  %v180_v28 = vld.sshfl [vmem:[#allocation1] sm:$0xff pattern:$0x73625140] }
  0x1c   : > { %516 = vmatpush.bf16.msra.mxu0 %v765_v18  ;;  %v184_v29 = vld.sshfl [vmem:[#allocation1 + $0x20] sm:$0xff pattern:$0x73625140]  ;;  %v187_v30 = vshll.u32 %v180_v28, 16  ;;  %198 = vst [vmem:[#allocation1] ss:$4 sm:$0xff] %v630_v26 }
  0x1d   : > { %529 = vmatpush.bf16.msra.mxu1 %v773_v19  ;;  %v193_v33 = vshll.u32 %v184_v29, 16  ;;  %202 = vst [vmem:[#allocation1 + $0x20] ss:$4 sm:$0xff] %v631_v27  ;;  %v185_v36 = vshrl.u32 %v180_v28, 16  ;;  %v191_v38 = vshrl.u32 %v184_v29, 16 }
  0x1e   : > { %542 = vmatpush.bf16.msra.mxu2 %v781_v20  ;;  %v189_v37 = vrot.slane %v187_v30, 1 }
  0x1f   : > { %555 = vmatpush.bf16.msra.mxu3 %v789_v21  ;;  %v195_v39 = vrot.slane %v193_v33, 1 }
  0x20   : > { %517 = vmatpush.bf16.msra.mxu0 %v764_v22  ;;  %v190_v44 = vor.u32 %v189_v37, %v185_v36 }
  0x21   : > { %530 = vmatpush.bf16.msra.mxu1 %v772_v23  ;;  %v196_v45 = vor.u32 %v195_v39, %v191_v38 }
  0x22   : > { %543 = vmatpush.bf16.msra.mxu2 %v780_v24  ;;  %v218_v55 = vrot.slane %v190_v44, 7 }
  0x23   : > { %556 = vmatpush.bf16.msra.mxu3 %v788_v25  ;;  %v199_v46 = vld.sshfl [vmem:[#allocation1] sm:$0xff pattern:$0x73625140]  ;;  %v221_v58 = vrot.slane %v196_v45, 7 }
  0x24   : > { %518 = vmatpush.bf16.msra.mxu0 %v763_v31  ;;  %v203_v47 = vld.sshfl [vmem:[#allocation1 + $0x20] sm:$0xff pattern:$0x73625140]  ;;  %v204_v48 = vshrl.u32 %v199_v46, 16  ;;  %v206_v49 = vshll.u32 %v199_v46, 16  ;;  %v227_v1 = vsel %vm224_vm0, %v169_v56, %v218_v55 }
  0x25   : > { %531 = vmatpush.bf16.msra.mxu1 %v771_v32  ;;  %v210_v51 = vshrl.u32 %v203_v47, 16  ;;  %v212_v52 = vshll.u32 %v203_v47, 16  ;;  %v236_v3 = vsel %vm224_vm0, %v170_v59, %v221_v58 }
  0x26   : > { %544 = vmatpush.bf16.msra.mxu2 %v779_v34  ;;  %v208_v54 = vrot.slane %v206_v49, 1 }
  0x27   : > { %557 = vmatpush.bf16.msra.mxu3 %v787_v35  ;;  %v214_v57 = vrot.slane %v212_v52, 1 }
  0x28   : > { %519 = vmatpush.bf16.msra.mxu0 %v762_v40  ;;  %v209_v60 = vor.u32 %v208_v54, %v204_v48 }
  0x29   : > { %532 = vmatpush.bf16.msra.mxu1 %v770_v41  ;;  %v215_v62 = vor.u32 %v214_v57, %v210_v51 }
  0x2a   : > { %545 = vmatpush.bf16.msra.mxu2 %v778_v42  ;;  %v220_v0 = vrot.slane %v209_v60, 5 }
  0x2b   : > { %558 = vmatpush.bf16.msra.mxu3 %v786_v43  ;;  %v223_v2 = vrot.slane %v215_v62, 5 }
  0x2c   : > { %v231_v4 = vsel %vm228_vm1, %v219_v61, %v220_v0 }
  0x2d   : > { %v233_v5 = vsel %vm232_vm2, %v227_v1, %v231_v4  ;;  %v239_v6 = vsel %vm228_vm1, %v222_v63, %v223_v2 }
  0x2e   : > { %v240_v7 = vsel %vm232_vm2, %v236_v3, %v239_v6  ;;  %309 = vst [vmem:[#allocation1] ss:$9 sm:$0xff] %v233_v5 }
  0x2f   : > { %311 = vst [vmem:[#allocation1 + $0x1] ss:$9 sm:$0xff] %v240_v7 }
  0x36   : > { %v312_v8 = vld [vmem:[#allocation1] sm:$0xff]  ;;  %v313_v9 = vld [vmem:[#allocation1 + $0x9] sm:$0xff]  ;;  %v314_v10 = vld [vmem:[#allocation1 + $0x12] sm:$0xff] }
  0x37   : > { %520 = vmatmul.bf16.vlgmr.msra.gmra.mxu0 %v312_v8  ;;  %533 = vmatmul.bf16.vlgmr.msra.gmra.mxu1 %v313_v9  ;;  %v315_v11 = vld [vmem:[#allocation1 + $0x1b] sm:$0xff] }
  0x38   : > { %546 = vmatmul.bf16.vlgmr.msra.gmra.mxu2 %v314_v10  ;;  %559 = vmatmul.bf16.vlgmr.msra.gmra.mxu3 %v315_v11 }
  0xb4   : > { %v521_v13 = vpop.f32.mrf.mxu0  ;;  %v534_v14 = vpop.f32.mrf.mxu1 }
  0xb5   : > { %v522_v15 = vadd.f32 %v803_v12, %v521_v13 }
  0xb7   : > { %v535_v16 = vadd.f32 %v534_v14, %v522_v15 }
  0xbb   : > { %v547_v17 = vpop.f32.mrf.mxu2  ;;  %v560_v18 = vpop.f32.mrf.mxu3 }
  0xbc   : > { %v548_v19 = vadd.f32 %v547_v17, %v535_v16  ;;  %v523_v20 = vpop.f32.mrf.mxu0  ;;  %v536_v21 = vpop.f32.mrf.mxu1 }
  0xbe   : > { %v561_v22 = vadd.f32 %v560_v18, %v548_v19 }
  0xc0   : > { %v564_v23 = vmax.f32 %v561_v22, 0.0 }
  0xc2   : > { %v565_v24 = vpack.c.bf16 %v564_v23, %v564_v23 }
  0xc3   : > { %v549_v25 = vpop.f32.mrf.mxu2  ;;  %v562_v26 = vpop.f32.mrf.mxu3 }
  0xc4   : > { %567 = vst.msk [vmem:[%s168_s10] sm:$0x3] %vm566_vm3, %v565_v24 }
  0xc5 PF: > { %s13_s12 = sadd.s32 1, %s810_s12  }
  0xc6   : > { %p10_p4 = scmp.ge.s32.totalorder %s13_s12, 4  }
  0xc8   :  { %12 = sbr.rel (!%p10_p4) target bundleno = 1 (0x1), region = 66 }

// kernel: pose_exp_net_forward.11
= control target key start
LH: loop header
LB: loop body
LE: loop exit
PB: predicated region body
PF: predicated region fallthrough
CT: control target
= control target key end

     0   :  { %s1234_s12 = smov 0   ;;  %s1454_s0 = inlined_call_operand.vmem [shape: bf16[2,2,2,256], index: 0, kind: input, shape index: {}]   ;;  %s1455_s1 = inlined_call_operand.vmem [shape: bf16[1024,128], index: 1, kind: input, shape index: {}]   ;;  %s1456_s2 = inlined_call_operand.vmem [shape: f32[1,128], index: 2, kind: input, shape index: {}]   ;;  %s1457_s3 = inlined_call_operand.vmem [shape: bf16[2,1,128], index: 3, kind: output, shape index: {}]  }
   0x1 LB: > { %s869_s13 = sadd.s32 4294967295, %s1212_s12   ;;  %p873_p0 = scmp.ge.s32.totalorder %s1212_s12, 1  ;;  %s1212_s12 = sphi %s1234_s12, %s13_s12  }
   0x2   : > { %p136_p1 = scmp.lt.s32.totalorder %s1212_s12, 3 }
   0x4   : > { %p137_p2 = pnand %p873_p0, %p136_p1 }
   0x5   : > { %p157_p3 = scmp.lt.s32.totalorder (!%p137_p2), %s869_s13, 1 }
   0x6   : > { %140 = sbr.rel (%p137_p2) target bundleno = 219 (0xdb), region = 32 }
   0xb   : > { %v1141_v0 = vld [vmem:[%s1455_s1 + $0x38] sm:$0xff]  ;;  %v1140_v4 = vld [vmem:[%s1455_s1 + $0x30] sm:$0xff]  ;;  %s1459_s13 = smov (!%p157_p3, %s869_s13), 1  ;;  %v1139_v8 = vld [vmem:[%s1455_s1 + $0x28] sm:$0xff]  ;;  %vm816_vm0 = vcmask 1040384  }
   0xc   : > { %v1149_v1 = vld [vmem:[%s1455_s1 + $0x78] sm:$0xff]  ;;  %710 = vmatpush.bf16.msra.mxu0 %v1141_v0  ;;  %v1148_v5 = vld [vmem:[%s1455_s1 + $0x70] sm:$0xff]  ;;  %v1147_v9 = vld [vmem:[%s1455_s1 + $0x68] sm:$0xff]  ;;  %s874_s11 = sshll.u32 %s1459_s13, 2  ;;  %s163_s26 = scalar_lea.vmem %s1457_s3, %s1459_s13  ;;  %vm817_vm1 = vsmask.f32 256 }
   0xd   : > { %v1157_v2 = vld [vmem:[%s1455_s1 + $0xb8] sm:$0xff]  ;;  %723 = vmatpush.bf16.msra.mxu1 %v1149_v1  ;;  %v1156_v6 = vld [vmem:[%s1455_s1 + $0xb0] sm:$0xff]  ;;  %v1155_v10 = vld [vmem:[%s1455_s1 + $0xa8] sm:$0xff]  ;;  %s1290_s20 = scalar_lea.vmem %s1454_s0, %s874_s11 }
   0xe   : > { %v1165_v3 = vld [vmem:[%s1455_s1 + $0xf8] sm:$0xff]  ;;  %736 = vmatpush.bf16.msra.mxu2 %v1157_v2  ;;  %v1164_v7 = vld [vmem:[%s1455_s1 + $0xf0] sm:$0xff]  ;;  %v1163_v11 = vld [vmem:[%s1455_s1 + $0xe8] sm:$0xff] }
   0xf   : > { %749 = vmatpush.bf16.msra.mxu3 %v1165_v3  ;;  %v1138_v12 = vld [vmem:[%s1455_s1 + $0x20] sm:$0xff]  ;;  %v1137_v17 = vld [vmem:[%s1455_s1 + $0x18] sm:$0xff]  ;;  %v1136_v21 = vld [vmem:[%s1455_s1 + $0x10] sm:$0xff] }
  0x10   : > { %711 = vmatpush.bf16.msra.mxu0 %v1140_v4  ;;  %v1146_v13 = vld [vmem:[%s1455_s1 + $0x60] sm:$0xff]  ;;  %v1145_v18 = vld [vmem:[%s1455_s1 + $0x58] sm:$0xff]  ;;  %v1144_v22 = vld [vmem:[%s1455_s1 + $0x50] sm:$0xff] }
  0x11   : > { %724 = vmatpush.bf16.msra.mxu1 %v1148_v5  ;;  %v1154_v14 = vld [vmem:[%s1455_s1 + $0xa0] sm:$0xff]  ;;  %v1153_v19 = vld [vmem:[%s1455_s1 + $0x98] sm:$0xff]  ;;  %v1152_v23 = vld [vmem:[%s1455_s1 + $0x90] sm:$0xff] }
  0x12   : > { %737 = vmatpush.bf16.msra.mxu2 %v1156_v6  ;;  %v1162_v15 = vld [vmem:[%s1455_s1 + $0xe0] sm:$0xff]  ;;  %v1161_v20 = vld [vmem:[%s1455_s1 + $0xd8] sm:$0xff]  ;;  %v1160_v24 = vld [vmem:[%s1455_s1 + $0xd0] sm:$0xff] }
  0x13   : > { %750 = vmatpush.bf16.msra.mxu3 %v1164_v7  ;;  %v164_v16 = vld [vmem:[%s1290_s20] sm:$0x3]  ;;  %v1135_v27 = vld [vmem:[%s1455_s1 + $0x8] sm:$0xff]  ;;  %v875_v35 = vld [vmem:[%s1290_s20 + $0x2] sm:$0x3] }
  0x14   : > { %712 = vmatpush.bf16.msra.mxu0 %v1139_v8  ;;  %168 = vst [vmem:[#allocation1] ss:$9 sm:$0xff] %v164_v16  ;;  %v1143_v28 = vld [vmem:[%s1455_s1 + $0x48] sm:$0xff]  ;;  %v1134_v31 = vld [vmem:[%s1455_s1] sm:$0xff]  ;;  %v1173_v36 = vld [vmem:[%s1455_s1 + $0x138] sm:$0xff] }
  0x15   : > { %725 = vmatpush.bf16.msra.mxu1 %v1147_v9  ;;  %v1151_v29 = vld [vmem:[%s1455_s1 + $0x88] sm:$0xff]  ;;  %v1142_v32 = vld [vmem:[%s1455_s1 + $0x40] sm:$0xff]  ;;  %v1181_v37 = vld [vmem:[%s1455_s1 + $0x178] sm:$0xff] }
  0x16   : > { %738 = vmatpush.bf16.msra.mxu2 %v1155_v10  ;;  %v1159_v30 = vld [vmem:[%s1455_s1 + $0xc8] sm:$0xff]  ;;  %v1150_v33 = vld [vmem:[%s1455_s1 + $0x80] sm:$0xff]  ;;  %v1189_v38 = vld [vmem:[%s1455_s1 + $0x1b8] sm:$0xff] }
  0x17   : > { %751 = vmatpush.bf16.msra.mxu3 %v1163_v11  ;;  %v1158_v34 = vld [vmem:[%s1455_s1 + $0xc0] sm:$0xff]  ;;  %v1197_v39 = vld [vmem:[%s1455_s1 + $0x1f8] sm:$0xff]  ;;  %v1172_v44 = vld [vmem:[%s1455_s1 + $0x130] sm:$0xff] }
  0x18   : > { %713 = vmatpush.bf16.msra.mxu0 %v1138_v12  ;;  %v1180_v45 = vld [vmem:[%s1455_s1 + $0x170] sm:$0xff]  ;;  %v1171_v48 = vld [vmem:[%s1455_s1 + $0x128] sm:$0xff]  ;;  %v1170_v54 = vld [vmem:[%s1455_s1 + $0x120] sm:$0xff] }
  0x19   : > { %726 = vmatpush.bf16.msra.mxu1 %v1146_v13  ;;  %v1188_v46 = vld [vmem:[%s1455_s1 + $0x1b0] sm:$0xff]  ;;  %v1179_v49 = vld [vmem:[%s1455_s1 + $0x168] sm:$0xff]  ;;  %v1178_v55 = vld [vmem:[%s1455_s1 + $0x160] sm:$0xff] }
  0x1a   : > { %739 = vmatpush.bf16.msra.mxu2 %v1154_v14  ;;  %v1196_v47 = vld [vmem:[%s1455_s1 + $0x1f0] sm:$0xff]  ;;  %v1187_v50 = vld [vmem:[%s1455_s1 + $0x1a8] sm:$0xff]  ;;  %v1186_v56 = vld [vmem:[%s1455_s1 + $0x1a0] sm:$0xff] }
  0x1b   : > { %752 = vmatpush.bf16.msra.mxu3 %v1162_v15  ;;  %v169_v25 = vld [vmem:[#allocation1] sm:$0xff]  ;;  %v170_v26 = vld [vmem:[#allocation1 + $0x9] sm:$0xff]  ;;  %v1169_v58 = vld [vmem:[%s1455_s1 + $0x118] sm:$0xff] }
  0x1c   : > { %714 = vmatpush.bf16.msra.mxu0 %v1137_v17  ;;  %173 = vst [vmem:[#allocation1] ss:$9 sm:$0xff] %v164_v16  ;;  %v1195_v51 = vld [vmem:[%s1455_s1 + $0x1e8] sm:$0xff]  ;;  %v1194_v57 = vld [vmem:[%s1455_s1 + $0x1e0] sm:$0xff]  ;;  %v1177_v59 = vld [vmem:[%s1455_s1 + $0x158] sm:$0xff] }
  0x1d   : > { %727 = vmatpush.bf16.msra.mxu1 %v1145_v18  ;;  %v1185_v60 = vld [vmem:[%s1455_s1 + $0x198] sm:$0xff]  ;;  %v1168_v62 = vld [vmem:[%s1455_s1 + $0x110] sm:$0xff]  ;;  %v1167_v2 = vld [vmem:[%s1455_s1 + $0x108] sm:$0xff] }
  0x1e   : > { %740 = vmatpush.bf16.msra.mxu2 %v1153_v19  ;;  %v1193_v61 = vld [vmem:[%s1455_s1 + $0x1d8] sm:$0xff]  ;;  %v1176_v63 = vld [vmem:[%s1455_s1 + $0x150] sm:$0xff]  ;;  %v1175_v3 = vld [vmem:[%s1455_s1 + $0x148] sm:$0xff] }
  0x1f   : > { %753 = vmatpush.bf16.msra.mxu3 %v1161_v20  ;;  %v1184_v0 = vld [vmem:[%s1455_s1 + $0x190] sm:$0xff]  ;;  %v1183_v4 = vld [vmem:[%s1455_s1 + $0x188] sm:$0xff]  ;;  %v1166_v6 = vld [vmem:[%s1455_s1 + $0x100] sm:$0xff] }
  0x20   : > { %715 = vmatpush.bf16.msra.mxu0 %v1136_v21  ;;  %v1192_v1 = vld [vmem:[%s1455_s1 + $0x1d0] sm:$0xff]  ;;  %v1191_v5 = vld [vmem:[%s1455_s1 + $0x1c8] sm:$0xff]  ;;  %v1174_v7 = vld [vmem:[%s1455_s1 + $0x140] sm:$0xff] }
  0x21   : > { %728 = vmatpush.bf16.msra.mxu1 %v1144_v22  ;;  %v1182_v8 = vld [vmem:[%s1455_s1 + $0x180] sm:$0xff]  ;;  %vm818_vm2 = vmand %vm816_vm0, %vm817_vm1 }
  0x22   : > { %741 = vmatpush.bf16.msra.mxu2 %v1152_v23  ;;  %v1190_v9 = vld [vmem:[%s1455_s1 + $0x1c0] sm:$0xff] }
  0x23   : > { %754 = vmatpush.bf16.msra.mxu3 %v1160_v24  ;;  %v174_v40 = vld [vmem:[#allocation1] sm:$0xff]  ;;  %v175_v41 = vld [vmem:[#allocation1 + $0x9] sm:$0xff] }
  0x24   : > { %716 = vmatpush.bf16.msra.mxu0 %v1135_v27  ;;  %v176_v42 = vshrl.u32 %v174_v40, 16  ;;  %183 = vst [vmem:[#allocation1] ss:$9 sm:$0xff] %v875_v35  ;;  %v178_v43 = vshrl.u32 %v175_v41, 16  ;;  %v325_v20 = vld [vmem:[%s1456_s2] sm:$0x1] }
  0x25   : > { %729 = vmatpush.bf16.msra.mxu1 %v1143_v28 }
  0x26   : > { %742 = vmatpush.bf16.msra.mxu2 %v1151_v29 }
  0x27   : > { %755 = vmatpush.bf16.msra.mxu3 %v1159_v30 }
  0x28   : > { %717 = vmatpush.bf16.msra.mxu0 %v1134_v31 }
  0x29   : > { %730 = vmatpush.bf16.msra.mxu1 %v1142_v32 }
  0x2a   : > { %743 = vmatpush.bf16.msra.mxu2 %v1150_v33 }
  0x2b   : > { %756 = vmatpush.bf16.msra.mxu3 %v1158_v34  ;;  %718 = vmatmul.bf16.vlgmr.msra.gmra.mxu0 %v169_v25  ;;  %v184_v52 = vld [vmem:[#allocation1] sm:$0xff]  ;;  %v185_v53 = vld [vmem:[#allocation1 + $0x9] sm:$0xff] }
  0x2c   : > { %762 = vmatpush.bf16.msrb.mxu0 %v1173_v36  ;;  %731 = vmatmul.bf16.vlgmr.msra.gmra.mxu1 %v170_v26  ;;  %188 = vst [vmem:[#allocation1] ss:$9 sm:$0xff] %v875_v35 }
  0x2d   : > { %775 = vmatpush.bf16.msrb.mxu1 %v1181_v37  ;;  %744 = vmatmul.bf16.vlgmr.msra.gmra.mxu2 %v176_v42 }
  0x2e   : > { %788 = vmatpush.bf16.msrb.mxu2 %v1189_v38  ;;  %757 = vmatmul.bf16.vlgmr.msra.gmra.mxu3 %v178_v43  ;;  %v819_v38 = vld [vmem:[%s163_s26] sm:$0x1] }
  0x2f   : > { %801 = vmatpush.bf16.msrb.mxu3 %v1197_v39 }
  0x30   : > { %763 = vmatpush.bf16.msrb.mxu0 %v1172_v44 }
  0x31   : > { %776 = vmatpush.bf16.msrb.mxu1 %v1180_v45 }
  0x32   : > { %789 = vmatpush.bf16.msrb.mxu2 %v1188_v46 }
  0x33   : > { %802 = vmatpush.bf16.msrb.mxu3 %v1196_v47  ;;  %v189_v10 = vld [vmem:[#allocation1] sm:$0xff]  ;;  %v190_v11 = vld [vmem:[#allocation1 + $0x9] sm:$0xff] }
  0x34   : > { %764 = vmatpush.bf16.msrb.mxu0 %v1171_v48  ;;  %v191_v12 = vshrl.u32 %v189_v10, 16  ;;  %v193_v13 = vshrl.u32 %v190_v11, 16 }
  0x35   : > { %777 = vmatpush.bf16.msrb.mxu1 %v1179_v49 }
  0x36   : > { %790 = vmatpush.bf16.msrb.mxu2 %v1187_v50 }
  0x37   : > { %803 = vmatpush.bf16.msrb.mxu3 %v1195_v51 }
  0x38   : > { %765 = vmatpush.bf16.msrb.mxu0 %v1170_v54 }
  0x39   : > { %778 = vmatpush.bf16.msrb.mxu1 %v1178_v55 }
  0x3a   : > { %791 = vmatpush.bf16.msrb.mxu2 %v1186_v56 }
  0x3b   : > { %804 = vmatpush.bf16.msrb.mxu3 %v1194_v57 }
  0x3c   : > { %766 = vmatpush.bf16.msrb.mxu0 %v1169_v58 }
  0x3d   : > { %779 = vmatpush.bf16.msrb.mxu1 %v1177_v59 }
  0x3e   : > { %792 = vmatpush.bf16.msrb.mxu2 %v1185_v60 }
  0x3f   : > { %805 = vmatpush.bf16.msrb.mxu3 %v1193_v61 }
  0x40   : > { %767 = vmatpush.bf16.msrb.mxu0 %v1168_v62 }
  0x41   : > { %780 = vmatpush.bf16.msrb.mxu1 %v1176_v63 }
  0x42   : > { %793 = vmatpush.bf16.msrb.mxu2 %v1184_v0 }
  0x43   : > { %806 = vmatpush.bf16.msrb.mxu3 %v1192_v1 }
  0x44   : > { %768 = vmatpush.bf16.msrb.mxu0 %v1167_v2 }
  0x45   : > { %781 = vmatpush.bf16.msrb.mxu1 %v1175_v3 }
  0x46   : > { %794 = vmatpush.bf16.msrb.mxu2 %v1183_v4 }
  0x47   : > { %807 = vmatpush.bf16.msrb.mxu3 %v1191_v5 }
  0x48   : > { %769 = vmatpush.bf16.msrb.mxu0 %v1166_v6 }
  0x49   : > { %782 = vmatpush.bf16.msrb.mxu1 %v1174_v7 }
  0x4a   : > { %795 = vmatpush.bf16.msrb.mxu2 %v1182_v8 }
  0x4b   : > { %808 = vmatpush.bf16.msrb.mxu3 %v1190_v9  ;;  %770 = vmatmul.bf16.vlgmr.msrb.gmra.mxu0 %v184_v52 }
  0x4c   : > { %783 = vmatmul.bf16.vlgmr.msrb.gmra.mxu1 %v185_v53 }
  0x4d   : > { %796 = vmatmul.bf16.vlgmr.msrb.gmra.mxu2 %v191_v12 }
  0x4e   : > { %809 = vmatmul.bf16.vlgmr.msrb.gmra.mxu3 %v193_v13 }
  0xa8   : > { %v719_v14 = vpop.f32.mrf.mxu0 }
  0xa9   : > { %v732_v15 = vpop.f32.mrf.mxu1  ;;  %v720_v23 = vadd.f32 %v719_v14, %v325_v20 }
  0xab   : > { %v733_v24 = vadd.f32 %v732_v15, %v720_v23 }
  0xb0   : > { %v745_v16 = vpop.f32.mrf.mxu2  ;;  %v721_v18 = vpop.f32.mrf.mxu0 }
  0xb1   : > { %v758_v17 = vpop.f32.mrf.mxu3  ;;  %v734_v19 = vpop.f32.mrf.mxu1  ;;  %v746_v25 = vadd.f32 %v745_v16, %v733_v24 }
  0xb3   : > { %v759_v26 = vadd.f32 %v758_v17, %v746_v25 }
  0xb8   : > { %v747_v21 = vpop.f32.mrf.mxu2 }
  0xb9   : > { %v760_v22 = vpop.f32.mrf.mxu3 }
  0xc8   : > { %v771_v27 = vpop.f32.mrf.mxu0 }
  0xc9   : > { %v784_v28 = vpop.f32.mrf.mxu1  ;;  %v772_v29 = vadd.f32 %v771_v27, %v759_v26 }
  0xcb   : > { %v785_v30 = vadd.f32 %v784_v28, %v772_v29 }
  0xd0   : > { %v797_v31 = vpop.f32.mrf.mxu2  ;;  %v773_v34 = vpop.f32.mrf.mxu0 }
  0xd1   : > { %v810_v32 = vpop.f32.mrf.mxu3  ;;  %v798_v33 = vadd.f32 %v797_v31, %v785_v30  ;;  %v786_v35 = vpop.f32.mrf.mxu1 }
  0xd3   : > { %v811_v36 = vadd.f32 %v810_v32, %v798_v33 }
  0xd5   : > { %v814_v37 = vmax.f32 %v811_v36, 0.0 }
  0xd7   : > { %v815_v39 = vpack.c.bf16 %v814_v37, %v814_v37 }
  0xd8   : > { %v799_v40 = vpop.f32.mrf.mxu2 }
  0xd9   : > { %v812_v41 = vpop.f32.mrf.mxu3  ;;  %v820_v42 = vsel %vm818_vm2, %v815_v39, %v819_v38 }
  0xda   : > { %821 = vst [vmem:[%s163_s26] sm:$0x1] %v820_v42 }
  0xdb PF: > { %s13_s12 = sadd.s32 1, %s1212_s12  }
  0xdc   : > { %p10_p4 = scmp.ge.s32.totalorder %s13_s12, 4  }
  0xde   :  { %12 = sbr.rel (!%p10_p4) target bundleno = 1 (0x1), region = 63 }

// kernel: pose_exp_net_forward.12
= control target key start
LH: loop header
LB: loop body
LE: loop exit
PB: predicated region body
PF: predicated region fallthrough
CT: control target
= control target key end

     0   :  { %s3580_s12 = smov 0   ;;  %s5249_s0 = inlined_call_operand.vmem [shape: bf16[2,2,2,512], index: 0, kind: input, shape index: {}]   ;;  %s5250_s1 = inlined_call_operand.vmem [shape: bf16[2048,256], index: 1, kind: input, shape index: {}]   ;;  %s5251_s2 = inlined_call_operand.vmem [shape: f32[1,256], index: 2, kind: input, shape index: {}]   ;;  %s5252_s3 = inlined_call_operand.vmem [shape: bf16[2,1,256], index: 3, kind: output, shape index: {}]  }
   0x1 LB: > { %s2254_s13 = sadd.s32 4294967295, %s3558_s12   ;;  %p2258_p0 = scmp.ge.s32.totalorder %s3558_s12, 1  ;;  %s3558_s12 = sphi %s3580_s12, %s13_s12  }
   0x2   : > { %p136_p1 = scmp.lt.s32.totalorder %s3558_s12, 3 }
   0x4   : > { %p137_p2 = pnand %p2258_p0, %p136_p1 }
   0x5   : > { %p158_p3 = scmp.lt.s32.totalorder (!%p137_p2), %s2254_s13, 1 }
   0x6   : > { %140 = sbr.rel (%p137_p2) target bundleno = 416 (0x1a0), region = 32 }
   0xb   : > { %v2320_v0 = vld [vmem:[%s5250_s1 + $0x70] sm:$0xf]  ;;  %v3303_v1 = vld [vmem:[%s5250_s1 + $0x74] sm:$0xf0]  ;;  %v2312_v11 = vld [vmem:[%s5250_s1 + $0x60] sm:$0xf] }
   0xc   : > { %v2384_v2 = vld [vmem:[%s5250_s1 + $0xf0] sm:$0xf]  ;;  %v2321_v3 = vor.u32 %v3303_v1, %v2320_v0  ;;  %v3319_v4 = vld [vmem:[%s5250_s1 + $0xf4] sm:$0xf0]  ;;  %v3301_v13 = vld [vmem:[%s5250_s1 + $0x64] sm:$0xf0] }
   0xd   : > { %v2448_v5 = vld [vmem:[%s5250_s1 + $0x170] sm:$0xf]  ;;  %v3335_v6 = vld [vmem:[%s5250_s1 + $0x174] sm:$0xf0]  ;;  %v2385_v7 = vor.u32 %v3319_v4, %v2384_v2  ;;  %v2376_v14 = vld [vmem:[%s5250_s1 + $0xe0] sm:$0xf]  ;;  %v2313_v16 = vor.u32 %v3301_v13, %v2312_v11 }
   0xe   : > { %v2449_v8 = vor.u32 %v3335_v6, %v2448_v5  ;;  %v2512_v9 = vld [vmem:[%s5250_s1 + $0x1f0] sm:$0xf]  ;;  %v3351_v10 = vld [vmem:[%s5250_s1 + $0x1f4] sm:$0xf0]  ;;  %1765 = vmatpush.bf16.msra.mxu0 %v2321_v3  ;;  %v3317_v15 = vld [vmem:[%s5250_s1 + $0xe4] sm:$0xf0] }
   0xf   : > { %v2513_v12 = vor.u32 %v3351_v10, %v2512_v9  ;;  %1778 = vmatpush.bf16.msra.mxu1 %v2385_v7  ;;  %v2377_v17 = vor.u32 %v3317_v15, %v2376_v14  ;;  %v2440_v18 = vld [vmem:[%s5250_s1 + $0x160] sm:$0xf]  ;;  %v3333_v19 = vld [vmem:[%s5250_s1 + $0x164] sm:$0xf0]  ;;  %v2304_v23 = vld [vmem:[%s5250_s1 + $0x50] sm:$0xf] }
  0x10   : > { %1791 = vmatpush.bf16.msra.mxu2 %v2449_v8  ;;  %v2504_v20 = vld [vmem:[%s5250_s1 + $0x1e0] sm:$0xf]  ;;  %v2441_v21 = vor.u32 %v3333_v19, %v2440_v18  ;;  %v3349_v22 = vld [vmem:[%s5250_s1 + $0x1e4] sm:$0xf0]  ;;  %v3299_v24 = vld [vmem:[%s5250_s1 + $0x54] sm:$0xf0] }
  0x11   : > { %1804 = vmatpush.bf16.msra.mxu3 %v2513_v12  ;;  %v2505_v25 = vor.u32 %v3349_v22, %v2504_v20  ;;  %v2368_v26 = vld [vmem:[%s5250_s1 + $0xd0] sm:$0xf]  ;;  %v3315_v27 = vld [vmem:[%s5250_s1 + $0xd4] sm:$0xf0]  ;;  %v2305_v29 = vor.u32 %v3299_v24, %v2304_v23  ;;  %v2296_v35 = vld [vmem:[%s5250_s1 + $0x40] sm:$0xf] }
  0x12   : > { %v2432_v28 = vld [vmem:[%s5250_s1 + $0x150] sm:$0xf]  ;;  %1766 = vmatpush.bf16.msra.mxu0 %v2313_v16  ;;  %v3331_v30 = vld [vmem:[%s5250_s1 + $0x154] sm:$0xf0]  ;;  %v2369_v33 = vor.u32 %v3315_v27, %v2368_v26  ;;  %v3297_v36 = vld [vmem:[%s5250_s1 + $0x44] sm:$0xf0] }
  0x13   : > { %v2496_v31 = vld [vmem:[%s5250_s1 + $0x1d0] sm:$0xf]  ;;  %v3347_v32 = vld [vmem:[%s5250_s1 + $0x1d4] sm:$0xf0]  ;;  %1779 = vmatpush.bf16.msra.mxu1 %v2377_v17  ;;  %v2433_v34 = vor.u32 %v3331_v30, %v2432_v28  ;;  %v2360_v37 = vld [vmem:[%s5250_s1 + $0xc0] sm:$0xf]  ;;  %v2297_v44 = vor.u32 %v3297_v36, %v2296_v35 }
  0x14   : > { %1792 = vmatpush.bf16.msra.mxu2 %v2441_v21  ;;  %v2497_v38 = vor.u32 %v3347_v32, %v2496_v31  ;;  %v3313_v39 = vld [vmem:[%s5250_s1 + $0xc4] sm:$0xf0]  ;;  %v2424_v40 = vld [vmem:[%s5250_s1 + $0x140] sm:$0xf]  ;;  %v2288_v47 = vld [vmem:[%s5250_s1 + $0x30] sm:$0xf] }
  0x15   : > { %1805 = vmatpush.bf16.msra.mxu3 %v2505_v25  ;;  %v3329_v41 = vld [vmem:[%s5250_s1 + $0x144] sm:$0xf0]  ;;  %v2488_v42 = vld [vmem:[%s5250_s1 + $0x1c0] sm:$0xf]  ;;  %v2361_v45 = vor.u32 %v3313_v39, %v2360_v37  ;;  %v3295_v48 = vld [vmem:[%s5250_s1 + $0x34] sm:$0xf0] }
  0x16   : > { %v3345_v43 = vld [vmem:[%s5250_s1 + $0x1c4] sm:$0xf0]  ;;  %1767 = vmatpush.bf16.msra.mxu0 %v2305_v29  ;;  %v2425_v46 = vor.u32 %v3329_v41, %v2424_v40  ;;  %v2352_v49 = vld [vmem:[%s5250_s1 + $0xb0] sm:$0xf]  ;;  %v3311_v51 = vld [vmem:[%s5250_s1 + $0xb4] sm:$0xf0]  ;;  %v2289_v56 = vor.u32 %v3295_v48, %v2288_v47 }
  0x17   : > { %1780 = vmatpush.bf16.msra.mxu1 %v2369_v33  ;;  %v2489_v50 = vor.u32 %v3345_v43, %v2488_v42  ;;  %v2416_v52 = vld [vmem:[%s5250_s1 + $0x130] sm:$0xf]  ;;  %v3327_v53 = vld [vmem:[%s5250_s1 + $0x134] sm:$0xf0]  ;;  %v2353_v57 = vor.u32 %v3311_v51, %v2352_v49  ;;  %v2280_v59 = vld [vmem:[%s5250_s1 + $0x20] sm:$0xf] }
  0x18   : > { %1793 = vmatpush.bf16.msra.mxu2 %v2433_v34  ;;  %v2480_v54 = vld [vmem:[%s5250_s1 + $0x1b0] sm:$0xf]  ;;  %v3343_v55 = vld [vmem:[%s5250_s1 + $0x1b4] sm:$0xf0]  ;;  %v2417_v58 = vor.u32 %v3327_v53, %v2416_v52  ;;  %v3293_v60 = vld [vmem:[%s5250_s1 + $0x24] sm:$0xf0] }
  0x19   : > { %1806 = vmatpush.bf16.msra.mxu3 %v2497_v38  ;;  %v2344_v61 = vld [vmem:[%s5250_s1 + $0xa0] sm:$0xf]  ;;  %v2481_v62 = vor.u32 %v3343_v55, %v2480_v54  ;;  %v3309_v63 = vld [vmem:[%s5250_s1 + $0xa4] sm:$0xf0]  ;;  %v2281_v4 = vor.u32 %v3293_v60, %v2280_v59  ;;  %v2272_v7 = vld [vmem:[%s5250_s1 + $0x10] sm:$0xf] }
  0x1a   : > { %1768 = vmatpush.bf16.msra.mxu0 %v2297_v44  ;;  %v2408_v0 = vld [vmem:[%s5250_s1 + $0x120] sm:$0xf]  ;;  %v3325_v1 = vld [vmem:[%s5250_s1 + $0x124] sm:$0xf0]  ;;  %v2345_v5 = vor.u32 %v3309_v63, %v2344_v61  ;;  %v3291_v8 = vld [vmem:[%s5250_s1 + $0x14] sm:$0xf0] }
  0x1b   : > { %1781 = vmatpush.bf16.msra.mxu1 %v2361_v45  ;;  %v2472_v2 = vld [vmem:[%s5250_s1 + $0x1a0] sm:$0xf]  ;;  %v3341_v3 = vld [vmem:[%s5250_s1 + $0x1a4] sm:$0xf0]  ;;  %v2409_v6 = vor.u32 %v3325_v1, %v2408_v0  ;;  %v2336_v9 = vld [vmem:[%s5250_s1 + $0x90] sm:$0xf]  ;;  %v2273_v16 = vor.u32 %v3291_v8, %v2272_v7 }
  0x1c   : > { %1794 = vmatpush.bf16.msra.mxu2 %v2425_v46  ;;  %v2473_v10 = vor.u32 %v3341_v3, %v2472_v2  ;;  %v3307_v11 = vld [vmem:[%s5250_s1 + $0x94] sm:$0xf0]  ;;  %v2400_v12 = vld [vmem:[%s5250_s1 + $0x110] sm:$0xf]  ;;  %v2264_v17 = vld [vmem:[%s5250_s1] sm:$0xf] }
  0x1d   : > { %1807 = vmatpush.bf16.msra.mxu3 %v2489_v50  ;;  %v3323_v13 = vld [vmem:[%s5250_s1 + $0x114] sm:$0xf0]  ;;  %v2464_v14 = vld [vmem:[%s5250_s1 + $0x190] sm:$0xf]  ;;  %v3289_v18 = vld [vmem:[%s5250_s1 + $0x4] sm:$0xf0]  ;;  %v2337_v19 = vor.u32 %v3307_v11, %v2336_v9 }
  0x1e   : > { %1769 = vmatpush.bf16.msra.mxu0 %v2289_v56  ;;  %v3339_v15 = vld [vmem:[%s5250_s1 + $0x194] sm:$0xf0]  ;;  %v2401_v20 = vor.u32 %v3323_v13, %v2400_v12  ;;  %v2328_v21 = vld [vmem:[%s5250_s1 + $0x80] sm:$0xf]  ;;  %v3305_v22 = vld [vmem:[%s5250_s1 + $0x84] sm:$0xf0]  ;;  %v2265_v31 = vor.u32 %v3289_v18, %v2264_v17 }
  0x1f   : > { %1782 = vmatpush.bf16.msra.mxu1 %v2353_v57  ;;  %v2392_v23 = vld [vmem:[%s5250_s1 + $0x100] sm:$0xf]  ;;  %v2465_v24 = vor.u32 %v3339_v15, %v2464_v14  ;;  %v3321_v25 = vld [vmem:[%s5250_s1 + $0x104] sm:$0xf0]  ;;  %v2576_v28 = vld [vmem:[%s5250_s1 + $0x270] sm:$0xf]  ;;  %v2329_v35 = vor.u32 %v3305_v22, %v2328_v21 }
  0x20   : > { %1795 = vmatpush.bf16.msra.mxu2 %v2417_v58  ;;  %v2456_v26 = vld [vmem:[%s5250_s1 + $0x180] sm:$0xf]  ;;  %v3337_v27 = vld [vmem:[%s5250_s1 + $0x184] sm:$0xf0]  ;;  %v3367_v29 = vld [vmem:[%s5250_s1 + $0x274] sm:$0xf0]  ;;  %v2393_v36 = vor.u32 %v3321_v25, %v2392_v23 }
  0x21   : > { %1808 = vmatpush.bf16.msra.mxu3 %v2481_v62  ;;  %v2640_v30 = vld [vmem:[%s5250_s1 + $0x2f0] sm:$0xf]  ;;  %v3383_v32 = vld [vmem:[%s5250_s1 + $0x2f4] sm:$0xf0]  ;;  %v2457_v39 = vor.u32 %v3337_v27, %v2456_v26  ;;  %v2577_v40 = vor.u32 %v3367_v29, %v2576_v28  ;;  %v2568_v43 = vld [vmem:[%s5250_s1 + $0x260] sm:$0xf] }
  0x22   : > { %1770 = vmatpush.bf16.msra.mxu0 %v2281_v4  ;;  %v2704_v33 = vld [vmem:[%s5250_s1 + $0x370] sm:$0xf]  ;;  %v3399_v34 = vld [vmem:[%s5250_s1 + $0x374] sm:$0xf0]  ;;  %v2641_v41 = vor.u32 %v3383_v32, %v2640_v30  ;;  %v3365_v44 = vld [vmem:[%s5250_s1 + $0x264] sm:$0xf0] }
  0x23   : > { %1783 = vmatpush.bf16.msra.mxu1 %v2345_v5  ;;  %v2768_v37 = vld [vmem:[%s5250_s1 + $0x3f0] sm:$0xf]  ;;  %v3415_v38 = vld [vmem:[%s5250_s1 + $0x3f4] sm:$0xf0]  ;;  %v2705_v42 = vor.u32 %v3399_v34, %v2704_v33  ;;  %v2632_v45 = vld [vmem:[%s5250_s1 + $0x2e0] sm:$0xf]  ;;  %v2569_v52 = vor.u32 %v3365_v44, %v2568_v43 }
  0x24   : > { %1796 = vmatpush.bf16.msra.mxu2 %v2409_v6  ;;  %v2769_v46 = vor.u32 %v3415_v38, %v2768_v37  ;;  %v3381_v47 = vld [vmem:[%s5250_s1 + $0x2e4] sm:$0xf0]  ;;  %v2696_v48 = vld [vmem:[%s5250_s1 + $0x360] sm:$0xf]  ;;  %v2560_v55 = vld [vmem:[%s5250_s1 + $0x250] sm:$0xf] }
  0x25   : > { %1809 = vmatpush.bf16.msra.mxu3 %v2473_v10  ;;  %v3397_v49 = vld [vmem:[%s5250_s1 + $0x364] sm:$0xf0]  ;;  %v2760_v50 = vld [vmem:[%s5250_s1 + $0x3e0] sm:$0xf]  ;;  %v2633_v53 = vor.u32 %v3381_v47, %v2632_v45  ;;  %v3363_v56 = vld [vmem:[%s5250_s1 + $0x254] sm:$0xf0] }
  0x26   : > { %1771 = vmatpush.bf16.msra.mxu0 %v2273_v16  ;;  %v3413_v51 = vld [vmem:[%s5250_s1 + $0x3e4] sm:$0xf0]  ;;  %v2697_v54 = vor.u32 %v3397_v49, %v2696_v48  ;;  %v2624_v57 = vld [vmem:[%s5250_s1 + $0x2d0] sm:$0xf]  ;;  %v3379_v59 = vld [vmem:[%s5250_s1 + $0x2d4] sm:$0xf0]  ;;  %v2561_v0 = vor.u32 %v3363_v56, %v2560_v55 }
  0x27   : > { %1784 = vmatpush.bf16.msra.mxu1 %v2337_v19  ;;  %v2761_v58 = vor.u32 %v3413_v51, %v2760_v50  ;;  %v2688_v60 = vld [vmem:[%s5250_s1 + $0x350] sm:$0xf]  ;;  %v3395_v61 = vld [vmem:[%s5250_s1 + $0x354] sm:$0xf0]  ;;  %v2552_v1 = vld [vmem:[%s5250_s1 + $0x240] sm:$0xf]  ;;  %v2625_v2 = vor.u32 %v3379_v59, %v2624_v57 }
  0x28   : > { %1797 = vmatpush.bf16.msra.mxu2 %v2401_v20  ;;  %v2752_v62 = vld [vmem:[%s5250_s1 + $0x3d0] sm:$0xf]  ;;  %v3411_v63 = vld [vmem:[%s5250_s1 + $0x3d4] sm:$0xf0]  ;;  %v2689_v3 = vor.u32 %v3395_v61, %v2688_v60  ;;  %v3361_v4 = vld [vmem:[%s5250_s1 + $0x244] sm:$0xf0] }
  0x29   : > { %1810 = vmatpush.bf16.msra.mxu3 %v2465_v24  ;;  %v2616_v5 = vld [vmem:[%s5250_s1 + $0x2c0] sm:$0xf]  ;;  %v3377_v6 = vld [vmem:[%s5250_s1 + $0x2c4] sm:$0xf0]  ;;  %v2753_v7 = vor.u32 %v3411_v63, %v2752_v62  ;;  %s5254_s13 = smov (!%p158_p3, %s2254_s13), 1  ;;  %v2553_v12 = vor.u32 %v3361_v4, %v2552_v1  ;;  %vm2186_vm0 = vcmask 1040384  }
  0x2a   : > { %1772 = vmatpush.bf16.msra.mxu0 %v2265_v31  ;;  %v2680_v8 = vld [vmem:[%s5250_s1 + $0x340] sm:$0xf]  ;;  %v3393_v9 = vld [vmem:[%s5250_s1 + $0x344] sm:$0xf0]  ;;  %v2544_v13 = vld [vmem:[%s5250_s1 + $0x230] sm:$0xf]  ;;  %v2617_v14 = vor.u32 %v3377_v6, %v2616_v5 }
  0x2b   : > { %1785 = vmatpush.bf16.msra.mxu1 %v2329_v35  ;;  %v2744_v10 = vld [vmem:[%s5250_s1 + $0x3c0] sm:$0xf]  ;;  %v3409_v11 = vld [vmem:[%s5250_s1 + $0x3c4] sm:$0xf0]  ;;  %s2259_s6 = sshll.u32 %s5254_s13, 3  ;;  %v2681_v15 = vor.u32 %v3393_v9, %v2680_v8  ;;  %s2260_s21 = sshll.u32 %s5254_s13, 1 }
  0x2c   : > { %1798 = vmatpush.bf16.msra.mxu2 %v2393_v36  ;;  %v3359_v16 = vld [vmem:[%s5250_s1 + $0x234] sm:$0xf0]  ;;  %v2608_v17 = vld [vmem:[%s5250_s1 + $0x2b0] sm:$0xf]  ;;  %s3898_s17 = scalar_lea.vmem %s5249_s0, %s2259_s6  ;;  %v2745_v19 = vor.u32 %v3409_v11, %v2744_v10  ;;  %v2536_v28 = vld [vmem:[%s5250_s1 + $0x220] sm:$0xf]  ;;  %s165_s24 = scalar_lea.vmem %s5252_s3, %s2260_s21 }
  0x2d   : > { %1811 = vmatpush.bf16.msra.mxu3 %v2457_v39  ;;  %v3375_v18 = vld [vmem:[%s5250_s1 + $0x2b4] sm:$0xf0]  ;;  %v2672_v20 = vld [vmem:[%s5250_s1 + $0x330] sm:$0xf]  ;;  %v166_v22 = vld [vmem:[%s3898_s17] sm:$0xf]  ;;  %v2545_v25 = vor.u32 %v3359_v16, %v2544_v13 }
  0x2e   : > { %1817 = vmatpush.bf16.msrb.mxu0 %v2577_v40  ;;  %v3391_v21 = vld [vmem:[%s5250_s1 + $0x334] sm:$0xf0]  ;;  %v2736_v23 = vld [vmem:[%s5250_s1 + $0x3b0] sm:$0xf]  ;;  %170 = vst [vmem:[#allocation1] ss:$9 sm:$0xff] %v166_v22  ;;  %v2609_v26 = vor.u32 %v3375_v18, %v2608_v17 }
  0x2f   : > { %1830 = vmatpush.bf16.msrb.mxu1 %v2641_v41  ;;  %v3407_v24 = vld [vmem:[%s5250_s1 + $0x3b4] sm:$0xf0]  ;;  %v2673_v27 = vor.u32 %v3391_v21, %v2672_v20  ;;  %v3357_v29 = vld [vmem:[%s5250_s1 + $0x224] sm:$0xf0]  ;;  %v2600_v30 = vld [vmem:[%s5250_s1 + $0x2a0] sm:$0xf] }
  0x30   : > { %1843 = vmatpush.bf16.msrb.mxu2 %v2705_v42  ;;  %v2737_v31 = vor.u32 %v3407_v24, %v2736_v23  ;;  %v3373_v32 = vld [vmem:[%s5250_s1 + $0x2a4] sm:$0xf0]  ;;  %v2664_v33 = vld [vmem:[%s5250_s1 + $0x320] sm:$0xf]  ;;  %v2537_v37 = vor.u32 %v3357_v29, %v2536_v28  ;;  %v2528_v38 = vld [vmem:[%s5250_s1 + $0x210] sm:$0xf] }
  0x31   : > { %1856 = vmatpush.bf16.msrb.mxu3 %v2769_v46  ;;  %v3389_v34 = vld [vmem:[%s5250_s1 + $0x324] sm:$0xf0]  ;;  %v2728_v35 = vld [vmem:[%s5250_s1 + $0x3a0] sm:$0xf]  ;;  %v3355_v39 = vld [vmem:[%s5250_s1 + $0x214] sm:$0xf0]  ;;  %v2601_v41 = vor.u32 %v3373_v32, %v2600_v30 }
  0x32   : > { %1818 = vmatpush.bf16.msrb.mxu0 %v2569_v52  ;;  %v3405_v36 = vld [vmem:[%s5250_s1 + $0x3a4] sm:$0xf0]  ;;  %v2592_v40 = vld [vmem:[%s5250_s1 + $0x290] sm:$0xf]  ;;  %v2665_v42 = vor.u32 %v3389_v34, %v2664_v33  ;;  %v3371_v43 = vld [vmem:[%s5250_s1 + $0x294] sm:$0xf0] }
  0x33   : > { %1831 = vmatpush.bf16.msrb.mxu1 %v2633_v53  ;;  %v2656_v44 = vld [vmem:[%s5250_s1 + $0x310] sm:$0xf]  ;;  %v3387_v45 = vld [vmem:[%s5250_s1 + $0x314] sm:$0xf0]  ;;  %v2729_v46 = vor.u32 %v3405_v36, %v2728_v35  ;;  %v2529_v53 = vor.u32 %v3355_v39, %v2528_v38  ;;  %v3353_v55 = vld [vmem:[%s5250_s1 + $0x204] sm:$0xf0]  ;;  %v2593_v56 = vor.u32 %v3371_v43, %v2592_v40 }
  0x34   : > { %1844 = vmatpush.bf16.msrb.mxu2 %v2697_v54  ;;  %v2720_v50 = vld [vmem:[%s5250_s1 + $0x390] sm:$0xf]  ;;  %v3403_v51 = vld [vmem:[%s5250_s1 + $0x394] sm:$0xf0]  ;;  %v2520_v54 = vld [vmem:[%s5250_s1 + $0x200] sm:$0xf]  ;;  %v2657_v57 = vor.u32 %v3387_v45, %v2656_v44 }
  0x35   : > { %1857 = vmatpush.bf16.msrb.mxu3 %v2761_v58  ;;  %v3955_v47 = vld [vmem:[#allocation1 + $0x12] sm:$0xff]  ;;  %v3957_v48 = vld [vmem:[#allocation1] sm:$0xff]  ;;  %v3969_v52 = vld [vmem:[#allocation1 + $0x9] sm:$0xff]  ;;  %v2721_v61 = vor.u32 %v3403_v51, %v2720_v50  ;;  %v2521_v5 = vor.u32 %v3353_v55, %v2520_v54  ;;  %vm2192_vm1 = vsmask.f32 256  ;;  %vm2194_vm2 = vcmask 1041409  }
  0x36   : > { %1819 = vmatpush.bf16.msrb.mxu0 %v2561_v0  ;;  %v3959_v49 = vld [vmem:[#allocation1 + $0x1b] sm:$0xff]  ;;  %1799 = vmatmul.bf16.vlgmr.msra.gmra.mxu2 %v3955_v47  ;;  %v3369_v59 = vld [vmem:[%s5250_s1 + $0x284] sm:$0xf0]  ;;  %v2832_v1 = vld [vmem:[%s5250_s1 + $0x470] sm:$0xf] }
  0x37   : > { %1832 = vmatpush.bf16.msrb.mxu1 %v2625_v2  ;;  %1773 = vmatmul.bf16.vlgmr.msra.gmra.mxu0 %v3957_v48  ;;  %179 = vst [vmem:[#allocation1] ss:$9 sm:$0xff] %v166_v22  ;;  %v2584_v58 = vld [vmem:[%s5250_s1 + $0x280] sm:$0xf]  ;;  %v3385_v62 = vld [vmem:[%s5250_s1 + $0x304] sm:$0xf0]  ;;  %vm2193_vm4 = vmand %vm2186_vm0, %vm2192_vm1 }
  0x38   : > { %1845 = vmatpush.bf16.msrb.mxu2 %v2689_v3  ;;  %1812 = vmatmul.bf16.vlgmr.msra.gmra.mxu3 %v3959_v49  ;;  %v2648_v60 = vld [vmem:[%s5250_s1 + $0x300] sm:$0xf]  ;;  %v3401_v0 = vld [vmem:[%s5250_s1 + $0x384] sm:$0xf0]  ;;  %v3431_v2 = vld [vmem:[%s5250_s1 + $0x474] sm:$0xf0]  ;;  %v2585_v9 = vor.u32 %v3369_v59, %v2584_v58 }
  0x39   : > { %1858 = vmatpush.bf16.msrb.mxu3 %v2753_v7  ;;  %1786 = vmatmul.bf16.vlgmr.msra.gmra.mxu1 %v3969_v52  ;;  %v2712_v63 = vld [vmem:[%s5250_s1 + $0x380] sm:$0xf]  ;;  %v2896_v3 = vld [vmem:[%s5250_s1 + $0x4f0] sm:$0xf]  ;;  %v4007_v4 = vld [vmem:[%s3898_s17 + $0x4] sm:$0xf]  ;;  %v2649_v10 = vor.u32 %v3385_v62, %v2648_v60 }
  0x3a   : > { %1820 = vmatpush.bf16.msrb.mxu0 %v2553_v12  ;;  %v3447_v6 = vld [vmem:[%s5250_s1 + $0x4f4] sm:$0xf0]  ;;  %v2960_v7 = vld [vmem:[%s5250_s1 + $0x570] sm:$0xf]  ;;  %v2824_v13 = vld [vmem:[%s5250_s1 + $0x460] sm:$0xf] }
  0x3b   : > { %1833 = vmatpush.bf16.msrb.mxu1 %v2617_v14  ;;  %v3463_v8 = vld [vmem:[%s5250_s1 + $0x574] sm:$0xf0]  ;;  %v3024_v11 = vld [vmem:[%s5250_s1 + $0x5f0] sm:$0xf]  ;;  %v2713_v14 = vor.u32 %v3401_v0, %v2712_v63  ;;  %v3429_v16 = vld [vmem:[%s5250_s1 + $0x464] sm:$0xf0] }
  0x3c   : > { %1846 = vmatpush.bf16.msrb.mxu2 %v2681_v15  ;;  %v3479_v12 = vld [vmem:[%s5250_s1 + $0x5f4] sm:$0xf0]  ;;  %v2833_v15 = vor.u32 %v3431_v2, %v2832_v1  ;;  %v2888_v17 = vld [vmem:[%s5250_s1 + $0x4e0] sm:$0xf]  ;;  %v3445_v18 = vld [vmem:[%s5250_s1 + $0x4e4] sm:$0xf0]  ;;  %v2961_v20 = vor.u32 %v3463_v8, %v2960_v7  ;;  %v2825_v30 = vor.u32 %v3429_v16, %v2824_v13 }
  0x3d   : > { %1859 = vmatpush.bf16.msrb.mxu3 %v2745_v19  ;;  %v2897_v19 = vor.u32 %v3447_v6, %v2896_v3  ;;  %v2952_v21 = vld [vmem:[%s5250_s1 + $0x560] sm:$0xf]  ;;  %v3461_v22 = vld [vmem:[%s5250_s1 + $0x564] sm:$0xf0]  ;;  %v3025_v24 = vor.u32 %v3479_v12, %v3024_v11  ;;  %v2889_v32 = vor.u32 %v3445_v18, %v2888_v17  ;;  %v3427_v34 = vld [vmem:[%s5250_s1 + $0x454] sm:$0xf0] }
  0x3e   : > { %1821 = vmatpush.bf16.msrb.mxu0 %v2545_v25  ;;  %v4042_v23 = vld [vmem:[#allocation1 + $0x12] sm:$0xff]  ;;  %v4044_v25 = vld [vmem:[#allocation1] sm:$0xff]  ;;  %v3477_v29 = vld [vmem:[%s5250_s1 + $0x5e4] sm:$0xf0]  ;;  %v2953_v33 = vor.u32 %v3461_v22, %v2952_v21  ;;  %vm2195_vm3 = vsmask.f32 1280 }
  0x3f   : > { %1834 = vmatpush.bf16.msrb.mxu1 %v2609_v26  ;;  %v4046_v26 = vld [vmem:[#allocation1 + $0x1b] sm:$0xff]  ;;  %v2880_v35 = vld [vmem:[%s5250_s1 + $0x4d0] sm:$0xf]  ;;  %v188_v38 = vshrl.u32 %v4042_v23, 16  ;;  %v184_v43 = vshrl.u32 %v4044_v25, 16  ;;  %vm2196_vm5 = vmand %vm2194_vm2, %vm2195_vm3 }
  0x40   : > { %1847 = vmatpush.bf16.msrb.mxu2 %v2673_v27  ;;  %v4048_v27 = vld [vmem:[#allocation1 + $0x9] sm:$0xff]  ;;  %v3016_v28 = vld [vmem:[%s5250_s1 + $0x5e0] sm:$0xf]  ;;  %v3443_v36 = vld [vmem:[%s5250_s1 + $0x4d4] sm:$0xf0]  ;;  %v190_v44 = vshrl.u32 %v4046_v26, 16 }
  0x41   : > { %1860 = vmatpush.bf16.msrb.mxu3 %v2737_v31  ;;  %197 = vst [vmem:[#allocation1] ss:$9 sm:$0xff] %v4007_v4  ;;  %v2816_v31 = vld [vmem:[%s5250_s1 + $0x450] sm:$0xf]  ;;  %v3459_v40 = vld [vmem:[%s5250_s1 + $0x554] sm:$0xf0]  ;;  %v2881_v50 = vor.u32 %v3443_v36, %v2880_v35  ;;  %vm2197_vm6 = vmor %vm2196_vm5, %vm2193_vm4 }
  0x42   : > { %1822 = vmatpush.bf16.msrb.mxu0 %v2537_v37  ;;  %v3017_v37 = vor.u32 %v3477_v29, %v3016_v28  ;;  %v2944_v39 = vld [vmem:[%s5250_s1 + $0x550] sm:$0xf]  ;;  %v2817_v45 = vor.u32 %v3427_v34, %v2816_v31  ;;  %v3425_v54 = vld [vmem:[%s5250_s1 + $0x444] sm:$0xf0]  ;;  %v2872_v55 = vld [vmem:[%s5250_s1 + $0x4c0] sm:$0xf] }
  0x43   : > { %1835 = vmatpush.bf16.msrb.mxu1 %v2601_v41  ;;  %v3008_v41 = vld [vmem:[%s5250_s1 + $0x5d0] sm:$0xf]  ;;  %v2945_v51 = vor.u32 %v3459_v40, %v2944_v39  ;;  %v2936_v58 = vld [vmem:[%s5250_s1 + $0x540] sm:$0xf]  ;;  %v3457_v59 = vld [vmem:[%s5250_s1 + $0x544] sm:$0xf0] }
  0x44   : > { %1848 = vmatpush.bf16.msrb.mxu2 %v2665_v42  ;;  %v3475_v42 = vld [vmem:[%s5250_s1 + $0x5d4] sm:$0xf0]  ;;  %v3000_v60 = vld [vmem:[%s5250_s1 + $0x5c0] sm:$0xf]  ;;  %v2800_v62 = vld [vmem:[%s5250_s1 + $0x430] sm:$0xf] }
  0x45   : > { %1861 = vmatpush.bf16.msrb.mxu3 %v2729_v46  ;;  %v186_v46 = vshrl.u32 %v4048_v27, 16  ;;  %v3423_v0 = vld [vmem:[%s5250_s1 + $0x434] sm:$0xf0]  ;;  %v2864_v1 = vld [vmem:[%s5250_s1 + $0x4b0] sm:$0xf] }
  0x46   : > { %1823 = vmatpush.bf16.msrb.mxu0 %v2529_v53  ;;  %v2808_v53 = vld [vmem:[%s5250_s1 + $0x440] sm:$0xf]  ;;  %v3439_v2 = vld [vmem:[%s5250_s1 + $0x4b4] sm:$0xf0]  ;;  %v2928_v6 = vld [vmem:[%s5250_s1 + $0x530] sm:$0xf] }
  0x47   : > { %1836 = vmatpush.bf16.msrb.mxu1 %v2593_v56  ;;  %v3009_v56 = vor.u32 %v3475_v42, %v3008_v41  ;;  %v2809_v63 = vor.u32 %v3425_v54, %v2808_v53  ;;  %v3455_v7 = vld [vmem:[%s5250_s1 + $0x534] sm:$0xf0]  ;;  %v2992_v13 = vld [vmem:[%s5250_s1 + $0x5b0] sm:$0xf]  ;;  %v2865_v16 = vor.u32 %v3439_v2, %v2864_v1  ;;  %v2792_v18 = vld [vmem:[%s5250_s1 + $0x420] sm:$0xf] }
  0x48   : > { %1849 = vmatpush.bf16.msrb.mxu2 %v2657_v57  ;;  %v3441_v57 = vld [vmem:[%s5250_s1 + $0x4c4] sm:$0xf0]  ;;  %v4135_v8 = vld [vmem:[#allocation1] sm:$0xff]  ;;  %v2929_v17 = vor.u32 %v3455_v7, %v2928_v6  ;;  %v3419_v34 = vld [vmem:[%s5250_s1 + $0x414] sm:$0xf0] }
  0x49   : > { %1862 = vmatpush.bf16.msrb.mxu3 %v2721_v61  ;;  %v3473_v61 = vld [vmem:[%s5250_s1 + $0x5c4] sm:$0xf0]  ;;  %v2873_v3 = vor.u32 %v3441_v57, %v2872_v55  ;;  %v4141_v12 = vld [vmem:[#allocation1 + $0x1b] sm:$0xff]  ;;  %v2848_v35 = vld [vmem:[%s5250_s1 + $0x490] sm:$0xf] }
  0x4a   : > { %1824 = vmatpush.bf16.msrb.mxu0 %v2521_v5  ;;  %v2937_v5 = vor.u32 %v3457_v59, %v2936_v58  ;;  %v4139_v11 = vld [vmem:[#allocation1 + $0x9] sm:$0xff]  ;;  %v2920_v22 = vld [vmem:[%s5250_s1 + $0x520] sm:$0xf]  ;;  %v3451_v40 = vld [vmem:[%s5250_s1 + $0x514] sm:$0xf0] }
  0x4b   : > { %1837 = vmatpush.bf16.msrb.mxu1 %v2585_v9  ;;  %v3001_v9 = vor.u32 %v3473_v61, %v3000_v60  ;;  %v3437_v21 = vld [vmem:[%s5250_s1 + $0x4a4] sm:$0xf0]  ;;  %v2984_v28 = vld [vmem:[%s5250_s1 + $0x5a0] sm:$0xf]  ;;  %v2912_v39 = vld [vmem:[%s5250_s1 + $0x510] sm:$0xf] }
  0x4c   : > { %1850 = vmatpush.bf16.msrb.mxu2 %v2649_v10  ;;  %v4137_v10 = vld [vmem:[#allocation1 + $0x12] sm:$0xff]  ;;  %v3469_v29 = vld [vmem:[%s5250_s1 + $0x5a4] sm:$0xf0]  ;;  %v2913_v54 = vor.u32 %v3451_v40, %v2912_v39  ;;  %v2840_v55 = vld [vmem:[%s5250_s1 + $0x480] sm:$0xf] }
  0x4d   : > { %1863 = vmatpush.bf16.msrb.mxu3 %v2713_v14  ;;  %1825 = vmatmul.bf16.vlgmr.msrb.gmra.mxu0 %v184_v43  ;;  %v3471_v14 = vld [vmem:[%s5250_s1 + $0x5b4] sm:$0xf0]  ;;  %206 = vst [vmem:[#allocation1] ss:$9 sm:$0xff] %v4007_v4  ;;  %v2985_v36 = vor.u32 %v3469_v29, %v2984_v28  ;;  %v2976_v41 = vld [vmem:[%s5250_s1 + $0x590] sm:$0xf] }
  0x4e   : > { %1869 = vmatpush.bf16.msra.mxu0 %v2833_v15  ;;  %1838 = vmatmul.bf16.vlgmr.msrb.gmra.mxu1 %v186_v46  ;;  %v2801_v15 = vor.u32 %v3423_v0, %v2800_v62  ;;  %v2993_v4 = vor.u32 %v3471_v14, %v2992_v13  ;;  %v3467_v42 = vld [vmem:[%s5250_s1 + $0x594] sm:$0xf0]  ;;  %v2904_v57 = vld [vmem:[%s5250_s1 + $0x500] sm:$0xf]  ;;  %v3449_v59 = vld [vmem:[%s5250_s1 + $0x504] sm:$0xf0] }
  0x4f   : > { %1882 = vmatpush.bf16.msra.mxu1 %v2897_v19  ;;  %1851 = vmatmul.bf16.vlgmr.msrb.gmra.mxu2 %v188_v38  ;;  %v3421_v19 = vld [vmem:[%s5250_s1 + $0x424] sm:$0xf0]  ;;  %v2977_v58 = vor.u32 %v3467_v42, %v2976_v41  ;;  %v2968_v60 = vld [vmem:[%s5250_s1 + $0x580] sm:$0xf]  ;;  %v3088_v62 = vld [vmem:[%s5250_s1 + $0x670] sm:$0xf]  ;;  %v2905_v7 = vor.u32 %v3449_v59, %v2904_v57 }
  0x50   : > { %1895 = vmatpush.bf16.msra.mxu2 %v2961_v20  ;;  %1864 = vmatmul.bf16.vlgmr.msrb.gmra.mxu3 %v190_v44  ;;  %v2856_v20 = vld [vmem:[%s5250_s1 + $0x4a0] sm:$0xf]  ;;  %v3465_v61 = vld [vmem:[%s5250_s1 + $0x584] sm:$0xf0]  ;;  %v3152_v0 = vld [vmem:[%s5250_s1 + $0x6f0] sm:$0xf] }
  0x51   : > { %1908 = vmatpush.bf16.msra.mxu3 %v3025_v24  ;;  %v3453_v24 = vld [vmem:[%s5250_s1 + $0x524] sm:$0xf0]  ;;  %v2857_v31 = vor.u32 %v3437_v21, %v2856_v20  ;;  %v3511_v2 = vld [vmem:[%s5250_s1 + $0x6f4] sm:$0xf0]  ;;  %v2969_v14 = vor.u32 %v3465_v61, %v2968_v60  ;;  %v3144_v20 = vld [vmem:[%s5250_s1 + $0x6e0] sm:$0xf] }
  0x52   : > { %1870 = vmatpush.bf16.msra.mxu0 %v2825_v30  ;;  %v2793_v30 = vor.u32 %v3421_v19, %v2792_v18  ;;  %v3543_v13 = vld [vmem:[%s5250_s1 + $0x7f4] sm:$0xf0]  ;;  %v3080_v18 = vld [vmem:[%s5250_s1 + $0x660] sm:$0xf]  ;;  %v3493_v19 = vld [vmem:[%s5250_s1 + $0x664] sm:$0xf0] }
  0x53   : > { %1883 = vmatpush.bf16.msra.mxu1 %v2889_v32  ;;  %v2921_v32 = vor.u32 %v3453_v24, %v2920_v22  ;;  %v3509_v21 = vld [vmem:[%s5250_s1 + $0x6e4] sm:$0xf0]  ;;  %v3208_v22 = vld [vmem:[%s5250_s1 + $0x760] sm:$0xf]  ;;  %v3200_v39 = vld [vmem:[%s5250_s1 + $0x750] sm:$0xf] }
  0x54   : > { %1896 = vmatpush.bf16.msra.mxu2 %v2953_v33  ;;  %v2784_v33 = vld [vmem:[%s5250_s1 + $0x410] sm:$0xf]  ;;  %v3525_v24 = vld [vmem:[%s5250_s1 + $0x764] sm:$0xf0]  ;;  %v3272_v28 = vld [vmem:[%s5250_s1 + $0x7e0] sm:$0xf] }
  0x55   : > { %1909 = vmatpush.bf16.msra.mxu3 %v3017_v37  ;;  %v3435_v37 = vld [vmem:[%s5250_s1 + $0x494] sm:$0xf0]  ;;  %v3541_v29 = vld [vmem:[%s5250_s1 + $0x7e4] sm:$0xf0]  ;;  %v3264_v41 = vld [vmem:[%s5250_s1 + $0x7d0] sm:$0xf] }
  0x56   : > { %1871 = vmatpush.bf16.msra.mxu0 %v2817_v45  ;;  %v2785_v45 = vor.u32 %v3419_v34, %v2784_v33  ;;  %v2849_v53 = vor.u32 %v3435_v37, %v2848_v35  ;;  %v3072_v33 = vld [vmem:[%s5250_s1 + $0x650] sm:$0xf]  ;;  %v3491_v34 = vld [vmem:[%s5250_s1 + $0x654] sm:$0xf0]  ;;  %v3505_v57 = vld [vmem:[%s5250_s1 + $0x6c4] sm:$0xf0] }
  0x57   : > { %1884 = vmatpush.bf16.msra.mxu1 %v2881_v50  ;;  %v2776_v50 = vld [vmem:[%s5250_s1 + $0x400] sm:$0xf]  ;;  %v3136_v35 = vld [vmem:[%s5250_s1 + $0x6d0] sm:$0xf]  ;;  %v3507_v37 = vld [vmem:[%s5250_s1 + $0x6d4] sm:$0xf0] }
  0x58   : > { %1897 = vmatpush.bf16.msra.mxu2 %v2945_v51  ;;  %v3417_v51 = vld [vmem:[%s5250_s1 + $0x404] sm:$0xf0]  ;;  %v3523_v40 = vld [vmem:[%s5250_s1 + $0x754] sm:$0xf0]  ;;  %v3256_v60 = vld [vmem:[%s5250_s1 + $0x7c0] sm:$0xf] }
  0x59   : > { %1910 = vmatpush.bf16.msra.mxu3 %v3009_v56  ;;  %v3433_v56 = vld [vmem:[%s5250_s1 + $0x484] sm:$0xf0]  ;;  %v2777_v1 = vor.u32 %v3417_v51, %v2776_v50  ;;  %v3539_v42 = vld [vmem:[%s5250_s1 + $0x7d4] sm:$0xf0]  ;;  %v3137_v50 = vor.u32 %v3507_v37, %v3136_v35  ;;  %v3201_v51 = vor.u32 %v3523_v40, %v3200_v39  ;;  %v3104_v35 = vld [vmem:[%s5250_s1 + $0x690] sm:$0xf] }
  0x5a   : > { %1872 = vmatpush.bf16.msra.mxu0 %v2809_v63  ;;  %v3495_v63 = vld [vmem:[%s5250_s1 + $0x674] sm:$0xf0]  ;;  %v2841_v6 = vor.u32 %v3433_v56, %v2840_v55  ;;  %v3128_v55 = vld [vmem:[%s5250_s1 + $0x6c0] sm:$0xf]  ;;  %v3265_v56 = vor.u32 %v3539_v42, %v3264_v41  ;;  %v3521_v59 = vld [vmem:[%s5250_s1 + $0x744] sm:$0xf0] }
  0x5b   : > { %1885 = vmatpush.bf16.msra.mxu1 %v2873_v3  ;;  %v3216_v3 = vld [vmem:[%s5250_s1 + $0x770] sm:$0xf]  ;;  %v3537_v61 = vld [vmem:[%s5250_s1 + $0x7c4] sm:$0xf0]  ;;  %v3499_v37 = vld [vmem:[%s5250_s1 + $0x694] sm:$0xf0] }
  0x5c   : > { %1898 = vmatpush.bf16.msra.mxu2 %v2937_v5  ;;  %v3527_v5 = vld [vmem:[%s5250_s1 + $0x774] sm:$0xf0]  ;;  %v3168_v39 = vld [vmem:[%s5250_s1 + $0x710] sm:$0xf]  ;;  %v3010_v23 = vld [vmem:[%s5250_s1 + $0x5d8] sm:$0xf0] }
  0x5d   : > { %1911 = vmatpush.bf16.msra.mxu3 %v3001_v9  ;;  %v3280_v9 = vld [vmem:[%s5250_s1 + $0x7f0] sm:$0xf]  ;;  %v3515_v40 = vld [vmem:[%s5250_s1 + $0x714] sm:$0xf0]  ;;  %v2810_v25 = vld [vmem:[%s5250_s1 + $0x448] sm:$0xf0] }
  0x5e   : > { %1873 = vmatpush.bf16.msra.mxu0 %v2801_v15  ;;  %v3089_v15 = vor.u32 %v3495_v63, %v3088_v62  ;;  %v3129_v63 = vor.u32 %v3505_v57, %v3128_v55  ;;  %v3232_v41 = vld [vmem:[%s5250_s1 + $0x790] sm:$0xf]  ;;  %v3531_v42 = vld [vmem:[%s5250_s1 + $0x794] sm:$0xf0]  ;;  %v3169_v55 = vor.u32 %v3515_v40, %v3168_v39  ;;  %v3160_v57 = vld [vmem:[%s5250_s1 + $0x700] sm:$0xf] }
  0x5f   : > { %1886 = vmatpush.bf16.msra.mxu1 %v2865_v16  ;;  %v3153_v16 = vor.u32 %v3511_v2, %v3152_v0  ;;  %v3487_v2 = vld [vmem:[%s5250_s1 + $0x634] sm:$0xf0]  ;;  %v3440_v26 = vld [vmem:[%s5250_s1 + $0x4c4] sm:$0xf] }
  0x60   : > { %1899 = vmatpush.bf16.msra.mxu2 %v2929_v17  ;;  %v3217_v17 = vor.u32 %v3527_v5, %v3216_v3  ;;  %v3120_v3 = vld [vmem:[%s5250_s1 + $0x6b0] sm:$0xf]  ;;  %v3257_v5 = vor.u32 %v3537_v61, %v3256_v60  ;;  %v3224_v60 = vld [vmem:[%s5250_s1 + $0x780] sm:$0xf]  ;;  %v3529_v61 = vld [vmem:[%s5250_s1 + $0x784] sm:$0xf0] }
  0x61   : > { %1912 = vmatpush.bf16.msra.mxu3 %v2993_v4  ;;  %v3281_v4 = vor.u32 %v3543_v13, %v3280_v9  ;;  %v3519_v9 = vld [vmem:[%s5250_s1 + $0x734] sm:$0xf0]  ;;  %v3248_v13 = vld [vmem:[%s5250_s1 + $0x7b0] sm:$0xf] }
  0x62   : > { %1874 = vmatpush.bf16.msra.mxu0 %v2793_v30  ;;  %v3081_v30 = vor.u32 %v3493_v19, %v3080_v18  ;;  %v3048_v18 = vld [vmem:[%s5250_s1 + $0x620] sm:$0xf]  ;;  %v3485_v19 = vld [vmem:[%s5250_s1 + $0x624] sm:$0xf0] }
  0x63   : > { %1887 = vmatpush.bf16.msra.mxu1 %v2857_v31  ;;  %v3145_v31 = vor.u32 %v3509_v21, %v3144_v20  ;;  %v3112_v20 = vld [vmem:[%s5250_s1 + $0x6a0] sm:$0xf]  ;;  %v3501_v21 = vld [vmem:[%s5250_s1 + $0x6a4] sm:$0xf0] }
  0x64   : > { %1900 = vmatpush.bf16.msra.mxu2 %v2921_v32  ;;  %v3209_v32 = vor.u32 %v3525_v24, %v3208_v22  ;;  %v3176_v22 = vld [vmem:[%s5250_s1 + $0x720] sm:$0xf]  ;;  %v3517_v24 = vld [vmem:[%s5250_s1 + $0x724] sm:$0xf0] }
  0x65   : > { %1913 = vmatpush.bf16.msra.mxu3 %v2985_v36  ;;  %v3273_v36 = vor.u32 %v3541_v29, %v3272_v28  ;;  %v3240_v28 = vld [vmem:[%s5250_s1 + $0x7a0] sm:$0xf]  ;;  %v3533_v29 = vld [vmem:[%s5250_s1 + $0x7a4] sm:$0xf0] }
  0x66   : > { %1875 = vmatpush.bf16.msra.mxu0 %v2785_v45  ;;  %v3073_v45 = vor.u32 %v3491_v34, %v3072_v33  ;;  %v3040_v33 = vld [vmem:[%s5250_s1 + $0x610] sm:$0xf]  ;;  %v3483_v34 = vld [vmem:[%s5250_s1 + $0x614] sm:$0xf0] }
  0x67   : > { %1888 = vmatpush.bf16.msra.mxu1 %v2849_v53  ;;  %v3064_v53 = vld [vmem:[%s5250_s1 + $0x640] sm:$0xf] }
  0x68   : > { %1901 = vmatpush.bf16.msra.mxu2 %v2913_v54  ;;  %v3489_v54 = vld [vmem:[%s5250_s1 + $0x644] sm:$0xf0] }
  0x69   : > { %1914 = vmatpush.bf16.msra.mxu3 %v2977_v58  ;;  %v3192_v58 = vld [vmem:[%s5250_s1 + $0x740] sm:$0xf]  ;;  %v3065_v62 = vor.u32 %v3489_v54, %v3064_v53  ;;  %v3105_v54 = vor.u32 %v3499_v37, %v3104_v35  ;;  %v3348_v35 = vld [vmem:[%s5250_s1 + $0x1e4] sm:$0xf] }
  0x6a   : > { %1876 = vmatpush.bf16.msra.mxu0 %v2777_v1  ;;  %v3193_v0 = vor.u32 %v3521_v59, %v3192_v58  ;;  %v3056_v1 = vld [vmem:[%s5250_s1 + $0x630] sm:$0xf]  ;;  %v3096_v53 = vld [vmem:[%s5250_s1 + $0x680] sm:$0xf]  ;;  %v3513_v58 = vld [vmem:[%s5250_s1 + $0x704] sm:$0xf0]  ;;  %v3233_v59 = vor.u32 %v3531_v42, %v3232_v41 }
  0x6b   : > { %1889 = vmatpush.bf16.msra.mxu1 %v2841_v6  ;;  %v3503_v6 = vld [vmem:[%s5250_s1 + $0x6b4] sm:$0xf0]  ;;  %v3298_v42 = vld [vmem:[%s5250_s1 + $0x54] sm:$0xf] }
  0x6c   : > { %1902 = vmatpush.bf16.msra.mxu2 %v2905_v7  ;;  %v3184_v7 = vld [vmem:[%s5250_s1 + $0x730] sm:$0xf] }
  0x6d   : > { %1915 = vmatpush.bf16.msra.mxu3 %v2969_v14  ;;  %1877 = vmatmul.bf16.vlgmr.msra.gmra.mxu0 %v4135_v8  ;;  %v3535_v14 = vld [vmem:[%s5250_s1 + $0x7b4] sm:$0xf0] }
  0x6e   : > { %1921 = vmatpush.bf16.msrb.mxu0 %v3089_v15  ;;  %1890 = vmatmul.bf16.vlgmr.msra.gmra.mxu1 %v4139_v11  ;;  %v3057_v15 = vor.u32 %v3487_v2, %v3056_v1  ;;  %v4427_v1 = vld [vmem:[#allocation1] sm:$0xff] }
  0x6f   : > { %1934 = vmatpush.bf16.msrb.mxu1 %v3153_v16  ;;  %1903 = vmatmul.bf16.vlgmr.msra.gmra.mxu2 %v4137_v10  ;;  %v3121_v16 = vor.u32 %v3503_v6, %v3120_v3  ;;  %v2386_v3 = vld [vmem:[%s5250_s1 + $0xf8] sm:$0xf0] }
  0x70   : > { %1947 = vmatpush.bf16.msrb.mxu2 %v3217_v17  ;;  %1916 = vmatmul.bf16.vlgmr.msra.gmra.mxu3 %v4141_v12  ;;  %v3185_v17 = vor.u32 %v3519_v9, %v3184_v7  ;;  %v2450_v6 = vld [vmem:[%s5250_s1 + $0x178] sm:$0xf0]  ;;  %v3161_v9 = vor.u32 %v3513_v58, %v3160_v57 }
  0x71   : > { %1960 = vmatpush.bf16.msrb.mxu3 %v3281_v4  ;;  %v3249_v4 = vor.u32 %v3535_v14, %v3248_v13  ;;  %v3350_v13 = vld [vmem:[%s5250_s1 + $0x1f4] sm:$0xf]  ;;  %v2514_v14 = vld [vmem:[%s5250_s1 + $0x1f8] sm:$0xf0] }
  0x72   : > { %1922 = vmatpush.bf16.msrb.mxu0 %v3081_v30  ;;  %v3049_v30 = vor.u32 %v3485_v19, %v3048_v18  ;;  %v4445_v18 = vld [vmem:[#allocation1 + $0x12] sm:$0xff]  ;;  %v4447_v19 = vld [vmem:[#allocation1 + $0x9] sm:$0xff]  ;;  %v2498_v57 = vld [vmem:[%s5250_s1 + $0x1d8] sm:$0xf0] }
  0x73   : > { %1935 = vmatpush.bf16.msrb.mxu1 %v3145_v31  ;;  %v3113_v31 = vor.u32 %v3501_v21, %v3112_v20  ;;  %v4449_v20 = vld [vmem:[#allocation1 + $0x1b] sm:$0xff] }
  0x74   : > { %1948 = vmatpush.bf16.msrb.mxu2 %v3209_v32  ;;  %v3177_v32 = vor.u32 %v3517_v24, %v3176_v22  ;;  %v3300_v22 = vld [vmem:[%s5250_s1 + $0x64] sm:$0xf]  ;;  %v2314_v24 = vld [vmem:[%s5250_s1 + $0x68] sm:$0xf0]  ;;  %v217_v37 = vshrl.u32 %v4449_v20, 16 }
  0x75   : > { %1961 = vmatpush.bf16.msrb.mxu3 %v3273_v36  ;;  %v3241_v36 = vor.u32 %v3533_v29, %v3240_v28  ;;  %v3316_v28 = vld [vmem:[%s5250_s1 + $0xe4] sm:$0xf]  ;;  %v2517_v29 = vor.u32 %v3350_v13, %v2514_v14  ;;  %v2317_v39 = vor.u32 %v3300_v22, %v2314_v24  ;;  %v2354_v22 = vld [vmem:[%s5250_s1 + $0xb8] sm:$0xf0]  ;;  %v3326_v24 = vld [vmem:[%s5250_s1 + $0x134] sm:$0xf] }
  0x76   : > { %1923 = vmatpush.bf16.msrb.mxu0 %v3073_v45  ;;  %v3041_v45 = vor.u32 %v3483_v34, %v3040_v33  ;;  %v215_v33 = vshrl.u32 %v4445_v18, 16  ;;  %v213_v34 = vshrl.u32 %v4447_v19, 16 }
  0x77   : > { %1936 = vmatpush.bf16.msrb.mxu1 %v3137_v50  ;;  %v3032_v50 = vld [vmem:[%s5250_s1 + $0x600] sm:$0xf] }
  0x78   : > { %1949 = vmatpush.bf16.msrb.mxu2 %v3201_v51  ;;  %v3481_v51 = vld [vmem:[%s5250_s1 + $0x604] sm:$0xf0] }
  0x79   : > { %1962 = vmatpush.bf16.msrb.mxu3 %v3265_v56  ;;  %v3497_v56 = vld [vmem:[%s5250_s1 + $0x684] sm:$0xf0]  ;;  %v3033_v2 = vor.u32 %v3481_v51, %v3032_v50  ;;  %v3314_v50 = vld [vmem:[%s5250_s1 + $0xd4] sm:$0xf] }
  0x7a   : > { %1924 = vmatpush.bf16.msrb.mxu0 %v3065_v62  ;;  %v3302_v62 = vld [vmem:[%s5250_s1 + $0x74] sm:$0xf]  ;;  %v3097_v7 = vor.u32 %v3497_v56, %v3096_v53  ;;  %v2370_v53 = vld [vmem:[%s5250_s1 + $0xd8] sm:$0xf0] }
  0x7b   : > { %1937 = vmatpush.bf16.msrb.mxu1 %v3129_v63  ;;  %v2322_v63 = vld [vmem:[%s5250_s1 + $0x78] sm:$0xf0]  ;;  %v3346_v56 = vld [vmem:[%s5250_s1 + $0x1d4] sm:$0xf] }
  0x7c   : > { %1950 = vmatpush.bf16.msrb.mxu2 %v3193_v0  ;;  %v3318_v0 = vld [vmem:[%s5250_s1 + $0xf4] sm:$0xf] }
  0x7d   : > { %1963 = vmatpush.bf16.msrb.mxu3 %v3257_v5  ;;  %v3334_v5 = vld [vmem:[%s5250_s1 + $0x174] sm:$0xf] }
  0x7e   : > { %1925 = vmatpush.bf16.msrb.mxu0 %v3057_v15  ;;  %v3225_v15 = vor.u32 %v3529_v61, %v3224_v60  ;;  %v2453_v21 = vor.u32 %v3334_v5, %v2450_v6  ;;  %v3296_v61 = vld [vmem:[%s5250_s1 + $0x44] sm:$0xf]  ;;  %v2426_v5 = vld [vmem:[%s5250_s1 + $0x148] sm:$0xf0] }
  0x7f   : > { %1938 = vmatpush.bf16.msrb.mxu1 %v3121_v16  ;;  %v2325_v16 = vor.u32 %v3302_v62, %v2322_v63  ;;  %v2298_v62 = vld [vmem:[%s5250_s1 + $0x48] sm:$0xf0]  ;;  %v3312_v63 = vld [vmem:[%s5250_s1 + $0xc4] sm:$0xf] }
  0x80   : > { %1951 = vmatpush.bf16.msrb.mxu2 %v3185_v17  ;;  %v211_v17 = vshrl.u32 %v4427_v1, 16  ;;  %v3344_v6 = vld [vmem:[%s5250_s1 + $0x1c4] sm:$0xf] }
  0x81   : > { %1964 = vmatpush.bf16.msrb.mxu3 %v3249_v4  ;;  %v2389_v4 = vor.u32 %v3318_v0, %v2386_v3  ;;  %v2501_v0 = vor.u32 %v3346_v56, %v2498_v57  ;;  %v3328_v3 = vld [vmem:[%s5250_s1 + $0x144] sm:$0xf]  ;;  %v3290_v57 = vld [vmem:[%s5250_s1 + $0x14] sm:$0xf] }
  0x82   : > { %1926 = vmatpush.bf16.msrb.mxu0 %v3049_v30  ;;  %v2378_v30 = vld [vmem:[%s5250_s1 + $0xe8] sm:$0xf0]  ;;  %v2429_v14 = vor.u32 %v3328_v3, %v2426_v5  ;;  %v3288_v5 = vld [vmem:[%s5250_s1 + $0x4] sm:$0xf] }
  0x83   : > { %1939 = vmatpush.bf16.msrb.mxu1 %v3113_v31  ;;  %v3332_v31 = vld [vmem:[%s5250_s1 + $0x164] sm:$0xf]  ;;  %v2381_v40 = vor.u32 %v3316_v28, %v2378_v30  ;;  %v2418_v28 = vld [vmem:[%s5250_s1 + $0x138] sm:$0xf0] }
  0x84   : > { %1952 = vmatpush.bf16.msrb.mxu2 %v3177_v32  ;;  %v2442_v32 = vld [vmem:[%s5250_s1 + $0x168] sm:$0xf0]  ;;  %v2482_v30 = vld [vmem:[%s5250_s1 + $0x1b8] sm:$0xf0] }
  0x85   : > { %1965 = vmatpush.bf16.msrb.mxu3 %v3241_v36  ;;  %v2506_v36 = vld [vmem:[%s5250_s1 + $0x1e8] sm:$0xf0]  ;;  %v2445_v41 = vor.u32 %v3332_v31, %v2442_v32 }
  0x86   : > { %1927 = vmatpush.bf16.msrb.mxu0 %v3041_v45  ;;  %v2306_v45 = vld [vmem:[%s5250_s1 + $0x58] sm:$0xf0]  ;;  %v2509_v51 = vor.u32 %v3348_v35, %v2506_v36  ;;  %v2421_v35 = vor.u32 %v3326_v24, %v2418_v28  ;;  %v3292_v36 = vld [vmem:[%s5250_s1 + $0x24] sm:$0xf]  ;;  %v3366_v24 = vld [vmem:[%s5250_s1 + $0x274] sm:$0xf] }
  0x87   : > { %1940 = vmatpush.bf16.msrb.mxu1 %v3105_v54  ;;  %v3330_v54 = vld [vmem:[%s5250_s1 + $0x154] sm:$0xf]  ;;  %v2309_v58 = vor.u32 %v3298_v42, %v2306_v45  ;;  %v2346_v42 = vld [vmem:[%s5250_s1 + $0xa8] sm:$0xf0]  ;;  %v3324_v45 = vld [vmem:[%s5250_s1 + $0x124] sm:$0xf] }
  0x88   : > { %1953 = vmatpush.bf16.msrb.mxu2 %v3169_v55  ;;  %v2434_v55 = vld [vmem:[%s5250_s1 + $0x158] sm:$0xf0] }
  0x89   : > { %1966 = vmatpush.bf16.msrb.mxu3 %v3233_v59  ;;  %v2373_v59 = vor.u32 %v3314_v50, %v2370_v53  ;;  %v2437_v60 = vor.u32 %v3330_v54, %v2434_v55  ;;  %v2410_v50 = vld [vmem:[%s5250_s1 + $0x128] sm:$0xf0]  ;;  %v2578_v28 = vld [vmem:[%s5250_s1 + $0x278] sm:$0xf0] }
  0x8a   : > { %1928 = vmatpush.bf16.msrb.mxu0 %v3033_v2  ;;  %v2362_v2 = vld [vmem:[%s5250_s1 + $0xc8] sm:$0xf0]  ;;  %v2413_v56 = vor.u32 %v3324_v45, %v2410_v50  ;;  %v2581_v45 = vor.u32 %v3366_v24, %v2578_v28  ;;  %v3392_v24 = vld [vmem:[%s5250_s1 + $0x344] sm:$0xf] }
  0x8b   : > { %1941 = vmatpush.bf16.msrb.mxu1 %v3097_v7  ;;  %v2490_v7 = vld [vmem:[%s5250_s1 + $0x1c8] sm:$0xf0]  ;;  %v2365_v13 = vor.u32 %v3312_v63, %v2362_v2  ;;  %v2402_v63 = vld [vmem:[%s5250_s1 + $0x118] sm:$0xf0] }
  0x8c   : > { %1954 = vmatpush.bf16.msrb.mxu2 %v3161_v9  ;;  %v2301_v9 = vor.u32 %v3296_v61, %v2298_v62  ;;  %v2474_v53 = vld [vmem:[%s5250_s1 + $0x1a8] sm:$0xf0]  ;;  %v2338_v61 = vld [vmem:[%s5250_s1 + $0x98] sm:$0xf0]  ;;  %v3322_v62 = vld [vmem:[%s5250_s1 + $0x114] sm:$0xf] }
  0x8d   : > { %1967 = vmatpush.bf16.msrb.mxu3 %v3225_v15  ;;  %1929 = vmatmul.bf16.vlgmr.msrb.gmra.mxu0 %v211_v17  ;;  %v3294_v15 = vld [vmem:[%s5250_s1 + $0x34] sm:$0xf]  ;;  %v2466_v2 = vld [vmem:[%s5250_s1 + $0x198] sm:$0xf0]  ;;  %v2682_v28 = vld [vmem:[%s5250_s1 + $0x348] sm:$0xf0] }
  0x8e   : > { %1973 = vmatpush.bf16.msra.mxu0 %v2325_v16  ;;  %1942 = vmatmul.bf16.vlgmr.msrb.gmra.mxu1 %v213_v34  ;;  %v2290_v16 = vld [vmem:[%s5250_s1 + $0x38] sm:$0xf0] }
  0x8f   : > { %1986 = vmatpush.bf16.msra.mxu1 %v2389_v4  ;;  %1955 = vmatmul.bf16.vlgmr.msrb.gmra.mxu2 %v215_v33  ;;  %v3310_v4 = vld [vmem:[%s5250_s1 + $0xb4] sm:$0xf]  ;;  %v2293_v31 = vor.u32 %v3294_v15, %v2290_v16  ;;  %v3320_v15 = vld [vmem:[%s5250_s1 + $0x104] sm:$0xf] }
  0x90   : > { %1999 = vmatpush.bf16.msra.mxu2 %v2453_v21  ;;  %1968 = vmatmul.bf16.vlgmr.msrb.gmra.mxu3 %v217_v37  ;;  %v2493_v21 = vor.u32 %v3344_v6, %v2490_v7  ;;  %v2357_v32 = vor.u32 %v3310_v4, %v2354_v22  ;;  %v2266_v6 = vld [vmem:[%s5250_s1 + $0x8] sm:$0xf0] }
  0x91   : > { %2012 = vmatpush.bf16.msra.mxu3 %v2517_v29  ;;  %v3342_v29 = vld [vmem:[%s5250_s1 + $0x1b4] sm:$0xf]  ;;  %v2394_v4 = vld [vmem:[%s5250_s1 + $0x108] sm:$0xf0] }
  0x92   : > { %1974 = vmatpush.bf16.msra.mxu0 %v2317_v39  ;;  %v2282_v39 = vld [vmem:[%s5250_s1 + $0x28] sm:$0xf0] }
  0x93   : > { %1987 = vmatpush.bf16.msra.mxu1 %v2381_v40  ;;  %v3308_v40 = vld [vmem:[%s5250_s1 + $0xa4] sm:$0xf]  ;;  %v2285_v54 = vor.u32 %v3292_v36, %v2282_v39  ;;  %v2458_v22 = vld [vmem:[%s5250_s1 + $0x188] sm:$0xf0]  ;;  %v2397_v39 = vor.u32 %v3320_v15, %v2394_v4  ;;  %v2754_v15 = vld [vmem:[%s5250_s1 + $0x3d8] sm:$0xf0] }
  0x94   : > { %2000 = vmatpush.bf16.msra.mxu2 %v2445_v41  ;;  %v2485_v41 = vor.u32 %v3342_v29, %v2482_v30  ;;  %v2349_v55 = vor.u32 %v3308_v40, %v2346_v42  ;;  %v3382_v29 = vld [vmem:[%s5250_s1 + $0x2f4] sm:$0xf]  ;;  %v2269_v30 = vor.u32 %v3288_v5, %v2266_v6 }
  0x95   : > { %2013 = vmatpush.bf16.msra.mxu3 %v2509_v51  ;;  %v3340_v51 = vld [vmem:[%s5250_s1 + $0x1a4] sm:$0xf]  ;;  %v3414_v40 = vld [vmem:[%s5250_s1 + $0x3f4] sm:$0xf] }
  0x96   : > { %1975 = vmatpush.bf16.msra.mxu0 %v2309_v58  ;;  %v2274_v58 = vld [vmem:[%s5250_s1 + $0x18] sm:$0xf0]  ;;  %v3378_v5 = vld [vmem:[%s5250_s1 + $0x2d4] sm:$0xf] }
  0x97   : > { %1988 = vmatpush.bf16.msra.mxu1 %v2373_v59  ;;  %v3306_v59 = vld [vmem:[%s5250_s1 + $0x94] sm:$0xf]  ;;  %v2277_v3 = vor.u32 %v3290_v57, %v2274_v58  ;;  %v2634_v57 = vld [vmem:[%s5250_s1 + $0x2e8] sm:$0xf0]  ;;  %v3396_v58 = vld [vmem:[%s5250_s1 + $0x364] sm:$0xf] }
  0x98   : > { %2001 = vmatpush.bf16.msra.mxu2 %v2437_v60  ;;  %v2477_v60 = vor.u32 %v3340_v51, %v2474_v53  ;;  %v2341_v7 = vor.u32 %v3306_v59, %v2338_v61  ;;  %v3364_v53 = vld [vmem:[%s5250_s1 + $0x264] sm:$0xf]  ;;  %v2698_v59 = vld [vmem:[%s5250_s1 + $0x368] sm:$0xf0] }
  0x99   : > { %2014 = vmatpush.bf16.msra.mxu3 %v2501_v0  ;;  %v3338_v0 = vld [vmem:[%s5250_s1 + $0x194] sm:$0xf]  ;;  %v2762_v61 = vld [vmem:[%s5250_s1 + $0x3e8] sm:$0xf0] }
  0x9a   : > { %1976 = vmatpush.bf16.msra.mxu0 %v2301_v9  ;;  %v2405_v9 = vor.u32 %v3322_v62, %v2402_v63  ;;  %v2469_v16 = vor.u32 %v3338_v0, %v2466_v2  ;;  %v2701_v0 = vor.u32 %v3396_v58, %v2698_v59  ;;  %v3362_v2 = vld [vmem:[%s5250_s1 + $0x254] sm:$0xf]  ;;  %v2538_v58 = vld [vmem:[%s5250_s1 + $0x228] sm:$0xf0]  ;;  %v3372_v59 = vld [vmem:[%s5250_s1 + $0x2a4] sm:$0xf] }
  0x9b   : > { %1989 = vmatpush.bf16.msra.mxu1 %v2365_v13  ;;  %v3304_v13 = vld [vmem:[%s5250_s1 + $0x84] sm:$0xf] }
  0x9c   : > { %2002 = vmatpush.bf16.msra.mxu2 %v2429_v14  ;;  %v2330_v14 = vld [vmem:[%s5250_s1 + $0x88] sm:$0xf0] }
  0x9d   : > { %2015 = vmatpush.bf16.msra.mxu3 %v2493_v21  ;;  %v3336_v21 = vld [vmem:[%s5250_s1 + $0x184] sm:$0xf]  ;;  %v2333_v36 = vor.u32 %v3304_v13, %v2330_v14  ;;  %v2690_v13 = vld [vmem:[%s5250_s1 + $0x358] sm:$0xf0]  ;;  %v3410_v14 = vld [vmem:[%s5250_s1 + $0x3d4] sm:$0xf] }
  0x9e   : > { %1977 = vmatpush.bf16.msra.mxu0 %v2293_v31  ;;  %v2642_v31 = vld [vmem:[%s5250_s1 + $0x2f8] sm:$0xf0]  ;;  %v2461_v42 = vor.u32 %v3336_v21, %v2458_v22  ;;  %v3360_v21 = vld [vmem:[%s5250_s1 + $0x244] sm:$0xf]  ;;  %v2554_v22 = vld [vmem:[%s5250_s1 + $0x248] sm:$0xf0] }
  0x9f   : > { %1990 = vmatpush.bf16.msra.mxu1 %v2357_v32  ;;  %v3398_v32 = vld [vmem:[%s5250_s1 + $0x374] sm:$0xf]  ;;  %v2645_v50 = vor.u32 %v3382_v29, %v2642_v31  ;;  %v3408_v29 = vld [vmem:[%s5250_s1 + $0x3c4] sm:$0xf]  ;;  %v2557_v31 = vor.u32 %v3360_v21, %v2554_v22  ;;  %v2722_v22 = vld [vmem:[%s5250_s1 + $0x398] sm:$0xf0] }
  0xa0   : > { %2003 = vmatpush.bf16.msra.mxu2 %v2421_v35  ;;  %v2706_v35 = vld [vmem:[%s5250_s1 + $0x378] sm:$0xf0]  ;;  %v3402_v21 = vld [vmem:[%s5250_s1 + $0x394] sm:$0xf] }
  0xa1   : > { %2016 = vmatpush.bf16.msra.mxu3 %v2485_v41  ;;  %v2770_v41 = vld [vmem:[%s5250_s1 + $0x3f8] sm:$0xf0]  ;;  %v2709_v51 = vor.u32 %v3398_v32, %v2706_v35  ;;  %v2685_v35 = vor.u32 %v3392_v24, %v2682_v28  ;;  %v3368_v24 = vld [vmem:[%s5250_s1 + $0x284] sm:$0xf] }
  0xa2   : > { %1978 = vmatpush.bf16.msra.mxu0 %v2285_v54  ;;  %v2570_v54 = vld [vmem:[%s5250_s1 + $0x268] sm:$0xf0] }
  0xa3   : > { %1991 = vmatpush.bf16.msra.mxu1 %v2349_v55  ;;  %v3380_v55 = vld [vmem:[%s5250_s1 + $0x2e4] sm:$0xf]  ;;  %v2573_v62 = vor.u32 %v3364_v53, %v2570_v54  ;;  %v2738_v53 = vld [vmem:[%s5250_s1 + $0x3b8] sm:$0xf0] }
  0xa4   : > { %2004 = vmatpush.bf16.msra.mxu2 %v2413_v56  ;;  %v2773_v56 = vor.u32 %v3414_v40, %v2770_v41  ;;  %v2637_v63 = vor.u32 %v3380_v55, %v2634_v57  ;;  %v3374_v40 = vld [vmem:[%s5250_s1 + $0x2b4] sm:$0xf]  ;;  %v3356_v57 = vld [vmem:[%s5250_s1 + $0x224] sm:$0xf] }
  0xa5   : > { %2017 = vmatpush.bf16.msra.mxu3 %v2477_v60  ;;  %v3412_v60 = vld [vmem:[%s5250_s1 + $0x3e4] sm:$0xf] }
  0xa6   : > { %1979 = vmatpush.bf16.msra.mxu0 %v2277_v3  ;;  %v2562_v3 = vld [vmem:[%s5250_s1 + $0x258] sm:$0xf0]  ;;  %v2765_v6 = vor.u32 %v3412_v60, %v2762_v61  ;;  %v2602_v61 = vld [vmem:[%s5250_s1 + $0x2a8] sm:$0xf0] }
  0xa7   : > { %1992 = vmatpush.bf16.msra.mxu1 %v2341_v7  ;;  %v2626_v7 = vld [vmem:[%s5250_s1 + $0x2d8] sm:$0xf0] }
  0xa8   : > { %2005 = vmatpush.bf16.msra.mxu2 %v2405_v9  ;;  %v3394_v9 = vld [vmem:[%s5250_s1 + $0x354] sm:$0xf]  ;;  %v2629_v4 = vor.u32 %v3378_v5, %v2626_v7 }
  0xa9   : > { %2018 = vmatpush.bf16.msra.mxu3 %v2469_v16  ;;  %v2565_v16 = vor.u32 %v3362_v2, %v2562_v3  ;;  %v2730_v2 = vld [vmem:[%s5250_s1 + $0x3a8] sm:$0xf0]  ;;  %v2541_v3 = vor.u32 %v3356_v57, %v2538_v58  ;;  %v3354_v5 = vld [vmem:[%s5250_s1 + $0x214] sm:$0xf] }
  0xaa   : > { %1980 = vmatpush.bf16.msra.mxu0 %v2269_v30  ;;  %v2746_v30 = vld [vmem:[%s5250_s1 + $0x3c8] sm:$0xf0]  ;;  %v3478_v58 = vld [vmem:[%s5250_s1 + $0x5f4] sm:$0xf] }
  0xab   : > { %1993 = vmatpush.bf16.msra.mxu1 %v2333_v36  ;;  %v3358_v36 = vld [vmem:[%s5250_s1 + $0x234] sm:$0xf]  ;;  %v2749_v41 = vor.u32 %v3408_v29, %v2746_v30  ;;  %v2586_v30 = vld [vmem:[%s5250_s1 + $0x288] sm:$0xf0] }
  0xac   : > { %2006 = vmatpush.bf16.msra.mxu2 %v2397_v39  ;;  %v2546_v39 = vld [vmem:[%s5250_s1 + $0x238] sm:$0xf0] }
  0xad   : > { %2019 = vmatpush.bf16.msra.mxu3 %v2461_v42  ;;  %1981 = vmatmul.bf16.vlgmr.msra.gmra.mxu0 %v3957_v48  ;;  %v3376_v48 = vld [vmem:[%s5250_s1 + $0x2c4] sm:$0xf]  ;;  %v2610_v42 = vld [vmem:[%s5250_s1 + $0x2b8] sm:$0xf0]  ;;  %v2549_v54 = vor.u32 %v3358_v36, %v2546_v39  ;;  %v2650_v36 = vld [vmem:[%s5250_s1 + $0x308] sm:$0xf0] }
  0xae   : > { %2025 = vmatpush.bf16.msrb.mxu0 %v2581_v45  ;;  %1994 = vmatmul.bf16.vlgmr.msra.gmra.mxu1 %v3969_v52  ;;  %v2618_v52 = vld [vmem:[%s5250_s1 + $0x2c8] sm:$0xf0]  ;;  %v3390_v45 = vld [vmem:[%s5250_s1 + $0x334] sm:$0xf]  ;;  %v2613_v55 = vor.u32 %v3374_v40, %v2610_v42  ;;  %v3400_v39 = vld [vmem:[%s5250_s1 + $0x384] sm:$0xf] }
  0xaf   : > { %2038 = vmatpush.bf16.msrb.mxu1 %v2645_v50  ;;  %2007 = vmatmul.bf16.vlgmr.msra.gmra.mxu2 %v3955_v47  ;;  %v2693_v47 = vor.u32 %v3394_v9, %v2690_v13  ;;  %v2621_v32 = vor.u32 %v3376_v48, %v2618_v52  ;;  %v2674_v50 = vld [vmem:[%s5250_s1 + $0x338] sm:$0xf0]  ;;  %v3370_v13 = vld [vmem:[%s5250_s1 + $0x294] sm:$0xf]  ;;  %v2522_v52 = vld [vmem:[%s5250_s1 + $0x208] sm:$0xf0] }
  0xb0   : > { %2051 = vmatpush.bf16.msrb.mxu2 %v2709_v51  ;;  %2020 = vmatmul.bf16.vlgmr.msra.gmra.mxu3 %v3959_v49  ;;  %v2757_v49 = vor.u32 %v3410_v14, %v2754_v15  ;;  %v3406_v51 = vld [vmem:[%s5250_s1 + $0x3b4] sm:$0xf]  ;;  %v2530_v9 = vld [vmem:[%s5250_s1 + $0x218] sm:$0xf0]  ;;  %v2714_v40 = vld [vmem:[%s5250_s1 + $0x388] sm:$0xf0] }
  0xb1   : > { %2064 = vmatpush.bf16.msrb.mxu3 %v2773_v56  ;;  %v2677_v56 = vor.u32 %v3390_v45, %v2674_v50  ;;  %v2741_v60 = vor.u32 %v3406_v51, %v2738_v53  ;;  %v2594_v14 = vld [vmem:[%s5250_s1 + $0x298] sm:$0xf0]  ;;  %v2533_v48 = vor.u32 %v3354_v5, %v2530_v9  ;;  %v3446_v45 = vld [vmem:[%s5250_s1 + $0x4f4] sm:$0xf]  ;;  %v3444_v5 = vld [vmem:[%s5250_s1 + $0x4e4] sm:$0xf] }
  0xb2   : > { %2026 = vmatpush.bf16.msrb.mxu0 %v2573_v62  ;;  %v3388_v62 = vld [vmem:[%s5250_s1 + $0x324] sm:$0xf]  ;;  %v2597_v28 = vor.u32 %v3370_v13, %v2594_v14  ;;  %v2834_v42 = vld [vmem:[%s5250_s1 + $0x478] sm:$0xf0]  ;;  %v3462_v53 = vld [vmem:[%s5250_s1 + $0x574] sm:$0xf] }
  0xb3   : > { %2039 = vmatpush.bf16.msrb.mxu1 %v2637_v63  ;;  %v2666_v63 = vld [vmem:[%s5250_s1 + $0x328] sm:$0xf0]  ;;  %v2898_v51 = vld [vmem:[%s5250_s1 + $0x4f8] sm:$0xf0]  ;;  %v3460_v13 = vld [vmem:[%s5250_s1 + $0x564] sm:$0xf] }
  0xb4   : > { %2052 = vmatpush.bf16.msrb.mxu2 %v2701_v0  ;;  %v3404_v0 = vld [vmem:[%s5250_s1 + $0x3a4] sm:$0xf]  ;;  %v2669_v7 = vor.u32 %v3388_v62, %v2666_v63  ;;  %v2901_v63 = vor.u32 %v3446_v45, %v2898_v51  ;;  %v2890_v9 = vld [vmem:[%s5250_s1 + $0x4e8] sm:$0xf0] }
  0xb5   : > { %2065 = vmatpush.bf16.msrb.mxu3 %v2765_v6  ;;  %v2605_v6 = vor.u32 %v3372_v59, %v2602_v61  ;;  %v2733_v15 = vor.u32 %v3404_v0, %v2730_v2  ;;  %v3026_v59 = vld [vmem:[%s5250_s1 + $0x5f8] sm:$0xf0]  ;;  %v2717_v61 = vor.u32 %v3400_v39, %v2714_v40  ;;  %v3428_v2 = vld [vmem:[%s5250_s1 + $0x464] sm:$0xf]  ;;  %v2954_v14 = vld [vmem:[%s5250_s1 + $0x568] sm:$0xf0] }
  0xb6   : > { %2027 = vmatpush.bf16.msrb.mxu0 %v2565_v16  ;;  %v3386_v16 = vld [vmem:[%s5250_s1 + $0x314] sm:$0xf]  ;;  %v2938_v51 = vld [vmem:[%s5250_s1 + $0x548] sm:$0xf0] }
  0xb7   : > { %2040 = vmatpush.bf16.msrb.mxu1 %v2629_v4  ;;  %v2658_v4 = vld [vmem:[%s5250_s1 + $0x318] sm:$0xf0]  ;;  %v3474_v40 = vld [vmem:[%s5250_s1 + $0x5d4] sm:$0xf] }
  0xb8   : > { %2053 = vmatpush.bf16.msrb.mxu2 %v2693_v47  ;;  %v4799_v47 = vld [vmem:[%s5251_s2] sm:$0x3]  ;;  %v2661_v29 = vor.u32 %v3386_v16, %v2658_v4  ;;  %v3476_v16 = vld [vmem:[%s5250_s1 + $0x5e4] sm:$0xf]  ;;  %v3018_v4 = vld [vmem:[%s5250_s1 + $0x5e8] sm:$0xf0]  ;;  %v3013_v27 = vor.u32 %v3474_v40, %v3010_v23 }
  0xb9   : > { %2066 = vmatpush.bf16.msrb.mxu3 %v2757_v49  ;;  %v3352_v49 = vld [vmem:[%s5250_s1 + $0x204] sm:$0xf]  ;;  %v2786_v40 = vld [vmem:[%s5250_s1 + $0x418] sm:$0xf0]  ;;  %v3434_v23 = vld [vmem:[%s5250_s1 + $0x494] sm:$0xf] }
  0xba   : > { %2028 = vmatpush.bf16.msrb.mxu0 %v2557_v31  ;;  %v3384_v31 = vld [vmem:[%s5250_s1 + $0x304] sm:$0xf]  ;;  %v2525_v50 = vor.u32 %v3352_v49, %v2522_v52  ;;  %v2957_v49 = vor.u32 %v3460_v13, %v2954_v14  ;;  %v1762_v19 = vperm.slane %v4799_v47, 1 }
  0xbb   : > { %2041 = vmatpush.bf16.msrb.mxu1 %v2621_v32  ;;  %v1761_v32 = vperm.slane %v4799_v47, 0  ;;  %v2653_v57 = vor.u32 %v3384_v31, %v2650_v36  ;;  %v3021_v31 = vor.u32 %v3476_v16, %v3018_v4  ;;  %v2946_v36 = vld [vmem:[%s5250_s1 + $0x558] sm:$0xf0]  ;;  %v3420_v16 = vld [vmem:[%s5250_s1 + $0x424] sm:$0xf] }
  0xbc   : > { %2054 = vmatpush.bf16.msrb.mxu2 %v2685_v35  ;;  %v2725_v35 = vor.u32 %v3402_v21, %v2722_v22  ;;  %v1800_v22 = vpop.f32.mrf.mxu2  ;;  %v2794_v4 = vld [vmem:[%s5250_s1 + $0x428] sm:$0xf0] }
  0xbd   : > { %2067 = vmatpush.bf16.msrb.mxu3 %v2749_v41  ;;  %v3430_v41 = vld [vmem:[%s5250_s1 + $0x474] sm:$0xf] }
  0xbe   : > { %2029 = vmatpush.bf16.msrb.mxu0 %v2549_v54  ;;  %v2962_v54 = vld [vmem:[%s5250_s1 + $0x578] sm:$0xf0]  ;;  %v2837_v62 = vor.u32 %v3430_v41, %v2834_v42 }
  0xbf   : > { %2042 = vmatpush.bf16.msrb.mxu1 %v2613_v55  ;;  %v1774_v55 = vpop.f32.mrf.mxu0  ;;  %v2965_v0 = vor.u32 %v3462_v53, %v2962_v54  ;;  %v3472_v53 = vld [vmem:[%s5250_s1 + $0x5c4] sm:$0xf]  ;;  %v3002_v54 = vld [vmem:[%s5250_s1 + $0x5c8] sm:$0xf0] }
  0xc0   : > { %2055 = vmatpush.bf16.msrb.mxu2 %v2677_v56  ;;  %v2589_v56 = vor.u32 %v3368_v24, %v2586_v30  ;;  %v3426_v24 = vld [vmem:[%s5250_s1 + $0x454] sm:$0xf]  ;;  %v1813_v30 = vpop.f32.mrf.mxu3 }
  0xc1   : > { %2068 = vmatpush.bf16.msrb.mxu3 %v2741_v60  ;;  %v1775_v60 = vadd.f32 %v1774_v55, %v1761_v32  ;;  %v2882_v32 = vld [vmem:[%s5250_s1 + $0x4d8] sm:$0xf0] }
  0xc2   : > { %2030 = vmatpush.bf16.msrb.mxu0 %v2541_v3  ;;  %v2826_v3 = vld [vmem:[%s5250_s1 + $0x468] sm:$0xf0] }
  0xc3   : > { %2043 = vmatpush.bf16.msrb.mxu1 %v2605_v6  ;;  %v1787_v6 = vpop.f32.mrf.mxu1  ;;  %v2829_v21 = vor.u32 %v3428_v2, %v2826_v3  ;;  %v3454_v2 = vld [vmem:[%s5250_s1 + $0x534] sm:$0xf]  ;;  %v2930_v3 = vld [vmem:[%s5250_s1 + $0x538] sm:$0xf0] }
  0xc4   : > { %2056 = vmatpush.bf16.msrb.mxu2 %v2669_v7  ;;  %v3029_v7 = vor.u32 %v3478_v58, %v3026_v59  ;;  %v3422_v59 = vld [vmem:[%s5250_s1 + $0x434] sm:$0xf]  ;;  %v2933_v14 = vor.u32 %v3454_v2, %v2930_v3  ;;  %v3090_v2 = vld [vmem:[%s5250_s1 + $0x678] sm:$0xf0] }
  0xc5   : > { %2069 = vmatpush.bf16.msrb.mxu3 %v2733_v15  ;;  %v1788_v15 = vadd.f32 %v1787_v6, %v1775_v60  ;;  %v2802_v60 = vld [vmem:[%s5250_s1 + $0x438] sm:$0xf0]  ;;  %v3510_v3 = vld [vmem:[%s5250_s1 + $0x6f4] sm:$0xf] }
  0xc6   : > { %2031 = vmatpush.bf16.msrb.mxu0 %v2533_v48  ;;  %v2893_v48 = vor.u32 %v3444_v5, %v2890_v9  ;;  %v3470_v5 = vld [vmem:[%s5250_s1 + $0x5b4] sm:$0xf]  ;;  %v2994_v6 = vld [vmem:[%s5250_s1 + $0x5b8] sm:$0xf0] }
  0xc7   : > { %2044 = vmatpush.bf16.msrb.mxu1 %v2597_v28  ;;  %v1801_v52 = vadd.f32 %v1800_v22, %v1788_v15  ;;  %v2818_v28 = vld [vmem:[%s5250_s1 + $0x458] sm:$0xf0]  ;;  %v1776_v39 = vpop.f32.mrf.mxu0 }
  0xc8   : > { %2057 = vmatpush.bf16.msrb.mxu2 %v2661_v29  ;;  %v3442_v29 = vld [vmem:[%s5250_s1 + $0x4d4] sm:$0xf]  ;;  %v2821_v41 = vor.u32 %v3426_v24, %v2818_v28  ;;  %v2922_v24 = vld [vmem:[%s5250_s1 + $0x528] sm:$0xf0]  ;;  %v3468_v28 = vld [vmem:[%s5250_s1 + $0x5a4] sm:$0xf] }
  0xc9   : > { %2070 = vmatpush.bf16.msrb.mxu3 %v2725_v35  ;;  %v3458_v35 = vld [vmem:[%s5250_s1 + $0x554] sm:$0xf]  ;;  %v2885_v42 = vor.u32 %v3442_v29, %v2882_v32  ;;  %v2986_v29 = vld [vmem:[%s5250_s1 + $0x5a8] sm:$0xf0] }
  0xca   : > { %2032 = vmatpush.bf16.msrb.mxu0 %v2525_v50  ;;  %v2949_v45 = vor.u32 %v3458_v35, %v2946_v36  ;;  %v3424_v50 = vld [vmem:[%s5250_s1 + $0x444] sm:$0xf]  ;;  %v3418_v39 = vld [vmem:[%s5250_s1 + $0x414] sm:$0xf] }
  0xcb   : > { %2045 = vmatpush.bf16.msrb.mxu1 %v2589_v56  ;;  %v2813_v55 = vor.u32 %v3424_v50, %v2810_v25  ;;  %v1802_v56 = vpop.f32.mrf.mxu2  ;;  %v2914_v50 = vld [vmem:[%s5250_s1 + $0x518] sm:$0xf0] }
  0xcc   : > { %2058 = vmatpush.bf16.msrb.mxu2 %v2653_v57  ;;  %v3432_v56 = vld [vmem:[%s5250_s1 + $0x484] sm:$0xf] }
  0xcd   : > { %2071 = vmatpush.bf16.msrb.mxu3 %v2717_v61  ;;  %2033 = vmatmul.bf16.vlgmr.msrb.gmra.mxu0 %v184_v43  ;;  %v1789_v43 = vpop.f32.mrf.mxu1  ;;  %v3438_v61 = vld [vmem:[%s5250_s1 + $0x4b4] sm:$0xf] }
  0xce   : > { %2077 = vmatpush.bf16.msra.mxu0 %v2837_v62  ;;  %2046 = vmatmul.bf16.vlgmr.msrb.gmra.mxu1 %v186_v46  ;;  %v3456_v46 = vld [vmem:[%s5250_s1 + $0x544] sm:$0xf]  ;;  %v1815_v62 = vpop.f32.mrf.mxu3  ;;  %v2978_v43 = vld [vmem:[%s5250_s1 + $0x598] sm:$0xf0] }
  0xcf   : > { %2090 = vmatpush.bf16.msra.mxu1 %v2901_v63  ;;  %2059 = vmatmul.bf16.vlgmr.msrb.gmra.mxu2 %v188_v38  ;;  %v1814_v38 = vadd.f32 %v1813_v30, %v1801_v52  ;;  %v2941_v58 = vor.u32 %v3456_v46, %v2938_v51  ;;  %v3005_v63 = vor.u32 %v3472_v53, %v3002_v54  ;;  %v1826_v9 = vpop.f32.mrf.mxu0  ;;  %v3452_v52 = vld [vmem:[%s5250_s1 + $0x524] sm:$0xf]  ;;  %v2778_v51 = vld [vmem:[%s5250_s1 + $0x408] sm:$0xf0] }
  0xd0   : > { %2103 = vmatpush.bf16.msra.mxu2 %v2965_v0  ;;  %2072 = vmatmul.bf16.vlgmr.msrb.gmra.mxu3 %v190_v44  ;;  %v2874_v44 = vld [vmem:[%s5250_s1 + $0x4c8] sm:$0xf0]  ;;  %v2866_v0 = vld [vmem:[%s5250_s1 + $0x4b8] sm:$0xf0]  ;;  %v2925_v35 = vor.u32 %v3452_v52, %v2922_v24  ;;  %v3416_v46 = vld [vmem:[%s5250_s1 + $0x404] sm:$0xf] }
  0xd1   : > { %2116 = vmatpush.bf16.msra.mxu3 %v3029_v7  ;;  %v2877_v57 = vor.u32 %v3440_v26, %v2874_v44  ;;  %v2805_v7 = vor.u32 %v3422_v59, %v2802_v60  ;;  %v2869_v13 = vor.u32 %v3438_v61, %v2866_v0  ;;  %v1827_v15 = vadd.f32 %v1826_v9, %v1814_v38  ;;  %v3466_v26 = vld [vmem:[%s5250_s1 + $0x594] sm:$0xf]  ;;  %v2906_v61 = vld [vmem:[%s5250_s1 + $0x508] sm:$0xf0]  ;;  %v3464_v62 = vld [vmem:[%s5250_s1 + $0x584] sm:$0xf] }
  0xd2   : > { %2078 = vmatpush.bf16.msra.mxu0 %v2829_v21  ;;  %v3436_v21 = vld [vmem:[%s5250_s1 + $0x4a4] sm:$0xf]  ;;  %v2989_v38 = vor.u32 %v3468_v28, %v2986_v29  ;;  %v2981_v60 = vor.u32 %v3466_v26, %v2978_v43  ;;  %v3494_v0 = vld [vmem:[%s5250_s1 + $0x674] sm:$0xf]  ;;  %v3218_v9 = vld [vmem:[%s5250_s1 + $0x778] sm:$0xf0] }
  0xd3   : > { %2091 = vmatpush.bf16.msra.mxu1 %v2893_v48  ;;  %v2997_v48 = vor.u32 %v3470_v5, %v2994_v6  ;;  %v1852_v36 = vpop.f32.mrf.mxu2  ;;  %v2781_v5 = vor.u32 %v3416_v46, %v2778_v51  ;;  %v3154_v6 = vld [vmem:[%s5250_s1 + $0x6f8] sm:$0xf0]  ;;  %v3492_v24 = vld [vmem:[%s5250_s1 + $0x664] sm:$0xf]  ;;  %v3082_v28 = vld [vmem:[%s5250_s1 + $0x668] sm:$0xf0] }
  0xd4   : > { %2104 = vmatpush.bf16.msra.mxu2 %v2957_v49  ;;  %v2858_v49 = vld [vmem:[%s5250_s1 + $0x4a8] sm:$0xf0]  ;;  %v3508_v29 = vld [vmem:[%s5250_s1 + $0x6e4] sm:$0xf]  ;;  %v3522_v26 = vld [vmem:[%s5250_s1 + $0x754] sm:$0xf] }
  0xd5   : > { %2117 = vmatpush.bf16.msra.mxu3 %v3021_v31  ;;  %v1839_v22 = vpop.f32.mrf.mxu1  ;;  %v2797_v31 = vor.u32 %v3420_v16, %v2794_v4  ;;  %v2861_v32 = vor.u32 %v3436_v21, %v2858_v49  ;;  %v3282_v16 = vld [vmem:[%s5250_s1 + $0x7f8] sm:$0xf0]  ;;  %v3157_v49 = vor.u32 %v3510_v3, %v3154_v6  ;;  %v3486_v3 = vld [vmem:[%s5250_s1 + $0x634] sm:$0xf] }
  0xd6   : > { %2079 = vmatpush.bf16.msra.mxu0 %v2821_v41  ;;  %v1840_v30 = vadd.f32 %v1839_v22, %v1827_v15  ;;  %v1865_v25 = vpop.f32.mrf.mxu3  ;;  %v3542_v15 = vld [vmem:[%s5250_s1 + $0x7f4] sm:$0xf]  ;;  %v3093_v22 = vor.u32 %v3494_v0, %v3090_v2  ;;  %v3202_v43 = vld [vmem:[%s5250_s1 + $0x758] sm:$0xf0] }
  0xd7   : > { %2092 = vmatpush.bf16.msra.mxu1 %v2885_v42  ;;  %v2850_v42 = vld [vmem:[%s5250_s1 + $0x498] sm:$0xf0]  ;;  %v1828_v53 = vpop.f32.mrf.mxu0  ;;  %v3502_v6 = vld [vmem:[%s5250_s1 + $0x6b4] sm:$0xf] }
  0xd8   : > { %2105 = vmatpush.bf16.msra.mxu2 %v2949_v45  ;;  %v1853_v41 = vadd.f32 %v1852_v36, %v1840_v30  ;;  %v3450_v45 = vld [vmem:[%s5250_s1 + $0x514] sm:$0xf]  ;;  %v2853_v54 = vor.u32 %v3434_v23, %v2850_v42  ;;  %v3285_v30 = vor.u32 %v3542_v15, %v3282_v16  ;;  %v3540_v36 = vld [vmem:[%s5250_s1 + $0x7e4] sm:$0xf]  ;;  %v3074_v42 = vld [vmem:[%s5250_s1 + $0x658] sm:$0xf0]  ;;  %v3205_v53 = vor.u32 %v3522_v26, %v3202_v43 }
  0xd9   : > { %2118 = vmatpush.bf16.msra.mxu3 %v3013_v27  ;;  %v2789_v27 = vor.u32 %v3418_v39, %v2786_v40  ;;  %v3274_v39 = vld [vmem:[%s5250_s1 + $0x7e8] sm:$0xf0]  ;;  %v3085_v40 = vor.u32 %v3492_v24, %v3082_v28  ;;  %v3534_v15 = vld [vmem:[%s5250_s1 + $0x7b4] sm:$0xf]  ;;  %v3250_v16 = vld [vmem:[%s5250_s1 + $0x7b8] sm:$0xf0] }
  0xda   : > { %2080 = vmatpush.bf16.msra.mxu0 %v2813_v55  ;;  %v5008_v44 = vadd.f32 %v1865_v25, %v1853_v41  ;;  %v2917_v55 = vor.u32 %v3450_v45, %v2914_v50  ;;  %v3490_v41 = vld [vmem:[%s5250_s1 + $0x654] sm:$0xf]  ;;  %v3277_v50 = vor.u32 %v3540_v36, %v3274_v39  ;;  %v3138_v25 = vld [vmem:[%s5250_s1 + $0x6d8] sm:$0xf0]  ;;  %v3253_v24 = vor.u32 %v3534_v15, %v3250_v16  ;;  %v3532_v36 = vld [vmem:[%s5250_s1 + $0x7a4] sm:$0xf] }
  0xdb   : > { %2093 = vmatpush.bf16.msra.mxu1 %v2877_v57  ;;  %v2842_v57 = vld [vmem:[%s5250_s1 + $0x488] sm:$0xf0]  ;;  %v1854_v4 = vpop.f32.mrf.mxu2  ;;  %v3506_v45 = vld [vmem:[%s5250_s1 + $0x6d4] sm:$0xf]  ;;  %v3077_v46 = vor.u32 %v3490_v41, %v3074_v42 }
  0xdc   : > { %2106 = vmatpush.bf16.msra.mxu2 %v2941_v58  ;;  %v3448_v58 = vld [vmem:[%s5250_s1 + $0x504] sm:$0xf]  ;;  %v3141_v51 = vor.u32 %v3506_v45, %v3138_v25  ;;  %v3242_v39 = vld [vmem:[%s5250_s1 + $0x7a8] sm:$0xf0]  ;;  %v3042_v25 = vld [vmem:[%s5250_s1 + $0x618] sm:$0xf0] }
  0xdd   : > { %2119 = vmatpush.bf16.msra.mxu3 %v3005_v63  ;;  %v1841_v59 = vpop.f32.mrf.mxu1  ;;  %v2970_v63 = vld [vmem:[%s5250_s1 + $0x588] sm:$0xf0]  ;;  %v3498_v26 = vld [vmem:[%s5250_s1 + $0x694] sm:$0xf]  ;;  %v3245_v43 = vor.u32 %v3532_v36, %v3242_v39 }
  0xde   : > { %2081 = vmatpush.bf16.msra.mxu0 %v2805_v7  ;;  %v3526_v7 = vld [vmem:[%s5250_s1 + $0x774] sm:$0xf]  ;;  %v2973_v21 = vor.u32 %v3464_v62, %v2970_v63  ;;  %v3536_v59 = vld [vmem:[%s5250_s1 + $0x7c4] sm:$0xf] }
  0xdf   : > { %2094 = vmatpush.bf16.msra.mxu1 %v2869_v13  ;;  %v2845_v13 = vor.u32 %v3432_v56, %v2842_v57  ;;  %v3221_v52 = vor.u32 %v3526_v7, %v3218_v9  ;;  %v3520_v56 = vld [vmem:[%s5250_s1 + $0x744] sm:$0xf]  ;;  %v3194_v57 = vld [vmem:[%s5250_s1 + $0x748] sm:$0xf0]  ;;  %v3122_v9 = vld [vmem:[%s5250_s1 + $0x6b8] sm:$0xf0] }
  0xe0   : > { %2107 = vmatpush.bf16.msra.mxu2 %v2933_v14  ;;  %v2909_v14 = vor.u32 %v3448_v58, %v2906_v61  ;;  %v3197_v2 = vor.u32 %v3520_v56, %v3194_v57  ;;  %v3496_v56 = vld [vmem:[%s5250_s1 + $0x684] sm:$0xf] }
  0xe1   : > { %2120 = vmatpush.bf16.msra.mxu3 %v2997_v48  ;;  %v1867_v48 = vpop.f32.mrf.mxu3 }
  0xe2   : > { %2082 = vmatpush.bf16.msra.mxu0 %v2797_v31  ;;  %v3146_v31 = vld [vmem:[%s5250_s1 + $0x6e8] sm:$0xf0]  ;;  %v3484_v48 = vld [vmem:[%s5250_s1 + $0x624] sm:$0xf] }
  0xe3   : > { %2095 = vmatpush.bf16.msra.mxu1 %v2861_v32  ;;  %v3524_v32 = vld [vmem:[%s5250_s1 + $0x764] sm:$0xf]  ;;  %v3149_v23 = vor.u32 %v3508_v29, %v3146_v31  ;;  %v3114_v29 = vld [vmem:[%s5250_s1 + $0x6a8] sm:$0xf0] }
  0xe4   : > { %2108 = vmatpush.bf16.msra.mxu2 %v2925_v35  ;;  %v3210_v35 = vld [vmem:[%s5250_s1 + $0x768] sm:$0xf0] }
  0xe5   : > { %2121 = vmatpush.bf16.msra.mxu3 %v2989_v38  ;;  %v3213_v38 = vor.u32 %v3524_v32, %v3210_v35  ;;  %v3178_v31 = vld [vmem:[%s5250_s1 + $0x728] sm:$0xf0] }
  0xe6   : > { %2083 = vmatpush.bf16.msra.mxu0 %v2789_v27  ;;  %v3266_v27 = vld [vmem:[%s5250_s1 + $0x7d8] sm:$0xf0] }
  0xe7   : > { %2096 = vmatpush.bf16.msra.mxu1 %v2853_v54  ;;  %v3504_v54 = vld [vmem:[%s5250_s1 + $0x6c4] sm:$0xf] }
  0xe8   : > { %2109 = vmatpush.bf16.msra.mxu2 %v2917_v55  ;;  %v3130_v55 = vld [vmem:[%s5250_s1 + $0x6c8] sm:$0xf0] }
  0xe9   : > { %2122 = vmatpush.bf16.msra.mxu3 %v2981_v60  ;;  %v3258_v60 = vld [vmem:[%s5250_s1 + $0x7c8] sm:$0xf0]  ;;  %v3133_v0 = vor.u32 %v3504_v54, %v3130_v55 }
  0xea   : > { %2084 = vmatpush.bf16.msra.mxu0 %v2781_v5  ;;  %v1878_v58 = vpop.f32.mrf.mxu0  ;;  %v3058_v5 = vld [vmem:[%s5250_s1 + $0x638] sm:$0xf0]  ;;  %v3034_v55 = vld [vmem:[%s5250_s1 + $0x608] sm:$0xf0] }
  0xeb   : > { %2097 = vmatpush.bf16.msra.mxu1 %v2845_v13  ;;  %v1879_v61 = vadd.f32 %v1878_v58, %v5008_v44  ;;  %v1891_v63 = vpop.f32.mrf.mxu1  ;;  %v3261_v44 = vor.u32 %v3536_v59, %v3258_v60  ;;  %v3518_v13 = vld [vmem:[%s5250_s1 + $0x734] sm:$0xf]  ;;  %v3061_v4 = vor.u32 %v3486_v3, %v3058_v5  ;;  %v3098_v58 = vld [vmem:[%s5250_s1 + $0x688] sm:$0xf0]  ;;  %v3512_v59 = vld [vmem:[%s5250_s1 + $0x704] sm:$0xf] }
  0xec   : > { %2110 = vmatpush.bf16.msra.mxu2 %v2909_v14  ;;  %v3186_v14 = vld [vmem:[%s5250_s1 + $0x738] sm:$0xf0]  ;;  %v3162_v60 = vld [vmem:[%s5250_s1 + $0x708] sm:$0xf0]  ;;  %v3101_v3 = vor.u32 %v3496_v56, %v3098_v58 }
  0xed   : > { %2123 = vmatpush.bf16.msra.mxu3 %v2973_v21  ;;  %2085 = vmatmul.bf16.vlgmr.msra.gmra.mxu0 %v4135_v8  ;;  %v3538_v8 = vld [vmem:[%s5250_s1 + $0x7d4] sm:$0xf]  ;;  %v1892_v7 = vadd.f32 %v1891_v63, %v1879_v61  ;;  %v3125_v21 = vor.u32 %v3502_v6, %v3122_v9  ;;  %v3226_v63 = vld [vmem:[%s5250_s1 + $0x788] sm:$0xf0]  ;;  %v3165_v5 = vor.u32 %v3512_v59, %v3162_v60 }
  0xee   : > { %2129 = vmatpush.bf16.msrb.mxu0 %v3093_v22  ;;  %2098 = vmatmul.bf16.vlgmr.msra.gmra.mxu1 %v4139_v11  ;;  %v3066_v11 = vld [vmem:[%s5250_s1 + $0x648] sm:$0xf0]  ;;  %v3189_v22 = vor.u32 %v3518_v13, %v3186_v14 }
  0xef   : > { %2142 = vmatpush.bf16.msrb.mxu1 %v3157_v49  ;;  %2111 = vmatmul.bf16.vlgmr.msra.gmra.mxu2 %v4137_v10  ;;  %v3488_v10 = vld [vmem:[%s5250_s1 + $0x644] sm:$0xf]  ;;  %v3050_v49 = vld [vmem:[%s5250_s1 + $0x628] sm:$0xf0] }
  0xf0   : > { %2155 = vmatpush.bf16.msrb.mxu2 %v3221_v52  ;;  %2124 = vmatmul.bf16.vlgmr.msra.gmra.mxu3 %v4141_v12  ;;  %v3269_v12 = vor.u32 %v3538_v8, %v3266_v27  ;;  %v3069_v62 = vor.u32 %v3488_v10, %v3066_v11  ;;  %v3500_v52 = vld [vmem:[%s5250_s1 + $0x6a4] sm:$0xf]  ;;  %v3106_v8 = vld [vmem:[%s5250_s1 + $0x698] sm:$0xf0]  ;;  %v3514_v27 = vld [vmem:[%s5250_s1 + $0x714] sm:$0xf] }
  0xf1   : > { %2168 = vmatpush.bf16.msrb.mxu3 %v3285_v30  ;;  %v3516_v30 = vld [vmem:[%s5250_s1 + $0x724] sm:$0xf]  ;;  %v3117_v42 = vor.u32 %v3500_v52, %v3114_v29  ;;  %v3109_v11 = vor.u32 %v3498_v26, %v3106_v8 }
  0xf2   : > { %2130 = vmatpush.bf16.msrb.mxu0 %v3085_v40  ;;  %v1904_v28 = vpop.f32.mrf.mxu2  ;;  %v1880_v40 = vpop.f32.mrf.mxu0  ;;  %v3181_v45 = vor.u32 %v3516_v30, %v3178_v31 }
  0xf3   : > { %2143 = vmatpush.bf16.msrb.mxu1 %v3149_v23  ;;  %v1905_v32 = vadd.f32 %v1904_v28, %v1892_v7  ;;  %v1917_v35 = vpop.f32.mrf.mxu3  ;;  %v3053_v23 = vor.u32 %v3484_v48, %v3050_v49 }
  0xf4   : > { %2156 = vmatpush.bf16.msrb.mxu2 %v3213_v38  ;;  %v1893_v38 = vpop.f32.mrf.mxu1 }
  0xf5   : > { %2169 = vmatpush.bf16.msrb.mxu3 %v3277_v50  ;;  %v1918_v41 = vadd.f32 %v1917_v35, %v1905_v32  ;;  %v3482_v50 = vld [vmem:[%s5250_s1 + $0x614] sm:$0xf] }
  0xf6   : > { %2131 = vmatpush.bf16.msrb.mxu0 %v3077_v46  ;;  %v3170_v46 = vld [vmem:[%s5250_s1 + $0x718] sm:$0xf0]  ;;  %v3045_v10 = vor.u32 %v3482_v50, %v3042_v25 }
  0xf7   : > { %2144 = vmatpush.bf16.msrb.mxu1 %v3141_v51  ;;  %v3530_v51 = vld [vmem:[%s5250_s1 + $0x794] sm:$0xf]  ;;  %v3173_v54 = vor.u32 %v3514_v27, %v3170_v46 }
  0xf8   : > { %2157 = vmatpush.bf16.msrb.mxu2 %v3205_v53  ;;  %v3234_v53 = vld [vmem:[%s5250_s1 + $0x798] sm:$0xf0] }
  0xf9   : > { %2170 = vmatpush.bf16.msrb.mxu3 %v3269_v12  ;;  %v3480_v12 = vld [vmem:[%s5250_s1 + $0x604] sm:$0xf]  ;;  %v3237_v57 = vor.u32 %v3530_v51, %v3234_v53 }
  0xfa   : > { %2132 = vmatpush.bf16.msrb.mxu0 %v3069_v62  ;;  %v1906_v61 = vpop.f32.mrf.mxu2  ;;  %v3528_v62 = vld [vmem:[%s5250_s1 + $0x784] sm:$0xf] }
  0xfb   : > { %2145 = vmatpush.bf16.msrb.mxu1 %v3133_v0  ;;  %v1919_v0 = vpop.f32.mrf.mxu3  ;;  %v3229_v6 = vor.u32 %v3528_v62, %v3226_v63 }
  0xfc   : > { %2158 = vmatpush.bf16.msrb.mxu2 %v3197_v2  ;;  %v3037_v2 = vor.u32 %v3480_v12, %v3034_v55 }
  0xfd   : > { %2171 = vmatpush.bf16.msrb.mxu3 %v3261_v44 }
  0xfe   : > { %2133 = vmatpush.bf16.msrb.mxu0 %v3061_v4 }
  0xff   : > { %2146 = vmatpush.bf16.msrb.mxu1 %v3125_v21 }
 0x100   : > { %2159 = vmatpush.bf16.msrb.mxu2 %v3189_v22 }
 0x101   : > { %2172 = vmatpush.bf16.msrb.mxu3 %v3253_v24 }
 0x102   : > { %2134 = vmatpush.bf16.msrb.mxu0 %v3053_v23 }
 0x103   : > { %2147 = vmatpush.bf16.msrb.mxu1 %v3117_v42 }
 0x104   : > { %2160 = vmatpush.bf16.msrb.mxu2 %v3181_v45 }
 0x105   : > { %2173 = vmatpush.bf16.msrb.mxu3 %v3245_v43 }
 0x106   : > { %2135 = vmatpush.bf16.msrb.mxu0 %v3045_v10 }
 0x107   : > { %2148 = vmatpush.bf16.msrb.mxu1 %v3109_v11 }
 0x108   : > { %2161 = vmatpush.bf16.msrb.mxu2 %v3173_v54 }
 0x109   : > { %2174 = vmatpush.bf16.msrb.mxu3 %v3237_v57 }
 0x10a   : > { %2136 = vmatpush.bf16.msrb.mxu0 %v3037_v2  ;;  %v1930_v44 = vpop.f32.mrf.mxu0 }
 0x10b   : > { %2149 = vmatpush.bf16.msrb.mxu1 %v3101_v3  ;;  %v1931_v7 = vadd.f32 %v1930_v44, %v1918_v41  ;;  %v1943_v9 = vpop.f32.mrf.mxu1  ;;  %v2198_v44 = vld [vmem:[%s165_s24] sm:$0x3] }
 0x10c   : > { %2162 = vmatpush.bf16.msrb.mxu2 %v3165_v5 }
 0x10d   : > { %2175 = vmatpush.bf16.msrb.mxu3 %v3229_v6  ;;  %2137 = vmatmul.bf16.vlgmr.msrb.gmra.mxu0 %v211_v17  ;;  %v1944_v13 = vadd.f32 %v1943_v9, %v1931_v7 }
 0x10e   : > { %2150 = vmatmul.bf16.vlgmr.msrb.gmra.mxu1 %v213_v34 }
 0x10f   : > { %2163 = vmatmul.bf16.vlgmr.msrb.gmra.mxu2 %v215_v33 }
 0x110   : > { %2176 = vmatmul.bf16.vlgmr.msrb.gmra.mxu3 %v217_v37 }
 0x112   : > { %v1956_v14 = vpop.f32.mrf.mxu2  ;;  %v1932_v4 = vpop.f32.mrf.mxu0 }
 0x113   : > { %v1957_v15 = vadd.f32 %v1956_v14, %v1944_v13  ;;  %v1969_v16 = vpop.f32.mrf.mxu3  ;;  %v1945_v21 = vpop.f32.mrf.mxu1 }
 0x115   : > { %v1970_v1 = vadd.f32 %v1969_v16, %v1957_v15 }
 0x117   : > { %v2181_v0 = vmax.f32 %v1970_v1, 0.0 }
 0x11a   : > { %v1958_v17 = vpop.f32.mrf.mxu2 }
 0x11b   : > { %v1971_v22 = vpop.f32.mrf.mxu3 }
 0x12a   : > { %v1982_v34 = vpop.f32.mrf.mxu0 }
 0x12b   : > { %v1983_v18 = vadd.f32 %v1982_v34, %v1762_v19  ;;  %v1995_v33 = vpop.f32.mrf.mxu1 }
 0x12d   : > { %v1996_v48 = vadd.f32 %v1995_v33, %v1983_v18 }
 0x132   : > { %v2008_v20 = vpop.f32.mrf.mxu2  ;;  %v1984_v24 = vpop.f32.mrf.mxu0 }
 0x133   : > { %v2009_v37 = vadd.f32 %v2008_v20, %v1996_v48  ;;  %v2021_v49 = vpop.f32.mrf.mxu3  ;;  %v1997_v28 = vpop.f32.mrf.mxu1 }
 0x135   : > { %v2022_v52 = vadd.f32 %v2021_v49, %v2009_v37 }
 0x13a   : > { %v2010_v29 = vpop.f32.mrf.mxu2 }
 0x13b   : > { %v2023_v30 = vpop.f32.mrf.mxu3 }
 0x14a   : > { %v2034_v31 = vpop.f32.mrf.mxu0 }
 0x14b   : > { %v2047_v32 = vpop.f32.mrf.mxu1  ;;  %v2035_v42 = vadd.f32 %v2034_v31, %v2022_v52 }
 0x14d   : > { %v2048_v26 = vadd.f32 %v2047_v32, %v2035_v42 }
 0x152   : > { %v2060_v35 = vpop.f32.mrf.mxu2  ;;  %v2036_v39 = vpop.f32.mrf.mxu0 }
 0x153   : > { %v2073_v36 = vpop.f32.mrf.mxu3  ;;  %v2049_v40 = vpop.f32.mrf.mxu1  ;;  %v2061_v8 = vadd.f32 %v2060_v35, %v2048_v26 }
 0x155   : > { %v2074_v51 = vadd.f32 %v2073_v36, %v2061_v8 }
 0x15a   : > { %v2062_v23 = vpop.f32.mrf.mxu2 }
 0x15b   : > { %v2075_v47 = vpop.f32.mrf.mxu3 }
 0x16a   : > { %v2086_v38 = vpop.f32.mrf.mxu0 }
 0x16b   : > { %v2099_v41 = vpop.f32.mrf.mxu1  ;;  %v2087_v53 = vadd.f32 %v2086_v38, %v2074_v51 }
 0x16d   : > { %v2100_v10 = vadd.f32 %v2099_v41, %v2087_v53 }
 0x172   : > { %v2112_v45 = vpop.f32.mrf.mxu2  ;;  %v2088_v25 = vpop.f32.mrf.mxu0 }
 0x173   : > { %v2125_v50 = vpop.f32.mrf.mxu3  ;;  %v2101_v43 = vpop.f32.mrf.mxu1  ;;  %v2113_v11 = vadd.f32 %v2112_v45, %v2100_v10 }
 0x175   : > { %v2126_v54 = vadd.f32 %v2125_v50, %v2113_v11 }
 0x17a   : > { %v2114_v27 = vpop.f32.mrf.mxu2 }
 0x17b   : > { %v2127_v46 = vpop.f32.mrf.mxu3 }
 0x18a   : > { %v2138_v12 = vpop.f32.mrf.mxu0 }
 0x18b   : > { %v2151_v55 = vpop.f32.mrf.mxu1  ;;  %v2139_v56 = vadd.f32 %v2138_v12, %v2126_v54 }
 0x18d   : > { %v2152_v57 = vadd.f32 %v2151_v55, %v2139_v56 }
 0x192   : > { %v2164_v58 = vpop.f32.mrf.mxu2  ;;  %v2140_v61 = vpop.f32.mrf.mxu0 }
 0x193   : > { %v2165_v59 = vadd.f32 %v2164_v58, %v2152_v57  ;;  %v2177_v60 = vpop.f32.mrf.mxu3  ;;  %v2153_v62 = vpop.f32.mrf.mxu1 }
 0x195   : > { %v2178_v63 = vadd.f32 %v2177_v60, %v2165_v59 }
 0x197   : > { %v2182_v2 = vmax.f32 %v2178_v63, 0.0 }
 0x199   : > { %v2183_v3 = vpack.c.bf16 %v2182_v2, %v2181_v0 }
 0x19a   : > { %v2166_v5 = vpop.f32.mrf.mxu2 }
 0x19b   : > { %v2185_v6 = vrot.slane %v2183_v3, 3  ;;  %v2179_v7 = vpop.f32.mrf.mxu3 }
 0x19d   : > { %v2189_v9 = vsel %vm2186_vm0, %v2183_v3, %v2185_v6 }
 0x19e   : > { %v2199_v13 = vsel %vm2197_vm6, %v2189_v9, %v2198_v44 }
 0x19f   : > { %2200 = vst [vmem:[%s165_s24] sm:$0x3] %v2199_v13 }
 0x1a0 PF: > { %s13_s12 = sadd.s32 1, %s3558_s12  }
 0x1a1   : > { %p10_p4 = scmp.ge.s32.totalorder %s13_s12, 4  }
 0x1a3   :  { %12 = sbr.rel (!%p10_p4) target bundleno = 1 (0x1), region = 63 }

// kernel: pose_exp_net_forward.15
= control target key start
LH: loop header
LB: loop body
LE: loop exit
PB: predicated region body
PF: predicated region fallthrough
CT: control target
= control target key end

     0   :  { %vm62_vm0 = vcmask 1041409   ;;  %vm108_vm1 = vcmask 91136   ;;  %s243_s1 = inlined_call_operand.vmem [shape: f32[256,12], index: 1, kind: input, shape index: {}]   ;;  %s244_s2 = inlined_call_operand.vmem [shape: f32[1,12], index: 2, kind: input, shape index: {}]   ;;  %s245_s0 = inlined_call_operand.vmem [shape: bf16[2,1,256], index: 0, kind: input, shape index: {}]   ;;  %s246_s3 = inlined_call_operand.vmem [shape: f32[2,12], index: 3, kind: output, shape index: {}]  }
   0x1   :  { %v35_v0 = vld [vmem:[%s243_s1 + $0x78] sm:$0xff]  ;;  %v34_v1 = vld [vmem:[%s243_s1 + $0x70] sm:$0xff]  ;;  %v33_v4 = vld [vmem:[%s243_s1 + $0x68] sm:$0xff] }
   0x2   :  { %v51_v2 = vld [vmem:[%s243_s1 + $0xf8] sm:$0xff]  ;;  %67 = vmatpush.msra.mxu0 %v35_v0  ;;  %v50_v3 = vld [vmem:[%s243_s1 + $0xf0] sm:$0xff]  ;;  %v49_v5 = vld [vmem:[%s243_s1 + $0xe8] sm:$0xff] }
   0x3   :  { %87 = vmatpush.msra.mxu1 %v51_v2  ;;  %v32_v6 = vld [vmem:[%s243_s1 + $0x60] sm:$0xff]  ;;  %v31_v8 = vld [vmem:[%s243_s1 + $0x58] sm:$0xff]  ;;  %v30_v10 = vld [vmem:[%s243_s1 + $0x50] sm:$0xff] }
   0x4   :  { %68 = vmatpush.msra.mxu0 %v34_v1  ;;  %v48_v7 = vld [vmem:[%s243_s1 + $0xe0] sm:$0xff]  ;;  %v47_v9 = vld [vmem:[%s243_s1 + $0xd8] sm:$0xff]  ;;  %v46_v11 = vld [vmem:[%s243_s1 + $0xd0] sm:$0xff] }
   0x5   :  { %88 = vmatpush.msra.mxu1 %v50_v3  ;;  %v29_v12 = vld [vmem:[%s243_s1 + $0x48] sm:$0xff]  ;;  %v28_v14 = vld [vmem:[%s243_s1 + $0x40] sm:$0xff]  ;;  %v27_v16 = vld [vmem:[%s243_s1 + $0x38] sm:$0xff] }
   0x6   :  { %69 = vmatpush.msra.mxu0 %v33_v4  ;;  %v45_v13 = vld [vmem:[%s243_s1 + $0xc8] sm:$0xff]  ;;  %v44_v15 = vld [vmem:[%s243_s1 + $0xc0] sm:$0xff]  ;;  %v43_v17 = vld [vmem:[%s243_s1 + $0xb8] sm:$0xff] }
   0x7   :  { %89 = vmatpush.msra.mxu1 %v49_v5  ;;  %v26_v18 = vld [vmem:[%s243_s1 + $0x30] sm:$0xff]  ;;  %v25_v20 = vld [vmem:[%s243_s1 + $0x28] sm:$0xff]  ;;  %v14_v22 = vld [vmem:[%s245_s0] sm:$0x3] }
   0x8   :  { %70 = vmatpush.msra.mxu0 %v32_v6  ;;  %v42_v19 = vld [vmem:[%s243_s1 + $0xb0] sm:$0xff]  ;;  %v41_v21 = vld [vmem:[%s243_s1 + $0xa8] sm:$0xff]  ;;  %v15_v23 = vld [vmem:[%s245_s0 + $0x2] sm:$0x3]  ;;  %v16_v26 = vunpack.c.l.bf16 %v14_v22 }
   0x9   :  { %90 = vmatpush.msra.mxu1 %v48_v7  ;;  %v24_v24 = vld [vmem:[%s243_s1 + $0x20] sm:$0xff]  ;;  %v17_v27 = vunpack.c.l.bf16 %v15_v23  ;;  %v23_v28 = vld [vmem:[%s243_s1 + $0x18] sm:$0xff]  ;;  %v22_v30 = vld [vmem:[%s243_s1 + $0x10] sm:$0xff] }
   0xa   :  { %71 = vmatpush.msra.mxu0 %v31_v8  ;;  %v40_v25 = vld [vmem:[%s243_s1 + $0xa0] sm:$0xff]  ;;  %v39_v29 = vld [vmem:[%s243_s1 + $0x98] sm:$0xff]  ;;  %v38_v31 = vld [vmem:[%s243_s1 + $0x90] sm:$0xff]  ;;  %v58_v32 = vperm.slane %v16_v26, 0  ;;  %v59_v34 = vperm.slane %v16_v26, 2 }
   0xb   :  { %91 = vmatpush.msra.mxu1 %v47_v9  ;;  %v60_v33 = vperm.slane %v17_v27, 0  ;;  %v61_v35 = vperm.slane %v17_v27, 2  ;;  %v21_v36 = vld [vmem:[%s243_s1 + $0x8] sm:$0xff]  ;;  %v20_v38 = vld [vmem:[%s243_s1] sm:$0xff] }
   0xc   :  { %72 = vmatpush.msra.mxu0 %v30_v10  ;;  %v37_v37 = vld [vmem:[%s243_s1 + $0x88] sm:$0xff]  ;;  %v36_v39 = vld [vmem:[%s243_s1 + $0x80] sm:$0xff] }
   0xd   :  { %92 = vmatpush.msra.mxu1 %v46_v11  ;;  %v63_v40 = vsel %vm62_vm0, %v60_v33, %v58_v32  ;;  %v64_v41 = vsel %vm62_vm0, %v61_v35, %v59_v34  ;;  %v114_v42 = vld [vmem:[%s244_s2] ss:$0 sm:$0xff] }
   0xe   :  { %73 = vmatpush.msra.mxu0 %v29_v12 }
   0xf   :  { %93 = vmatpush.msra.mxu1 %v45_v13 }
  0x10   :  { %74 = vmatpush.msra.mxu0 %v28_v14 }
  0x11   :  { %94 = vmatpush.msra.mxu1 %v44_v15 }
  0x12   :  { %75 = vmatpush.msra.mxu0 %v27_v16 }
  0x13   :  { %95 = vmatpush.msra.mxu1 %v43_v17 }
  0x14   :  { %76 = vmatpush.msra.mxu0 %v26_v18 }
  0x15   :  { %96 = vmatpush.msra.mxu1 %v42_v19 }
  0x16   :  { %77 = vmatpush.msra.mxu0 %v25_v20 }
  0x17   :  { %97 = vmatpush.msra.mxu1 %v41_v21 }
  0x18   :  { %78 = vmatpush.msra.mxu0 %v24_v24 }
  0x19   :  { %98 = vmatpush.msra.mxu1 %v40_v25 }
  0x1a   :  { %79 = vmatpush.msra.mxu0 %v23_v28 }
  0x1b   :  { %99 = vmatpush.msra.mxu1 %v39_v29 }
  0x1c   :  { %80 = vmatpush.msra.mxu0 %v22_v30 }
  0x1d   :  { %100 = vmatpush.msra.mxu1 %v38_v31 }
  0x1e   :  { %81 = vmatpush.msra.mxu0 %v21_v36 }
  0x1f   :  { %101 = vmatpush.msra.mxu1 %v37_v37 }
  0x20   :  { %82 = vmatpush.msra.mxu0 %v20_v38 }
  0x21   :  { %102 = vmatpush.msra.mxu1 %v36_v39  ;;  %83 = vmatmul.f32.vlgmr.msra.gmra.mxu0 %v63_v40 }
  0x22   :  { %103 = vmatmul.f32.vlgmr.msra.gmra.mxu1 %v64_v41 }
  0x9e   :  { %v84_v43 = vpop.f32.mrf.mxu0 }
  0x9f   :  { %v104_v44 = vpop.f32.mrf.mxu1  ;;  %v85_v45 = vadd.f32 %v114_v42, %v84_v43 }
  0xa1   :  { %v105_v46 = vadd.f32 %v104_v44, %v85_v45 }
  0xa3   :  { %v107_v47 = vmul.f32 0.01, %v105_v46 }
  0xa5   :  { %109 = vst.msk [vmem:[%s246_s3] sm:$0x3] %vm108_vm1, %v107_v47 }

// kernel: pose_exp_net_forward.13
= control target key start
LH: loop header
LB: loop body
LE: loop exit
PB: predicated region body
PF: predicated region fallthrough
CT: control target
= control target key end

     0   :  { %s6861_s12 = smov 0   ;;  %s10181_s0 = inlined_call_operand.vmem [shape: bf16[2,2,2,1024], index: 0, kind: input, shape index: {}]   ;;  %s10182_s1 = inlined_call_operand.vmem [shape: bf16[4096,256], index: 1, kind: input, shape index: {}]   ;;  %s10183_s2 = inlined_call_operand.vmem [shape: f32[1,256], index: 2, kind: input, shape index: {}]   ;;  %s10184_s3 = inlined_call_operand.vmem [shape: bf16[2,1,256], index: 3, kind: output, shape index: {}]  }
   0x1 LB: > { %s4254_s13 = sadd.s32 4294967295, %s6839_s12   ;;  %p4258_p0 = scmp.ge.s32.totalorder %s6839_s12, 1  ;;  %s6839_s12 = sphi %s6861_s12, %s13_s12  }
   0x2   : > { %p136_p1 = scmp.lt.s32.totalorder %s6839_s12, 3 }
   0x4   : > { %p137_p2 = pnand %p4258_p0, %p136_p1 }
   0x5   : > { %p158_p3 = scmp.lt.s32.totalorder (!%p137_p2), %s4254_s13, 1 }
   0x6   : > { %140 = sbr.rel (%p137_p2) target bundleno = 672 (0x2a0), region = 32 }
   0xb   : > { %v4320_v0 = vld [vmem:[%s10182_s1 + $0x70] sm:$0xf]  ;;  %v6327_v1 = vld [vmem:[%s10182_s1 + $0x74] sm:$0xf0]  ;;  %v4312_v11 = vld [vmem:[%s10182_s1 + $0x60] sm:$0xf] }
   0xc   : > { %v4384_v2 = vld [vmem:[%s10182_s1 + $0xf0] sm:$0xf]  ;;  %v4321_v3 = vor.u32 %v6327_v1, %v4320_v0  ;;  %v6343_v4 = vld [vmem:[%s10182_s1 + $0xf4] sm:$0xf0]  ;;  %v6325_v13 = vld [vmem:[%s10182_s1 + $0x64] sm:$0xf0] }
   0xd   : > { %v4448_v5 = vld [vmem:[%s10182_s1 + $0x170] sm:$0xf]  ;;  %v6359_v6 = vld [vmem:[%s10182_s1 + $0x174] sm:$0xf0]  ;;  %v4385_v7 = vor.u32 %v6343_v4, %v4384_v2  ;;  %v4376_v14 = vld [vmem:[%s10182_s1 + $0xe0] sm:$0xf]  ;;  %v4313_v16 = vor.u32 %v6325_v13, %v4312_v11 }
   0xe   : > { %v4449_v8 = vor.u32 %v6359_v6, %v4448_v5  ;;  %v4512_v9 = vld [vmem:[%s10182_s1 + $0x1f0] sm:$0xf]  ;;  %v6375_v10 = vld [vmem:[%s10182_s1 + $0x1f4] sm:$0xf0]  ;;  %3349 = vmatpush.bf16.msra.mxu0 %v4321_v3  ;;  %v6341_v15 = vld [vmem:[%s10182_s1 + $0xe4] sm:$0xf0] }
   0xf   : > { %v4513_v12 = vor.u32 %v6375_v10, %v4512_v9  ;;  %3362 = vmatpush.bf16.msra.mxu1 %v4385_v7  ;;  %v4377_v17 = vor.u32 %v6341_v15, %v4376_v14  ;;  %v4440_v18 = vld [vmem:[%s10182_s1 + $0x160] sm:$0xf]  ;;  %v6357_v19 = vld [vmem:[%s10182_s1 + $0x164] sm:$0xf0]  ;;  %v4304_v23 = vld [vmem:[%s10182_s1 + $0x50] sm:$0xf] }
  0x10   : > { %3375 = vmatpush.bf16.msra.mxu2 %v4449_v8  ;;  %v4504_v20 = vld [vmem:[%s10182_s1 + $0x1e0] sm:$0xf]  ;;  %v4441_v21 = vor.u32 %v6357_v19, %v4440_v18  ;;  %v6373_v22 = vld [vmem:[%s10182_s1 + $0x1e4] sm:$0xf0]  ;;  %v6323_v24 = vld [vmem:[%s10182_s1 + $0x54] sm:$0xf0] }
  0x11   : > { %3388 = vmatpush.bf16.msra.mxu3 %v4513_v12  ;;  %v4505_v25 = vor.u32 %v6373_v22, %v4504_v20  ;;  %v4368_v26 = vld [vmem:[%s10182_s1 + $0xd0] sm:$0xf]  ;;  %v6339_v27 = vld [vmem:[%s10182_s1 + $0xd4] sm:$0xf0]  ;;  %v4305_v29 = vor.u32 %v6323_v24, %v4304_v23  ;;  %v4296_v35 = vld [vmem:[%s10182_s1 + $0x40] sm:$0xf] }
  0x12   : > { %v4432_v28 = vld [vmem:[%s10182_s1 + $0x150] sm:$0xf]  ;;  %3350 = vmatpush.bf16.msra.mxu0 %v4313_v16  ;;  %v6355_v30 = vld [vmem:[%s10182_s1 + $0x154] sm:$0xf0]  ;;  %v4369_v33 = vor.u32 %v6339_v27, %v4368_v26  ;;  %v6321_v36 = vld [vmem:[%s10182_s1 + $0x44] sm:$0xf0] }
  0x13   : > { %v4496_v31 = vld [vmem:[%s10182_s1 + $0x1d0] sm:$0xf]  ;;  %v6371_v32 = vld [vmem:[%s10182_s1 + $0x1d4] sm:$0xf0]  ;;  %3363 = vmatpush.bf16.msra.mxu1 %v4377_v17  ;;  %v4433_v34 = vor.u32 %v6355_v30, %v4432_v28  ;;  %v4360_v37 = vld [vmem:[%s10182_s1 + $0xc0] sm:$0xf]  ;;  %v4297_v44 = vor.u32 %v6321_v36, %v4296_v35 }
  0x14   : > { %3376 = vmatpush.bf16.msra.mxu2 %v4441_v21  ;;  %v4497_v38 = vor.u32 %v6371_v32, %v4496_v31  ;;  %v6337_v39 = vld [vmem:[%s10182_s1 + $0xc4] sm:$0xf0]  ;;  %v4424_v40 = vld [vmem:[%s10182_s1 + $0x140] sm:$0xf]  ;;  %v4288_v47 = vld [vmem:[%s10182_s1 + $0x30] sm:$0xf] }
  0x15   : > { %3389 = vmatpush.bf16.msra.mxu3 %v4505_v25  ;;  %v6353_v41 = vld [vmem:[%s10182_s1 + $0x144] sm:$0xf0]  ;;  %v4488_v42 = vld [vmem:[%s10182_s1 + $0x1c0] sm:$0xf]  ;;  %v4361_v45 = vor.u32 %v6337_v39, %v4360_v37  ;;  %v6319_v48 = vld [vmem:[%s10182_s1 + $0x34] sm:$0xf0] }
  0x16   : > { %v6369_v43 = vld [vmem:[%s10182_s1 + $0x1c4] sm:$0xf0]  ;;  %3351 = vmatpush.bf16.msra.mxu0 %v4305_v29  ;;  %v4425_v46 = vor.u32 %v6353_v41, %v4424_v40  ;;  %v4352_v49 = vld [vmem:[%s10182_s1 + $0xb0] sm:$0xf]  ;;  %v6335_v51 = vld [vmem:[%s10182_s1 + $0xb4] sm:$0xf0]  ;;  %v4289_v56 = vor.u32 %v6319_v48, %v4288_v47 }
  0x17   : > { %3364 = vmatpush.bf16.msra.mxu1 %v4369_v33  ;;  %v4489_v50 = vor.u32 %v6369_v43, %v4488_v42  ;;  %v4416_v52 = vld [vmem:[%s10182_s1 + $0x130] sm:$0xf]  ;;  %v6351_v53 = vld [vmem:[%s10182_s1 + $0x134] sm:$0xf0]  ;;  %v4353_v57 = vor.u32 %v6335_v51, %v4352_v49  ;;  %v4280_v59 = vld [vmem:[%s10182_s1 + $0x20] sm:$0xf] }
  0x18   : > { %3377 = vmatpush.bf16.msra.mxu2 %v4433_v34  ;;  %v4480_v54 = vld [vmem:[%s10182_s1 + $0x1b0] sm:$0xf]  ;;  %v6367_v55 = vld [vmem:[%s10182_s1 + $0x1b4] sm:$0xf0]  ;;  %v4417_v58 = vor.u32 %v6351_v53, %v4416_v52  ;;  %v6317_v60 = vld [vmem:[%s10182_s1 + $0x24] sm:$0xf0] }
  0x19   : > { %3390 = vmatpush.bf16.msra.mxu3 %v4497_v38  ;;  %v4344_v61 = vld [vmem:[%s10182_s1 + $0xa0] sm:$0xf]  ;;  %v4481_v62 = vor.u32 %v6367_v55, %v4480_v54  ;;  %v6333_v63 = vld [vmem:[%s10182_s1 + $0xa4] sm:$0xf0]  ;;  %v4281_v4 = vor.u32 %v6317_v60, %v4280_v59  ;;  %v4272_v7 = vld [vmem:[%s10182_s1 + $0x10] sm:$0xf] }
  0x1a   : > { %3352 = vmatpush.bf16.msra.mxu0 %v4297_v44  ;;  %v4408_v0 = vld [vmem:[%s10182_s1 + $0x120] sm:$0xf]  ;;  %v6349_v1 = vld [vmem:[%s10182_s1 + $0x124] sm:$0xf0]  ;;  %v4345_v5 = vor.u32 %v6333_v63, %v4344_v61  ;;  %v6315_v8 = vld [vmem:[%s10182_s1 + $0x14] sm:$0xf0] }
  0x1b   : > { %3365 = vmatpush.bf16.msra.mxu1 %v4361_v45  ;;  %v4472_v2 = vld [vmem:[%s10182_s1 + $0x1a0] sm:$0xf]  ;;  %v6365_v3 = vld [vmem:[%s10182_s1 + $0x1a4] sm:$0xf0]  ;;  %v4409_v6 = vor.u32 %v6349_v1, %v4408_v0  ;;  %v4336_v9 = vld [vmem:[%s10182_s1 + $0x90] sm:$0xf]  ;;  %v4273_v16 = vor.u32 %v6315_v8, %v4272_v7 }
  0x1c   : > { %3378 = vmatpush.bf16.msra.mxu2 %v4425_v46  ;;  %v4473_v10 = vor.u32 %v6365_v3, %v4472_v2  ;;  %v6331_v11 = vld [vmem:[%s10182_s1 + $0x94] sm:$0xf0]  ;;  %v4400_v12 = vld [vmem:[%s10182_s1 + $0x110] sm:$0xf]  ;;  %v4264_v17 = vld [vmem:[%s10182_s1] sm:$0xf] }
  0x1d   : > { %3391 = vmatpush.bf16.msra.mxu3 %v4489_v50  ;;  %v6347_v13 = vld [vmem:[%s10182_s1 + $0x114] sm:$0xf0]  ;;  %v4464_v14 = vld [vmem:[%s10182_s1 + $0x190] sm:$0xf]  ;;  %v6313_v18 = vld [vmem:[%s10182_s1 + $0x4] sm:$0xf0]  ;;  %v4337_v19 = vor.u32 %v6331_v11, %v4336_v9 }
  0x1e   : > { %3353 = vmatpush.bf16.msra.mxu0 %v4289_v56  ;;  %v6363_v15 = vld [vmem:[%s10182_s1 + $0x194] sm:$0xf0]  ;;  %v4401_v20 = vor.u32 %v6347_v13, %v4400_v12  ;;  %v4328_v21 = vld [vmem:[%s10182_s1 + $0x80] sm:$0xf]  ;;  %v6329_v22 = vld [vmem:[%s10182_s1 + $0x84] sm:$0xf0]  ;;  %v4265_v31 = vor.u32 %v6313_v18, %v4264_v17 }
  0x1f   : > { %3366 = vmatpush.bf16.msra.mxu1 %v4353_v57  ;;  %v4392_v23 = vld [vmem:[%s10182_s1 + $0x100] sm:$0xf]  ;;  %v4465_v24 = vor.u32 %v6363_v15, %v4464_v14  ;;  %v6345_v25 = vld [vmem:[%s10182_s1 + $0x104] sm:$0xf0]  ;;  %v4576_v28 = vld [vmem:[%s10182_s1 + $0x270] sm:$0xf]  ;;  %v4329_v35 = vor.u32 %v6329_v22, %v4328_v21 }
  0x20   : > { %3379 = vmatpush.bf16.msra.mxu2 %v4417_v58  ;;  %v4456_v26 = vld [vmem:[%s10182_s1 + $0x180] sm:$0xf]  ;;  %v6361_v27 = vld [vmem:[%s10182_s1 + $0x184] sm:$0xf0]  ;;  %v6391_v29 = vld [vmem:[%s10182_s1 + $0x274] sm:$0xf0]  ;;  %v4393_v36 = vor.u32 %v6345_v25, %v4392_v23 }
  0x21   : > { %3392 = vmatpush.bf16.msra.mxu3 %v4481_v62  ;;  %v4640_v30 = vld [vmem:[%s10182_s1 + $0x2f0] sm:$0xf]  ;;  %v6407_v32 = vld [vmem:[%s10182_s1 + $0x2f4] sm:$0xf0]  ;;  %v4457_v39 = vor.u32 %v6361_v27, %v4456_v26  ;;  %v4577_v40 = vor.u32 %v6391_v29, %v4576_v28  ;;  %v4568_v43 = vld [vmem:[%s10182_s1 + $0x260] sm:$0xf] }
  0x22   : > { %3354 = vmatpush.bf16.msra.mxu0 %v4281_v4  ;;  %v4704_v33 = vld [vmem:[%s10182_s1 + $0x370] sm:$0xf]  ;;  %v6423_v34 = vld [vmem:[%s10182_s1 + $0x374] sm:$0xf0]  ;;  %v4641_v41 = vor.u32 %v6407_v32, %v4640_v30  ;;  %v6389_v44 = vld [vmem:[%s10182_s1 + $0x264] sm:$0xf0] }
  0x23   : > { %3367 = vmatpush.bf16.msra.mxu1 %v4345_v5  ;;  %v4768_v37 = vld [vmem:[%s10182_s1 + $0x3f0] sm:$0xf]  ;;  %v6439_v38 = vld [vmem:[%s10182_s1 + $0x3f4] sm:$0xf0]  ;;  %v4705_v42 = vor.u32 %v6423_v34, %v4704_v33  ;;  %v4632_v45 = vld [vmem:[%s10182_s1 + $0x2e0] sm:$0xf]  ;;  %v4569_v52 = vor.u32 %v6389_v44, %v4568_v43 }
  0x24   : > { %3380 = vmatpush.bf16.msra.mxu2 %v4409_v6  ;;  %v4769_v46 = vor.u32 %v6439_v38, %v4768_v37  ;;  %v6405_v47 = vld [vmem:[%s10182_s1 + $0x2e4] sm:$0xf0]  ;;  %v4696_v48 = vld [vmem:[%s10182_s1 + $0x360] sm:$0xf]  ;;  %v4560_v55 = vld [vmem:[%s10182_s1 + $0x250] sm:$0xf] }
  0x25   : > { %3393 = vmatpush.bf16.msra.mxu3 %v4473_v10  ;;  %v6421_v49 = vld [vmem:[%s10182_s1 + $0x364] sm:$0xf0]  ;;  %v4760_v50 = vld [vmem:[%s10182_s1 + $0x3e0] sm:$0xf]  ;;  %v4633_v53 = vor.u32 %v6405_v47, %v4632_v45  ;;  %v6387_v56 = vld [vmem:[%s10182_s1 + $0x254] sm:$0xf0] }
  0x26   : > { %3355 = vmatpush.bf16.msra.mxu0 %v4273_v16  ;;  %v6437_v51 = vld [vmem:[%s10182_s1 + $0x3e4] sm:$0xf0]  ;;  %v4697_v54 = vor.u32 %v6421_v49, %v4696_v48  ;;  %v4624_v57 = vld [vmem:[%s10182_s1 + $0x2d0] sm:$0xf]  ;;  %v6403_v59 = vld [vmem:[%s10182_s1 + $0x2d4] sm:$0xf0]  ;;  %v4561_v0 = vor.u32 %v6387_v56, %v4560_v55 }
  0x27   : > { %3368 = vmatpush.bf16.msra.mxu1 %v4337_v19  ;;  %v4761_v58 = vor.u32 %v6437_v51, %v4760_v50  ;;  %v4688_v60 = vld [vmem:[%s10182_s1 + $0x350] sm:$0xf]  ;;  %v6419_v61 = vld [vmem:[%s10182_s1 + $0x354] sm:$0xf0]  ;;  %v4552_v1 = vld [vmem:[%s10182_s1 + $0x240] sm:$0xf]  ;;  %v4625_v2 = vor.u32 %v6403_v59, %v4624_v57 }
  0x28   : > { %3381 = vmatpush.bf16.msra.mxu2 %v4401_v20  ;;  %v4752_v62 = vld [vmem:[%s10182_s1 + $0x3d0] sm:$0xf]  ;;  %v6435_v63 = vld [vmem:[%s10182_s1 + $0x3d4] sm:$0xf0]  ;;  %v4689_v3 = vor.u32 %v6419_v61, %v4688_v60  ;;  %v6385_v4 = vld [vmem:[%s10182_s1 + $0x244] sm:$0xf0] }
  0x29   : > { %3394 = vmatpush.bf16.msra.mxu3 %v4465_v24  ;;  %v4616_v5 = vld [vmem:[%s10182_s1 + $0x2c0] sm:$0xf]  ;;  %v6401_v6 = vld [vmem:[%s10182_s1 + $0x2c4] sm:$0xf0]  ;;  %v4753_v7 = vor.u32 %v6435_v63, %v4752_v62  ;;  %s10204_s13 = smov (!%p158_p3, %s4254_s13), 1  ;;  %v4553_v12 = vor.u32 %v6385_v4, %v4552_v1  ;;  %vm4186_vm0 = vcmask 1040384  }
  0x2a   : > { %3356 = vmatpush.bf16.msra.mxu0 %v4265_v31  ;;  %v4680_v8 = vld [vmem:[%s10182_s1 + $0x340] sm:$0xf]  ;;  %v6417_v9 = vld [vmem:[%s10182_s1 + $0x344] sm:$0xf0]  ;;  %v4544_v13 = vld [vmem:[%s10182_s1 + $0x230] sm:$0xf]  ;;  %v4617_v14 = vor.u32 %v6401_v6, %v4616_v5 }
  0x2b   : > { %3369 = vmatpush.bf16.msra.mxu1 %v4329_v35  ;;  %v4744_v10 = vld [vmem:[%s10182_s1 + $0x3c0] sm:$0xf]  ;;  %v6433_v11 = vld [vmem:[%s10182_s1 + $0x3c4] sm:$0xf0]  ;;  %s4259_s6 = sshll.u32 %s10204_s13, 4  ;;  %v4681_v15 = vor.u32 %v6417_v9, %v4680_v8  ;;  %s4260_s28 = sshll.u32 %s10204_s13, 1 }
  0x2c   : > { %3382 = vmatpush.bf16.msra.mxu2 %v4393_v36  ;;  %v6383_v16 = vld [vmem:[%s10182_s1 + $0x234] sm:$0xf0]  ;;  %v4608_v17 = vld [vmem:[%s10182_s1 + $0x2b0] sm:$0xf]  ;;  %s7179_s17 = scalar_lea.vmem %s10181_s0, %s4259_s6  ;;  %v4745_v19 = vor.u32 %v6433_v11, %v4744_v10  ;;  %v4536_v26 = vld [vmem:[%s10182_s1 + $0x220] sm:$0xf]  ;;  %s165_s4 = scalar_lea.vmem %s10184_s3, %s4260_s28 }
  0x2d   : > { %3395 = vmatpush.bf16.msra.mxu3 %v4457_v39  ;;  %v6399_v18 = vld [vmem:[%s10182_s1 + $0x2b4] sm:$0xf0]  ;;  %v4672_v20 = vld [vmem:[%s10182_s1 + $0x330] sm:$0xf]  ;;  %v7188_v22 = vld [vmem:[%s7179_s17] sm:$0xff]  ;;  %v4545_v25 = vor.u32 %v6383_v16, %v4544_v13  ;;  %vm4194_vm2 = vcmask 1041409  }
  0x2e   : > { %3401 = vmatpush.bf16.msrb.mxu0 %v4577_v40  ;;  %v6415_v21 = vld [vmem:[%s10182_s1 + $0x334] sm:$0xf0]  ;;  %v4736_v23 = vld [vmem:[%s10182_s1 + $0x3b0] sm:$0xf]  ;;  %170 = vst [vmem:[#allocation1] ss:$9 sm:$0xff] %v7188_v22  ;;  %v4609_v27 = vor.u32 %v6399_v18, %v4608_v17 }
  0x2f   : > { %3414 = vmatpush.bf16.msrb.mxu1 %v4641_v41  ;;  %v6431_v24 = vld [vmem:[%s10182_s1 + $0x3b4] sm:$0xf0]  ;;  %v4673_v28 = vor.u32 %v6415_v21, %v4672_v20  ;;  %v6381_v29 = vld [vmem:[%s10182_s1 + $0x224] sm:$0xf0]  ;;  %v4600_v30 = vld [vmem:[%s10182_s1 + $0x2a0] sm:$0xf] }
  0x30   : > { %3427 = vmatpush.bf16.msrb.mxu2 %v4705_v42  ;;  %v6397_v31 = vld [vmem:[%s10182_s1 + $0x2a4] sm:$0xf0]  ;;  %v4737_v32 = vor.u32 %v6431_v24, %v4736_v23  ;;  %v4664_v33 = vld [vmem:[%s10182_s1 + $0x320] sm:$0xf]  ;;  %v4528_v37 = vld [vmem:[%s10182_s1 + $0x210] sm:$0xf]  ;;  %v4537_v39 = vor.u32 %v6381_v29, %v4536_v26 }
  0x31   : > { %3440 = vmatpush.bf16.msrb.mxu3 %v4769_v46  ;;  %v6413_v34 = vld [vmem:[%s10182_s1 + $0x324] sm:$0xf0]  ;;  %v4728_v35 = vld [vmem:[%s10182_s1 + $0x3a0] sm:$0xf]  ;;  %v6379_v38 = vld [vmem:[%s10182_s1 + $0x214] sm:$0xf0]  ;;  %v4601_v43 = vor.u32 %v6397_v31, %v4600_v30 }
  0x32   : > { %3402 = vmatpush.bf16.msrb.mxu0 %v4569_v52  ;;  %v6429_v36 = vld [vmem:[%s10182_s1 + $0x3a4] sm:$0xf0]  ;;  %v4592_v40 = vld [vmem:[%s10182_s1 + $0x290] sm:$0xf]  ;;  %v6395_v41 = vld [vmem:[%s10182_s1 + $0x294] sm:$0xf0]  ;;  %v4665_v44 = vor.u32 %v6413_v34, %v4664_v33  ;;  %v4529_v55 = vor.u32 %v6379_v38, %v4528_v37 }
  0x33   : > { %3415 = vmatpush.bf16.msrb.mxu1 %v4633_v53  ;;  %v4656_v42 = vld [vmem:[%s10182_s1 + $0x310] sm:$0xf]  ;;  %v6411_v45 = vld [vmem:[%s10182_s1 + $0x314] sm:$0xf0]  ;;  %v4729_v48 = vor.u32 %v6429_v36, %v4728_v35  ;;  %v4520_v53 = vld [vmem:[%s10182_s1 + $0x200] sm:$0xf]  ;;  %v4593_v60 = vor.u32 %v6395_v41, %v4592_v40 }
  0x34   : > { %3428 = vmatpush.bf16.msrb.mxu2 %v4697_v54  ;;  %v4720_v46 = vld [vmem:[%s10182_s1 + $0x390] sm:$0xf]  ;;  %v6427_v47 = vld [vmem:[%s10182_s1 + $0x394] sm:$0xf0]  ;;  %v6377_v54 = vld [vmem:[%s10182_s1 + $0x204] sm:$0xf0]  ;;  %v4657_v61 = vor.u32 %v6411_v45, %v4656_v42 }
  0x35   : > { %3441 = vmatpush.bf16.msrb.mxu3 %v4761_v58  ;;  %v7245_v49 = vld [vmem:[#allocation1 + $0x12] sm:$0xff]  ;;  %v7247_v50 = vld [vmem:[#allocation1] sm:$0xff]  ;;  %v7253_v52 = vld [vmem:[#allocation1 + $0x9] sm:$0xff]  ;;  %v4521_v8 = vor.u32 %v6377_v54, %v4520_v53  ;;  %vm4192_vm1 = vsmask.f32 256 }
  0x36   : > { %3403 = vmatpush.bf16.msrb.mxu0 %v4561_v0  ;;  %v7249_v51 = vld [vmem:[#allocation1 + $0x1b] sm:$0xff]  ;;  %3383 = vmatmul.bf16.vlgmr.msra.gmra.mxu2 %v7245_v49  ;;  %v6393_v57 = vld [vmem:[%s10182_s1 + $0x284] sm:$0xf0]  ;;  %v4832_v0 = vld [vmem:[%s10182_s1 + $0x470] sm:$0xf] }
  0x37   : > { %3416 = vmatpush.bf16.msrb.mxu1 %v4625_v2  ;;  %3357 = vmatmul.bf16.vlgmr.msra.gmra.mxu0 %v7247_v50  ;;  %v4584_v56 = vld [vmem:[%s10182_s1 + $0x280] sm:$0xf]  ;;  %v6409_v59 = vld [vmem:[%s10182_s1 + $0x304] sm:$0xf0]  ;;  %v7283_v1 = vld [vmem:[#allocation1 + $0x36] sm:$0xff]  ;;  %v4721_v2 = vor.u32 %v6427_v47, %v4720_v46 }
  0x38   : > { %3429 = vmatpush.bf16.msrb.mxu2 %v4689_v3  ;;  %3396 = vmatmul.bf16.vlgmr.msra.gmra.mxu3 %v7249_v51  ;;  %v4648_v58 = vld [vmem:[%s10182_s1 + $0x300] sm:$0xf]  ;;  %v6425_v63 = vld [vmem:[%s10182_s1 + $0x384] sm:$0xf0]  ;;  %v7290_v5 = vld [vmem:[#allocation1 + $0x2d] sm:$0xff] }
  0x39   : > { %3442 = vmatpush.bf16.msrb.mxu3 %v4753_v7  ;;  %v4712_v62 = vld [vmem:[%s10182_s1 + $0x380] sm:$0xf]  ;;  %3370 = vmatmul.bf16.vlgmr.msra.gmra.mxu1 %v7253_v52  ;;  %v7286_v3 = vld [vmem:[#allocation1 + $0x24] sm:$0xff]  ;;  %v6455_v6 = vld [vmem:[%s10182_s1 + $0x474] sm:$0xf0]  ;;  %v4649_v13 = vor.u32 %v6409_v59, %v4648_v58 }
  0x3a   : > { %3404 = vmatpush.bf16.msrb.mxu0 %v4553_v12  ;;  %v7288_v4 = vld [vmem:[#allocation1 + $0x3f] sm:$0xff]  ;;  %v4896_v7 = vld [vmem:[%s10182_s1 + $0x4f0] sm:$0xf]  ;;  %v6471_v9 = vld [vmem:[%s10182_s1 + $0x4f4] sm:$0xf0]  ;;  %v4585_v12 = vor.u32 %v6393_v57, %v4584_v56  ;;  %v4713_v16 = vor.u32 %v6425_v63, %v4712_v62  ;;  %v4833_v17 = vor.u32 %v6455_v6, %v4832_v0 }
  0x3b   : > { %3417 = vmatpush.bf16.msrb.mxu1 %v4617_v14  ;;  %187 = vst [vmem:[#allocation1] ss:$9 sm:$0xff] %v7188_v22  ;;  %v4960_v10 = vld [vmem:[%s10182_s1 + $0x570] sm:$0xf]  ;;  %v6487_v11 = vld [vmem:[%s10182_s1 + $0x574] sm:$0xf0]  ;;  %v4897_v18 = vor.u32 %v6471_v9, %v4896_v7  ;;  %vm4193_vm4 = vmand %vm4186_vm0, %vm4192_vm1 }
  0x3c   : > { %3430 = vmatpush.bf16.msrb.mxu2 %v4681_v15  ;;  %v5024_v14 = vld [vmem:[%s10182_s1 + $0x5f0] sm:$0xf]  ;;  %v6503_v15 = vld [vmem:[%s10182_s1 + $0x5f4] sm:$0xf0]  ;;  %v4824_v20 = vld [vmem:[%s10182_s1 + $0x460] sm:$0xf] }
  0x3d   : > { %3443 = vmatpush.bf16.msrb.mxu3 %v4745_v19  ;;  %v4961_v19 = vor.u32 %v6487_v11, %v4960_v10  ;;  %v6453_v21 = vld [vmem:[%s10182_s1 + $0x464] sm:$0xf0]  ;;  %v4888_v22 = vld [vmem:[%s10182_s1 + $0x4e0] sm:$0xf]  ;;  %v5025_v23 = vor.u32 %v6503_v15, %v5024_v14  ;;  %v6451_v33 = vld [vmem:[%s10182_s1 + $0x454] sm:$0xf0] }
  0x3e   : > { %3405 = vmatpush.bf16.msrb.mxu0 %v4545_v25  ;;  %v6469_v24 = vld [vmem:[%s10182_s1 + $0x4e4] sm:$0xf0]  ;;  %v4952_v25 = vld [vmem:[%s10182_s1 + $0x560] sm:$0xf]  ;;  %v4825_v29 = vor.u32 %v6453_v21, %v4824_v20  ;;  %v4880_v34 = vld [vmem:[%s10182_s1 + $0x4d0] sm:$0xf] }
  0x3f   : > { %3418 = vmatpush.bf16.msrb.mxu1 %v4609_v27  ;;  %v6485_v26 = vld [vmem:[%s10182_s1 + $0x564] sm:$0xf0]  ;;  %v5016_v27 = vld [vmem:[%s10182_s1 + $0x5e0] sm:$0xf]  ;;  %v4889_v30 = vor.u32 %v6469_v24, %v4888_v22  ;;  %v6467_v36 = vld [vmem:[%s10182_s1 + $0x4d4] sm:$0xf0] }
  0x40   : > { %3431 = vmatpush.bf16.msrb.mxu2 %v4673_v28  ;;  %v6501_v28 = vld [vmem:[%s10182_s1 + $0x5e4] sm:$0xf0]  ;;  %v4953_v31 = vor.u32 %v6485_v26, %v4952_v25  ;;  %v4944_v37 = vld [vmem:[%s10182_s1 + $0x550] sm:$0xf]  ;;  %v6483_v38 = vld [vmem:[%s10182_s1 + $0x554] sm:$0xf0]  ;;  %v4881_v42 = vor.u32 %v6467_v36, %v4880_v34 }
  0x41   : > { %3444 = vmatpush.bf16.msrb.mxu3 %v4737_v32  ;;  %v4816_v32 = vld [vmem:[%s10182_s1 + $0x450] sm:$0xf]  ;;  %v5017_v35 = vor.u32 %v6501_v28, %v5016_v27  ;;  %v6499_v40 = vld [vmem:[%s10182_s1 + $0x5d4] sm:$0xf0]  ;;  %v6449_v45 = vld [vmem:[%s10182_s1 + $0x444] sm:$0xf0] }
  0x42   : > { %3406 = vmatpush.bf16.msrb.mxu0 %v4537_v39  ;;  %v5008_v39 = vld [vmem:[%s10182_s1 + $0x5d0] sm:$0xf]  ;;  %v4817_v41 = vor.u32 %v6451_v33, %v4816_v32  ;;  %v4872_v46 = vld [vmem:[%s10182_s1 + $0x4c0] sm:$0xf]  ;;  %v6481_v54 = vld [vmem:[%s10182_s1 + $0x544] sm:$0xf0] }
  0x43   : > { %3419 = vmatpush.bf16.msrb.mxu1 %v4601_v43  ;;  %v4945_v43 = vor.u32 %v6483_v38, %v4944_v37  ;;  %v5009_v47 = vor.u32 %v6499_v40, %v5008_v39  ;;  %v4936_v53 = vld [vmem:[%s10182_s1 + $0x540] sm:$0xf]  ;;  %v6497_v56 = vld [vmem:[%s10182_s1 + $0x5c4] sm:$0xf0]  ;;  %v4864_v62 = vld [vmem:[%s10182_s1 + $0x4b0] sm:$0xf] }
  0x44   : > { %3432 = vmatpush.bf16.msrb.mxu2 %v4665_v44  ;;  %v4808_v44 = vld [vmem:[%s10182_s1 + $0x440] sm:$0xf]  ;;  %v4937_v59 = vor.u32 %v6481_v54, %v4936_v53  ;;  %v6463_v0 = vld [vmem:[%s10182_s1 + $0x4b4] sm:$0xf0]  ;;  %v4992_v7 = vld [vmem:[%s10182_s1 + $0x5b0] sm:$0xf] }
  0x45   : > { %3445 = vmatpush.bf16.msrb.mxu3 %v4729_v48  ;;  %v6465_v48 = vld [vmem:[%s10182_s1 + $0x4c4] sm:$0xf0]  ;;  %v4809_v57 = vor.u32 %v6449_v45, %v4808_v44  ;;  %v6479_v6 = vld [vmem:[%s10182_s1 + $0x534] sm:$0xf0]  ;;  %v4865_v10 = vor.u32 %v6463_v0, %v4864_v62  ;;  %v4856_v14 = vld [vmem:[%s10182_s1 + $0x4a0] sm:$0xf] }
  0x46   : > { %3407 = vmatpush.bf16.msrb.mxu0 %v4529_v55  ;;  %v5000_v55 = vld [vmem:[%s10182_s1 + $0x5c0] sm:$0xf]  ;;  %v4873_v58 = vor.u32 %v6465_v48, %v4872_v46  ;;  %v6493_v20 = vld [vmem:[%s10182_s1 + $0x5a4] sm:$0xf0]  ;;  %v4784_v24 = vld [vmem:[%s10182_s1 + $0x410] sm:$0xf] }
  0x47   : > { %3420 = vmatpush.bf16.msrb.mxu1 %v4593_v60  ;;  %v4800_v60 = vld [vmem:[%s10182_s1 + $0x430] sm:$0xf]  ;;  %v5001_v63 = vor.u32 %v6497_v56, %v5000_v55  ;;  %v6443_v25 = vld [vmem:[%s10182_s1 + $0x414] sm:$0xf0]  ;;  %v4776_v33 = vld [vmem:[%s10182_s1 + $0x400] sm:$0xf] }
  0x48   : > { %3433 = vmatpush.bf16.msrb.mxu2 %v4657_v61  ;;  %v6447_v61 = vld [vmem:[%s10182_s1 + $0x434] sm:$0xf0]  ;;  %v4848_v26 = vld [vmem:[%s10182_s1 + $0x490] sm:$0xf]  ;;  %v4785_v34 = vor.u32 %v6443_v25, %v4784_v24  ;;  %v4840_v36 = vld [vmem:[%s10182_s1 + $0x480] sm:$0xf] }
  0x49   : > { %3446 = vmatpush.bf16.msrb.mxu3 %v4721_v2  ;;  %v4928_v2 = vld [vmem:[%s10182_s1 + $0x530] sm:$0xf]  ;;  %v4801_v9 = vor.u32 %v6447_v61, %v4800_v60  ;;  %v6459_v28 = vld [vmem:[%s10182_s1 + $0x494] sm:$0xf0]  ;;  %v6457_v37 = vld [vmem:[%s10182_s1 + $0x484] sm:$0xf0] }
  0x4a   : > { %3408 = vmatpush.bf16.msrb.mxu0 %v4521_v8  ;;  %v6495_v8 = vld [vmem:[%s10182_s1 + $0x5b4] sm:$0xf0]  ;;  %v4929_v11 = vor.u32 %v6479_v6, %v4928_v2  ;;  %v4849_v38 = vor.u32 %v6459_v28, %v4848_v26  ;;  %v4904_v40 = vld [vmem:[%s10182_s1 + $0x500] sm:$0xf]  ;;  %v6489_v44 = vld [vmem:[%s10182_s1 + $0x584] sm:$0xf0] }
  0x4b   : > { %3421 = vmatpush.bf16.msrb.mxu1 %v4585_v12  ;;  %v4792_v12 = vld [vmem:[%s10182_s1 + $0x420] sm:$0xf]  ;;  %v4993_v15 = vor.u32 %v6495_v8, %v4992_v7  ;;  %v6491_v32 = vld [vmem:[%s10182_s1 + $0x594] sm:$0xf0]  ;;  %v5088_v45 = vld [vmem:[%s10182_s1 + $0x670] sm:$0xf] }
  0x4c   : > { %3434 = vmatpush.bf16.msrb.mxu2 %v4649_v13  ;;  %v6445_v13 = vld [vmem:[%s10182_s1 + $0x424] sm:$0xf0]  ;;  %v6519_v46 = vld [vmem:[%s10182_s1 + $0x674] sm:$0xf0]  ;;  %v7495_v48 = vld [vmem:[#allocation1] sm:$0xff] }
  0x4d   : > { %3447 = vmatpush.bf16.msrb.mxu3 %v4713_v16  ;;  %3409 = vmatmul.bf16.vlgmr.msrb.gmra.mxu0 %v7286_v3  ;;  %v6461_v16 = vld [vmem:[%s10182_s1 + $0x4a4] sm:$0xf0]  ;;  %v4793_v21 = vor.u32 %v6445_v13, %v4792_v12  ;;  %v7497_v53 = vld [vmem:[#allocation1 + $0x12] sm:$0xff]  ;;  %v196_v0 = vshrl.u32 %v7495_v48, 16  ;;  %v7518_v7 = vld [vmem:[#allocation1 + $0x1b] sm:$0xff] }
  0x4e   : > { %3453 = vmatpush.bf16.msra.mxu0 %v4833_v17  ;;  %3422 = vmatmul.bf16.vlgmr.msrb.gmra.mxu1 %v7290_v5  ;;  %v4920_v17 = vld [vmem:[%s10182_s1 + $0x520] sm:$0xf]  ;;  %v4857_v22 = vor.u32 %v6461_v16, %v4856_v14  ;;  %v6535_v55 = vld [vmem:[%s10182_s1 + $0x6f4] sm:$0xf0]  ;;  %v5216_v56 = vld [vmem:[%s10182_s1 + $0x770] sm:$0xf] }
  0x4f   : > { %3466 = vmatpush.bf16.msra.mxu1 %v4897_v18  ;;  %3435 = vmatmul.bf16.vlgmr.msrb.gmra.mxu2 %v7283_v1  ;;  %v6477_v18 = vld [vmem:[%s10182_s1 + $0x524] sm:$0xf0]  ;;  %v5280_v60 = vld [vmem:[%s10182_s1 + $0x7f0] sm:$0xf]  ;;  %v6567_v61 = vld [vmem:[%s10182_s1 + $0x7f4] sm:$0xf0] }
  0x50   : > { %3479 = vmatpush.bf16.msra.mxu2 %v4961_v19  ;;  %3448 = vmatmul.bf16.vlgmr.msrb.gmra.mxu3 %v7288_v4  ;;  %v4984_v19 = vld [vmem:[%s10182_s1 + $0x5a0] sm:$0xf]  ;;  %v200_v2 = vshrl.u32 %v7497_v53, 16  ;;  %v7516_v6 = vld [vmem:[#allocation1 + $0x9] sm:$0xff]  ;;  %v5281_v13 = vor.u32 %v6567_v61, %v5280_v60  ;;  %v6515_v24 = vld [vmem:[%s10182_s1 + $0x654] sm:$0xf0] }
  0x51   : > { %3492 = vmatpush.bf16.msra.mxu3 %v5025_v23  ;;  %v4921_v23 = vor.u32 %v6477_v18, %v4920_v17  ;;  %v4985_v27 = vor.u32 %v6493_v20, %v4984_v19  ;;  %v5144_v12 = vld [vmem:[%s10182_s1 + $0x6e0] sm:$0xf]  ;;  %v6533_v14 = vld [vmem:[%s10182_s1 + $0x6e4] sm:$0xf0]  ;;  %v198_v18 = vshrl.u32 %v7516_v6, 16  ;;  %v202_v19 = vshrl.u32 %v7518_v7, 16 }
  0x52   : > { %3454 = vmatpush.bf16.msra.mxu0 %v4825_v29  ;;  %v4912_v29 = vld [vmem:[%s10182_s1 + $0x510] sm:$0xf]  ;;  %v6549_v16 = vld [vmem:[%s10182_s1 + $0x764] sm:$0xf0]  ;;  %v5272_v20 = vld [vmem:[%s10182_s1 + $0x7e0] sm:$0xf]  ;;  %v5145_v26 = vor.u32 %v6533_v14, %v5144_v12 }
  0x53   : > { %3467 = vmatpush.bf16.msra.mxu1 %v4889_v30  ;;  %v6475_v30 = vld [vmem:[%s10182_s1 + $0x514] sm:$0xf0]  ;;  %v7539_v17 = vld [vmem:[%s7179_s17 + $0x8] sm:$0xff]  ;;  %v5136_v25 = vld [vmem:[%s10182_s1 + $0x6d0] sm:$0xf] }
  0x54   : > { %3480 = vmatpush.bf16.msra.mxu2 %v4953_v31  ;;  %v4976_v31 = vld [vmem:[%s10182_s1 + $0x590] sm:$0xf]  ;;  %v4913_v39 = vor.u32 %v6475_v30, %v4912_v29  ;;  %v6531_v28 = vld [vmem:[%s10182_s1 + $0x6d4] sm:$0xf0]  ;;  %v6562_v48 = vld [vmem:[%s10182_s1 + $0x7d4] sm:$0xf] }
  0x55   : > { %3493 = vmatpush.bf16.msra.mxu3 %v5017_v35  ;;  %v6441_v35 = vld [vmem:[%s10182_s1 + $0x404] sm:$0xf0]  ;;  %v5200_v29 = vld [vmem:[%s10182_s1 + $0x750] sm:$0xf]  ;;  %v6547_v30 = vld [vmem:[%s10182_s1 + $0x754] sm:$0xf0] }
  0x56   : > { %3455 = vmatpush.bf16.msra.mxu0 %v4817_v41  ;;  %v6473_v41 = vld [vmem:[%s10182_s1 + $0x504] sm:$0xf0]  ;;  %v4777_v54 = vor.u32 %v6441_v35, %v4776_v33  ;;  %v6563_v33 = vld [vmem:[%s10182_s1 + $0x7d4] sm:$0xf0]  ;;  %v5120_v61 = vld [vmem:[%s10182_s1 + $0x6b0] sm:$0xf] }
  0x57   : > { %3468 = vmatpush.bf16.msra.mxu1 %v4881_v42  ;;  %v4968_v42 = vld [vmem:[%s10182_s1 + $0x580] sm:$0xf]  ;;  %v7581_v35 = vld [vmem:[#allocation1 + $0x36] sm:$0xff]  ;;  %v6512_v6 = vld [vmem:[%s10182_s1 + $0x644] sm:$0xf] }
  0x58   : > { %3481 = vmatpush.bf16.msra.mxu2 %v4945_v43  ;;  %v4977_v43 = vor.u32 %v6491_v32, %v4976_v31  ;;  %v4969_v62 = vor.u32 %v6489_v44, %v4968_v42  ;;  %v5264_v32 = vld [vmem:[%s10182_s1 + $0x7d0] sm:$0xf]  ;;  %v6513_v42 = vld [vmem:[%s10182_s1 + $0x644] sm:$0xf0]  ;;  %v6511_v60 = vld [vmem:[%s10182_s1 + $0x634] sm:$0xf0] }
  0x59   : > { %3494 = vmatpush.bf16.msra.mxu3 %v5009_v47  ;;  %v5152_v47 = vld [vmem:[%s10182_s1 + $0x6f0] sm:$0xf]  ;;  %v5265_v44 = vor.u32 %v6563_v33, %v5264_v32  ;;  %vm4195_vm3 = vsmask.f32 1280 }
  0x5a   : > { %3456 = vmatpush.bf16.msra.mxu0 %v4809_v57  ;;  %v6551_v57 = vld [vmem:[%s10182_s1 + $0x774] sm:$0xf0]  ;;  %v5153_v8 = vor.u32 %v6535_v55, %v5152_v47  ;;  %v6545_v47 = vld [vmem:[%s10182_s1 + $0x744] sm:$0xf0]  ;;  %v5104_v32 = vld [vmem:[%s10182_s1 + $0x690] sm:$0xf] }
  0x5b   : > { %3469 = vmatpush.bf16.msra.mxu1 %v4873_v58  ;;  %v4841_v58 = vor.u32 %v6457_v37, %v4840_v36  ;;  %v7583_v36 = vld [vmem:[#allocation1 + $0x2d] sm:$0xff]  ;;  %v7585_v37 = vld [vmem:[#allocation1 + $0x3f] sm:$0xff]  ;;  %v6561_v55 = vld [vmem:[%s10182_s1 + $0x7c4] sm:$0xf0] }
  0x5c   : > { %3482 = vmatpush.bf16.msra.mxu2 %v4937_v59  ;;  %v4905_v59 = vor.u32 %v6473_v41, %v4904_v40  ;;  %v5201_v40 = vor.u32 %v6547_v30, %v5200_v29  ;;  %v5064_v41 = vld [vmem:[%s10182_s1 + $0x640] sm:$0xf]  ;;  %v5040_v30 = vld [vmem:[%s10182_s1 + $0x610] sm:$0xf]  ;;  %vm4196_vm5 = vmand %vm4194_vm2, %vm4195_vm3 }
  0x5d   : > { %3495 = vmatpush.bf16.msra.mxu3 %v5001_v63  ;;  %v5089_v63 = vor.u32 %v6519_v46, %v5088_v45  ;;  %v6529_v45 = vld [vmem:[%s10182_s1 + $0x6c4] sm:$0xf0]  ;;  %v5192_v46 = vld [vmem:[%s10182_s1 + $0x740] sm:$0xf]  ;;  %vm4197_vm6 = vmor %vm4196_vm5, %vm4193_vm4 }
  0x5e   : > { %3457 = vmatpush.bf16.msra.mxu0 %v4801_v9  ;;  %v5217_v9 = vor.u32 %v6551_v57, %v5216_v56  ;;  %v5065_v56 = vor.u32 %v6513_v42, %v5064_v41  ;;  %v5232_v41 = vld [vmem:[%s10182_s1 + $0x790] sm:$0xf]  ;;  %v6555_v42 = vld [vmem:[%s10182_s1 + $0x794] sm:$0xf0] }
  0x5f   : > { %3470 = vmatpush.bf16.msra.mxu1 %v4865_v10  ;;  %v5080_v10 = vld [vmem:[%s10182_s1 + $0x660] sm:$0xf] }
  0x60   : > { %3483 = vmatpush.bf16.msra.mxu2 %v4929_v11  ;;  %v6517_v11 = vld [vmem:[%s10182_s1 + $0x664] sm:$0xf0] }
  0x61   : > { %3496 = vmatpush.bf16.msra.mxu3 %v4993_v15  ;;  %v5208_v15 = vld [vmem:[%s10182_s1 + $0x760] sm:$0xf] }
  0x62   : > { %3458 = vmatpush.bf16.msra.mxu0 %v4793_v21  ;;  %v6565_v21 = vld [vmem:[%s10182_s1 + $0x7e4] sm:$0xf0] }
  0x63   : > { %3471 = vmatpush.bf16.msra.mxu1 %v4857_v22  ;;  %v5081_v22 = vor.u32 %v6517_v11, %v5080_v10  ;;  %v5273_v31 = vor.u32 %v6565_v21, %v5272_v20  ;;  %v5248_v10 = vld [vmem:[%s10182_s1 + $0x7b0] sm:$0xf]  ;;  %v6559_v11 = vld [vmem:[%s10182_s1 + $0x7b4] sm:$0xf0]  ;;  %v5112_v20 = vld [vmem:[%s10182_s1 + $0x6a0] sm:$0xf] }
  0x64   : > { %3484 = vmatpush.bf16.msra.mxu2 %v4921_v23  ;;  %v5072_v23 = vld [vmem:[%s10182_s1 + $0x650] sm:$0xf]  ;;  %v5249_v21 = vor.u32 %v6559_v11, %v5248_v10  ;;  %v6615_v11 = vld [vmem:[%s10182_s1 + $0x974] sm:$0xf0] }
  0x65   : > { %3497 = vmatpush.bf16.msra.mxu3 %v4985_v27  ;;  %v5209_v27 = vor.u32 %v6549_v16, %v5208_v15  ;;  %v5048_v15 = vld [vmem:[%s10182_s1 + $0x620] sm:$0xf]  ;;  %v6509_v16 = vld [vmem:[%s10182_s1 + $0x624] sm:$0xf0]  ;;  %v5472_v10 = vld [vmem:[%s10182_s1 + $0x970] sm:$0xf] }
  0x66   : > { %3459 = vmatpush.bf16.msra.mxu0 %v4785_v34  ;;  %v7575_v34 = vld [vmem:[#allocation1 + $0x24] sm:$0xff] }
  0x67   : > { %3472 = vmatpush.bf16.msra.mxu1 %v4849_v38  ;;  %v5073_v38 = vor.u32 %v6515_v24, %v5072_v23  ;;  %221 = vst [vmem:[#allocation1] ss:$9 sm:$0xff] %v7539_v17  ;;  %v5176_v23 = vld [vmem:[%s10182_s1 + $0x720] sm:$0xf]  ;;  %v6541_v24 = vld [vmem:[%s10182_s1 + $0x724] sm:$0xf0] }
  0x68   : > { %3485 = vmatpush.bf16.msra.mxu2 %v4913_v39  ;;  %v5137_v39 = vor.u32 %v6531_v28, %v5136_v25  ;;  %v5240_v25 = vld [vmem:[%s10182_s1 + $0x7a0] sm:$0xf]  ;;  %v5177_v29 = vor.u32 %v6541_v24, %v5176_v23  ;;  %v5473_v23 = vor.u32 %v6615_v11, %v5472_v10  ;;  %v6609_v11 = vld [vmem:[%s10182_s1 + $0x944] sm:$0xf0] }
  0x69   : > { %3498 = vmatpush.bf16.msra.mxu3 %v4977_v43  ;;  %v5128_v43 = vld [vmem:[%s10182_s1 + $0x6c0] sm:$0xf] }
  0x6a   : > { %3460 = vmatpush.bf16.msra.mxu0 %v4777_v54  ;;  %v5256_v54 = vld [vmem:[%s10182_s1 + $0x7c0] sm:$0xf]  ;;  %v5129_v57 = vor.u32 %v6529_v45, %v5128_v43  ;;  %v6505_v45 = vld [vmem:[%s10182_s1 + $0x604] sm:$0xf0] }
  0x6b   : > { %3473 = vmatpush.bf16.msra.mxu1 %v4841_v58  ;;  %v5193_v58 = vor.u32 %v6545_v47, %v5192_v46  ;;  %v5336_v24 = vld [vmem:[%s10182_s1 + $0x860] sm:$0xf] }
  0x6c   : > { %3486 = vmatpush.bf16.msra.mxu2 %v4905_v59  ;;  %v5056_v59 = vld [vmem:[%s10182_s1 + $0x630] sm:$0xf]  ;;  %v5448_v10 = vld [vmem:[%s10182_s1 + $0x940] sm:$0xf] }
  0x6d   : > { %3499 = vmatpush.bf16.msra.mxu3 %v4969_v62  ;;  %3461 = vmatmul.bf16.vlgmr.msra.gmra.mxu0 %v196_v0  ;;  %v5257_v62 = vor.u32 %v6561_v55, %v5256_v54  ;;  %v5057_v12 = vor.u32 %v6511_v60, %v5056_v59  ;;  %v5096_v54 = vld [vmem:[%s10182_s1 + $0x680] sm:$0xf]  ;;  %v6521_v55 = vld [vmem:[%s10182_s1 + $0x684] sm:$0xf0] }
  0x6e   : > { %3505 = vmatpush.bf16.msrb.mxu0 %v5089_v63  ;;  %3474 = vmatmul.bf16.vlgmr.msra.gmra.mxu1 %v198_v18  ;;  %v6527_v63 = vld [vmem:[%s10182_s1 + $0x6b4] sm:$0xf0]  ;;  %v5224_v59 = vld [vmem:[%s10182_s1 + $0x780] sm:$0xf]  ;;  %v6553_v60 = vld [vmem:[%s10182_s1 + $0x784] sm:$0xf0] }
  0x6f   : > { %3518 = vmatpush.bf16.msrb.mxu1 %v5153_v8  ;;  %3487 = vmatmul.bf16.vlgmr.msra.gmra.mxu2 %v200_v2  ;;  %v5184_v8 = vld [vmem:[%s10182_s1 + $0x730] sm:$0xf] }
  0x70   : > { %3531 = vmatpush.bf16.msrb.mxu2 %v5217_v9  ;;  %3500 = vmatmul.bf16.vlgmr.msra.gmra.mxu3 %v202_v19  ;;  %v6543_v9 = vld [vmem:[%s10182_s1 + $0x734] sm:$0xf0] }
  0x71   : > { %3544 = vmatpush.bf16.msrb.mxu3 %v5281_v13  ;;  %v5121_v13 = vor.u32 %v6527_v63, %v5120_v61  ;;  %v5185_v14 = vor.u32 %v6543_v9, %v5184_v8  ;;  %v5344_v61 = vld [vmem:[%s10182_s1 + $0x870] sm:$0xf]  ;;  %v6599_v9 = vld [vmem:[%s10182_s1 + $0x8f4] sm:$0xf0] }
  0x72   : > { %3506 = vmatpush.bf16.msrb.mxu0 %v5081_v22  ;;  %v6525_v22 = vld [vmem:[%s10182_s1 + $0x6a4] sm:$0xf0]  ;;  %v5408_v63 = vld [vmem:[%s10182_s1 + $0x8f0] sm:$0xf] }
  0x73   : > { %3519 = vmatpush.bf16.msrb.mxu1 %v5145_v26  ;;  %v6557_v26 = vld [vmem:[%s10182_s1 + $0x7a4] sm:$0xf0]  ;;  %v5113_v28 = vor.u32 %v6525_v22, %v5112_v20  ;;  %v5409_v22 = vor.u32 %v6599_v9, %v5408_v63  ;;  %v5384_v63 = vld [vmem:[%s10182_s1 + $0x8c0] sm:$0xf] }
  0x74   : > { %3532 = vmatpush.bf16.msrb.mxu2 %v5209_v27  ;;  %v5049_v27 = vor.u32 %v6509_v16, %v5048_v15  ;;  %v5241_v33 = vor.u32 %v6557_v26, %v5240_v25  ;;  %v6631_v15 = vld [vmem:[%s10182_s1 + $0x9f4] sm:$0xf0]  ;;  %v5225_v16 = vor.u32 %v6553_v60, %v5224_v59  ;;  %v6581_v25 = vld [vmem:[%s10182_s1 + $0x864] sm:$0xf0]  ;;  %v5400_v26 = vld [vmem:[%s10182_s1 + $0x8e0] sm:$0xf] }
  0x75   : > { %3545 = vmatpush.bf16.msrb.mxu3 %v5273_v31  ;;  %v6507_v31 = vld [vmem:[%s10182_s1 + $0x614] sm:$0xf0]  ;;  %v6593_v9 = vld [vmem:[%s10182_s1 + $0x8c4] sm:$0xf0] }
  0x76   : > { %3507 = vmatpush.bf16.msrb.mxu0 %v5073_v38  ;;  %v6523_v38 = vld [vmem:[%s10182_s1 + $0x694] sm:$0xf0]  ;;  %v5041_v43 = vor.u32 %v6507_v31, %v5040_v30  ;;  %v6613_v30 = vld [vmem:[%s10182_s1 + $0x964] sm:$0xf0]  ;;  %v208_v31 = vshrl.u32 %v7581_v35, 16 }
  0x77   : > { %3520 = vmatpush.bf16.msrb.mxu1 %v5137_v39  ;;  %v5168_v39 = vld [vmem:[%s10182_s1 + $0x710] sm:$0xf]  ;;  %v5105_v46 = vor.u32 %v6523_v38, %v5104_v32  ;;  %v206_v32 = vshrl.u32 %v7583_v36, 16  ;;  %v6629_v38 = vld [vmem:[%s10182_s1 + $0x9e4] sm:$0xf0] }
  0x78   : > { %3533 = vmatpush.bf16.msrb.mxu2 %v5201_v40  ;;  %v6539_v40 = vld [vmem:[%s10182_s1 + $0x714] sm:$0xf0]  ;;  %v6576_v36 = vld [vmem:[%s10182_s1 + $0x844] sm:$0xf] }
  0x79   : > { %3546 = vmatpush.bf16.msrb.mxu3 %v5265_v44  ;;  %v5032_v44 = vld [vmem:[%s10182_s1 + $0x600] sm:$0xf]  ;;  %v5169_v47 = vor.u32 %v6539_v40, %v5168_v39  ;;  %v10193_v39 = vshrl.u32 %v7585_v37, 16  ;;  %v5337_v40 = vor.u32 %v6581_v25, %v5336_v24  ;;  %v6591_v25 = vld [vmem:[%s10182_s1 + $0x8b4] sm:$0xf0] }
  0x7a   : > { %3508 = vmatpush.bf16.msrb.mxu0 %v5065_v56  ;;  %v5160_v56 = vld [vmem:[%s10182_s1 + $0x700] sm:$0xf]  ;;  %v5033_v8 = vor.u32 %v6505_v45, %v5032_v44  ;;  %v6579_v44 = vld [vmem:[%s10182_s1 + $0x854] sm:$0xf0]  ;;  %v5392_v45 = vld [vmem:[%s10182_s1 + $0x8d0] sm:$0xf] }
  0x7b   : > { %3521 = vmatpush.bf16.msrb.mxu1 %v5129_v57  ;;  %v5233_v57 = vor.u32 %v6555_v42, %v5232_v41 }
  0x7c   : > { %3534 = vmatpush.bf16.msrb.mxu2 %v5193_v58  ;;  %v6537_v58 = vld [vmem:[%s10182_s1 + $0x704] sm:$0xf0] }
  0x7d   : > { %3547 = vmatpush.bf16.msrb.mxu3 %v5257_v62  ;;  %v6583_v62 = vld [vmem:[%s10182_s1 + $0x874] sm:$0xf0] }
  0x7e   : > { %3509 = vmatpush.bf16.msrb.mxu0 %v5057_v12  ;;  %v5097_v12 = vor.u32 %v6521_v55, %v5096_v54  ;;  %v5345_v20 = vor.u32 %v6583_v62, %v5344_v61  ;;  %v5456_v54 = vld [vmem:[%s10182_s1 + $0x950] sm:$0xf]  ;;  %v6611_v55 = vld [vmem:[%s10182_s1 + $0x954] sm:$0xf0]  ;;  %v5320_v61 = vld [vmem:[%s10182_s1 + $0x840] sm:$0xf] }
  0x7f   : > { %3522 = vmatpush.bf16.msrb.mxu1 %v5121_v13  ;;  %v5161_v13 = vor.u32 %v6537_v58, %v5160_v56  ;;  %v5520_v56 = vld [vmem:[%s10182_s1 + $0x9d0] sm:$0xf]  ;;  %v5457_v60 = vor.u32 %v6611_v55, %v5456_v54  ;;  %v6577_v62 = vld [vmem:[%s10182_s1 + $0x844] sm:$0xf0] }
  0x80   : > { %3535 = vmatpush.bf16.msrb.mxu2 %v5185_v14  ;;  %v5536_v14 = vld [vmem:[%s10182_s1 + $0x9f0] sm:$0xf]  ;;  %v6621_v54 = vld [vmem:[%s10182_s1 + $0x9a4] sm:$0xf0] }
  0x81   : > { %3548 = vmatpush.bf16.msrb.mxu3 %v5249_v21  ;;  %v204_v21 = vshrl.u32 %v7575_v34, 16  ;;  %v6626_v34 = vld [vmem:[%s10182_s1 + $0x9d4] sm:$0xf] }
  0x82   : > { %3510 = vmatpush.bf16.msrb.mxu0 %v5049_v27  ;;  %v5537_v27 = vor.u32 %v6631_v15, %v5536_v14  ;;  %v5321_v14 = vor.u32 %v6577_v62, %v5320_v61  ;;  %v5385_v15 = vor.u32 %v6593_v9, %v5384_v63  ;;  %v6587_v62 = vld [vmem:[%s10182_s1 + $0x894] sm:$0xf0]  ;;  %v5424_v63 = vld [vmem:[%s10182_s1 + $0x910] sm:$0xf] }
  0x83   : > { %3523 = vmatpush.bf16.msrb.mxu1 %v5113_v28  ;;  %v6597_v28 = vld [vmem:[%s10182_s1 + $0x8e4] sm:$0xf0]  ;;  %v5488_v9 = vld [vmem:[%s10182_s1 + $0x990] sm:$0xf] }
  0x84   : > { %3536 = vmatpush.bf16.msrb.mxu2 %v5177_v29  ;;  %v5464_v29 = vld [vmem:[%s10182_s1 + $0x960] sm:$0xf]  ;;  %v5401_v41 = vor.u32 %v6597_v28, %v5400_v26  ;;  %v5440_v26 = vld [vmem:[%s10182_s1 + $0x930] sm:$0xf] }
  0x85   : > { %3549 = vmatpush.bf16.msrb.mxu3 %v5241_v33  ;;  %v5528_v33 = vld [vmem:[%s10182_s1 + $0x9e0] sm:$0xf]  ;;  %v5465_v42 = vor.u32 %v6613_v30, %v5464_v29  ;;  %v5504_v28 = vld [vmem:[%s10182_s1 + $0x9b0] sm:$0xf]  ;;  %v6623_v29 = vld [vmem:[%s10182_s1 + $0x9b4] sm:$0xf0] }
  0x86   : > { %3511 = vmatpush.bf16.msrb.mxu0 %v5041_v43  ;;  %v5328_v43 = vld [vmem:[%s10182_s1 + $0x850] sm:$0xf] }
  0x87   : > { %3524 = vmatpush.bf16.msrb.mxu1 %v5105_v46  ;;  %v5529_v46 = vor.u32 %v6629_v38, %v5528_v33  ;;  %v5329_v58 = vor.u32 %v6579_v44, %v5328_v43  ;;  %v5505_v43 = vor.u32 %v6623_v29, %v5504_v28  ;;  %v6589_v44 = vld [vmem:[%s10182_s1 + $0x8a4] sm:$0xf0]  ;;  %v6647_v28 = vld [vmem:[%s10182_s1 + $0xa74] sm:$0xf0]  ;;  %v5664_v29 = vld [vmem:[%s10182_s1 + $0xaf0] sm:$0xf] }
  0x88   : > { %3537 = vmatpush.bf16.msrb.mxu2 %v5169_v47  ;;  %v6595_v47 = vld [vmem:[%s10182_s1 + $0x8d4] sm:$0xf0] }
  0x89   : > { %3550 = vmatpush.bf16.msrb.mxu3 %v5233_v57  ;;  %v6627_v57 = vld [vmem:[%s10182_s1 + $0x9d4] sm:$0xf0]  ;;  %v5393_v59 = vor.u32 %v6595_v47, %v5392_v45  ;;  %v5432_v45 = vld [vmem:[%s10182_s1 + $0x920] sm:$0xf] }
  0x8a   : > { %3512 = vmatpush.bf16.msrb.mxu0 %v5033_v8  ;;  %v5521_v8 = vor.u32 %v6627_v57, %v5520_v56  ;;  %v5496_v47 = vld [vmem:[%s10182_s1 + $0x9a0] sm:$0xf] }
  0x8b   : > { %3525 = vmatpush.bf16.msrb.mxu1 %v5097_v12  ;;  %v5512_v12 = vld [vmem:[%s10182_s1 + $0x9c0] sm:$0xf]  ;;  %v5497_v61 = vor.u32 %v6621_v54, %v5496_v47 }
  0x8c   : > { %3538 = vmatpush.bf16.msrb.mxu2 %v5161_v13  ;;  %v6625_v13 = vld [vmem:[%s10182_s1 + $0x9c4] sm:$0xf0]  ;;  %v5592_v47 = vld [vmem:[%s10182_s1 + $0xa60] sm:$0xf] }
  0x8d   : > { %3551 = vmatpush.bf16.msrb.mxu3 %v5225_v16  ;;  %3513 = vmatmul.bf16.vlgmr.msrb.gmra.mxu0 %v204_v21  ;;  %v5449_v16 = vor.u32 %v6609_v11, %v5448_v10  ;;  %v5513_v24 = vor.u32 %v6625_v13, %v5512_v12  ;;  %v6619_v10 = vld [vmem:[%s10182_s1 + $0x994] sm:$0xf0]  ;;  %v5288_v12 = vld [vmem:[%s10182_s1 + $0x800] sm:$0xf]  ;;  %v6569_v13 = vld [vmem:[%s10182_s1 + $0x804] sm:$0xf0] }
  0x8e   : > { %3557 = vmatpush.bf16.msra.mxu0 %v5345_v20  ;;  %3526 = vmatmul.bf16.vlgmr.msrb.gmra.mxu1 %v206_v32  ;;  %v5312_v20 = vld [vmem:[%s10182_s1 + $0x830] sm:$0xf] }
  0x8f   : > { %3570 = vmatpush.bf16.msra.mxu1 %v5409_v22  ;;  %3539 = vmatmul.bf16.vlgmr.msrb.gmra.mxu2 %v208_v31  ;;  %v6575_v22 = vld [vmem:[%s10182_s1 + $0x834] sm:$0xf0] }
  0x90   : > { %3583 = vmatpush.bf16.msra.mxu2 %v5473_v23  ;;  %3552 = vmatmul.bf16.vlgmr.msrb.gmra.mxu3 %v10193_v39  ;;  %v5376_v23 = vld [vmem:[%s10182_s1 + $0x8b0] sm:$0xf]  ;;  %v5313_v30 = vor.u32 %v6575_v22, %v5312_v20  ;;  %v6585_v20 = vld [vmem:[%s10182_s1 + $0x884] sm:$0xf0]  ;;  %v5416_v22 = vld [vmem:[%s10182_s1 + $0x900] sm:$0xf] }
  0x91   : > { %3596 = vmatpush.bf16.msra.mxu3 %v5537_v27  ;;  %v6607_v27 = vld [vmem:[%s10182_s1 + $0x934] sm:$0xf0]  ;;  %v5377_v33 = vor.u32 %v6591_v25, %v5376_v23  ;;  %v5489_v23 = vor.u32 %v6619_v10, %v5488_v9  ;;  %v5480_v25 = vld [vmem:[%s10182_s1 + $0x980] sm:$0xf] }
  0x92   : > { %3558 = vmatpush.bf16.msra.mxu0 %v5337_v40  ;;  %v5441_v38 = vor.u32 %v6607_v27, %v5440_v26  ;;  %v5304_v40 = vld [vmem:[%s10182_s1 + $0x820] sm:$0xf]  ;;  %v6617_v26 = vld [vmem:[%s10182_s1 + $0x984] sm:$0xf0]  ;;  %v5600_v27 = vld [vmem:[%s10182_s1 + $0xa70] sm:$0xf] }
  0x93   : > { %3571 = vmatpush.bf16.msra.mxu1 %v5401_v41  ;;  %v6573_v41 = vld [vmem:[%s10182_s1 + $0x824] sm:$0xf0]  ;;  %v5784_v9 = vld [vmem:[%s10182_s1 + $0xbe0] sm:$0xf] }
  0x94   : > { %3584 = vmatpush.bf16.msra.mxu2 %v5465_v42  ;;  %v5368_v42 = vld [vmem:[%s10182_s1 + $0x8a0] sm:$0xf]  ;;  %v5305_v55 = vor.u32 %v6573_v41, %v5304_v40  ;;  %v6679_v40 = vld [vmem:[%s10182_s1 + $0xb74] sm:$0xf0] }
  0x95   : > { %3597 = vmatpush.bf16.msra.mxu3 %v5529_v46  ;;  %v6605_v46 = vld [vmem:[%s10182_s1 + $0x924] sm:$0xf0]  ;;  %v5369_v56 = vor.u32 %v6589_v44, %v5368_v42  ;;  %v6695_v44 = vld [vmem:[%s10182_s1 + $0xbf4] sm:$0xf0] }
  0x96   : > { %3559 = vmatpush.bf16.msra.mxu0 %v5329_v58  ;;  %v5433_v57 = vor.u32 %v6605_v46, %v5432_v45  ;;  %v5296_v58 = vld [vmem:[%s10182_s1 + $0x810] sm:$0xf]  ;;  %v5481_v45 = vor.u32 %v6617_v26, %v5480_v25  ;;  %v5601_v46 = vor.u32 %v6647_v28, %v5600_v27  ;;  %v7965_v10 = vld [vmem:[#allocation1 + $0x1b] sm:$0xff] }
  0x97   : > { %3572 = vmatpush.bf16.msra.mxu1 %v5393_v59  ;;  %v6571_v59 = vld [vmem:[%s10182_s1 + $0x814] sm:$0xf0]  ;;  %v7986_v25 = vld [vmem:[#allocation1 + $0x2d] sm:$0xff]  ;;  %v7988_v26 = vld [vmem:[#allocation1 + $0x3f] sm:$0xff] }
  0x98   : > { %3585 = vmatpush.bf16.msra.mxu2 %v5457_v60  ;;  %v5360_v60 = vld [vmem:[%s10182_s1 + $0x890] sm:$0xf]  ;;  %v5297_v11 = vor.u32 %v6571_v59, %v5296_v58  ;;  %v5656_v58 = vld [vmem:[%s10182_s1 + $0xae0] sm:$0xf]  ;;  %v6661_v59 = vld [vmem:[%s10182_s1 + $0xae4] sm:$0xf0] }
  0x99   : > { %3598 = vmatpush.bf16.msra.mxu3 %v5521_v8  ;;  %v6603_v8 = vld [vmem:[%s10182_s1 + $0x914] sm:$0xf0]  ;;  %v5712_v28 = vld [vmem:[%s10182_s1 + $0xb50] sm:$0xf] }
  0x9a   : > { %3560 = vmatpush.bf16.msra.mxu0 %v5321_v14  ;;  %v5361_v14 = vor.u32 %v6587_v62, %v5360_v60  ;;  %v7954_v62 = vld [vmem:[#allocation1 + $0x9] sm:$0xff] }
  0x9b   : > { %3573 = vmatpush.bf16.msra.mxu1 %v5385_v15  ;;  %v5425_v15 = vor.u32 %v6603_v8, %v5424_v63  ;;  %v5720_v63 = vld [vmem:[%s10182_s1 + $0xb60] sm:$0xf]  ;;  %v6677_v8 = vld [vmem:[%s10182_s1 + $0xb64] sm:$0xf0] }
  0x9c   : > { %3586 = vmatpush.bf16.msra.mxu2 %v5449_v16  ;;  %v5352_v16 = vld [vmem:[%s10182_s1 + $0x880] sm:$0xf] }
  0x9d   : > { %3599 = vmatpush.bf16.msra.mxu3 %v5513_v24  ;;  %v6601_v24 = vld [vmem:[%s10182_s1 + $0x904] sm:$0xf0]  ;;  %v5353_v41 = vor.u32 %v6585_v20, %v5352_v16  ;;  %v6659_v16 = vld [vmem:[%s10182_s1 + $0xad4] sm:$0xf0] }
  0x9e   : > { %3561 = vmatpush.bf16.msra.mxu0 %v5313_v30  ;;  %v5289_v30 = vor.u32 %v6569_v13, %v5288_v12  ;;  %v5417_v42 = vor.u32 %v6601_v24, %v5416_v22  ;;  %v5584_v12 = vld [vmem:[%s10182_s1 + $0xa50] sm:$0xf]  ;;  %v6643_v13 = vld [vmem:[%s10182_s1 + $0xa54] sm:$0xf0]  ;;  %v7982_v20 = vld [vmem:[#allocation1 + $0x24] sm:$0xff]  ;;  %v5657_v22 = vor.u32 %v6661_v59, %v5656_v58 }
  0x9f   : > { %3574 = vmatpush.bf16.msra.mxu1 %v5377_v33  ;;  %v6663_v33 = vld [vmem:[%s10182_s1 + $0xaf4] sm:$0xf0] }
  0xa0   : > { %3587 = vmatpush.bf16.msra.mxu2 %v5441_v38  ;;  %v5728_v38 = vld [vmem:[%s10182_s1 + $0xb70] sm:$0xf]  ;;  %v5665_v54 = vor.u32 %v6663_v33, %v5664_v29  ;;  %v7984_v24 = vld [vmem:[#allocation1 + $0x36] sm:$0xff] }
  0xa1   : > { %3600 = vmatpush.bf16.msra.mxu3 %v5505_v43  ;;  %v5792_v43 = vld [vmem:[%s10182_s1 + $0xbf0] sm:$0xf]  ;;  %v6675_v29 = vld [vmem:[%s10182_s1 + $0xb54] sm:$0xf0] }
  0xa2   : > { %3562 = vmatpush.bf16.msra.mxu0 %v5305_v55  ;;  %v5729_v55 = vor.u32 %v6679_v40, %v5728_v38  ;;  %v5793_v60 = vor.u32 %v6695_v44, %v5792_v43  ;;  %v6691_v33 = vld [vmem:[%s10182_s1 + $0xbd4] sm:$0xf0]  ;;  %v5585_v38 = vor.u32 %v6643_v13, %v5584_v12  ;;  %v5640_v43 = vld [vmem:[%s10182_s1 + $0xac0] sm:$0xf]  ;;  %v5696_v12 = vld [vmem:[%s10182_s1 + $0xb30] sm:$0xf] }
  0xa3   : > { %3575 = vmatpush.bf16.msra.mxu1 %v5369_v56  ;;  %v7941_v56 = vld [vmem:[#allocation1] sm:$0xff]  ;;  %v6671_v13 = vld [vmem:[%s10182_s1 + $0xb34] sm:$0xf0] }
  0xa4   : > { %3588 = vmatpush.bf16.msra.mxu2 %v5433_v57  ;;  %v6645_v57 = vld [vmem:[%s10182_s1 + $0xa64] sm:$0xf0] }
  0xa5   : > { %3601 = vmatpush.bf16.msra.mxu3 %v5497_v61  ;;  %v7952_v61 = vld [vmem:[#allocation1 + $0x12] sm:$0xff] }
  0xa6   : > { %3563 = vmatpush.bf16.msra.mxu0 %v5297_v11  ;;  %v6693_v11 = vld [vmem:[%s10182_s1 + $0xbe4] sm:$0xf0]  ;;  %238 = vst [vmem:[#allocation1] ss:$9 sm:$0xff] %v7539_v17  ;;  %v5713_v17 = vor.u32 %v6675_v29, %v5712_v28  ;;  %v5624_v29 = vld [vmem:[%s10182_s1 + $0xaa0] sm:$0xf] }
  0xa7   : > { %3576 = vmatpush.bf16.msra.mxu1 %v5361_v14  ;;  %v5593_v14 = vor.u32 %v6645_v57, %v5592_v47  ;;  %v5785_v27 = vor.u32 %v6693_v11, %v5784_v9  ;;  %v6673_v47 = vld [vmem:[%s10182_s1 + $0xb44] sm:$0xf0]  ;;  %v6655_v11 = vld [vmem:[%s10182_s1 + $0xab4] sm:$0xf0] }
  0xa8   : > { %3589 = vmatpush.bf16.msra.mxu2 %v5425_v15  ;;  %v5648_v15 = vld [vmem:[%s10182_s1 + $0xad0] sm:$0xf]  ;;  %v6637_v28 = vld [vmem:[%s10182_s1 + $0xa24] sm:$0xf0] }
  0xa9   : > { %3602 = vmatpush.bf16.msra.mxu3 %v5489_v23  ;;  %v5721_v23 = vor.u32 %v6677_v8, %v5720_v63  ;;  %v5649_v40 = vor.u32 %v6659_v16, %v5648_v15  ;;  %v6639_v63 = vld [vmem:[%s10182_s1 + $0xa34] sm:$0xf0]  ;;  %v5632_v8 = vld [vmem:[%s10182_s1 + $0xab0] sm:$0xf] }
  0xaa   : > { %3564 = vmatpush.bf16.msra.mxu0 %v5289_v30  ;;  %v5776_v30 = vld [vmem:[%s10182_s1 + $0xbd0] sm:$0xf]  ;;  %v6687_v15 = vld [vmem:[%s10182_s1 + $0xbb4] sm:$0xf0] }
  0xab   : > { %3577 = vmatpush.bf16.msra.mxu1 %v5353_v41  ;;  %v5576_v41 = vld [vmem:[%s10182_s1 + $0xa40] sm:$0xf]  ;;  %v5777_v44 = vor.u32 %v6691_v33, %v5776_v30  ;;  %v6653_v33 = vld [vmem:[%s10182_s1 + $0xaa4] sm:$0xf0] }
  0xac   : > { %3590 = vmatpush.bf16.msra.mxu2 %v5417_v42  ;;  %v6641_v42 = vld [vmem:[%s10182_s1 + $0xa44] sm:$0xf0] }
  0xad   : > { %3603 = vmatpush.bf16.msra.mxu3 %v5481_v45  ;;  %3565 = vmatmul.bf16.vlgmr.msra.gmra.mxu0 %v7941_v56  ;;  %v6657_v45 = vld [vmem:[%s10182_s1 + $0xac4] sm:$0xf0]  ;;  %v5577_v57 = vor.u32 %v6641_v42, %v5576_v41 }
  0xae   : > { %3609 = vmatpush.bf16.msrb.mxu0 %v5601_v46  ;;  %3578 = vmatmul.bf16.vlgmr.msra.gmra.mxu1 %v7954_v62  ;;  %v5704_v46 = vld [vmem:[%s10182_s1 + $0xb40] sm:$0xf]  ;;  %v5641_v58 = vor.u32 %v6657_v45, %v5640_v43  ;;  %v6685_v41 = vld [vmem:[%s10182_s1 + $0xba4] sm:$0xf0]  ;;  %v5552_v43 = vld [vmem:[%s10182_s1 + $0xa10] sm:$0xf] }
  0xaf   : > { %3622 = vmatpush.bf16.msrb.mxu1 %v5665_v54  ;;  %3591 = vmatmul.bf16.vlgmr.msra.gmra.mxu2 %v7952_v61  ;;  %v5768_v54 = vld [vmem:[%s10182_s1 + $0xbc0] sm:$0xf]  ;;  %v5705_v59 = vor.u32 %v6673_v47, %v5704_v46  ;;  %v6635_v46 = vld [vmem:[%s10182_s1 + $0xa14] sm:$0xf0]  ;;  %v5616_v47 = vld [vmem:[%s10182_s1 + $0xa90] sm:$0xf] }
  0xb0   : > { %3635 = vmatpush.bf16.msrb.mxu2 %v5729_v55  ;;  %3604 = vmatmul.bf16.vlgmr.msra.gmra.mxu3 %v7965_v10  ;;  %v6689_v55 = vld [vmem:[%s10182_s1 + $0xbc4] sm:$0xf0] }
  0xb1   : > { %3648 = vmatpush.bf16.msrb.mxu3 %v5793_v60  ;;  %v5568_v60 = vld [vmem:[%s10182_s1 + $0xa30] sm:$0xf]  ;;  %v5769_v9 = vor.u32 %v6689_v55, %v5768_v54  ;;  %v6651_v54 = vld [vmem:[%s10182_s1 + $0xa94] sm:$0xf0] }
  0xb2   : > { %3610 = vmatpush.bf16.msrb.mxu0 %v5593_v14  ;;  %v5760_v14 = vld [vmem:[%s10182_s1 + $0xbb0] sm:$0xf]  ;;  %v5569_v16 = vor.u32 %v6639_v63, %v5568_v60  ;;  %v6683_v63 = vld [vmem:[%s10182_s1 + $0xb94] sm:$0xf0] }
  0xb3   : > { %3623 = vmatpush.bf16.msrb.mxu1 %v5657_v22  ;;  %v5633_v22 = vor.u32 %v6655_v11, %v5632_v8  ;;  %v5761_v30 = vor.u32 %v6687_v15, %v5760_v14  ;;  %v5744_v60 = vld [vmem:[%s10182_s1 + $0xb90] sm:$0xf]  ;;  %v5553_v8 = vor.u32 %v6635_v46, %v5552_v43  ;;  %v6633_v11 = vld [vmem:[%s10182_s1 + $0xa04] sm:$0xf0] }
  0xb4   : > { %3636 = vmatpush.bf16.msrb.mxu2 %v5721_v23  ;;  %v5697_v23 = vor.u32 %v6671_v13, %v5696_v12  ;;  %v5608_v12 = vld [vmem:[%s10182_s1 + $0xa80] sm:$0xf]  ;;  %v5617_v13 = vor.u32 %v6651_v54, %v5616_v47  ;;  %v6649_v15 = vld [vmem:[%s10182_s1 + $0xa84] sm:$0xf0]  ;;  %v3358_v43 = vpop.f32.mrf.mxu0  ;;  %v6048_v46 = vld [vmem:[%s10182_s1 + $0xdf0] sm:$0xf] }
  0xb5   : > { %3649 = vmatpush.bf16.msrb.mxu3 %v5785_v27  ;;  %v5560_v27 = vld [vmem:[%s10182_s1 + $0xa20] sm:$0xf]  ;;  %v6759_v47 = vld [vmem:[%s10182_s1 + $0xdf4] sm:$0xf0] }
  0xb6   : > { %3611 = vmatpush.bf16.msrb.mxu0 %v5585_v38  ;;  %v5688_v38 = vld [vmem:[%s10182_s1 + $0xb20] sm:$0xf]  ;;  %v5561_v42 = vor.u32 %v6637_v28, %v5560_v27  ;;  %v6665_v27 = vld [vmem:[%s10182_s1 + $0xb04] sm:$0xf0] }
  0xb7   : > { %3624 = vmatpush.bf16.msrb.mxu1 %v5649_v40  ;;  %v6669_v40 = vld [vmem:[%s10182_s1 + $0xb24] sm:$0xf0]  ;;  %v5736_v28 = vld [vmem:[%s10182_s1 + $0xb80] sm:$0xf] }
  0xb8   : > { %3637 = vmatpush.bf16.msrb.mxu2 %v5713_v17  ;;  %v5752_v17 = vld [vmem:[%s10182_s1 + $0xba0] sm:$0xf]  ;;  %v5689_v45 = vor.u32 %v6669_v40, %v5688_v38  ;;  %v5920_v38 = vld [vmem:[%s10182_s1 + $0xcf0] sm:$0xf] }
  0xb9   : > { %3650 = vmatpush.bf16.msrb.mxu3 %v5777_v44  ;;  %v5625_v44 = vor.u32 %v6653_v33, %v5624_v29  ;;  %v5753_v55 = vor.u32 %v6685_v41, %v5752_v17  ;;  %v6681_v29 = vld [vmem:[%s10182_s1 + $0xb84] sm:$0xf0]  ;;  %v6711_v33 = vld [vmem:[%s10182_s1 + $0xc74] sm:$0xf0]  ;;  %v5984_v41 = vld [vmem:[%s10182_s1 + $0xd70] sm:$0xf] }
  0xba   : > { %3612 = vmatpush.bf16.msrb.mxu0 %v5577_v57  ;;  %v5680_v57 = vld [vmem:[%s10182_s1 + $0xb10] sm:$0xf]  ;;  %v6727_v17 = vld [vmem:[%s10182_s1 + $0xcf4] sm:$0xf0] }
  0xbb   : > { %3625 = vmatpush.bf16.msrb.mxu1 %v5641_v58  ;;  %v6667_v58 = vld [vmem:[%s10182_s1 + $0xb14] sm:$0xf0] }
  0xbc   : > { %3638 = vmatpush.bf16.msrb.mxu2 %v5705_v59  ;;  %v783_v59 = vld [vmem:[%s10183_s2] sm:$0x3]  ;;  %v5681_v14 = vor.u32 %v6667_v58, %v5680_v57  ;;  %v5921_v58 = vor.u32 %v6727_v17, %v5920_v38  ;;  %v6707_v38 = vld [vmem:[%s10182_s1 + $0xc54] sm:$0xf0]  ;;  %v3397_v17 = vpop.f32.mrf.mxu3 }
  0xbd   : > { %3651 = vmatpush.bf16.msrb.mxu3 %v5769_v9  ;;  %v5544_v9 = vld [vmem:[%s10182_s1 + $0xa00] sm:$0xf] }
  0xbe   : > { %3613 = vmatpush.bf16.msrb.mxu0 %v5569_v16  ;;  %v5672_v16 = vld [vmem:[%s10182_s1 + $0xb00] sm:$0xf]  ;;  %v5545_v40 = vor.u32 %v6633_v11, %v5544_v9  ;;  %v3371_v9 = vpop.f32.mrf.mxu1  ;;  %v6049_v11 = vor.u32 %v6759_v47, %v6048_v46  ;;  %v6032_v46 = vld [vmem:[%s10182_s1 + $0xdd0] sm:$0xf]  ;;  %v6755_v47 = vld [vmem:[%s10182_s1 + $0xdd4] sm:$0xf0] }
  0xbf   : > { %3626 = vmatpush.bf16.msrb.mxu1 %v5633_v22  ;;  %v3345_v22 = vperm.slane %v783_v59, 0 }
  0xc0   : > { %3639 = vmatpush.bf16.msrb.mxu2 %v5697_v23  ;;  %v5745_v23 = vor.u32 %v6683_v63, %v5744_v60  ;;  %v5848_v60 = vld [vmem:[%s10182_s1 + $0xc60] sm:$0xf]  ;;  %v6709_v63 = vld [vmem:[%s10182_s1 + $0xc64] sm:$0xf0] }
  0xc1   : > { %3652 = vmatpush.bf16.msrb.mxu3 %v5761_v30  ;;  %v5856_v30 = vld [vmem:[%s10182_s1 + $0xc70] sm:$0xf]  ;;  %v3359_v54 = vadd.f32 %v3358_v43, %v3345_v22  ;;  %v6757_v22 = vld [vmem:[%s10182_s1 + $0xde4] sm:$0xf0] }
  0xc2   : > { %3614 = vmatpush.bf16.msrb.mxu0 %v5561_v42  ;;  %v6743_v42 = vld [vmem:[%s10182_s1 + $0xd74] sm:$0xf0]  ;;  %v5857_v57 = vor.u32 %v6711_v33, %v5856_v30  ;;  %v5840_v33 = vld [vmem:[%s10182_s1 + $0xc50] sm:$0xf] }
  0xc3   : > { %3627 = vmatpush.bf16.msrb.mxu1 %v5625_v44  ;;  %v5609_v44 = vor.u32 %v6649_v15, %v5608_v12  ;;  %v5985_v59 = vor.u32 %v6743_v42, %v5984_v41  ;;  %v6725_v12 = vld [vmem:[%s10182_s1 + $0xce4] sm:$0xf0]  ;;  %v3372_v15 = vadd.f32 %v3371_v9, %v3359_v54  ;;  %v6723_v42 = vld [vmem:[%s10182_s1 + $0xcd4] sm:$0xf0]  ;;  %v5968_v43 = vld [vmem:[%s10182_s1 + $0xd50] sm:$0xf]  ;;  %v6033_v9 = vor.u32 %v6755_v47, %v6032_v46 }
  0xc4   : > { %3640 = vmatpush.bf16.msrb.mxu2 %v5689_v45  ;;  %v5673_v45 = vor.u32 %v6665_v27, %v5672_v16  ;;  %v6040_v16 = vld [vmem:[%s10182_s1 + $0xde0] sm:$0xf]  ;;  %v3384_v27 = vpop.f32.mrf.mxu2 }
  0xc5   : > { %3653 = vmatpush.bf16.msrb.mxu3 %v5753_v55  ;;  %v5737_v55 = vor.u32 %v6681_v29, %v5736_v28  ;;  %v3385_v30 = vadd.f32 %v3384_v27, %v3372_v15  ;;  %v6041_v41 = vor.u32 %v6757_v22, %v6040_v16  ;;  %v6753_v15 = vld [vmem:[%s10182_s1 + $0xdc4] sm:$0xf0] }
  0xc6   : > { %3615 = vmatpush.bf16.msrb.mxu0 %v5553_v8  ;;  %v5912_v8 = vld [vmem:[%s10182_s1 + $0xce0] sm:$0xf] }
  0xc7   : > { %3628 = vmatpush.bf16.msrb.mxu1 %v5617_v13  ;;  %v5976_v13 = vld [vmem:[%s10182_s1 + $0xd60] sm:$0xf]  ;;  %v5913_v28 = vor.u32 %v6725_v12, %v5912_v8  ;;  %v3398_v54 = vadd.f32 %v3397_v17, %v3385_v30  ;;  %v3373_v8 = vpop.f32.mrf.mxu1  ;;  %v5888_v30 = vld [vmem:[%s10182_s1 + $0xcb0] sm:$0xf] }
  0xc8   : > { %3641 = vmatpush.bf16.msrb.mxu2 %v5681_v14  ;;  %v6741_v14 = vld [vmem:[%s10182_s1 + $0xd64] sm:$0xf0]  ;;  %v5960_v12 = vld [vmem:[%s10182_s1 + $0xd40] sm:$0xf]  ;;  %v5952_v17 = vld [vmem:[%s10182_s1 + $0xd30] sm:$0xf] }
  0xc9   : > { %3654 = vmatpush.bf16.msrb.mxu3 %v5745_v23  ;;  %v5849_v23 = vor.u32 %v6709_v63, %v5848_v60  ;;  %v5977_v29 = vor.u32 %v6741_v14, %v5976_v13  ;;  %v6705_v60 = vld [vmem:[%s10182_s1 + $0xc44] sm:$0xf0]  ;;  %v5896_v63 = vld [vmem:[%s10182_s1 + $0xcc0] sm:$0xf] }
  0xca   : > { %3616 = vmatpush.bf16.msrb.mxu0 %v5545_v40  ;;  %v5904_v40 = vld [vmem:[%s10182_s1 + $0xcd0] sm:$0xf]  ;;  %v6737_v13 = vld [vmem:[%s10182_s1 + $0xd44] sm:$0xf0]  ;;  %v6024_v14 = vld [vmem:[%s10182_s1 + $0xdc0] sm:$0xf] }
  0xcb   : > { %3629 = vmatpush.bf16.msrb.mxu1 %v5609_v44  ;;  %v6739_v44 = vld [vmem:[%s10182_s1 + $0xd54] sm:$0xf0]  ;;  %v5961_v27 = vor.u32 %v6737_v13, %v5960_v12  ;;  %v6717_v8 = vld [vmem:[%s10182_s1 + $0xca4] sm:$0xf0] }
  0xcc   : > { %3642 = vmatpush.bf16.msrb.mxu2 %v5673_v45  ;;  %v3360_v45 = vpop.f32.mrf.mxu0  ;;  %v3386_v22 = vpop.f32.mrf.mxu2  ;;  %v6749_v12 = vld [vmem:[%s10182_s1 + $0xda4] sm:$0xf0] }
  0xcd   : > { %3655 = vmatpush.bf16.msrb.mxu3 %v5737_v55  ;;  %3617 = vmatmul.bf16.vlgmr.msrb.gmra.mxu0 %v7982_v20  ;;  %v5841_v55 = vor.u32 %v6707_v38, %v5840_v33  ;;  %v3399_v33 = vpop.f32.mrf.mxu3  ;;  %v6025_v38 = vor.u32 %v6753_v15, %v6024_v14 }
  0xce   : > { %3661 = vmatpush.bf16.msra.mxu0 %v5857_v57  ;;  %3630 = vmatmul.bf16.vlgmr.msrb.gmra.mxu1 %v7986_v25  ;;  %v5905_v57 = vor.u32 %v6723_v42, %v5904_v40  ;;  %v6719_v40 = vld [vmem:[%s10182_s1 + $0xcb4] sm:$0xf0]  ;;  %v6016_v42 = vld [vmem:[%s10182_s1 + $0xdb0] sm:$0xf] }
  0xcf   : > { %3674 = vmatpush.bf16.msra.mxu1 %v5921_v58  ;;  %3643 = vmatmul.bf16.vlgmr.msrb.gmra.mxu2 %v7984_v24  ;;  %v5969_v58 = vor.u32 %v6739_v44, %v5968_v43  ;;  %v6751_v43 = vld [vmem:[%s10182_s1 + $0xdb4] sm:$0xf0]  ;;  %v5889_v46 = vor.u32 %v6719_v40, %v5888_v30 }
  0xd0   : > { %3687 = vmatpush.bf16.msra.mxu2 %v5985_v59  ;;  %3656 = vmatmul.bf16.vlgmr.msrb.gmra.mxu3 %v7988_v26  ;;  %v5832_v59 = vld [vmem:[%s10182_s1 + $0xc40] sm:$0xf]  ;;  %v6715_v33 = vld [vmem:[%s10182_s1 + $0xc94] sm:$0xf0] }
  0xd1   : > { %3700 = vmatpush.bf16.msra.mxu3 %v6049_v11  ;;  %v6721_v11 = vld [vmem:[%s10182_s1 + $0xcc4] sm:$0xf0]  ;;  %v5833_v16 = vor.u32 %v6705_v60, %v5832_v59  ;;  %v5880_v59 = vld [vmem:[%s10182_s1 + $0xca0] sm:$0xf]  ;;  %v3423_v60 = vpop.f32.mrf.mxu1  ;;  %v6731_v40 = vld [vmem:[%s10182_s1 + $0xd14] sm:$0xf0] }
  0xd2   : > { %3662 = vmatpush.bf16.msra.mxu0 %v5849_v23  ;;  %v5897_v23 = vor.u32 %v6721_v11, %v5896_v63  ;;  %v6017_v63 = vor.u32 %v6751_v43, %v6016_v42  ;;  %v6008_v11 = vld [vmem:[%s10182_s1 + $0xda0] sm:$0xf]  ;;  %v5881_v15 = vor.u32 %v6717_v8, %v5880_v59  ;;  %v6747_v42 = vld [vmem:[%s10182_s1 + $0xd94] sm:$0xf0]  ;;  %v6713_v59 = vld [vmem:[%s10182_s1 + $0xc84] sm:$0xf0] }
  0xd3   : > { %3675 = vmatpush.bf16.msra.mxu1 %v5913_v28  ;;  %v5824_v28 = vld [vmem:[%s10182_s1 + $0xc30] sm:$0xf] }
  0xd4   : > { %3688 = vmatpush.bf16.msra.mxu2 %v5977_v29  ;;  %v6703_v29 = vld [vmem:[%s10182_s1 + $0xc34] sm:$0xf0]  ;;  %v3410_v45 = vpop.f32.mrf.mxu0  ;;  %v3436_v22 = vpop.f32.mrf.mxu2 }
  0xd5   : > { %3701 = vmatpush.bf16.msra.mxu3 %v6041_v41  ;;  %v6735_v41 = vld [vmem:[%s10182_s1 + $0xd34] sm:$0xf0]  ;;  %v5825_v44 = vor.u32 %v6703_v29, %v5824_v28  ;;  %v5872_v28 = vld [vmem:[%s10182_s1 + $0xc90] sm:$0xf]  ;;  %v6009_v29 = vor.u32 %v6749_v12, %v6008_v11  ;;  %v6745_v11 = vld [vmem:[%s10182_s1 + $0xd84] sm:$0xf0] }
  0xd6   : > { %3663 = vmatpush.bf16.msra.mxu0 %v5841_v55  ;;  %v5953_v47 = vor.u32 %v6735_v41, %v5952_v17  ;;  %v3411_v55 = vadd.f32 %v3410_v45, %v3398_v54  ;;  %v5944_v54 = vld [vmem:[%s10182_s1 + $0xd20] sm:$0xf]  ;;  %v3449_v17 = vpop.f32.mrf.mxu3  ;;  %v6000_v41 = vld [vmem:[%s10182_s1 + $0xd90] sm:$0xf] }
  0xd7   : > { %3676 = vmatpush.bf16.msra.mxu1 %v5905_v57  ;;  %v5816_v57 = vld [vmem:[%s10182_s1 + $0xc20] sm:$0xf]  ;;  %v6112_v12 = vld [vmem:[%s10182_s1 + $0xe70] sm:$0xf] }
  0xd8   : > { %3689 = vmatpush.bf16.msra.mxu2 %v5969_v58  ;;  %v6701_v58 = vld [vmem:[%s10182_s1 + $0xc24] sm:$0xf0]  ;;  %v3424_v13 = vadd.f32 %v3423_v60, %v3411_v55  ;;  %v5800_v45 = vld [vmem:[%s10182_s1 + $0xc00] sm:$0xf] }
  0xd9   : > { %3702 = vmatpush.bf16.msra.mxu3 %v6033_v9  ;;  %v6733_v9 = vld [vmem:[%s10182_s1 + $0xd24] sm:$0xf0]  ;;  %v5817_v14 = vor.u32 %v6701_v58, %v5816_v57  ;;  %v5873_v57 = vor.u32 %v6715_v33, %v5872_v28  ;;  %v5928_v60 = vld [vmem:[%s10182_s1 + $0xd00] sm:$0xf]  ;;  %v3425_v8 = vpop.f32.mrf.mxu1  ;;  %v6823_v33 = vld [vmem:[%s10182_s1 + $0xff4] sm:$0xf0] }
  0xda   : > { %3664 = vmatpush.bf16.msra.mxu0 %v5833_v16  ;;  %v5945_v16 = vor.u32 %v6733_v9, %v5944_v54  ;;  %v3437_v30 = vadd.f32 %v3436_v22, %v3424_v13  ;;  %v6001_v54 = vor.u32 %v6747_v42, %v6000_v41  ;;  %v5992_v9 = vld [vmem:[%s10182_s1 + $0xd80] sm:$0xf]  ;;  %v6775_v13 = vld [vmem:[%s10182_s1 + $0xe74] sm:$0xf0] }
  0xdb   : > { %3677 = vmatpush.bf16.msra.mxu1 %v5897_v23  ;;  %v5808_v23 = vld [vmem:[%s10182_s1 + $0xc10] sm:$0xf]  ;;  %v6791_v22 = vld [vmem:[%s10182_s1 + $0xef4] sm:$0xf0]  ;;  %v6232_v8 = vld [vmem:[%s10182_s1 + $0xf60] sm:$0xf] }
  0xdc   : > { %3690 = vmatpush.bf16.msra.mxu2 %v5961_v27  ;;  %v6699_v27 = vld [vmem:[%s10182_s1 + $0xc14] sm:$0xf0]  ;;  %v3412_v55 = vpop.f32.mrf.mxu0 }
  0xdd   : > { %3703 = vmatpush.bf16.msra.mxu3 %v6025_v38  ;;  %v5936_v38 = vld [vmem:[%s10182_s1 + $0xd10] sm:$0xf]  ;;  %v5809_v43 = vor.u32 %v6699_v27, %v5808_v23  ;;  %v6807_v27 = vld [vmem:[%s10182_s1 + $0xf74] sm:$0xf0] }
  0xde   : > { %3665 = vmatpush.bf16.msra.mxu0 %v5825_v44  ;;  %v8302_v44 = vadd.f32 %v3449_v17, %v3437_v30  ;;  %v5937_v58 = vor.u32 %v6731_v40, %v5936_v38  ;;  %v6240_v23 = vld [vmem:[%s10182_s1 + $0xf70] sm:$0xf]  ;;  %v3438_v38 = vpop.f32.mrf.mxu2  ;;  %v5993_v40 = vor.u32 %v6745_v11, %v5992_v9  ;;  %v6113_v17 = vor.u32 %v6775_v13, %v6112_v12  ;;  %v6296_v12 = vld [vmem:[%s10182_s1 + $0xfe0] sm:$0xf]  ;;  %v6821_v13 = vld [vmem:[%s10182_s1 + $0xfe4] sm:$0xf0] }
  0xdf   : > { %3678 = vmatpush.bf16.msra.mxu1 %v5889_v46  ;;  %v6697_v46 = vld [vmem:[%s10182_s1 + $0xc04] sm:$0xf0]  ;;  %v6304_v30 = vld [vmem:[%s10182_s1 + $0xff0] sm:$0xf]  ;;  %v6241_v55 = vor.u32 %v6807_v27, %v6240_v23 }
  0xe0   : > { %3691 = vmatpush.bf16.msra.mxu2 %v5953_v47  ;;  %v5864_v47 = vld [vmem:[%s10182_s1 + $0xc80] sm:$0xf]  ;;  %v8355_v42 = vld [vmem:[#allocation1 + $0x12] sm:$0xff] }
  0xe1   : > { %3704 = vmatpush.bf16.msra.mxu3 %v6017_v63  ;;  %v6729_v63 = vld [vmem:[%s10182_s1 + $0xd04] sm:$0xf0]  ;;  %v5865_v28 = vor.u32 %v6713_v59, %v5864_v47  ;;  %v6168_v59 = vld [vmem:[%s10182_s1 + $0xee0] sm:$0xf]  ;;  %v10187_v9 = vshrl.u32 %v8355_v42, 16 }
  0xe2   : > { %3666 = vmatpush.bf16.msra.mxu0 %v5817_v14  ;;  %v6176_v14 = vld [vmem:[%s10182_s1 + $0xef0] sm:$0xf] }
  0xe3   : > { %3679 = vmatpush.bf16.msra.mxu1 %v5881_v15  ;;  %v8337_v15 = vld [vmem:[#allocation1] sm:$0xff]  ;;  %v6177_v47 = vor.u32 %v6791_v22, %v6176_v14  ;;  %v6096_v27 = vld [vmem:[%s10182_s1 + $0xe50] sm:$0xf] }
  0xe4   : > { %3692 = vmatpush.bf16.msra.mxu2 %v5945_v16  ;;  %v5801_v16 = vor.u32 %v6697_v46, %v5800_v45  ;;  %v10192_v41 = vshrl.u32 %v8337_v15, 16  ;;  %v8359_v45 = vld [vmem:[#allocation1 + $0x1b] sm:$0xff]  ;;  %v3451_v46 = vpop.f32.mrf.mxu3  ;;  %v6224_v38 = vld [vmem:[%s10182_s1 + $0xf50] sm:$0xf] }
  0xe5   : > { %3705 = vmatpush.bf16.msra.mxu3 %v6009_v29  ;;  %v5929_v29 = vor.u32 %v6729_v63, %v5928_v60  ;;  %v6305_v60 = vor.u32 %v6823_v33, %v6304_v30  ;;  %v6789_v63 = vld [vmem:[%s10182_s1 + $0xee4] sm:$0xf0]  ;;  %v10185_v14 = vshrl.u32 %v8359_v45, 16  ;;  %v6297_v30 = vor.u32 %v6821_v13, %v6296_v12  ;;  %v6787_v33 = vld [vmem:[%s10182_s1 + $0xed4] sm:$0xf0] }
  0xe6   : > { %3667 = vmatpush.bf16.msra.mxu0 %v5809_v43  ;;  %v8357_v43 = vld [vmem:[#allocation1 + $0x9] sm:$0xff]  ;;  %v6169_v22 = vor.u32 %v6789_v63, %v6168_v59  ;;  %v6819_v46 = vld [vmem:[%s10182_s1 + $0xfd4] sm:$0xf0] }
  0xe7   : > { %3680 = vmatpush.bf16.msra.mxu1 %v5873_v57  ;;  %v6104_v57 = vld [vmem:[%s10182_s1 + $0xe60] sm:$0xf]  ;;  %v10186_v11 = vshrl.u32 %v8357_v43, 16  ;;  %v6769_v59 = vld [vmem:[%s10182_s1 + $0xe44] sm:$0xf0] }
  0xe8   : > { %3693 = vmatpush.bf16.msra.mxu2 %v5937_v58  ;;  %v6773_v58 = vld [vmem:[%s10182_s1 + $0xe64] sm:$0xf0] }
  0xe9   : > { %3706 = vmatpush.bf16.msra.mxu3 %v6001_v54  ;;  %v6805_v54 = vld [vmem:[%s10182_s1 + $0xf64] sm:$0xf0] }
  0xea   : > { %3668 = vmatpush.bf16.msra.mxu0 %v5801_v16  ;;  %v6105_v16 = vor.u32 %v6773_v58, %v6104_v57  ;;  %v6233_v23 = vor.u32 %v6805_v54, %v6232_v8  ;;  %v6088_v58 = vld [vmem:[%s10182_s1 + $0xe40] sm:$0xf]  ;;  %v6785_v8 = vld [vmem:[%s10182_s1 + $0xec4] sm:$0xf0]  ;;  %v3462_v13 = vpop.f32.mrf.mxu0 }
  0xeb   : > { %3681 = vmatpush.bf16.msra.mxu1 %v5865_v28  ;;  %v6771_v28 = vld [vmem:[%s10182_s1 + $0xe54] sm:$0xf0]  ;;  %v6216_v54 = vld [vmem:[%s10182_s1 + $0xf40] sm:$0xf]  ;;  %v6801_v12 = vld [vmem:[%s10182_s1 + $0xf44] sm:$0xf0] }
  0xec   : > { %3694 = vmatpush.bf16.msra.mxu2 %v5929_v29  ;;  %v6160_v29 = vld [vmem:[%s10182_s1 + $0xed0] sm:$0xf] }
  0xed   : > { %3707 = vmatpush.bf16.msra.mxu3 %v5993_v40  ;;  %3669 = vmatmul.bf16.vlgmr.msra.gmra.mxu0 %v10192_v41  ;;  %v6803_v40 = vld [vmem:[%s10182_s1 + $0xf54] sm:$0xf0] }
  0xee   : > { %3713 = vmatpush.bf16.msrb.mxu0 %v6113_v17  ;;  %3682 = vmatmul.bf16.vlgmr.msra.gmra.mxu1 %v10186_v11  ;;  %v6288_v17 = vld [vmem:[%s10182_s1 + $0xfd0] sm:$0xf]  ;;  %v6225_v57 = vor.u32 %v6803_v40, %v6224_v38  ;;  %v6767_v38 = vld [vmem:[%s10182_s1 + $0xe34] sm:$0xf0] }
  0xef   : > { %3726 = vmatpush.bf16.msrb.mxu1 %v6177_v47  ;;  %3695 = vmatmul.bf16.vlgmr.msra.gmra.mxu2 %v10187_v9  ;;  %v6097_v47 = vor.u32 %v6771_v28, %v6096_v27  ;;  %v6289_v63 = vor.u32 %v6819_v46, %v6288_v17  ;;  %v6089_v27 = vor.u32 %v6769_v59, %v6088_v58  ;;  %v3475_v28 = vpop.f32.mrf.mxu1  ;;  %v6144_v40 = vld [vmem:[%s10182_s1 + $0xeb0] sm:$0xf]  ;;  %v6783_v46 = vld [vmem:[%s10182_s1 + $0xeb4] sm:$0xf0] }
  0xf0   : > { %3739 = vmatpush.bf16.msrb.mxu2 %v6241_v55  ;;  %3708 = vmatmul.bf16.vlgmr.msra.gmra.mxu3 %v10185_v14  ;;  %v6161_v55 = vor.u32 %v6787_v33, %v6160_v29  ;;  %v6080_v33 = vld [vmem:[%s10182_s1 + $0xe30] sm:$0xf]  ;;  %v6815_v58 = vld [vmem:[%s10182_s1 + $0xfb4] sm:$0xf0] }
  0xf1   : > { %3752 = vmatpush.bf16.msrb.mxu3 %v6305_v60  ;;  %v6152_v60 = vld [vmem:[%s10182_s1 + $0xec0] sm:$0xf]  ;;  %v6081_v59 = vor.u32 %v6767_v38, %v6080_v33  ;;  %v6813_v33 = vld [vmem:[%s10182_s1 + $0xfa4] sm:$0xf0]  ;;  %v8570_v11 = vld [vmem:[#allocation1 + $0x36] sm:$0xff] }
  0xf2   : > { %3714 = vmatpush.bf16.msrb.mxu0 %v6105_v16  ;;  %v6280_v16 = vld [vmem:[%s10182_s1 + $0xfc0] sm:$0xf]  ;;  %v6153_v29 = vor.u32 %v6785_v8, %v6152_v60  ;;  %v6145_v60 = vor.u32 %v6783_v46, %v6144_v40  ;;  %v3464_v38 = vpop.f32.mrf.mxu0  ;;  %v8572_v9 = vld [vmem:[#allocation1 + $0x2d] sm:$0xff] }
  0xf3   : > { %3727 = vmatpush.bf16.msrb.mxu1 %v6169_v22  ;;  %v6817_v22 = vld [vmem:[%s10182_s1 + $0xfc4] sm:$0xf0]  ;;  %v6072_v8 = vld [vmem:[%s10182_s1 + $0xe20] sm:$0xf] }
  0xf4   : > { %3740 = vmatpush.bf16.msrb.mxu2 %v6233_v23  ;;  %v3463_v23 = vadd.f32 %v3462_v13, %v8302_v44  ;;  %v6281_v44 = vor.u32 %v6817_v22, %v6280_v16  ;;  %v3488_v16 = vpop.f32.mrf.mxu2  ;;  %v6781_v22 = vld [vmem:[%s10182_s1 + $0xea4] sm:$0xf0] }
  0xf5   : > { %3753 = vmatpush.bf16.msrb.mxu3 %v6297_v30  ;;  %v6217_v30 = vor.u32 %v6801_v12, %v6216_v54  ;;  %v6765_v54 = vld [vmem:[%s10182_s1 + $0xe24] sm:$0xf0]  ;;  %v6136_v12 = vld [vmem:[%s10182_s1 + $0xea0] sm:$0xf] }
  0xf6   : > { %3715 = vmatpush.bf16.msrb.mxu0 %v6097_v47  ;;  %v3476_v17 = vadd.f32 %v3475_v28, %v3463_v23  ;;  %v6208_v47 = vld [vmem:[%s10182_s1 + $0xf30] sm:$0xf]  ;;  %v6200_v23 = vld [vmem:[%s10182_s1 + $0xf20] sm:$0xf]  ;;  %v6073_v40 = vor.u32 %v6765_v54, %v6072_v8  ;;  %v6795_v8 = vld [vmem:[%s10182_s1 + $0xf14] sm:$0xf0] }
  0xf7   : > { %3728 = vmatpush.bf16.msrb.mxu1 %v6161_v55  ;;  %v6799_v55 = vld [vmem:[%s10182_s1 + $0xf34] sm:$0xf0]  ;;  %v6256_v54 = vld [vmem:[%s10182_s1 + $0xf90] sm:$0xf] }
  0xf8   : > { %3741 = vmatpush.bf16.msrb.mxu2 %v6225_v57  ;;  %v6272_v57 = vld [vmem:[%s10182_s1 + $0xfb0] sm:$0xf]  ;;  %v3489_v28 = vadd.f32 %v3488_v16, %v3476_v17  ;;  %v6056_v16 = vld [vmem:[%s10182_s1 + $0xe00] sm:$0xf] }
  0xf9   : > { %3754 = vmatpush.bf16.msrb.mxu3 %v6289_v63  ;;  %v6209_v63 = vor.u32 %v6799_v55, %v6208_v47  ;;  %v6273_v13 = vor.u32 %v6815_v58, %v6272_v57  ;;  %v6137_v47 = vor.u32 %v6781_v22, %v6136_v12  ;;  %v6064_v17 = vld [vmem:[%s10182_s1 + $0xe10] sm:$0xf]  ;;  %v6763_v57 = vld [vmem:[%s10182_s1 + $0xe14] sm:$0xf0]  ;;  %v6761_v22 = vld [vmem:[%s10182_s1 + $0xe04] sm:$0xf0] }
  0xfa   : > { %3716 = vmatpush.bf16.msrb.mxu0 %v6089_v27  ;;  %v6797_v27 = vld [vmem:[%s10182_s1 + $0xf24] sm:$0xf0]  ;;  %v6128_v58 = vld [vmem:[%s10182_s1 + $0xe90] sm:$0xf]  ;;  %v6811_v12 = vld [vmem:[%s10182_s1 + $0xf94] sm:$0xf0] }
  0xfb   : > { %3729 = vmatpush.bf16.msrb.mxu1 %v6153_v29  ;;  %v3501_v29 = vpop.f32.mrf.mxu3  ;;  %v6201_v55 = vor.u32 %v6797_v27, %v6200_v23  ;;  %v6120_v23 = vld [vmem:[%s10182_s1 + $0xe80] sm:$0xf]  ;;  %v6257_v38 = vor.u32 %v6811_v12, %v6256_v54  ;;  %v4450_v54 = vld [vmem:[%s10182_s1 + $0x178] sm:$0xf0] }
  0xfc   : > { %3742 = vmatpush.bf16.msrb.mxu2 %v6217_v30  ;;  %v6264_v30 = vld [vmem:[%s10182_s1 + $0xfa0] sm:$0xf]  ;;  %v8493_v46 = vadd.f32 %v3501_v29, %v3489_v28  ;;  %v6777_v29 = vld [vmem:[%s10182_s1 + $0xe84] sm:$0xf0] }
  0xfd   : > { %3755 = vmatpush.bf16.msrb.mxu3 %v6281_v44  ;;  %v3477_v44 = vpop.f32.mrf.mxu1  ;;  %v6121_v12 = vor.u32 %v6777_v29, %v6120_v23  ;;  %v6324_v29 = vld [vmem:[%s10182_s1 + $0x64] sm:$0xf] }
  0xfe   : > { %3717 = vmatpush.bf16.msrb.mxu0 %v6081_v59  ;;  %v6265_v59 = vor.u32 %v6813_v33, %v6264_v30  ;;  %v6184_v30 = vld [vmem:[%s10182_s1 + $0xf00] sm:$0xf]  ;;  %v6793_v33 = vld [vmem:[%s10182_s1 + $0xf04] sm:$0xf0] }
  0xff   : > { %3730 = vmatpush.bf16.msrb.mxu1 %v6145_v60  ;;  %v6779_v60 = vld [vmem:[%s10182_s1 + $0xe94] sm:$0xf0]  ;;  %v6809_v44 = vld [vmem:[%s10182_s1 + $0xf84] sm:$0xf0] }
 0x100   : > { %3743 = vmatpush.bf16.msrb.mxu2 %v6209_v63  ;;  %v6192_v63 = vld [vmem:[%s10182_s1 + $0xf10] sm:$0xf]  ;;  %v6129_v27 = vor.u32 %v6779_v60, %v6128_v58  ;;  %v8552_v58 = vld [vmem:[#allocation1 + $0x24] sm:$0xff]  ;;  %v6057_v60 = vor.u32 %v6761_v22, %v6056_v16  ;;  %v4514_v16 = vld [vmem:[%s10182_s1 + $0x1f8] sm:$0xf0] }
 0x101   : > { %3756 = vmatpush.bf16.msrb.mxu3 %v6273_v13  ;;  %v6065_v13 = vor.u32 %v6763_v57, %v6064_v17  ;;  %v6193_v28 = vor.u32 %v6795_v8, %v6192_v63  ;;  %v4322_v17 = vld [vmem:[%s10182_s1 + $0x78] sm:$0xf0]  ;;  %v6342_v57 = vld [vmem:[%s10182_s1 + $0xf4] sm:$0xf]  ;;  %v10191_v14 = vshrl.u32 %v8552_v58, 16 }
 0x102   : > { %3718 = vmatpush.bf16.msrb.mxu0 %v6073_v40  ;;  %v6248_v40 = vld [vmem:[%s10182_s1 + $0xf80] sm:$0xf]  ;;  %v4386_v63 = vld [vmem:[%s10182_s1 + $0xf8] sm:$0xf0]  ;;  %v6358_v8 = vld [vmem:[%s10182_s1 + $0x174] sm:$0xf] }
 0x103   : > { %3731 = vmatpush.bf16.msrb.mxu1 %v6137_v47  ;;  %v6326_v47 = vld [vmem:[%s10182_s1 + $0x74] sm:$0xf]  ;;  %v6249_v22 = vor.u32 %v6809_v44, %v6248_v40  ;;  %v4389_v23 = vor.u32 %v6342_v57, %v4386_v63  ;;  %v4378_v40 = vld [vmem:[%s10182_s1 + $0xe8] sm:$0xf0]  ;;  %v6356_v44 = vld [vmem:[%s10182_s1 + $0x164] sm:$0xf] }
 0x104   : > { %3744 = vmatpush.bf16.msrb.mxu2 %v6201_v55  ;;  %v3490_v55 = vpop.f32.mrf.mxu2  ;;  %v10190_v57 = vshrl.u32 %v8572_v9, 16  ;;  %v4506_v63 = vld [vmem:[%s10182_s1 + $0x1e8] sm:$0xf0] }
 0x105   : > { %3757 = vmatpush.bf16.msrb.mxu3 %v6265_v59  ;;  %v3503_v59 = vpop.f32.mrf.mxu3  ;;  %v6185_v55 = vor.u32 %v6793_v33, %v6184_v30  ;;  %v4314_v30 = vld [vmem:[%s10182_s1 + $0x68] sm:$0xf0]  ;;  %v6340_v33 = vld [vmem:[%s10182_s1 + $0xe4] sm:$0xf] }
 0x106   : > { %3719 = vmatpush.bf16.msrb.mxu0 %v6065_v13  ;;  %v6374_v13 = vld [vmem:[%s10182_s1 + $0x1f4] sm:$0xf]  ;;  %v4325_v59 = vor.u32 %v6326_v47, %v4322_v17  ;;  %v4442_v47 = vld [vmem:[%s10182_s1 + $0x168] sm:$0xf0]  ;;  %v10189_v17 = vshrl.u32 %v8570_v11, 16 }
 0x107   : > { %3732 = vmatpush.bf16.msrb.mxu1 %v6129_v27  ;;  %v8574_v27 = vld [vmem:[#allocation1 + $0x3f] sm:$0xff] }
 0x108   : > { %3745 = vmatpush.bf16.msrb.mxu2 %v6193_v28  ;;  %v4453_v28 = vor.u32 %v6358_v8, %v4450_v54  ;;  %v10188_v8 = vshrl.u32 %v8574_v27, 16  ;;  %v4317_v54 = vor.u32 %v6324_v29, %v4314_v30  ;;  %v4434_v29 = vld [vmem:[%s10182_s1 + $0x158] sm:$0xf0]  ;;  %v6370_v30 = vld [vmem:[%s10182_s1 + $0x1d4] sm:$0xf] }
 0x109   : > { %3758 = vmatpush.bf16.msrb.mxu3 %v6257_v38  ;;  %v4517_v38 = vor.u32 %v6374_v13, %v4514_v16  ;;  %v6322_v13 = vld [vmem:[%s10182_s1 + $0x54] sm:$0xf]  ;;  %v4306_v16 = vld [vmem:[%s10182_s1 + $0x58] sm:$0xf0] }
 0x10a   : > { %3720 = vmatpush.bf16.msrb.mxu0 %v6057_v60  ;;  %v6372_v60 = vld [vmem:[%s10182_s1 + $0x1e4] sm:$0xf] }
 0x10b   : > { %3733 = vmatpush.bf16.msrb.mxu1 %v6121_v12  ;;  %v4381_v12 = vor.u32 %v6340_v33, %v4378_v40  ;;  %v4498_v33 = vld [vmem:[%s10182_s1 + $0x1d8] sm:$0xf0] }
 0x10c   : > { %3746 = vmatpush.bf16.msrb.mxu2 %v6185_v55  ;;  %v4445_v55 = vor.u32 %v6356_v44, %v4442_v47  ;;  %v6320_v47 = vld [vmem:[%s10182_s1 + $0x44] sm:$0xf] }
 0x10d   : > { %3759 = vmatpush.bf16.msrb.mxu3 %v6249_v22  ;;  %v6338_v22 = vld [vmem:[%s10182_s1 + $0xd4] sm:$0xf]  ;;  %3721 = vmatmul.bf16.vlgmr.msrb.gmra.mxu0 %v10191_v14 }
 0x10e   : > { %3765 = vmatpush.bf16.msra.mxu0 %v4325_v59  ;;  %v4509_v59 = vor.u32 %v6372_v60, %v4506_v63  ;;  %3734 = vmatmul.bf16.vlgmr.msrb.gmra.mxu1 %v10190_v57  ;;  %v4298_v60 = vld [vmem:[%s10182_s1 + $0x48] sm:$0xf0]  ;;  %v6336_v63 = vld [vmem:[%s10182_s1 + $0xc4] sm:$0xf] }
 0x10f   : > { %3778 = vmatpush.bf16.msra.mxu1 %v4389_v23  ;;  %v4370_v23 = vld [vmem:[%s10182_s1 + $0xd8] sm:$0xf0]  ;;  %3747 = vmatmul.bf16.vlgmr.msrb.gmra.mxu2 %v10189_v17 }
 0x110   : > { %3791 = vmatpush.bf16.msra.mxu2 %v4453_v28  ;;  %v6354_v28 = vld [vmem:[%s10182_s1 + $0x154] sm:$0xf]  ;;  %3760 = vmatmul.bf16.vlgmr.msrb.gmra.mxu3 %v10188_v8  ;;  %v4373_v40 = vor.u32 %v6338_v22, %v4370_v23  ;;  %v4501_v8 = vor.u32 %v6370_v30, %v4498_v33  ;;  %v4490_v22 = vld [vmem:[%s10182_s1 + $0x1c8] sm:$0xf0]  ;;  %v4301_v23 = vor.u32 %v6320_v47, %v4298_v60  ;;  %v4290_v17 = vld [vmem:[%s10182_s1 + $0x38] sm:$0xf0] }
 0x111   : > { %3804 = vmatpush.bf16.msra.mxu3 %v4517_v38  ;;  %v4309_v38 = vor.u32 %v6322_v13, %v4306_v16  ;;  %v4437_v44 = vor.u32 %v6354_v28, %v4434_v29  ;;  %v3514_v13 = vpop.f32.mrf.mxu0  ;;  %v6368_v16 = vld [vmem:[%s10182_s1 + $0x1c4] sm:$0xf]  ;;  %v3527_v28 = vpop.f32.mrf.mxu1  ;;  %v6318_v33 = vld [vmem:[%s10182_s1 + $0x34] sm:$0xf]  ;;  %v4418_v60 = vld [vmem:[%s10182_s1 + $0x138] sm:$0xf0] }
 0x112   : > { %3766 = vmatpush.bf16.msra.mxu0 %v4317_v54  ;;  %v4362_v54 = vld [vmem:[%s10182_s1 + $0xc8] sm:$0xf0] }
 0x113   : > { %3779 = vmatpush.bf16.msra.mxu1 %v4381_v12  ;;  %v6352_v12 = vld [vmem:[%s10182_s1 + $0x144] sm:$0xf]  ;;  %v4365_v29 = vor.u32 %v6336_v63, %v4362_v54  ;;  %v6366_v63 = vld [vmem:[%s10182_s1 + $0x1b4] sm:$0xf]  ;;  %v4293_v54 = vor.u32 %v6318_v33, %v4290_v17  ;;  %v4346_v17 = vld [vmem:[%s10182_s1 + $0xa8] sm:$0xf0]  ;;  %v3553_v33 = vpop.f32.mrf.mxu3 }
 0x114   : > { %3792 = vmatpush.bf16.msra.mxu2 %v4445_v55  ;;  %v4426_v55 = vld [vmem:[%s10182_s1 + $0x148] sm:$0xf0] }
 0x115   : > { %3805 = vmatpush.bf16.msra.mxu3 %v4509_v59  ;;  %v3515_v59 = vadd.f32 %v3514_v13, %v8493_v46  ;;  %v4429_v30 = vor.u32 %v6352_v12, %v4426_v55  ;;  %v4493_v46 = vor.u32 %v6368_v16, %v4490_v22  ;;  %v6316_v13 = vld [vmem:[%s10182_s1 + $0x24] sm:$0xf]  ;;  %v4282_v16 = vld [vmem:[%s10182_s1 + $0x28] sm:$0xf0] }
 0x116   : > { %3767 = vmatpush.bf16.msra.mxu0 %v4309_v38  ;;  %v6334_v38 = vld [vmem:[%s10182_s1 + $0xb4] sm:$0xf]  ;;  %v6332_v22 = vld [vmem:[%s10182_s1 + $0xa4] sm:$0xf] }
 0x117   : > { %3780 = vmatpush.bf16.msra.mxu1 %v4373_v40  ;;  %v3528_v47 = vadd.f32 %v3527_v28, %v3515_v59  ;;  %v4354_v40 = vld [vmem:[%s10182_s1 + $0xb8] sm:$0xf0]  ;;  %v6348_v28 = vld [vmem:[%s10182_s1 + $0x124] sm:$0xf] }
 0x118   : > { %3793 = vmatpush.bf16.msra.mxu2 %v4437_v44  ;;  %v6350_v44 = vld [vmem:[%s10182_s1 + $0x134] sm:$0xf]  ;;  %v4357_v12 = vor.u32 %v6334_v38, %v4354_v40  ;;  %v6364_v38 = vld [vmem:[%s10182_s1 + $0x1a4] sm:$0xf] }
 0x119   : > { %3806 = vmatpush.bf16.msra.mxu3 %v4501_v8  ;;  %v4482_v8 = vld [vmem:[%s10182_s1 + $0x1b8] sm:$0xf0]  ;;  %v4421_v55 = vor.u32 %v6350_v44, %v4418_v60  ;;  %v3516_v40 = vpop.f32.mrf.mxu0  ;;  %v4285_v44 = vor.u32 %v6316_v13, %v4282_v16  ;;  %v3529_v60 = vpop.f32.mrf.mxu1 }
 0x11a   : > { %3768 = vmatpush.bf16.msra.mxu0 %v4301_v23  ;;  %v4485_v59 = vor.u32 %v6366_v63, %v4482_v8  ;;  %v3540_v23 = vpop.f32.mrf.mxu2  ;;  %v4349_v8 = vor.u32 %v6332_v22, %v4346_v17  ;;  %v4402_v16 = vld [vmem:[%s10182_s1 + $0x118] sm:$0xf0]  ;;  %v6362_v22 = vld [vmem:[%s10182_s1 + $0x194] sm:$0xf]  ;;  %v6344_v40 = vld [vmem:[%s10182_s1 + $0x104] sm:$0xf] }
 0x11b   : > { %3781 = vmatpush.bf16.msra.mxu1 %v4365_v29  ;;  %v4410_v29 = vld [vmem:[%s10182_s1 + $0x128] sm:$0xf0]  ;;  %v6360_v60 = vld [vmem:[%s10182_s1 + $0x184] sm:$0xf] }
 0x11c   : > { %3794 = vmatpush.bf16.msra.mxu2 %v4429_v30  ;;  %v3541_v30 = vadd.f32 %v3540_v23, %v3528_v47  ;;  %v4413_v57 = vor.u32 %v6348_v28, %v4410_v29  ;;  %v6314_v47 = vld [vmem:[%s10182_s1 + $0x14] sm:$0xf]  ;;  %v4274_v23 = vld [vmem:[%s10182_s1 + $0x18] sm:$0xf0]  ;;  %v6312_v28 = vld [vmem:[%s10182_s1 + $0x4] sm:$0xf] }
 0x11d   : > { %3807 = vmatpush.bf16.msra.mxu3 %v4493_v46  ;;  %v4474_v46 = vld [vmem:[%s10182_s1 + $0x1a8] sm:$0xf0]  ;;  %v4277_v17 = vor.u32 %v6314_v47, %v4274_v23  ;;  %v6390_v23 = vld [vmem:[%s10182_s1 + $0x274] sm:$0xf] }
 0x11e   : > { %3769 = vmatpush.bf16.msra.mxu0 %v4293_v54  ;;  %v8708_v63 = vadd.f32 %v3553_v33, %v3541_v30  ;;  %v6330_v54 = vld [vmem:[%s10182_s1 + $0x94] sm:$0xf]  ;;  %v4477_v13 = vor.u32 %v6364_v38, %v4474_v46  ;;  %v4266_v29 = vld [vmem:[%s10182_s1 + $0x8] sm:$0xf0]  ;;  %v6328_v38 = vld [vmem:[%s10182_s1 + $0x84] sm:$0xf] }
 0x11f   : > { %3782 = vmatpush.bf16.msra.mxu1 %v4357_v12  ;;  %v4338_v12 = vld [vmem:[%s10182_s1 + $0x98] sm:$0xf0]  ;;  %v4330_v46 = vld [vmem:[%s10182_s1 + $0x88] sm:$0xf0] }
 0x120   : > { %3795 = vmatpush.bf16.msra.mxu2 %v4421_v55  ;;  %v6346_v55 = vld [vmem:[%s10182_s1 + $0x114] sm:$0xf]  ;;  %v4341_v30 = vor.u32 %v6330_v54, %v4338_v12  ;;  %v4578_v54 = vld [vmem:[%s10182_s1 + $0x278] sm:$0xf0]  ;;  %v3555_v12 = vpop.f32.mrf.mxu3 }
 0x121   : > { %3808 = vmatpush.bf16.msra.mxu3 %v4485_v59  ;;  %v4466_v59 = vld [vmem:[%s10182_s1 + $0x198] sm:$0xf0]  ;;  %v4405_v33 = vor.u32 %v6346_v55, %v4402_v16  ;;  %v4269_v55 = vor.u32 %v6312_v28, %v4266_v29  ;;  %v4581_v12 = vor.u32 %v6390_v23, %v4578_v54 }
 0x122   : > { %3770 = vmatpush.bf16.msra.mxu0 %v4285_v44  ;;  %v4469_v44 = vor.u32 %v6362_v22, %v4466_v59  ;;  %v3542_v47 = vpop.f32.mrf.mxu2  ;;  %v4642_v16 = vld [vmem:[%s10182_s1 + $0x2f8] sm:$0xf0]  ;;  %v6422_v22 = vld [vmem:[%s10182_s1 + $0x374] sm:$0xf] }
 0x123   : > { %3783 = vmatpush.bf16.msra.mxu1 %v4349_v8  ;;  %v4458_v8 = vld [vmem:[%s10182_s1 + $0x188] sm:$0xf0]  ;;  %v4706_v59 = vld [vmem:[%s10182_s1 + $0x378] sm:$0xf0]  ;;  %v4333_v47 = vor.u32 %v6328_v38, %v4330_v46  ;;  %v6404_v38 = vld [vmem:[%s10182_s1 + $0x2e4] sm:$0xf] }
 0x124   : > { %3796 = vmatpush.bf16.msra.mxu2 %v4413_v57  ;;  %v4394_v57 = vld [vmem:[%s10182_s1 + $0x108] sm:$0xf0]  ;;  %v4770_v28 = vld [vmem:[%s10182_s1 + $0x3f8] sm:$0xf0]  ;;  %v4461_v29 = vor.u32 %v6360_v60, %v4458_v8  ;;  %v4709_v39 = vor.u32 %v6422_v22, %v4706_v59  ;;  %v6436_v60 = vld [vmem:[%s10182_s1 + $0x3e4] sm:$0xf] }
 0x125   : > { %3809 = vmatpush.bf16.msra.mxu3 %v4477_v13  ;;  %v6406_v13 = vld [vmem:[%s10182_s1 + $0x2f4] sm:$0xf]  ;;  %v4397_v14 = vor.u32 %v6344_v40, %v4394_v57  ;;  %v4634_v40 = vld [vmem:[%s10182_s1 + $0x2e8] sm:$0xf0]  ;;  %v4690_v59 = vld [vmem:[%s10182_s1 + $0x358] sm:$0xf0] }
 0x126   : > { %3771 = vmatpush.bf16.msra.mxu0 %v4277_v17  ;;  %v6438_v17 = vld [vmem:[%s10182_s1 + $0x3f4] sm:$0xf]  ;;  %v4645_v41 = vor.u32 %v6406_v13, %v4642_v16  ;;  %v4698_v57 = vld [vmem:[%s10182_s1 + $0x368] sm:$0xf0]  ;;  %v4637_v54 = vor.u32 %v6404_v38, %v4634_v40  ;;  %v6432_v40 = vld [vmem:[%s10182_s1 + $0x3c4] sm:$0xf] }
 0x127   : > { %3784 = vmatpush.bf16.msra.mxu1 %v4341_v30  ;;  %v6388_v30 = vld [vmem:[%s10182_s1 + $0x264] sm:$0xf]  ;;  %v4773_v46 = vor.u32 %v6438_v17, %v4770_v28  ;;  %v4762_v8 = vld [vmem:[%s10182_s1 + $0x3e8] sm:$0xf0]  ;;  %v6402_v16 = vld [vmem:[%s10182_s1 + $0x2d4] sm:$0xf] }
 0x128   : > { %3797 = vmatpush.bf16.msra.mxu2 %v4405_v33  ;;  %v4570_v33 = vld [vmem:[%s10182_s1 + $0x268] sm:$0xf0]  ;;  %v4765_v22 = vor.u32 %v6436_v60, %v4762_v8  ;;  %v4754_v17 = vld [vmem:[%s10182_s1 + $0x3d8] sm:$0xf0] }
 0x129   : > { %3810 = vmatpush.bf16.msra.mxu3 %v4469_v44  ;;  %v6420_v44 = vld [vmem:[%s10182_s1 + $0x364] sm:$0xf]  ;;  %v4573_v23 = vor.u32 %v6388_v30, %v4570_v33  ;;  %v4554_v30 = vld [vmem:[%s10182_s1 + $0x248] sm:$0xf0] }
 0x12a   : > { %3772 = vmatpush.bf16.msra.mxu0 %v4269_v55  ;;  %v4701_v13 = vor.u32 %v6420_v44, %v4698_v57  ;;  %v6386_v55 = vld [vmem:[%s10182_s1 + $0x254] sm:$0xf]  ;;  %v6416_v33 = vld [vmem:[%s10182_s1 + $0x344] sm:$0xf]  ;;  %v4682_v38 = vld [vmem:[%s10182_s1 + $0x348] sm:$0xf0] }
 0x12b   : > { %3785 = vmatpush.bf16.msra.mxu1 %v4333_v47  ;;  %v6434_v47 = vld [vmem:[%s10182_s1 + $0x3d4] sm:$0xf]  ;;  %v4746_v44 = vld [vmem:[%s10182_s1 + $0x3c8] sm:$0xf0]  ;;  %v3579_v8 = vpop.f32.mrf.mxu1 }
 0x12c   : > { %3798 = vmatpush.bf16.msra.mxu2 %v4397_v14  ;;  %v4562_v14 = vld [vmem:[%s10182_s1 + $0x258] sm:$0xf0] }
 0x12d   : > { %3811 = vmatpush.bf16.msra.mxu3 %v4461_v29  ;;  %3773 = vmatmul.bf16.vlgmr.msra.gmra.mxu0 %v7247_v50  ;;  %v4565_v28 = vor.u32 %v6386_v55, %v4562_v14  ;;  %v6400_v50 = vld [vmem:[%s10182_s1 + $0x2c4] sm:$0xf]  ;;  %v4546_v55 = vld [vmem:[%s10182_s1 + $0x238] sm:$0xf0]  ;;  %v6398_v14 = vld [vmem:[%s10182_s1 + $0x2b4] sm:$0xf] }
 0x12e   : > { %3817 = vmatpush.bf16.msrb.mxu0 %v4581_v12  ;;  %3786 = vmatmul.bf16.vlgmr.msra.gmra.mxu1 %v7253_v52  ;;  %v6384_v12 = vld [vmem:[%s10182_s1 + $0x244] sm:$0xf]  ;;  %v4618_v52 = vld [vmem:[%s10182_s1 + $0x2c8] sm:$0xf0] }
 0x12f   : > { %3830 = vmatpush.bf16.msrb.mxu1 %v4645_v41  ;;  %v6418_v41 = vld [vmem:[%s10182_s1 + $0x354] sm:$0xf]  ;;  %3799 = vmatmul.bf16.vlgmr.msra.gmra.mxu2 %v7245_v49  ;;  %v4557_v60 = vor.u32 %v6384_v12, %v4554_v30  ;;  %v4538_v12 = vld [vmem:[%s10182_s1 + $0x228] sm:$0xf0]  ;;  %v6396_v30 = vld [vmem:[%s10182_s1 + $0x2a4] sm:$0xf] }
 0x130   : > { %3843 = vmatpush.bf16.msrb.mxu2 %v4709_v39  ;;  %v4626_v39 = vld [vmem:[%s10182_s1 + $0x2d8] sm:$0xf0]  ;;  %3812 = vmatmul.bf16.vlgmr.msra.gmra.mxu3 %v7249_v51  ;;  %v4693_v49 = vor.u32 %v6418_v41, %v4690_v59  ;;  %v4757_v51 = vor.u32 %v6434_v47, %v4754_v17  ;;  %v6430_v59 = vld [vmem:[%s10182_s1 + $0x3b4] sm:$0xf] }
 0x131   : > { %3856 = vmatpush.bf16.msrb.mxu3 %v4773_v46  ;;  %v4629_v29 = vor.u32 %v6402_v16, %v4626_v39  ;;  %v3566_v46 = vpop.f32.mrf.mxu0  ;;  %v6414_v39 = vld [vmem:[%s10182_s1 + $0x334] sm:$0xf]  ;;  %v4674_v41 = vld [vmem:[%s10182_s1 + $0x338] sm:$0xf0] }
 0x132   : > { %3818 = vmatpush.bf16.msrb.mxu0 %v4573_v23  ;;  %v3567_v57 = vadd.f32 %v3566_v46, %v8708_v63  ;;  %v4621_v23 = vor.u32 %v6400_v50, %v4618_v52  ;;  %v4749_v63 = vor.u32 %v6432_v40, %v4746_v44  ;;  %v4738_v47 = vld [vmem:[%s10182_s1 + $0x3b8] sm:$0xf0]  ;;  %v4602_v52 = vld [vmem:[%s10182_s1 + $0x2a8] sm:$0xf0]  ;;  %v6428_v44 = vld [vmem:[%s10182_s1 + $0x3a4] sm:$0xf] }
 0x133   : > { %3831 = vmatpush.bf16.msrb.mxu1 %v4637_v54  ;;  %v4685_v54 = vor.u32 %v6416_v33, %v4682_v38  ;;  %v4741_v50 = vor.u32 %v6430_v59, %v4738_v47  ;;  %v6412_v33 = vld [vmem:[%s10182_s1 + $0x324] sm:$0xf]  ;;  %v4666_v38 = vld [vmem:[%s10182_s1 + $0x328] sm:$0xf0]  ;;  %v3605_v40 = vpop.f32.mrf.mxu3  ;;  %v4658_v59 = vld [vmem:[%s10182_s1 + $0x318] sm:$0xf0] }
 0x134   : > { %3844 = vmatpush.bf16.msrb.mxu2 %v4701_v13  ;;  %v6382_v13 = vld [vmem:[%s10182_s1 + $0x234] sm:$0xf]  ;;  %v3580_v16 = vadd.f32 %v3579_v8, %v3567_v57  ;;  %v4730_v57 = vld [vmem:[%s10182_s1 + $0x3a8] sm:$0xf0] }
 0x135   : > { %3857 = vmatpush.bf16.msrb.mxu3 %v4765_v22  ;;  %v4610_v22 = vld [vmem:[%s10182_s1 + $0x2b8] sm:$0xf0]  ;;  %v4549_v17 = vor.u32 %v6382_v13, %v4546_v55  ;;  %v4605_v13 = vor.u32 %v6396_v30, %v4602_v52  ;;  %v4669_v55 = vor.u32 %v6412_v33, %v4666_v38  ;;  %v6426_v47 = vld [vmem:[%s10182_s1 + $0x394] sm:$0xf]  ;;  %v6408_v52 = vld [vmem:[%s10182_s1 + $0x304] sm:$0xf] }
 0x136   : > { %3819 = vmatpush.bf16.msrb.mxu0 %v4565_v28  ;;  %v4613_v28 = vor.u32 %v6398_v14, %v4610_v22  ;;  %v6378_v14 = vld [vmem:[%s10182_s1 + $0x214] sm:$0xf]  ;;  %v4733_v22 = vor.u32 %v6428_v44, %v4730_v57  ;;  %v4650_v38 = vld [vmem:[%s10182_s1 + $0x308] sm:$0xf0] }
 0x137   : > { %3832 = vmatpush.bf16.msrb.mxu1 %v4629_v29  ;;  %v4677_v29 = vor.u32 %v6414_v39, %v4674_v41  ;;  %v4594_v39 = vld [vmem:[%s10182_s1 + $0x298] sm:$0xf0]  ;;  %v6410_v41 = vld [vmem:[%s10182_s1 + $0x314] sm:$0xf] }
 0x138   : > { %3845 = vmatpush.bf16.msrb.mxu2 %v4693_v49  ;;  %v6380_v49 = vld [vmem:[%s10182_s1 + $0x224] sm:$0xf]  ;;  %v4661_v30 = vor.u32 %v6410_v41, %v4658_v59  ;;  %v6454_v57 = vld [vmem:[%s10182_s1 + $0x474] sm:$0xf]  ;;  %v5026_v41 = vld [vmem:[%s10182_s1 + $0x5f8] sm:$0xf0] }
 0x139   : > { %3858 = vmatpush.bf16.msrb.mxu3 %v4757_v51  ;;  %v3592_v51 = vpop.f32.mrf.mxu2  ;;  %v4541_v8 = vor.u32 %v6380_v49, %v4538_v12  ;;  %v4522_v49 = vld [vmem:[%s10182_s1 + $0x208] sm:$0xf0] }
 0x13a   : > { %3820 = vmatpush.bf16.msrb.mxu0 %v4557_v60  ;;  %v3593_v46 = vadd.f32 %v3592_v51, %v3580_v16  ;;  %v3568_v60 = vpop.f32.mrf.mxu0  ;;  %v6394_v16 = vld [vmem:[%s10182_s1 + $0x294] sm:$0xf]  ;;  %v4586_v51 = vld [vmem:[%s10182_s1 + $0x288] sm:$0xf0] }
 0x13b   : > { %3833 = vmatpush.bf16.msrb.mxu1 %v4621_v23  ;;  %v3581_v23 = vpop.f32.mrf.mxu1  ;;  %v4597_v12 = vor.u32 %v6394_v16, %v4594_v39  ;;  %v4834_v60 = vld [vmem:[%s10182_s1 + $0x478] sm:$0xf0]  ;;  %v6502_v39 = vld [vmem:[%s10182_s1 + $0x5f4] sm:$0xf] }
 0x13c   : > { %3846 = vmatpush.bf16.msrb.mxu2 %v4685_v54  ;;  %v8907_v54 = vadd.f32 %v3605_v40, %v3593_v46  ;;  %v6424_v46 = vld [vmem:[%s10182_s1 + $0x384] sm:$0xf]  ;;  %v4714_v40 = vld [vmem:[%s10182_s1 + $0x388] sm:$0xf0]  ;;  %v3607_v23 = vpop.f32.mrf.mxu3 }
 0x13d   : > { %3859 = vmatpush.bf16.msrb.mxu3 %v4749_v63  ;;  %v4530_v63 = vld [vmem:[%s10182_s1 + $0x218] sm:$0xf0]  ;;  %v4717_v59 = vor.u32 %v6424_v46, %v4714_v40 }
 0x13e   : > { %3821 = vmatpush.bf16.msrb.mxu0 %v4549_v17  ;;  %v4722_v17 = vld [vmem:[%s10182_s1 + $0x398] sm:$0xf0] }
 0x13f   : > { %3834 = vmatpush.bf16.msrb.mxu1 %v4613_v28  ;;  %v4533_v28 = vor.u32 %v6378_v14, %v4530_v63  ;;  %v4725_v33 = vor.u32 %v6426_v47, %v4722_v17  ;;  %v6486_v14 = vld [vmem:[%s10182_s1 + $0x574] sm:$0xf]  ;;  %v4962_v63 = vld [vmem:[%s10182_s1 + $0x578] sm:$0xf0]  ;;  %v4837_v47 = vor.u32 %v6454_v57, %v4834_v60 }
 0x140   : > { %3847 = vmatpush.bf16.msrb.mxu2 %v4677_v29  ;;  %v6376_v29 = vld [vmem:[%s10182_s1 + $0x204] sm:$0xf]  ;;  %v6450_v57 = vld [vmem:[%s10182_s1 + $0x454] sm:$0xf]  ;;  %v4818_v60 = vld [vmem:[%s10182_s1 + $0x458] sm:$0xf0] }
 0x141   : > { %3860 = vmatpush.bf16.msrb.mxu3 %v4741_v50  ;;  %v6392_v50 = vld [vmem:[%s10182_s1 + $0x284] sm:$0xf]  ;;  %v3594_v44 = vpop.f32.mrf.mxu2 }
 0x142   : > { %3822 = vmatpush.bf16.msrb.mxu0 %v4541_v8  ;;  %v6470_v8 = vld [vmem:[%s10182_s1 + $0x4f4] sm:$0xf]  ;;  %v4589_v16 = vor.u32 %v6392_v50, %v4586_v51  ;;  %v4890_v50 = vld [vmem:[%s10182_s1 + $0x4e8] sm:$0xf0]  ;;  %v6484_v51 = vld [vmem:[%s10182_s1 + $0x564] sm:$0xf] }
 0x143   : > { %3835 = vmatpush.bf16.msrb.mxu1 %v4605_v13  ;;  %v4525_v13 = vor.u32 %v6376_v29, %v4522_v49  ;;  %v6452_v29 = vld [vmem:[%s10182_s1 + $0x464] sm:$0xf]  ;;  %v4826_v49 = vld [vmem:[%s10182_s1 + $0x468] sm:$0xf0] }
 0x144   : > { %3848 = vmatpush.bf16.msrb.mxu2 %v4669_v55  ;;  %v4898_v55 = vld [vmem:[%s10182_s1 + $0x4f8] sm:$0xf0]  ;;  %v4829_v46 = vor.u32 %v6452_v29, %v4826_v49  ;;  %v6496_v29 = vld [vmem:[%s10182_s1 + $0x5c4] sm:$0xf]  ;;  %v5002_v49 = vld [vmem:[%s10182_s1 + $0x5c8] sm:$0xf0] }
 0x145   : > { %3861 = vmatpush.bf16.msrb.mxu3 %v4733_v22  ;;  %v4653_v22 = vor.u32 %v6408_v52, %v4650_v38  ;;  %v4901_v17 = vor.u32 %v6470_v8, %v4898_v55  ;;  %v4954_v52 = vld [vmem:[%s10182_s1 + $0x568] sm:$0xf0]  ;;  %v6466_v8 = vld [vmem:[%s10182_s1 + $0x4d4] sm:$0xf] }
 0x146   : > { %3823 = vmatpush.bf16.msrb.mxu0 %v4533_v28  ;;  %v4965_v28 = vor.u32 %v6486_v14, %v4962_v63  ;;  %v5018_v38 = vld [vmem:[%s10182_s1 + $0x5e8] sm:$0xf0]  ;;  %v4957_v44 = vor.u32 %v6484_v51, %v4954_v52  ;;  %v6482_v55 = vld [vmem:[%s10182_s1 + $0x554] sm:$0xf]  ;;  %v4946_v14 = vld [vmem:[%s10182_s1 + $0x558] sm:$0xf0] }
 0x147   : > { %3836 = vmatpush.bf16.msrb.mxu1 %v4597_v12  ;;  %v6468_v12 = vld [vmem:[%s10182_s1 + $0x4e4] sm:$0xf]  ;;  %v6498_v63 = vld [vmem:[%s10182_s1 + $0x5d4] sm:$0xf] }
 0x148   : > { %3849 = vmatpush.bf16.msrb.mxu2 %v4661_v30  ;;  %v5029_v30 = vor.u32 %v6502_v39, %v5026_v41  ;;  %v4893_v40 = vor.u32 %v6468_v12, %v4890_v50  ;;  %v4949_v39 = vor.u32 %v6482_v55, %v4946_v14  ;;  %v6448_v41 = vld [vmem:[%s10182_s1 + $0x444] sm:$0xf] }
 0x149   : > { %3862 = vmatpush.bf16.msrb.mxu3 %v4725_v33  ;;  %v6500_v33 = vld [vmem:[%s10182_s1 + $0x5e4] sm:$0xf] }
 0x14a   : > { %3824 = vmatpush.bf16.msrb.mxu0 %v4525_v13  ;;  %v5021_v23 = vor.u32 %v6500_v33, %v5018_v38  ;;  %v4882_v13 = vld [vmem:[%s10182_s1 + $0x4d8] sm:$0xf0]  ;;  %v6446_v33 = vld [vmem:[%s10182_s1 + $0x434] sm:$0xf] }
 0x14b   : > { %3837 = vmatpush.bf16.msrb.mxu1 %v4589_v16  ;;  %v4821_v16 = vor.u32 %v6450_v57, %v4818_v60  ;;  %v3631_v50 = vpop.f32.mrf.mxu1  ;;  %v4802_v38 = vld [vmem:[%s10182_s1 + $0x438] sm:$0xf0]  ;;  %v6478_v57 = vld [vmem:[%s10182_s1 + $0x534] sm:$0xf] }
 0x14c   : > { %3850 = vmatpush.bf16.msrb.mxu2 %v4653_v22  ;;  %v4885_v22 = vor.u32 %v6466_v8, %v4882_v13  ;;  %v4930_v60 = vld [vmem:[%s10182_s1 + $0x538] sm:$0xf0]  ;;  %v6494_v8 = vld [vmem:[%s10182_s1 + $0x5b4] sm:$0xf]  ;;  %v4805_v13 = vor.u32 %v6446_v33, %v4802_v38 }
 0x14d   : > { %3863 = vmatpush.bf16.msrb.mxu3 %v4717_v59  ;;  %3825 = vmatmul.bf16.vlgmr.msrb.gmra.mxu0 %v7286_v3  ;;  %v4810_v59 = vld [vmem:[%s10182_s1 + $0x448] sm:$0xf0]  ;;  %v6464_v3 = vld [vmem:[%s10182_s1 + $0x4c4] sm:$0xf]  ;;  %v4933_v14 = vor.u32 %v6478_v57, %v4930_v60  ;;  %v6458_v33 = vld [vmem:[%s10182_s1 + $0x494] sm:$0xf] }
 0x14e   : > { %3869 = vmatpush.bf16.msra.mxu0 %v4837_v47  ;;  %3838 = vmatmul.bf16.vlgmr.msrb.gmra.mxu1 %v7290_v5  ;;  %v4874_v5 = vld [vmem:[%s10182_s1 + $0x4c8] sm:$0xf0]  ;;  %v6480_v47 = vld [vmem:[%s10182_s1 + $0x544] sm:$0xf]  ;;  %v4978_v57 = vld [vmem:[%s10182_s1 + $0x598] sm:$0xf0] }
 0x14f   : > { %3882 = vmatpush.bf16.msra.mxu1 %v4901_v17  ;;  %3851 = vmatmul.bf16.vlgmr.msrb.gmra.mxu2 %v7283_v1  ;;  %v5010_v1 = vld [vmem:[%s10182_s1 + $0x5d8] sm:$0xf0]  ;;  %v4938_v17 = vld [vmem:[%s10182_s1 + $0x548] sm:$0xf0]  ;;  %v4877_v51 = vor.u32 %v6464_v3, %v4874_v5 }
 0x150   : > { %3895 = vmatpush.bf16.msra.mxu2 %v4965_v28  ;;  %3864 = vmatmul.bf16.vlgmr.msrb.gmra.mxu3 %v7288_v4  ;;  %v5013_v4 = vor.u32 %v6498_v63, %v5010_v1  ;;  %v3618_v28 = vpop.f32.mrf.mxu0  ;;  %v4941_v52 = vor.u32 %v6480_v47, %v4938_v17  ;;  %v6444_v63 = vld [vmem:[%s10182_s1 + $0x424] sm:$0xf]  ;;  %v4794_v1 = vld [vmem:[%s10182_s1 + $0x428] sm:$0xf0] }
 0x151   : > { %3908 = vmatpush.bf16.msra.mxu3 %v5029_v30  ;;  %v3619_v12 = vadd.f32 %v3618_v28, %v8907_v54  ;;  %v4813_v30 = vor.u32 %v6448_v41, %v4810_v59  ;;  %v5005_v54 = vor.u32 %v6496_v29, %v5002_v49  ;;  %v4858_v41 = vld [vmem:[%s10182_s1 + $0x4a8] sm:$0xf0]  ;;  %v6476_v59 = vld [vmem:[%s10182_s1 + $0x524] sm:$0xf]  ;;  %v4797_v29 = vor.u32 %v6444_v63, %v4794_v1 }
 0x152   : > { %3870 = vmatpush.bf16.msra.mxu0 %v4829_v46  ;;  %v6462_v46 = vld [vmem:[%s10182_s1 + $0x4b4] sm:$0xf]  ;;  %v4922_v3 = vld [vmem:[%s10182_s1 + $0x528] sm:$0xf0]  ;;  %v6492_v47 = vld [vmem:[%s10182_s1 + $0x5a4] sm:$0xf] }
 0x153   : > { %3883 = vmatpush.bf16.msra.mxu1 %v4893_v40  ;;  %v3632_v40 = vadd.f32 %v3631_v50, %v3619_v12  ;;  %v3657_v5 = vpop.f32.mrf.mxu3  ;;  %v4986_v17 = vld [vmem:[%s10182_s1 + $0x5a8] sm:$0xf0]  ;;  %v3633_v49 = vpop.f32.mrf.mxu1  ;;  %v4925_v50 = vor.u32 %v6476_v59, %v4922_v3  ;;  %v6472_v1 = vld [vmem:[%s10182_s1 + $0x504] sm:$0xf]  ;;  %v6518_v3 = vld [vmem:[%s10182_s1 + $0x674] sm:$0xf] }
 0x154   : > { %3896 = vmatpush.bf16.msra.mxu2 %v4957_v44  ;;  %v4866_v44 = vld [vmem:[%s10182_s1 + $0x4b8] sm:$0xf0]  ;;  %v4989_v38 = vor.u32 %v6492_v47, %v4986_v17  ;;  %v4842_v63 = vld [vmem:[%s10182_s1 + $0x488] sm:$0xf0] }
 0x155   : > { %3909 = vmatpush.bf16.msra.mxu3 %v5021_v23  ;;  %v4994_v23 = vld [vmem:[%s10182_s1 + $0x5b8] sm:$0xf0]  ;;  %v4869_v55 = vor.u32 %v6462_v46, %v4866_v44  ;;  %v6490_v44 = vld [vmem:[%s10182_s1 + $0x594] sm:$0xf] }
 0x156   : > { %3871 = vmatpush.bf16.msra.mxu0 %v4821_v16  ;;  %v6460_v16 = vld [vmem:[%s10182_s1 + $0x4a4] sm:$0xf]  ;;  %v4850_v46 = vld [vmem:[%s10182_s1 + $0x498] sm:$0xf0] }
 0x157   : > { %3884 = vmatpush.bf16.msra.mxu1 %v4885_v22  ;;  %v4997_v22 = vor.u32 %v6494_v8, %v4994_v23  ;;  %v6440_v8 = vld [vmem:[%s10182_s1 + $0x404] sm:$0xf]  ;;  %v4778_v23 = vld [vmem:[%s10182_s1 + $0x408] sm:$0xf0]  ;;  %v5218_v49 = vld [vmem:[%s10182_s1 + $0x778] sm:$0xf0] }
 0x158   : > { %3897 = vmatpush.bf16.msra.mxu2 %v4949_v39  ;;  %v3644_v39 = vpop.f32.mrf.mxu2  ;;  %v3620_v28 = vpop.f32.mrf.mxu0  ;;  %v4781_v17 = vor.u32 %v6440_v8, %v4778_v23  ;;  %v5146_v8 = vld [vmem:[%s10182_s1 + $0x6e8] sm:$0xf0]  ;;  %v6548_v23 = vld [vmem:[%s10182_s1 + $0x764] sm:$0xf] }
 0x159   : > { %3910 = vmatpush.bf16.msra.mxu3 %v5013_v4  ;;  %v3645_v4 = vadd.f32 %v3644_v39, %v3632_v40  ;;  %v4914_v40 = vld [vmem:[%s10182_s1 + $0x518] sm:$0xf0]  ;;  %v6488_v39 = vld [vmem:[%s10182_s1 + $0x584] sm:$0xf] }
 0x15a   : > { %3872 = vmatpush.bf16.msra.mxu0 %v4813_v30  ;;  %v4861_v30 = vor.u32 %v6460_v16, %v4858_v41  ;;  %v4981_v16 = vor.u32 %v6490_v44, %v4978_v57  ;;  %v4970_v41 = vld [vmem:[%s10182_s1 + $0x588] sm:$0xf0]  ;;  %v5154_v28 = vld [vmem:[%s10182_s1 + $0x6f8] sm:$0xf0]  ;;  %v6532_v57 = vld [vmem:[%s10182_s1 + $0x6e4] sm:$0xf] }
 0x15b   : > { %3885 = vmatpush.bf16.msra.mxu1 %v4877_v51  ;;  %v9106_v12 = vadd.f32 %v3657_v5, %v3645_v4  ;;  %v6442_v51 = vld [vmem:[%s10182_s1 + $0x414] sm:$0xf]  ;;  %v5090_v4 = vld [vmem:[%s10182_s1 + $0x678] sm:$0xf0]  ;;  %v3659_v47 = vpop.f32.mrf.mxu3  ;;  %v5082_v44 = vld [vmem:[%s10182_s1 + $0x668] sm:$0xf0] }
 0x15c   : > { %3898 = vmatpush.bf16.msra.mxu2 %v4941_v52  ;;  %v4786_v52 = vld [vmem:[%s10182_s1 + $0x418] sm:$0xf0]  ;;  %v6534_v5 = vld [vmem:[%s10182_s1 + $0x6f4] sm:$0xf] }
 0x15d   : > { %3911 = vmatpush.bf16.msra.mxu3 %v5005_v54  ;;  %v6474_v54 = vld [vmem:[%s10182_s1 + $0x514] sm:$0xf]  ;;  %v4789_v60 = vor.u32 %v6442_v51, %v4786_v52  ;;  %v5282_v52 = vld [vmem:[%s10182_s1 + $0x7f8] sm:$0xf0] }
 0x15e   : > { %3873 = vmatpush.bf16.msra.mxu0 %v4805_v13  ;;  %v4853_v13 = vor.u32 %v6458_v33, %v4850_v46  ;;  %v6566_v51 = vld [vmem:[%s10182_s1 + $0x7f4] sm:$0xf]  ;;  %v4973_v33 = vor.u32 %v6488_v39, %v4970_v41  ;;  %v5157_v46 = vor.u32 %v6534_v5, %v5154_v28  ;;  %v5074_v39 = vld [vmem:[%s10182_s1 + $0x658] sm:$0xf0]  ;;  %v6544_v28 = vld [vmem:[%s10182_s1 + $0x744] sm:$0xf] }
 0x15f   : > { %3886 = vmatpush.bf16.msra.mxu1 %v4869_v55  ;;  %v4917_v55 = vor.u32 %v6474_v54, %v4914_v40  ;;  %v6516_v40 = vld [vmem:[%s10182_s1 + $0x664] sm:$0xf]  ;;  %v6530_v41 = vld [vmem:[%s10182_s1 + $0x6d4] sm:$0xf]  ;;  %v5202_v5 = vld [vmem:[%s10182_s1 + $0x758] sm:$0xf0] }
 0x160   : > { %3899 = vmatpush.bf16.msra.mxu2 %v4933_v14  ;;  %v6456_v14 = vld [vmem:[%s10182_s1 + $0x484] sm:$0xf]  ;;  %v3646_v59 = vpop.f32.mrf.mxu2 }
 0x161   : > { %3912 = vmatpush.bf16.msra.mxu3 %v4997_v22  ;;  %v4906_v22 = vld [vmem:[%s10182_s1 + $0x508] sm:$0xf0] }
 0x162   : > { %3874 = vmatpush.bf16.msra.mxu0 %v4797_v29  ;;  %v6550_v29 = vld [vmem:[%s10182_s1 + $0x774] sm:$0xf] }
 0x163   : > { %3887 = vmatpush.bf16.msra.mxu1 %v4861_v30  ;;  %v4845_v30 = vor.u32 %v6456_v14, %v4842_v63  ;;  %v5221_v54 = vor.u32 %v6550_v29, %v5218_v49  ;;  %v5274_v14 = vld [vmem:[%s10182_s1 + $0x7e8] sm:$0xf0]  ;;  %v5085_v63 = vor.u32 %v6516_v40, %v5082_v44  ;;  %v5058_v40 = vld [vmem:[%s10182_s1 + $0x638] sm:$0xf0]  ;;  %v6526_v44 = vld [vmem:[%s10182_s1 + $0x6b4] sm:$0xf] }
 0x164   : > { %3900 = vmatpush.bf16.msra.mxu2 %v4925_v50  ;;  %v4909_v50 = vor.u32 %v6472_v1, %v4906_v22  ;;  %v5149_v1 = vor.u32 %v6532_v57, %v5146_v8  ;;  %v6514_v22 = vld [vmem:[%s10182_s1 + $0x654] sm:$0xf]  ;;  %v5194_v29 = vld [vmem:[%s10182_s1 + $0x748] sm:$0xf0] }
 0x165   : > { %3913 = vmatpush.bf16.msra.mxu3 %v4989_v38  ;;  %v5093_v38 = vor.u32 %v6518_v3, %v5090_v4  ;;  %v5138_v3 = vld [vmem:[%s10182_s1 + $0x6d8] sm:$0xf0]  ;;  %v6546_v4 = vld [vmem:[%s10182_s1 + $0x754] sm:$0xf]  ;;  %v5077_v47 = vor.u32 %v6514_v22, %v5074_v39  ;;  %v5050_v22 = vld [vmem:[%s10182_s1 + $0x628] sm:$0xf0] }
 0x166   : > { %3875 = vmatpush.bf16.msra.mxu0 %v4789_v60  ;;  %v5285_v60 = vor.u32 %v6566_v51, %v5282_v52  ;;  %v5141_v53 = vor.u32 %v6530_v41, %v5138_v3  ;;  %v6542_v8 = vld [vmem:[%s10182_s1 + $0x734] sm:$0xf]  ;;  %v6524_v39 = vld [vmem:[%s10182_s1 + $0x6a4] sm:$0xf]  ;;  %v5114_v3 = vld [vmem:[%s10182_s1 + $0x6a8] sm:$0xf0] }
 0x167   : > { %3888 = vmatpush.bf16.msra.mxu1 %v4853_v13  ;;  %v5210_v13 = vld [vmem:[%s10182_s1 + $0x768] sm:$0xf0] }
 0x168   : > { %3901 = vmatpush.bf16.msra.mxu2 %v4917_v55  ;;  %v6564_v55 = vld [vmem:[%s10182_s1 + $0x7e4] sm:$0xf] }
 0x169   : > { %3914 = vmatpush.bf16.msra.mxu3 %v4981_v16  ;;  %v5213_v16 = vor.u32 %v6548_v23, %v5210_v13  ;;  %v5277_v59 = vor.u32 %v6564_v55, %v5274_v14  ;;  %v5186_v23 = vld [vmem:[%s10182_s1 + $0x738] sm:$0xf0]  ;;  %v6558_v13 = vld [vmem:[%s10182_s1 + $0x7b4] sm:$0xf] }
 0x16a   : > { %3876 = vmatpush.bf16.msra.mxu0 %v4781_v17  ;;  %v6528_v17 = vld [vmem:[%s10182_s1 + $0x6c4] sm:$0xf]  ;;  %v3670_v49 = vpop.f32.mrf.mxu0  ;;  %v5250_v55 = vld [vmem:[%s10182_s1 + $0x7b8] sm:$0xf0] }
 0x16b   : > { %3889 = vmatpush.bf16.msra.mxu1 %v4845_v30  ;;  %v6560_v30 = vld [vmem:[%s10182_s1 + $0x7c4] sm:$0xf]  ;;  %v3671_v51 = vadd.f32 %v3670_v49, %v9106_v12  ;;  %v5253_v41 = vor.u32 %v6558_v13, %v5250_v55  ;;  %v6522_v49 = vld [vmem:[%s10182_s1 + $0x694] sm:$0xf]  ;;  %v5162_v13 = vld [vmem:[%s10182_s1 + $0x708] sm:$0xf0] }
 0x16c   : > { %3902 = vmatpush.bf16.msra.mxu2 %v4909_v50  ;;  %v5258_v50 = vld [vmem:[%s10182_s1 + $0x7c8] sm:$0xf0]  ;;  %v6552_v55 = vld [vmem:[%s10182_s1 + $0x784] sm:$0xf] }
 0x16d   : > { %3915 = vmatpush.bf16.msra.mxu3 %v4973_v33  ;;  %3877 = vmatmul.bf16.vlgmr.msra.gmra.mxu0 %v196_v0  ;;  %v5266_v0 = vld [vmem:[%s10182_s1 + $0x7d8] sm:$0xf0]  ;;  %v3683_v33 = vpop.f32.mrf.mxu1  ;;  %v5261_v12 = vor.u32 %v6560_v30, %v5258_v50 }
 0x16e   : > { %3921 = vmatpush.bf16.msrb.mxu0 %v5093_v38  ;;  %3890 = vmatmul.bf16.vlgmr.msra.gmra.mxu1 %v198_v18  ;;  %v5066_v18 = vld [vmem:[%s10182_s1 + $0x648] sm:$0xf0]  ;;  %v5269_v7 = vor.u32 %v6562_v48, %v5266_v0  ;;  %v3684_v57 = vadd.f32 %v3683_v33, %v3671_v51  ;;  %v5106_v50 = vld [vmem:[%s10182_s1 + $0x698] sm:$0xf0]  ;;  %v6538_v51 = vld [vmem:[%s10182_s1 + $0x714] sm:$0xf] }
 0x16f   : > { %3934 = vmatpush.bf16.msrb.mxu1 %v5157_v46  ;;  %3903 = vmatmul.bf16.vlgmr.msra.gmra.mxu2 %v200_v2  ;;  %v5205_v2 = vor.u32 %v6546_v4, %v5202_v5  ;;  %v5069_v52 = vor.u32 %v6512_v6, %v5066_v18  ;;  %v5197_v46 = vor.u32 %v6544_v28, %v5194_v29  ;;  %v6540_v4 = vld [vmem:[%s10182_s1 + $0x724] sm:$0xf]  ;;  %v5178_v5 = vld [vmem:[%s10182_s1 + $0x728] sm:$0xf0]  ;;  %v6506_v28 = vld [vmem:[%s10182_s1 + $0x614] sm:$0xf] }
 0x170   : > { %3947 = vmatpush.bf16.msrb.mxu2 %v5221_v54  ;;  %3916 = vmatmul.bf16.vlgmr.msra.gmra.mxu3 %v202_v19  ;;  %v5130_v19 = vld [vmem:[%s10182_s1 + $0x6c8] sm:$0xf0]  ;;  %v6510_v54 = vld [vmem:[%s10182_s1 + $0x634] sm:$0xf]  ;;  %v5042_v29 = vld [vmem:[%s10182_s1 + $0x618] sm:$0xf0] }
 0x171   : > { %3960 = vmatpush.bf16.msrb.mxu3 %v5285_v60  ;;  %v5133_v38 = vor.u32 %v6528_v17, %v5130_v19  ;;  %v5122_v60 = vld [vmem:[%s10182_s1 + $0x6b8] sm:$0xf0]  ;;  %v5061_v14 = vor.u32 %v6510_v54, %v5058_v40  ;;  %v5181_v19 = vor.u32 %v6540_v4, %v5178_v5  ;;  %v6554_v33 = vld [vmem:[%s10182_s1 + $0x794] sm:$0xf]  ;;  %v6504_v54 = vld [vmem:[%s10182_s1 + $0x604] sm:$0xf] }
 0x172   : > { %3922 = vmatpush.bf16.msrb.mxu0 %v5085_v63  ;;  %v5125_v63 = vor.u32 %v6526_v44, %v5122_v60  ;;  %v5034_v40 = vld [vmem:[%s10182_s1 + $0x608] sm:$0xf0]  ;;  %v5109_v44 = vor.u32 %v6522_v49, %v5106_v50  ;;  %v5474_v4 = vld [vmem:[%s10182_s1 + $0x978] sm:$0xf0] }
 0x173   : > { %3935 = vmatpush.bf16.msrb.mxu1 %v5149_v1  ;;  %v5189_v1 = vor.u32 %v6542_v8, %v5186_v23  ;;  %v3709_v0 = vpop.f32.mrf.mxu3  ;;  %v5098_v60 = vld [vmem:[%s10182_s1 + $0x688] sm:$0xf0]  ;;  %v6536_v8 = vld [vmem:[%s10182_s1 + $0x704] sm:$0xf] }
 0x174   : > { %3948 = vmatpush.bf16.msrb.mxu2 %v5213_v16  ;;  %v6508_v16 = vld [vmem:[%s10182_s1 + $0x624] sm:$0xf]  ;;  %v5402_v49 = vld [vmem:[%s10182_s1 + $0x8e8] sm:$0xf0] }
 0x175   : > { %3961 = vmatpush.bf16.msrb.mxu3 %v5277_v59  ;;  %v3696_v59 = vpop.f32.mrf.mxu2  ;;  %v5053_v6 = vor.u32 %v6508_v16, %v5050_v22  ;;  %v3685_v18 = vpop.f32.mrf.mxu1  ;;  %v5346_v16 = vld [vmem:[%s10182_s1 + $0x878] sm:$0xf0]  ;;  %v6598_v22 = vld [vmem:[%s10182_s1 + $0x8f4] sm:$0xf]  ;;  %v5466_v50 = vld [vmem:[%s10182_s1 + $0x968] sm:$0xf0] }
 0x176   : > { %3923 = vmatpush.bf16.msrb.mxu0 %v5077_v47  ;;  %v3697_v48 = vadd.f32 %v3696_v59, %v3684_v57  ;;  %v6556_v47 = vld [vmem:[%s10182_s1 + $0x7a4] sm:$0xf]  ;;  %v5410_v59 = vld [vmem:[%s10182_s1 + $0x8f8] sm:$0xf0] }
 0x177   : > { %3936 = vmatpush.bf16.msrb.mxu1 %v5141_v53  ;;  %v5242_v53 = vld [vmem:[%s10182_s1 + $0x7a8] sm:$0xf0]  ;;  %v6520_v57 = vld [vmem:[%s10182_s1 + $0x684] sm:$0xf] }
 0x178   : > { %3949 = vmatpush.bf16.msrb.mxu2 %v5205_v2  ;;  %v3672_v2 = vpop.f32.mrf.mxu0  ;;  %v9309_v17 = vadd.f32 %v3709_v0, %v3697_v48  ;;  %v5245_v30 = vor.u32 %v6556_v47, %v5242_v53  ;;  %v5101_v5 = vor.u32 %v6520_v57, %v5098_v60  ;;  %v5165_v48 = vor.u32 %v6536_v8, %v5162_v13  ;;  %v6630_v0 = vld [vmem:[%s10182_s1 + $0x9f4] sm:$0xf]  ;;  %v5538_v47 = vld [vmem:[%s10182_s1 + $0x9f8] sm:$0xf0] }
 0x179   : > { %3962 = vmatpush.bf16.msrb.mxu3 %v5269_v7  ;;  %v5117_v7 = vor.u32 %v6524_v39, %v5114_v3  ;;  %v6614_v3 = vld [vmem:[%s10182_s1 + $0x974] sm:$0xf]  ;;  %v5394_v57 = vld [vmem:[%s10182_s1 + $0x8d8] sm:$0xf0] }
 0x17a   : > { %3924 = vmatpush.bf16.msrb.mxu0 %v5069_v52  ;;  %v5170_v52 = vld [vmem:[%s10182_s1 + $0x718] sm:$0xf0]  ;;  %v5477_v18 = vor.u32 %v6614_v3, %v5474_v4  ;;  %v6610_v60 = vld [vmem:[%s10182_s1 + $0x954] sm:$0xf] }
 0x17b   : > { %3937 = vmatpush.bf16.msrb.mxu1 %v5133_v38  ;;  %v5234_v38 = vld [vmem:[%s10182_s1 + $0x798] sm:$0xf0]  ;;  %v3711_v39 = vpop.f32.mrf.mxu3 }
 0x17c   : > { %3950 = vmatpush.bf16.msrb.mxu2 %v5197_v46  ;;  %v5045_v46 = vor.u32 %v6506_v28, %v5042_v29  ;;  %v5237_v23 = vor.u32 %v6554_v33, %v5234_v38  ;;  %v6596_v28 = vld [vmem:[%s10182_s1 + $0x8e4] sm:$0xf]  ;;  %v5541_v29 = vor.u32 %v6630_v0, %v5538_v47  ;;  %v5458_v8 = vld [vmem:[%s10182_s1 + $0x958] sm:$0xf0]  ;;  %v5514_v39 = vld [vmem:[%s10182_s1 + $0x9c8] sm:$0xf0] }
 0x17d   : > { %3963 = vmatpush.bf16.msrb.mxu3 %v5261_v12  ;;  %v5173_v12 = vor.u32 %v6538_v51, %v5170_v52  ;;  %v6628_v51 = vld [vmem:[%s10182_s1 + $0x9e4] sm:$0xf]  ;;  %v5530_v52 = vld [vmem:[%s10182_s1 + $0x9e8] sm:$0xf0]  ;;  %v5405_v38 = vor.u32 %v6596_v28, %v5402_v49  ;;  %v5314_v0 = vld [vmem:[%s10182_s1 + $0x838] sm:$0xf0] }
 0x17e   : > { %3925 = vmatpush.bf16.msrb.mxu0 %v5061_v14  ;;  %v5226_v14 = vld [vmem:[%s10182_s1 + $0x788] sm:$0xf0]  ;;  %v6590_v47 = vld [vmem:[%s10182_s1 + $0x8b4] sm:$0xf] }
 0x17f   : > { %3938 = vmatpush.bf16.msrb.mxu1 %v5125_v63  ;;  %v3698_v63 = vpop.f32.mrf.mxu2  ;;  %v5229_v53 = vor.u32 %v6552_v55, %v5226_v14  ;;  %v6592_v55 = vld [vmem:[%s10182_s1 + $0x8c4] sm:$0xf]  ;;  %v5386_v14 = vld [vmem:[%s10182_s1 + $0x8c8] sm:$0xf0] }
 0x180   : > { %3951 = vmatpush.bf16.msrb.mxu2 %v5189_v1  ;;  %v6582_v1 = vld [vmem:[%s10182_s1 + $0x874] sm:$0xf]  ;;  %v6608_v63 = vld [vmem:[%s10182_s1 + $0x944] sm:$0xf]  ;;  %v5389_v4 = vor.u32 %v6592_v55, %v5386_v14  ;;  %v5362_v55 = vld [vmem:[%s10182_s1 + $0x898] sm:$0xf0] }
 0x181   : > { %3964 = vmatpush.bf16.msrb.mxu3 %v5253_v41  ;;  %v5037_v41 = vor.u32 %v6504_v54, %v5034_v40  ;;  %v5349_v2 = vor.u32 %v6582_v1, %v5346_v16  ;;  %v6578_v54 = vld [vmem:[%s10182_s1 + $0x854] sm:$0xf]  ;;  %v5330_v40 = vld [vmem:[%s10182_s1 + $0x858] sm:$0xf0]  ;;  %v5450_v1 = vld [vmem:[%s10182_s1 + $0x948] sm:$0xf0] }
 0x182   : > { %3926 = vmatpush.bf16.msrb.mxu0 %v5053_v6  ;;  %v5413_v6 = vor.u32 %v6598_v22, %v5410_v59  ;;  %v5333_v13 = vor.u32 %v6578_v54, %v5330_v40  ;;  %v6624_v22 = vld [vmem:[%s10182_s1 + $0x9c4] sm:$0xf]  ;;  %v5434_v54 = vld [vmem:[%s10182_s1 + $0x928] sm:$0xf0]  ;;  %v5426_v14 = vld [vmem:[%s10182_s1 + $0x918] sm:$0xf0] }
 0x183   : > { %3939 = vmatpush.bf16.msrb.mxu1 %v5117_v7  ;;  %v6580_v7 = vld [vmem:[%s10182_s1 + $0x864] sm:$0xf] }
 0x184   : > { %3952 = vmatpush.bf16.msrb.mxu2 %v5181_v19  ;;  %v5338_v19 = vld [vmem:[%s10182_s1 + $0x868] sm:$0xf0] }
 0x185   : > { %3965 = vmatpush.bf16.msrb.mxu3 %v5245_v30  ;;  %v6612_v30 = vld [vmem:[%s10182_s1 + $0x964] sm:$0xf]  ;;  %v5341_v33 = vor.u32 %v6580_v7, %v5338_v19  ;;  %v6622_v7 = vld [vmem:[%s10182_s1 + $0x9b4] sm:$0xf]  ;;  %v5506_v19 = vld [vmem:[%s10182_s1 + $0x9b8] sm:$0xf0] }
 0x186   : > { %3927 = vmatpush.bf16.msrb.mxu0 %v5045_v46  ;;  %v5469_v46 = vor.u32 %v6612_v30, %v5466_v50  ;;  %v6572_v30 = vld [vmem:[%s10182_s1 + $0x824] sm:$0xf]  ;;  %v5306_v50 = vld [vmem:[%s10182_s1 + $0x828] sm:$0xf0] }
 0x187   : > { %3940 = vmatpush.bf16.msrb.mxu1 %v5109_v44  ;;  %v6594_v44 = vld [vmem:[%s10182_s1 + $0x8d4] sm:$0xf] }
 0x188   : > { %3953 = vmatpush.bf16.msrb.mxu2 %v5173_v12  ;;  %v5533_v12 = vor.u32 %v6628_v51, %v5530_v52  ;;  %v5397_v35 = vor.u32 %v6594_v44, %v5394_v57  ;;  %v6588_v51 = vld [vmem:[%s10182_s1 + $0x8a4] sm:$0xf]  ;;  %v5509_v52 = vor.u32 %v6622_v7, %v5506_v19  ;;  %v5498_v57 = vld [vmem:[%s10182_s1 + $0x9a8] sm:$0xf0] }
 0x189   : > { %3966 = vmatpush.bf16.msrb.mxu3 %v5237_v23  ;;  %v10194_v23 = vshrl.u32 %v7585_v37, 16 }
 0x18a   : > { %3928 = vmatpush.bf16.msrb.mxu0 %v5037_v41  ;;  %v3722_v16 = vpop.f32.mrf.mxu0 }
 0x18b   : > { %3941 = vmatpush.bf16.msrb.mxu1 %v5101_v5  ;;  %v3723_v41 = vadd.f32 %v3722_v16, %v9309_v17  ;;  %v3735_v3 = vpop.f32.mrf.mxu1  ;;  %v5453_v5 = vor.u32 %v6608_v63, %v5450_v1  ;;  %v5517_v17 = vor.u32 %v6624_v22, %v5514_v39  ;;  %v6618_v63 = vld [vmem:[%s10182_s1 + $0x994] sm:$0xf]  ;;  %v5490_v1 = vld [vmem:[%s10182_s1 + $0x998] sm:$0xf0]  ;;  %v6568_v22 = vld [vmem:[%s10182_s1 + $0x804] sm:$0xf] }
 0x18c   : > { %3954 = vmatpush.bf16.msrb.mxu2 %v5165_v48  ;;  %v6574_v48 = vld [vmem:[%s10182_s1 + $0x834] sm:$0xf]  ;;  %v5290_v39 = vld [vmem:[%s10182_s1 + $0x808] sm:$0xf0] }
 0x18d   : > { %3967 = vmatpush.bf16.msrb.mxu3 %v5229_v53  ;;  %3929 = vmatmul.bf16.vlgmr.msrb.gmra.mxu0 %v204_v21  ;;  %v5522_v21 = vld [vmem:[%s10182_s1 + $0x9d8] sm:$0xf0]  ;;  %v3736_v53 = vadd.f32 %v3735_v3, %v3723_v41  ;;  %v5317_v28 = vor.u32 %v6574_v48, %v5314_v0  ;;  %v6584_v3 = vld [vmem:[%s10182_s1 + $0x884] sm:$0xf]  ;;  %v5493_v48 = vor.u32 %v6618_v63, %v5490_v1  ;;  %v5418_v0 = vld [vmem:[%s10182_s1 + $0x908] sm:$0xf0] }
 0x18e   : > { %3973 = vmatpush.bf16.msra.mxu0 %v5349_v2  ;;  %3942 = vmatmul.bf16.vlgmr.msrb.gmra.mxu1 %v206_v32  ;;  %v5322_v32 = vld [vmem:[%s10182_s1 + $0x848] sm:$0xf0]  ;;  %v5525_v37 = vor.u32 %v6626_v34, %v5522_v21  ;;  %v5378_v2 = vld [vmem:[%s10182_s1 + $0x8b8] sm:$0xf0]  ;;  %v5293_v19 = vor.u32 %v6568_v22, %v5290_v39  ;;  %v6674_v1 = vld [vmem:[%s10182_s1 + $0xb54] sm:$0xf] }
 0x18f   : > { %3986 = vmatpush.bf16.msra.mxu1 %v5413_v6  ;;  %3955 = vmatmul.bf16.vlgmr.msrb.gmra.mxu2 %v208_v31  ;;  %v5461_v31 = vor.u32 %v6610_v60, %v5458_v8  ;;  %v5325_v59 = vor.u32 %v6576_v36, %v5322_v32  ;;  %v6606_v6 = vld [vmem:[%s10182_s1 + $0x934] sm:$0xf]  ;;  %v5309_v8 = vor.u32 %v6572_v30, %v5306_v50  ;;  %v5650_v63 = vld [vmem:[%s10182_s1 + $0xad8] sm:$0xf0] }
 0x190   : > { %3999 = vmatpush.bf16.msra.mxu2 %v5477_v18  ;;  %3968 = vmatmul.bf16.vlgmr.msrb.gmra.mxu3 %v10194_v23  ;;  %v5442_v18 = vld [vmem:[%s10182_s1 + $0x938] sm:$0xf0]  ;;  %v6586_v36 = vld [vmem:[%s10182_s1 + $0x894] sm:$0xf] }
 0x191   : > { %4012 = vmatpush.bf16.msra.mxu3 %v5541_v29  ;;  %v5381_v29 = vor.u32 %v6590_v47, %v5378_v2  ;;  %v5445_v49 = vor.u32 %v6606_v6, %v5442_v18  ;;  %v5365_v41 = vor.u32 %v6586_v36, %v5362_v55  ;;  %v6616_v47 = vld [vmem:[%s10182_s1 + $0x984] sm:$0xf]  ;;  %v6646_v2 = vld [vmem:[%s10182_s1 + $0xa74] sm:$0xf]  ;;  %v5602_v6 = vld [vmem:[%s10182_s1 + $0xa78] sm:$0xf0] }
 0x192   : > { %3974 = vmatpush.bf16.msra.mxu0 %v5341_v33  ;;  %v3748_v33 = vpop.f32.mrf.mxu2  ;;  %v3724_v60 = vpop.f32.mrf.mxu0  ;;  %v6662_v18 = vld [vmem:[%s10182_s1 + $0xaf4] sm:$0xf]  ;;  %v5586_v55 = vld [vmem:[%s10182_s1 + $0xa58] sm:$0xf0] }
 0x193   : > { %3987 = vmatpush.bf16.msra.mxu1 %v5405_v38  ;;  %v5370_v38 = vld [vmem:[%s10182_s1 + $0x8a8] sm:$0xf0]  ;;  %v3749_v40 = vadd.f32 %v3748_v33, %v3736_v53  ;;  %v3761_v44 = vpop.f32.mrf.mxu3  ;;  %v3737_v34 = vpop.f32.mrf.mxu1  ;;  %v5778_v22 = vld [vmem:[%s10182_s1 + $0xbd8] sm:$0xf0] }
 0x194   : > { %4000 = vmatpush.bf16.msra.mxu2 %v5469_v46  ;;  %v6604_v46 = vld [vmem:[%s10182_s1 + $0x924] sm:$0xf]  ;;  %v5373_v23 = vor.u32 %v6588_v51, %v5370_v38  ;;  %v6694_v51 = vld [vmem:[%s10182_s1 + $0xbf4] sm:$0xf]  ;;  %v5605_v38 = vor.u32 %v6646_v2, %v5602_v6  ;;  %v5658_v60 = vld [vmem:[%s10182_s1 + $0xae8] sm:$0xf0] }
 0x195   : > { %4013 = vmatpush.bf16.msra.mxu3 %v5533_v12  ;;  %v6620_v12 = vld [vmem:[%s10182_s1 + $0x9a4] sm:$0xf]  ;;  %v9512_v21 = vadd.f32 %v3761_v44, %v3749_v40  ;;  %v5594_v44 = vld [vmem:[%s10182_s1 + $0xa68] sm:$0xf0] }
 0x196   : > { %3975 = vmatpush.bf16.msra.mxu0 %v5333_v13  ;;  %v5437_v13 = vor.u32 %v6604_v46, %v5434_v54  ;;  %v5501_v32 = vor.u32 %v6620_v12, %v5498_v57  ;;  %v6644_v40 = vld [vmem:[%s10182_s1 + $0xa64] sm:$0xf]  ;;  %v5722_v34 = vld [vmem:[%s10182_s1 + $0xb68] sm:$0xf0] }
 0x197   : > { %3988 = vmatpush.bf16.msra.mxu1 %v5397_v35  ;;  %v6570_v35 = vld [vmem:[%s10182_s1 + $0x814] sm:$0xf]  ;;  %v6660_v12 = vld [vmem:[%s10182_s1 + $0xae4] sm:$0xf] }
 0x198   : > { %4001 = vmatpush.bf16.msra.mxu2 %v5461_v31  ;;  %v5298_v31 = vld [vmem:[%s10182_s1 + $0x818] sm:$0xf0] }
 0x199   : > { %4014 = vmatpush.bf16.msra.mxu3 %v5525_v37  ;;  %v6602_v37 = vld [vmem:[%s10182_s1 + $0x914] sm:$0xf]  ;;  %v5301_v16 = vor.u32 %v6570_v35, %v5298_v31  ;;  %v5597_v35 = vor.u32 %v6644_v40, %v5594_v44  ;;  %v5661_v31 = vor.u32 %v6660_v12, %v5658_v60  ;;  %v5562_v60 = vld [vmem:[%s10182_s1 + $0xa28] sm:$0xf0] }
 0x19a   : > { %3976 = vmatpush.bf16.msra.mxu0 %v5325_v59  ;;  %v5429_v59 = vor.u32 %v6602_v37, %v5426_v14  ;;  %v3750_v53 = vpop.f32.mrf.mxu2  ;;  %v6658_v37 = vld [vmem:[%s10182_s1 + $0xad4] sm:$0xf] }
 0x19b   : > { %3989 = vmatpush.bf16.msra.mxu1 %v5389_v4  ;;  %v5354_v4 = vld [vmem:[%s10182_s1 + $0x888] sm:$0xf0]  ;;  %v3763_v7 = vpop.f32.mrf.mxu3 }
 0x19c   : > { %4002 = vmatpush.bf16.msra.mxu2 %v5453_v5  ;;  %v6600_v5 = vld [vmem:[%s10182_s1 + $0x904] sm:$0xf]  ;;  %v5357_v30 = vor.u32 %v6584_v3, %v5354_v4  ;;  %v5770_v53 = vld [vmem:[%s10182_s1 + $0xbc8] sm:$0xf0] }
 0x19d   : > { %4015 = vmatpush.bf16.msra.mxu3 %v5517_v17  ;;  %v5482_v17 = vld [vmem:[%s10182_s1 + $0x988] sm:$0xf0]  ;;  %v5421_v50 = vor.u32 %v6600_v5, %v5418_v0  ;;  %v6656_v3 = vld [vmem:[%s10182_s1 + $0xac4] sm:$0xf] }
 0x19e   : > { %3977 = vmatpush.bf16.msra.mxu0 %v5317_v28  ;;  %v5666_v28 = vld [vmem:[%s10182_s1 + $0xaf8] sm:$0xf0]  ;;  %v5485_v33 = vor.u32 %v6616_v47, %v5482_v17  ;;  %v6672_v0 = vld [vmem:[%s10182_s1 + $0xb44] sm:$0xf]  ;;  %v5706_v47 = vld [vmem:[%s10182_s1 + $0xb48] sm:$0xf0] }
 0x19f   : > { %3990 = vmatpush.bf16.msra.mxu1 %v5381_v29  ;;  %v6678_v29 = vld [vmem:[%s10182_s1 + $0xb74] sm:$0xf]  ;;  %v5669_v46 = vor.u32 %v6662_v18, %v5666_v28  ;;  %v6688_v17 = vld [vmem:[%s10182_s1 + $0xbc4] sm:$0xf]  ;;  %v5709_v7 = vor.u32 %v6672_v0, %v5706_v47  ;;  %v5570_v28 = vld [vmem:[%s10182_s1 + $0xa38] sm:$0xf0] }
 0x1a0   : > { %4003 = vmatpush.bf16.msra.mxu2 %v5445_v49  ;;  %v5730_v49 = vld [vmem:[%s10182_s1 + $0xb78] sm:$0xf0]  ;;  %v6632_v0 = vld [vmem:[%s10182_s1 + $0xa04] sm:$0xf]  ;;  %v5546_v47 = vld [vmem:[%s10182_s1 + $0xa08] sm:$0xf0] }
 0x1a1   : > { %4016 = vmatpush.bf16.msra.mxu3 %v5509_v52  ;;  %v5794_v52 = vld [vmem:[%s10182_s1 + $0xbf8] sm:$0xf0]  ;;  %v5733_v54 = vor.u32 %v6678_v29, %v5730_v49  ;;  %v6654_v29 = vld [vmem:[%s10182_s1 + $0xab4] sm:$0xf] }
 0x1a2   : > { %3978 = vmatpush.bf16.msra.mxu0 %v5309_v8  ;;  %v5797_v57 = vor.u32 %v6694_v51, %v5794_v52  ;;  %v6676_v8 = vld [vmem:[%s10182_s1 + $0xb64] sm:$0xf]  ;;  %v5634_v51 = vld [vmem:[%s10182_s1 + $0xab8] sm:$0xf0]  ;;  %v6670_v52 = vld [vmem:[%s10182_s1 + $0xb34] sm:$0xf] }
 0x1a3   : > { %3991 = vmatpush.bf16.msra.mxu1 %v5373_v23  ;;  %v6692_v23 = vld [vmem:[%s10182_s1 + $0xbe4] sm:$0xf]  ;;  %v5725_v36 = vor.u32 %v6676_v8, %v5722_v34  ;;  %v5637_v44 = vor.u32 %v6654_v29, %v5634_v51  ;;  %v5858_v51 = vld [vmem:[%s10182_s1 + $0xc78] sm:$0xf0] }
 0x1a4   : > { %4004 = vmatpush.bf16.msra.mxu2 %v5437_v13  ;;  %v5786_v13 = vld [vmem:[%s10182_s1 + $0xbe8] sm:$0xf0]  ;;  %v6652_v8 = vld [vmem:[%s10182_s1 + $0xaa4] sm:$0xf] }
 0x1a5   : > { %4017 = vmatpush.bf16.msra.mxu3 %v5501_v32  ;;  %v6642_v32 = vld [vmem:[%s10182_s1 + $0xa54] sm:$0xf]  ;;  %v5789_v14 = vor.u32 %v6692_v23, %v5786_v13  ;;  %v5626_v13 = vld [vmem:[%s10182_s1 + $0xaa8] sm:$0xf0]  ;;  %v6680_v29 = vld [vmem:[%s10182_s1 + $0xb84] sm:$0xf] }
 0x1a6   : > { %3979 = vmatpush.bf16.msra.mxu0 %v5301_v16  ;;  %v5714_v16 = vld [vmem:[%s10182_s1 + $0xb58] sm:$0xf0]  ;;  %v5589_v39 = vor.u32 %v6642_v32, %v5586_v55  ;;  %v6684_v55 = vld [vmem:[%s10182_s1 + $0xba4] sm:$0xf] }
 0x1a7   : > { %3992 = vmatpush.bf16.msra.mxu1 %v5365_v41  ;;  %v6640_v41 = vld [vmem:[%s10182_s1 + $0xa44] sm:$0xf] }
 0x1a8   : > { %4005 = vmatpush.bf16.msra.mxu2 %v5429_v59  ;;  %v5578_v59 = vld [vmem:[%s10182_s1 + $0xa48] sm:$0xf0] }
 0x1a9   : > { %4018 = vmatpush.bf16.msra.mxu3 %v5493_v48  ;;  %v5642_v48 = vld [vmem:[%s10182_s1 + $0xac8] sm:$0xf0]  ;;  %v5581_v2 = vor.u32 %v6640_v41, %v5578_v59  ;;  %v6650_v41 = vld [vmem:[%s10182_s1 + $0xa94] sm:$0xf]  ;;  %v5618_v59 = vld [vmem:[%s10182_s1 + $0xa98] sm:$0xf0] }
 0x1aa   : > { %3980 = vmatpush.bf16.msra.mxu0 %v5293_v19  ;;  %v3774_v6 = vpop.f32.mrf.mxu0  ;;  %v5645_v18 = vor.u32 %v6656_v3, %v5642_v48  ;;  %v6638_v19 = vld [vmem:[%s10182_s1 + $0xa34] sm:$0xf] }
 0x1ab   : > { %3993 = vmatpush.bf16.msra.mxu1 %v5357_v30  ;;  %v3787_v30 = vpop.f32.mrf.mxu1  ;;  %v5573_v40 = vor.u32 %v6638_v19, %v5570_v28  ;;  %v6666_v3 = vld [vmem:[%s10182_s1 + $0xb14] sm:$0xf]  ;;  %v5674_v28 = vld [vmem:[%s10182_s1 + $0xb08] sm:$0xf0] }
 0x1ac   : > { %4006 = vmatpush.bf16.msra.mxu2 %v5421_v50  ;;  %v5773_v50 = vor.u32 %v6688_v17, %v5770_v53  ;;  %v5621_v17 = vor.u32 %v6650_v41, %v5618_v59  ;;  %v5842_v41 = vld [vmem:[%s10182_s1 + $0xc58] sm:$0xf0] }
 0x1ad   : > { %4019 = vmatpush.bf16.msra.mxu3 %v5485_v33  ;;  %3981 = vmatmul.bf16.vlgmr.msra.gmra.mxu0 %v7941_v56  ;;  %v6690_v56 = vld [vmem:[%s10182_s1 + $0xbd4] sm:$0xf]  ;;  %v5698_v33 = vld [vmem:[%s10182_s1 + $0xb38] sm:$0xf0] }
 0x1ae   : > { %4025 = vmatpush.bf16.msrb.mxu0 %v5605_v38  ;;  %3994 = vmatmul.bf16.vlgmr.msra.gmra.mxu1 %v7954_v62  ;;  %v5717_v62 = vor.u32 %v6674_v1, %v5714_v16  ;;  %v5781_v5 = vor.u32 %v6690_v56, %v5778_v22  ;;  %v6686_v38 = vld [vmem:[%s10182_s1 + $0xbb4] sm:$0xf]  ;;  %v5701_v12 = vor.u32 %v6670_v52, %v5698_v33  ;;  %v5906_v59 = vld [vmem:[%s10182_s1 + $0xcd8] sm:$0xf0] }
 0x1af   : > { %4038 = vmatpush.bf16.msrb.mxu1 %v5669_v46  ;;  %4007 = vmatmul.bf16.vlgmr.msra.gmra.mxu2 %v7952_v61  ;;  %v5653_v61 = vor.u32 %v6658_v37, %v5650_v63  ;;  %v5762_v46 = vld [vmem:[%s10182_s1 + $0xbb8] sm:$0xf0]  ;;  %v5754_v37 = vld [vmem:[%s10182_s1 + $0xba8] sm:$0xf0]  ;;  %v5629_v16 = vor.u32 %v6652_v8, %v5626_v13  ;;  %v6634_v22 = vld [vmem:[%s10182_s1 + $0xa14] sm:$0xf]  ;;  %v5549_v33 = vor.u32 %v6632_v0, %v5546_v47 }
 0x1b0   : > { %4051 = vmatpush.bf16.msrb.mxu2 %v5733_v54  ;;  %4020 = vmatmul.bf16.vlgmr.msra.gmra.mxu3 %v7965_v10  ;;  %v6832_v10 = vld [vmem:[%s10183_s2] sm:$0x3]  ;;  %v5765_v23 = vor.u32 %v6686_v38, %v5762_v46  ;;  %v6726_v52 = vld [vmem:[%s10182_s1 + $0xcf4] sm:$0xf]  ;;  %v5922_v38 = vld [vmem:[%s10182_s1 + $0xcf8] sm:$0xf0] }
 0x1b1   : > { %4064 = vmatpush.bf16.msrb.mxu3 %v5797_v57  ;;  %v3346_v4 = vperm.slane %v6832_v10, 1  ;;  %v6636_v57 = vld [vmem:[%s10182_s1 + $0xa24] sm:$0xf]  ;;  %v5682_v10 = vld [vmem:[%s10182_s1 + $0xb18] sm:$0xf0] }
 0x1b2   : > { %4026 = vmatpush.bf16.msrb.mxu0 %v5597_v35  ;;  %v3800_v34 = vpop.f32.mrf.mxu2  ;;  %v6668_v35 = vld [vmem:[%s10182_s1 + $0xb24] sm:$0xf]  ;;  %v3776_v1 = vpop.f32.mrf.mxu0  ;;  %v5685_v53 = vor.u32 %v6666_v3, %v5682_v10  ;;  %v6742_v46 = vld [vmem:[%s10182_s1 + $0xd74] sm:$0xf]  ;;  %v5970_v10 = vld [vmem:[%s10182_s1 + $0xd58] sm:$0xf0] }
 0x1b3   : > { %4039 = vmatpush.bf16.msrb.mxu1 %v5661_v31  ;;  %v3775_v49 = vadd.f32 %v3774_v6, %v3346_v4  ;;  %v5690_v31 = vld [vmem:[%s10182_s1 + $0xb28] sm:$0xf0]  ;;  %v3813_v32 = vpop.f32.mrf.mxu3  ;;  %v6682_v4 = vld [vmem:[%s10182_s1 + $0xb94] sm:$0xf]  ;;  %v6708_v13 = vld [vmem:[%s10182_s1 + $0xc64] sm:$0xf] }
 0x1b4   : > { %4052 = vmatpush.bf16.msrb.mxu2 %v5725_v36  ;;  %v5693_v56 = vor.u32 %v6668_v35, %v5690_v31  ;;  %v5610_v6 = vld [vmem:[%s10182_s1 + $0xa88] sm:$0xf0]  ;;  %v6724_v31 = vld [vmem:[%s10182_s1 + $0xce4] sm:$0xf]  ;;  %v6738_v3 = vld [vmem:[%s10182_s1 + $0xd54] sm:$0xf] }
 0x1b5   : > { %4065 = vmatpush.bf16.msrb.mxu3 %v5789_v14  ;;  %v3788_v54 = vadd.f32 %v3787_v30, %v3775_v49  ;;  %v5565_v14 = vor.u32 %v6636_v57, %v5562_v60  ;;  %v5738_v49 = vld [vmem:[%s10182_s1 + $0xb88] sm:$0xf0]  ;;  %v6050_v57 = vld [vmem:[%s10182_s1 + $0xdf8] sm:$0xf0]  ;;  %v5973_v0 = vor.u32 %v6738_v3, %v5970_v10  ;;  %v6720_v47 = vld [vmem:[%s10182_s1 + $0xcc4] sm:$0xf] }
 0x1b6   : > { %4027 = vmatpush.bf16.msrb.mxu0 %v5589_v39  ;;  %v5554_v39 = vld [vmem:[%s10182_s1 + $0xa18] sm:$0xf0]  ;;  %v5741_v60 = vor.u32 %v6680_v29, %v5738_v49  ;;  %v5850_v35 = vld [vmem:[%s10182_s1 + $0xc68] sm:$0xf0]  ;;  %v6702_v49 = vld [vmem:[%s10182_s1 + $0xc34] sm:$0xf] }
 0x1b7   : > { %4040 = vmatpush.bf16.msrb.mxu1 %v5653_v61  ;;  %v3801_v36 = vadd.f32 %v3800_v34, %v3788_v54  ;;  %v3789_v61 = vpop.f32.mrf.mxu1  ;;  %v5557_v48 = vor.u32 %v6634_v22, %v5554_v39  ;;  %v5986_v54 = vld [vmem:[%s10182_s1 + $0xd78] sm:$0xf0]  ;;  %v5925_v34 = vor.u32 %v6726_v52, %v5922_v38  ;;  %v6042_v1 = vld [vmem:[%s10182_s1 + $0xde8] sm:$0xf0]  ;;  %v6706_v39 = vld [vmem:[%s10182_s1 + $0xc54] sm:$0xf] }
 0x1b8   : > { %4053 = vmatpush.bf16.msrb.mxu2 %v5717_v62  ;;  %v5757_v62 = vor.u32 %v6684_v55, %v5754_v37  ;;  %v6740_v55 = vld [vmem:[%s10182_s1 + $0xd64] sm:$0xf]  ;;  %v5978_v37 = vld [vmem:[%s10182_s1 + $0xd68] sm:$0xf0]  ;;  %v6722_v61 = vld [vmem:[%s10182_s1 + $0xcd4] sm:$0xf] }
 0x1b9   : > { %4066 = vmatpush.bf16.msrb.mxu3 %v5781_v5  ;;  %v9713_v63 = vadd.f32 %v3813_v32, %v3801_v36  ;;  %v5746_v5 = vld [vmem:[%s10182_s1 + $0xb98] sm:$0xf0]  ;;  %v5914_v32 = vld [vmem:[%s10182_s1 + $0xce8] sm:$0xf0]  ;;  %v5981_v22 = vor.u32 %v6740_v55, %v5978_v37 }
 0x1ba   : > { %4028 = vmatpush.bf16.msrb.mxu0 %v5581_v2  ;;  %v6648_v2 = vld [vmem:[%s10182_s1 + $0xa84] sm:$0xf]  ;;  %v5749_v19 = vor.u32 %v6682_v4, %v5746_v5  ;;  %v6034_v4 = vld [vmem:[%s10182_s1 + $0xdd8] sm:$0xf0]  ;;  %v5845_v5 = vor.u32 %v6706_v39, %v5842_v41 }
 0x1bb   : > { %4041 = vmatpush.bf16.msrb.mxu1 %v5645_v18  ;;  %v6664_v18 = vld [vmem:[%s10182_s1 + $0xb04] sm:$0xf]  ;;  %v3815_v30 = vpop.f32.mrf.mxu3  ;;  %v5890_v38 = vld [vmem:[%s10182_s1 + $0xcb8] sm:$0xf0] }
 0x1bc   : > { %4054 = vmatpush.bf16.msrb.mxu2 %v5709_v7  ;;  %v3802_v7 = vpop.f32.mrf.mxu2  ;;  %v5826_v30 = vld [vmem:[%s10182_s1 + $0xc38] sm:$0xf0] }
 0x1bd   : > { %4067 = vmatpush.bf16.msrb.mxu3 %v5773_v50  ;;  %v6710_v50 = vld [vmem:[%s10182_s1 + $0xc74] sm:$0xf] }
 0x1be   : > { %4029 = vmatpush.bf16.msrb.mxu0 %v5573_v40  ;;  %v5613_v40 = vor.u32 %v6648_v2, %v5610_v6  ;;  %v5861_v8 = vor.u32 %v6710_v50, %v5858_v51  ;;  %v5962_v2 = vld [vmem:[%s10182_s1 + $0xd48] sm:$0xf0]  ;;  %v6752_v6 = vld [vmem:[%s10182_s1 + $0xdc4] sm:$0xf]  ;;  %v6718_v50 = vld [vmem:[%s10182_s1 + $0xcb4] sm:$0xf] }
 0x1bf   : > { %4042 = vmatpush.bf16.msrb.mxu1 %v5637_v44  ;;  %v5677_v44 = vor.u32 %v6664_v18, %v5674_v28  ;;  %v6026_v18 = vld [vmem:[%s10182_s1 + $0xdc8] sm:$0xf0] }
 0x1c0   : > { %4055 = vmatpush.bf16.msrb.mxu2 %v5701_v12  ;;  %v6758_v12 = vld [vmem:[%s10182_s1 + $0xdf4] sm:$0xf] }
 0x1c1   : > { %4068 = vmatpush.bf16.msrb.mxu3 %v5765_v23  ;;  %v5989_v23 = vor.u32 %v6742_v46, %v5986_v54  ;;  %v6053_v36 = vor.u32 %v6758_v12, %v6050_v57  ;;  %v6734_v46 = vld [vmem:[%s10182_s1 + $0xd34] sm:$0xf]  ;;  %v5954_v54 = vld [vmem:[%s10182_s1 + $0xd38] sm:$0xf0]  ;;  %v5829_v12 = vor.u32 %v6702_v49, %v5826_v30  ;;  %v5893_v57 = vor.u32 %v6718_v50, %v5890_v38 }
 0x1c2   : > { %4030 = vmatpush.bf16.msrb.mxu0 %v5565_v14  ;;  %v6756_v14 = vld [vmem:[%s10182_s1 + $0xde4] sm:$0xf]  ;;  %v6774_v30 = vld [vmem:[%s10182_s1 + $0xe74] sm:$0xf]  ;;  %v6114_v50 = vld [vmem:[%s10182_s1 + $0xe78] sm:$0xf0] }
 0x1c3   : > { %4043 = vmatpush.bf16.msrb.mxu1 %v5629_v16  ;;  %v5853_v16 = vor.u32 %v6708_v13, %v5850_v35  ;;  %v6806_v38 = vld [vmem:[%s10182_s1 + $0xf74] sm:$0xf] }
 0x1c4   : > { %4056 = vmatpush.bf16.msrb.mxu2 %v5693_v56  ;;  %v5917_v56 = vor.u32 %v6724_v31, %v5914_v32  ;;  %v5882_v31 = vld [vmem:[%s10182_s1 + $0xca8] sm:$0xf0] }
 0x1c5   : > { %4069 = vmatpush.bf16.msrb.mxu3 %v5757_v62  ;;  %v6045_v62 = vor.u32 %v6756_v14, %v6042_v1  ;;  %v5946_v32 = vld [vmem:[%s10182_s1 + $0xd28] sm:$0xf0]  ;;  %v6748_v14 = vld [vmem:[%s10182_s1 + $0xda4] sm:$0xf] }
 0x1c6   : > { %4031 = vmatpush.bf16.msrb.mxu0 %v5557_v48  ;;  %v5909_v48 = vor.u32 %v6722_v61, %v5906_v59  ;;  %v6010_v1 = vld [vmem:[%s10182_s1 + $0xda8] sm:$0xf0]  ;;  %v6698_v61 = vld [vmem:[%s10182_s1 + $0xc14] sm:$0xf] }
 0x1c7   : > { %4044 = vmatpush.bf16.msrb.mxu1 %v5621_v17  ;;  %v5898_v17 = vld [vmem:[%s10182_s1 + $0xcc8] sm:$0xf0]  ;;  %v6714_v59 = vld [vmem:[%s10182_s1 + $0xc94] sm:$0xf]  ;;  %v6013_v10 = vor.u32 %v6748_v14, %v6010_v1 }
 0x1c8   : > { %4057 = vmatpush.bf16.msrb.mxu2 %v5685_v53  ;;  %v6736_v53 = vld [vmem:[%s10182_s1 + $0xd44] sm:$0xf]  ;;  %v5901_v28 = vor.u32 %v6720_v47, %v5898_v17  ;;  %v5802_v47 = vld [vmem:[%s10182_s1 + $0xc08] sm:$0xf0] }
 0x1c9   : > { %4070 = vmatpush.bf16.msrb.mxu3 %v5749_v19  ;;  %v5965_v29 = vor.u32 %v6736_v53, %v5962_v2  ;;  %v6712_v53 = vld [vmem:[%s10182_s1 + $0xc84] sm:$0xf]  ;;  %v5866_v2 = vld [vmem:[%s10182_s1 + $0xc88] sm:$0xf0] }
 0x1ca   : > { %4032 = vmatpush.bf16.msrb.mxu0 %v5549_v33  ;;  %v3826_v19 = vpop.f32.mrf.mxu0  ;;  %v6029_v33 = vor.u32 %v6752_v6, %v6026_v18  ;;  %v6728_v6 = vld [vmem:[%s10182_s1 + $0xd04] sm:$0xf] }
 0x1cb   : > { %4045 = vmatpush.bf16.msrb.mxu1 %v5613_v40  ;;  %v3827_v51 = vadd.f32 %v3826_v19, %v9713_v63  ;;  %v3839_v52 = vpop.f32.mrf.mxu1  ;;  %v6750_v40 = vld [vmem:[%s10182_s1 + $0xdb4] sm:$0xf]  ;;  %v6018_v63 = vld [vmem:[%s10182_s1 + $0xdb8] sm:$0xf0]  ;;  %v5930_v19 = vld [vmem:[%s10182_s1 + $0xd08] sm:$0xf0] }
 0x1cc   : > { %4058 = vmatpush.bf16.msrb.mxu2 %v5677_v44  ;;  %v6021_v35 = vor.u32 %v6750_v40, %v6018_v63  ;;  %v5933_v40 = vor.u32 %v6728_v6, %v5930_v19  ;;  %v6822_v63 = vld [vmem:[%s10182_s1 + $0xff4] sm:$0xf]  ;;  %v6816_v6 = vld [vmem:[%s10182_s1 + $0xfc4] sm:$0xf] }
 0x1cd   : > { %4071 = vmatpush.bf16.msrb.mxu3 %v5741_v60  ;;  %4033 = vmatmul.bf16.vlgmr.msrb.gmra.mxu0 %v7982_v20  ;;  %v6754_v20 = vld [vmem:[%s10182_s1 + $0xdd4] sm:$0xf]  ;;  %v3840_v44 = vadd.f32 %v3839_v52, %v3827_v51  ;;  %v5957_v60 = vor.u32 %v6734_v46, %v5954_v54  ;;  %v6242_v46 = vld [vmem:[%s10182_s1 + $0xf78] sm:$0xf0]  ;;  %v5869_v54 = vor.u32 %v6712_v53, %v5866_v2  ;;  %v6218_v53 = vld [vmem:[%s10182_s1 + $0xf48] sm:$0xf0] }
 0x1ce   : > { %4077 = vmatpush.bf16.msra.mxu0 %v5861_v8  ;;  %4046 = vmatmul.bf16.vlgmr.msrb.gmra.mxu1 %v7986_v25  ;;  %v5834_v25 = vld [vmem:[%s10182_s1 + $0xc48] sm:$0xf0]  ;;  %v6700_v8 = vld [vmem:[%s10182_s1 + $0xc24] sm:$0xf]  ;;  %v6790_v51 = vld [vmem:[%s10182_s1 + $0xef4] sm:$0xf] }
 0x1cf   : > { %4090 = vmatpush.bf16.msra.mxu1 %v5925_v34  ;;  %4059 = vmatmul.bf16.vlgmr.msrb.gmra.mxu2 %v7984_v24  ;;  %v6704_v24 = vld [vmem:[%s10182_s1 + $0xc44] sm:$0xf]  ;;  %v5818_v34 = vld [vmem:[%s10182_s1 + $0xc28] sm:$0xf0] }
 0x1d0   : > { %4103 = vmatpush.bf16.msra.mxu2 %v5989_v23  ;;  %4072 = vmatmul.bf16.vlgmr.msrb.gmra.mxu3 %v7988_v26  ;;  %v6037_v26 = vor.u32 %v6754_v20, %v6034_v4  ;;  %v5837_v7 = vor.u32 %v6704_v24, %v5834_v25  ;;  %v6716_v23 = vld [vmem:[%s10182_s1 + $0xca4] sm:$0xf]  ;;  %v5874_v20 = vld [vmem:[%s10182_s1 + $0xc98] sm:$0xf0]  ;;  %v6730_v4 = vld [vmem:[%s10182_s1 + $0xd14] sm:$0xf] }
 0x1d1   : > { %4116 = vmatpush.bf16.msra.mxu3 %v6053_v36  ;;  %v6732_v36 = vld [vmem:[%s10182_s1 + $0xd24] sm:$0xf]  ;;  %v5885_v39 = vor.u32 %v6716_v23, %v5882_v31  ;;  %v6106_v23 = vld [vmem:[%s10182_s1 + $0xe68] sm:$0xf0] }
 0x1d2   : > { %4078 = vmatpush.bf16.msra.mxu0 %v5853_v16  ;;  %v3852_v13 = vpop.f32.mrf.mxu2  ;;  %v5821_v16 = vor.u32 %v6700_v8, %v5818_v34  ;;  %v5949_v41 = vor.u32 %v6732_v36, %v5946_v32  ;;  %v6696_v25 = vld [vmem:[%s10182_s1 + $0xc04] sm:$0xf]  ;;  %v6245_v8 = vor.u32 %v6806_v38, %v6242_v46  ;;  %v6170_v31 = vld [vmem:[%s10182_s1 + $0xee8] sm:$0xf0]  ;;  %v6798_v38 = vld [vmem:[%s10182_s1 + $0xf34] sm:$0xf] }
 0x1d3   : > { %4091 = vmatpush.bf16.msra.mxu1 %v5917_v56  ;;  %v3853_v55 = vadd.f32 %v3852_v13, %v3840_v44  ;;  %v3865_v37 = vpop.f32.mrf.mxu3  ;;  %v3841_v3 = vpop.f32.mrf.mxu1  ;;  %v5805_v52 = vor.u32 %v6696_v25, %v5802_v47  ;;  %v6306_v44 = vld [vmem:[%s10182_s1 + $0xff8] sm:$0xf0]  ;;  %v6772_v34 = vld [vmem:[%s10182_s1 + $0xe64] sm:$0xf]  ;;  %v6234_v32 = vld [vmem:[%s10182_s1 + $0xf68] sm:$0xf0] }
 0x1d4   : > { %4104 = vmatpush.bf16.msra.mxu2 %v5981_v22  ;;  %v3828_v22 = vpop.f32.mrf.mxu0  ;;  %v6788_v13 = vld [vmem:[%s10182_s1 + $0xee4] sm:$0xf]  ;;  %v6109_v14 = vor.u32 %v6772_v34, %v6106_v23  ;;  %v6802_v3 = vld [vmem:[%s10182_s1 + $0xf54] sm:$0xf]  ;;  %v6090_v25 = vld [vmem:[%s10182_s1 + $0xe48] sm:$0xf0] }
 0x1d5   : > { %4117 = vmatpush.bf16.msra.mxu3 %v6045_v62  ;;  %v9912_v56 = vadd.f32 %v3865_v37, %v3853_v55  ;;  %v5810_v62 = vld [vmem:[%s10182_s1 + $0xc18] sm:$0xf0]  ;;  %v6804_v36 = vld [vmem:[%s10182_s1 + $0xf64] sm:$0xf]  ;;  %v6298_v37 = vld [vmem:[%s10182_s1 + $0xfe8] sm:$0xf0]  ;;  %v6173_v1 = vor.u32 %v6788_v13, %v6170_v31 }
 0x1d6   : > { %4079 = vmatpush.bf16.msra.mxu0 %v5845_v5  ;;  %v5938_v5 = vld [vmem:[%s10182_s1 + $0xd18] sm:$0xf0]  ;;  %v5813_v24 = vor.u32 %v6698_v61, %v5810_v62  ;;  %v6820_v55 = vld [vmem:[%s10182_s1 + $0xfe4] sm:$0xf]  ;;  %v6770_v22 = vld [vmem:[%s10182_s1 + $0xe54] sm:$0xf] }
 0x1d7   : > { %4092 = vmatpush.bf16.msra.mxu1 %v5909_v48  ;;  %v6746_v48 = vld [vmem:[%s10182_s1 + $0xd94] sm:$0xf]  ;;  %v5941_v17 = vor.u32 %v6730_v4, %v5938_v5  ;;  %v10195_v61 = vshrl.u32 %v8337_v15, 16  ;;  %v6301_v62 = vor.u32 %v6820_v55, %v6298_v37  ;;  %v10197_v4 = vshrl.u32 %v8357_v43, 16  ;;  %v6290_v5 = vld [vmem:[%s10182_s1 + $0xfd8] sm:$0xf0] }
 0x1d8   : > { %4105 = vmatpush.bf16.msra.mxu2 %v5973_v0  ;;  %v6002_v0 = vld [vmem:[%s10182_s1 + $0xd98] sm:$0xf0]  ;;  %v6818_v15 = vld [vmem:[%s10182_s1 + $0xfd4] sm:$0xf]  ;;  %v6768_v43 = vld [vmem:[%s10182_s1 + $0xe44] sm:$0xf] }
 0x1d9   : > { %4118 = vmatpush.bf16.msra.mxu3 %v6037_v26  ;;  %v5877_v26 = vor.u32 %v6714_v59, %v5874_v20  ;;  %v6162_v59 = vld [vmem:[%s10182_s1 + $0xed8] sm:$0xf0]  ;;  %v10196_v20 = vshrl.u32 %v8355_v42, 16  ;;  %v6784_v47 = vld [vmem:[%s10182_s1 + $0xec4] sm:$0xf]  ;;  %v6093_v19 = vor.u32 %v6768_v43, %v6090_v25 }
 0x1da   : > { %4080 = vmatpush.bf16.msra.mxu0 %v5837_v7  ;;  %v3854_v18 = vpop.f32.mrf.mxu2  ;;  %v6005_v7 = vor.u32 %v6746_v48, %v6002_v0  ;;  %v10198_v48 = vshrl.u32 %v8359_v45, 16  ;;  %v6293_v45 = vor.u32 %v6818_v15, %v6290_v5  ;;  %v6210_v46 = vld [vmem:[%s10182_s1 + $0xf38] sm:$0xf0]  ;;  %v6138_v13 = vld [vmem:[%s10182_s1 + $0xea8] sm:$0xf0] }
 0x1db   : > { %4093 = vmatpush.bf16.msra.mxu1 %v5901_v28  ;;  %v6744_v28 = vld [vmem:[%s10182_s1 + $0xd84] sm:$0xf]  ;;  %v3867_v49 = vpop.f32.mrf.mxu3  ;;  %v6282_v18 = vld [vmem:[%s10182_s1 + $0xfc8] sm:$0xf0]  ;;  %v6810_v15 = vld [vmem:[%s10182_s1 + $0xf94] sm:$0xf] }
 0x1dc   : > { %4106 = vmatpush.bf16.msra.mxu2 %v5965_v29  ;;  %v5994_v29 = vld [vmem:[%s10182_s1 + $0xd88] sm:$0xf0]  ;;  %v6812_v55 = vld [vmem:[%s10182_s1 + $0xfa4] sm:$0xf]  ;;  %v6258_v5 = vld [vmem:[%s10182_s1 + $0xf98] sm:$0xf0] }
 0x1dd   : > { %4119 = vmatpush.bf16.msra.mxu3 %v6029_v33  ;;  %v6178_v33 = vld [vmem:[%s10182_s1 + $0xef8] sm:$0xf0]  ;;  %v6202_v31 = vld [vmem:[%s10182_s1 + $0xf28] sm:$0xf0]  ;;  %v6776_v25 = vld [vmem:[%s10182_s1 + $0xe84] sm:$0xf] }
 0x1de   : > { %4081 = vmatpush.bf16.msra.mxu0 %v5829_v12  ;;  %v5997_v12 = vor.u32 %v6744_v28, %v5994_v29  ;;  %v6266_v37 = vld [vmem:[%s10182_s1 + $0xfa8] sm:$0xf0] }
 0x1df   : > { %4094 = vmatpush.bf16.msra.mxu1 %v5893_v57  ;;  %v6117_v57 = vor.u32 %v6774_v30, %v6114_v50  ;;  %v6766_v30 = vld [vmem:[%s10182_s1 + $0xe34] sm:$0xf]  ;;  %v6082_v50 = vld [vmem:[%s10182_s1 + $0xe38] sm:$0xf0]  ;;  %v6058_v43 = vld [vmem:[%s10182_s1 + $0xe08] sm:$0xf0] }
 0x1e0   : > { %4107 = vmatpush.bf16.msra.mxu2 %v5957_v60  ;;  %v6181_v60 = vor.u32 %v6790_v51, %v6178_v33  ;;  %v6782_v51 = vld [vmem:[%s10182_s1 + $0xeb4] sm:$0xf]  ;;  %v6146_v33 = vld [vmem:[%s10182_s1 + $0xeb8] sm:$0xf0] }
 0x1e1   : > { %4120 = vmatpush.bf16.msra.mxu3 %v6021_v35  ;;  %v6309_v35 = vor.u32 %v6822_v63, %v6306_v44  ;;  %v6085_v63 = vor.u32 %v6766_v30, %v6082_v50  ;;  %v6149_v44 = vor.u32 %v6782_v51, %v6146_v33  ;;  %v10200_v30 = vshrl.u32 %v8572_v9, 16 }
 0x1e2   : > { %4082 = vmatpush.bf16.msra.mxu0 %v5821_v16  ;;  %v6237_v16 = vor.u32 %v6804_v36, %v6234_v32  ;;  %v10201_v50 = vshrl.u32 %v8570_v11, 16  ;;  %v10202_v51 = vshrl.u32 %v8574_v27, 16 }
 0x1e3   : > { %4095 = vmatpush.bf16.msra.mxu1 %v5885_v39  ;;  %v6098_v39 = vld [vmem:[%s10182_s1 + $0xe58] sm:$0xf0] }
 0x1e4   : > { %4108 = vmatpush.bf16.msra.mxu2 %v5949_v41  ;;  %v6786_v41 = vld [vmem:[%s10182_s1 + $0xed4] sm:$0xf]  ;;  %v6101_v0 = vor.u32 %v6770_v22, %v6098_v39 }
 0x1e5   : > { %4121 = vmatpush.bf16.msra.mxu3 %v6013_v10  ;;  %v6226_v10 = vld [vmem:[%s10182_s1 + $0xf58] sm:$0xf0]  ;;  %v6165_v42 = vor.u32 %v6786_v41, %v6162_v59  ;;  %v6778_v59 = vld [vmem:[%s10182_s1 + $0xe94] sm:$0xf] }
 0x1e6   : > { %4083 = vmatpush.bf16.msra.mxu0 %v5813_v24  ;;  %v6229_v24 = vor.u32 %v6802_v3, %v6226_v10  ;;  %v6269_v3 = vor.u32 %v6812_v55, %v6266_v37  ;;  %v6130_v10 = vld [vmem:[%s10182_s1 + $0xe98] sm:$0xf0] }
 0x1e7   : > { %4096 = vmatpush.bf16.msra.mxu1 %v5877_v26  ;;  %v6154_v26 = vld [vmem:[%s10182_s1 + $0xec8] sm:$0xf0] }
 0x1e8   : > { %4109 = vmatpush.bf16.msra.mxu2 %v5941_v17  ;;  %v6800_v17 = vld [vmem:[%s10182_s1 + $0xf44] sm:$0xf]  ;;  %v6157_v29 = vor.u32 %v6784_v47, %v6154_v26  ;;  %v6261_v47 = vor.u32 %v6810_v15, %v6258_v5 }
 0x1e9   : > { %4122 = vmatpush.bf16.msra.mxu3 %v6005_v7  ;;  %v6221_v49 = vor.u32 %v6800_v17, %v6218_v53  ;;  %v6792_v26 = vld [vmem:[%s10182_s1 + $0xf04] sm:$0xf]  ;;  %v6186_v17 = vld [vmem:[%s10182_s1 + $0xf08] sm:$0xf0] }
 0x1ea   : > { %4084 = vmatpush.bf16.msra.mxu0 %v5805_v52  ;;  %v3878_v2 = vpop.f32.mrf.mxu0 }
 0x1eb   : > { %4097 = vmatpush.bf16.msra.mxu1 %v5869_v54  ;;  %v3879_v7 = vadd.f32 %v3878_v2, %v9912_v56  ;;  %v3891_v28 = vpop.f32.mrf.mxu1  ;;  %v6285_v56 = vor.u32 %v6816_v6, %v6282_v18  ;;  %v6814_v54 = vld [vmem:[%s10182_s1 + $0xfb4] sm:$0xf]  ;;  %v6808_v2 = vld [vmem:[%s10182_s1 + $0xf84] sm:$0xf]  ;;  %v6250_v6 = vld [vmem:[%s10182_s1 + $0xf88] sm:$0xf0] }
 0x1ec   : > { %4110 = vmatpush.bf16.msra.mxu2 %v5933_v40  ;;  %v6274_v40 = vld [vmem:[%s10182_s1 + $0xfb8] sm:$0xf0] }
 0x1ed   : > { %4123 = vmatpush.bf16.msra.mxu3 %v5997_v12  ;;  %4085 = vmatmul.bf16.vlgmr.msra.gmra.mxu0 %v10195_v61  ;;  %v3892_v52 = vadd.f32 %v3891_v28, %v3879_v7  ;;  %v6213_v12 = vor.u32 %v6798_v38, %v6210_v46  ;;  %v6277_v34 = vor.u32 %v6814_v54, %v6274_v40  ;;  %v6762_v61 = vld [vmem:[%s10182_s1 + $0xe14] sm:$0xf] }
 0x1ee   : > { %4129 = vmatpush.bf16.msrb.mxu0 %v6117_v57  ;;  %4098 = vmatmul.bf16.vlgmr.msra.gmra.mxu1 %v10197_v4  ;;  %v6764_v57 = vld [vmem:[%s10182_s1 + $0xe24] sm:$0xf]  ;;  %v6194_v4 = vld [vmem:[%s10182_s1 + $0xf18] sm:$0xf0]  ;;  %v6189_v28 = vor.u32 %v6792_v26, %v6186_v17 }
 0x1ef   : > { %4142 = vmatpush.bf16.msrb.mxu1 %v6181_v60  ;;  %4111 = vmatmul.bf16.vlgmr.msra.gmra.mxu2 %v10196_v20  ;;  %v6074_v60 = vld [vmem:[%s10182_s1 + $0xe28] sm:$0xf0]  ;;  %v6794_v20 = vld [vmem:[%s10182_s1 + $0xf14] sm:$0xf] }
 0x1f0   : > { %4155 = vmatpush.bf16.msrb.mxu2 %v6245_v8  ;;  %4124 = vmatmul.bf16.vlgmr.msra.gmra.mxu3 %v10198_v48  ;;  %v6780_v8 = vld [vmem:[%s10182_s1 + $0xea4] sm:$0xf] }
 0x1f1   : > { %4168 = vmatpush.bf16.msrb.mxu3 %v6309_v35  ;;  %v6796_v35 = vld [vmem:[%s10182_s1 + $0xf24] sm:$0xf]  ;;  %v6141_v39 = vor.u32 %v6780_v8, %v6138_v13 }
 0x1f2   : > { %4130 = vmatpush.bf16.msrb.mxu0 %v6109_v14  ;;  %v3904_v23 = vpop.f32.mrf.mxu2  ;;  %v3880_v14 = vpop.f32.mrf.mxu0  ;;  %v6205_v41 = vor.u32 %v6796_v35, %v6202_v31 }
 0x1f3   : > { %4143 = vmatpush.bf16.msrb.mxu1 %v6173_v1  ;;  %v3905_v36 = vadd.f32 %v3904_v23, %v3892_v52  ;;  %v3917_v32 = vpop.f32.mrf.mxu3  ;;  %v6077_v1 = vor.u32 %v6764_v57, %v6074_v60 }
 0x1f4   : > { %4156 = vmatpush.bf16.msrb.mxu2 %v6237_v16  ;;  %v3893_v16 = vpop.f32.mrf.mxu1 }
 0x1f5   : > { %4169 = vmatpush.bf16.msrb.mxu3 %v6301_v62  ;;  %v3918_v22 = vadd.f32 %v3917_v32, %v3905_v36  ;;  %v6066_v62 = vld [vmem:[%s10182_s1 + $0xe18] sm:$0xf0] }
 0x1f6   : > { %4131 = vmatpush.bf16.msrb.mxu0 %v6101_v0  ;;  %v6069_v48 = vor.u32 %v6762_v61, %v6066_v62  ;;  %v6133_v0 = vor.u32 %v6778_v59, %v6130_v10 }
 0x1f7   : > { %4144 = vmatpush.bf16.msrb.mxu1 %v6165_v42  ;;  %v6197_v42 = vor.u32 %v6794_v20, %v6194_v4 }
 0x1f8   : > { %4157 = vmatpush.bf16.msrb.mxu2 %v6229_v24  ;;  %v6760_v24 = vld [vmem:[%s10182_s1 + $0xe04] sm:$0xf] }
 0x1f9   : > { %4170 = vmatpush.bf16.msrb.mxu3 %v6293_v45  ;;  %v6122_v45 = vld [vmem:[%s10182_s1 + $0xe88] sm:$0xf0]  ;;  %v6061_v7 = vor.u32 %v6760_v24, %v6058_v43 }
 0x1fa   : > { %4132 = vmatpush.bf16.msrb.mxu0 %v6093_v19  ;;  %v3906_v53 = vpop.f32.mrf.mxu2  ;;  %v6125_v19 = vor.u32 %v6776_v25, %v6122_v45 }
 0x1fb   : > { %4145 = vmatpush.bf16.msrb.mxu1 %v6157_v29  ;;  %v3919_v18 = vpop.f32.mrf.mxu3  ;;  %v6253_v29 = vor.u32 %v6808_v2, %v6250_v6 }
 0x1fc   : > { %4158 = vmatpush.bf16.msrb.mxu2 %v6221_v49  ;;  %v10199_v49 = vshrl.u32 %v8552_v58, 16 }
 0x1fd   : > { %4171 = vmatpush.bf16.msrb.mxu3 %v6285_v56 }
 0x1fe   : > { %4133 = vmatpush.bf16.msrb.mxu0 %v6085_v63 }
 0x1ff   : > { %4146 = vmatpush.bf16.msrb.mxu1 %v6149_v44 }
 0x200   : > { %4159 = vmatpush.bf16.msrb.mxu2 %v6213_v12 }
 0x201   : > { %4172 = vmatpush.bf16.msrb.mxu3 %v6277_v34 }
 0x202   : > { %4134 = vmatpush.bf16.msrb.mxu0 %v6077_v1 }
 0x203   : > { %4147 = vmatpush.bf16.msrb.mxu1 %v6141_v39 }
 0x204   : > { %4160 = vmatpush.bf16.msrb.mxu2 %v6205_v41 }
 0x205   : > { %4173 = vmatpush.bf16.msrb.mxu3 %v6269_v3 }
 0x206   : > { %4135 = vmatpush.bf16.msrb.mxu0 %v6069_v48 }
 0x207   : > { %4148 = vmatpush.bf16.msrb.mxu1 %v6133_v0 }
 0x208   : > { %4161 = vmatpush.bf16.msrb.mxu2 %v6197_v42 }
 0x209   : > { %4174 = vmatpush.bf16.msrb.mxu3 %v6261_v47 }
 0x20a   : > { %4136 = vmatpush.bf16.msrb.mxu0 %v6061_v7  ;;  %v3930_v56 = vpop.f32.mrf.mxu0 }
 0x20b   : > { %4149 = vmatpush.bf16.msrb.mxu1 %v6125_v19  ;;  %v3931_v52 = vadd.f32 %v3930_v56, %v3918_v22  ;;  %v3943_v33 = vpop.f32.mrf.mxu1  ;;  %v4198_v56 = vld [vmem:[%s165_s4] sm:$0x3] }
 0x20c   : > { %4162 = vmatpush.bf16.msrb.mxu2 %v6189_v28 }
 0x20d   : > { %4175 = vmatpush.bf16.msrb.mxu3 %v6253_v29  ;;  %4137 = vmatmul.bf16.vlgmr.msrb.gmra.mxu0 %v10199_v49  ;;  %v3944_v38 = vadd.f32 %v3943_v33, %v3931_v52  ;;  %v4181_v29 = vmax.f32 %v9512_v21, 0.0 }
 0x20e   : > { %4150 = vmatmul.bf16.vlgmr.msrb.gmra.mxu1 %v10200_v30 }
 0x20f   : > { %4163 = vmatmul.bf16.vlgmr.msrb.gmra.mxu2 %v10201_v50 }
 0x210   : > { %4176 = vmatmul.bf16.vlgmr.msrb.gmra.mxu3 %v10202_v51 }
 0x212   : > { %v3956_v46 = vpop.f32.mrf.mxu2  ;;  %v3932_v63 = vpop.f32.mrf.mxu0 }
 0x213   : > { %v3957_v54 = vadd.f32 %v3956_v46, %v3944_v38  ;;  %v3969_v40 = vpop.f32.mrf.mxu3  ;;  %v3945_v44 = vpop.f32.mrf.mxu1 }
 0x215   : > { %v3970_v58 = vadd.f32 %v3969_v40, %v3957_v54 }
 0x21a   : > { %v3958_v12 = vpop.f32.mrf.mxu2 }
 0x21b   : > { %v3971_v57 = vpop.f32.mrf.mxu3 }
 0x22a   : > { %v3982_v9 = vpop.f32.mrf.mxu0 }
 0x22b   : > { %v3983_v60 = vadd.f32 %v3982_v9, %v3970_v58  ;;  %v3995_v8 = vpop.f32.mrf.mxu1 }
 0x22d   : > { %v3996_v11 = vadd.f32 %v3995_v8, %v3983_v60 }
 0x232   : > { %v4008_v34 = vpop.f32.mrf.mxu2  ;;  %v3984_v13 = vpop.f32.mrf.mxu0 }
 0x233   : > { %v4009_v23 = vadd.f32 %v4008_v34, %v3996_v11  ;;  %v4021_v27 = vpop.f32.mrf.mxu3  ;;  %v3997_v35 = vpop.f32.mrf.mxu1 }
 0x235   : > { %v4022_v31 = vadd.f32 %v4021_v27, %v4009_v23 }
 0x23a   : > { %v4010_v36 = vpop.f32.mrf.mxu2 }
 0x23b   : > { %v4023_v32 = vpop.f32.mrf.mxu3 }
 0x24a   : > { %v4034_v55 = vpop.f32.mrf.mxu0 }
 0x24b   : > { %v4047_v37 = vpop.f32.mrf.mxu1  ;;  %v4035_v59 = vadd.f32 %v4034_v55, %v4022_v31 }
 0x24d   : > { %v4048_v15 = vadd.f32 %v4047_v37, %v4035_v59 }
 0x252   : > { %v4060_v14 = vpop.f32.mrf.mxu2  ;;  %v4036_v16 = vpop.f32.mrf.mxu0 }
 0x253   : > { %v4073_v1 = vpop.f32.mrf.mxu3  ;;  %v4049_v22 = vpop.f32.mrf.mxu1  ;;  %v4061_v5 = vadd.f32 %v4060_v14, %v4048_v15 }
 0x255   : > { %v4074_v42 = vadd.f32 %v4073_v1, %v4061_v5 }
 0x25a   : > { %v4062_v39 = vpop.f32.mrf.mxu2 }
 0x25b   : > { %v4075_v41 = vpop.f32.mrf.mxu3 }
 0x26a   : > { %v4086_v61 = vpop.f32.mrf.mxu0 }
 0x26b   : > { %v4099_v62 = vpop.f32.mrf.mxu1  ;;  %v4087_v24 = vadd.f32 %v4086_v61, %v4074_v42 }
 0x26d   : > { %v4100_v43 = vadd.f32 %v4099_v62, %v4087_v24 }
 0x272   : > { %v4112_v3 = vpop.f32.mrf.mxu2  ;;  %v4088_v20 = vpop.f32.mrf.mxu0 }
 0x273   : > { %v4125_v10 = vpop.f32.mrf.mxu3  ;;  %v4101_v4 = vpop.f32.mrf.mxu1  ;;  %v4113_v25 = vadd.f32 %v4112_v3, %v4100_v43 }
 0x275   : > { %v4126_v47 = vadd.f32 %v4125_v10, %v4113_v25 }
 0x27a   : > { %v4114_v48 = vpop.f32.mrf.mxu2 }
 0x27b   : > { %v4127_v0 = vpop.f32.mrf.mxu3 }
 0x28a   : > { %v4138_v45 = vpop.f32.mrf.mxu0 }
 0x28b   : > { %v4151_v26 = vpop.f32.mrf.mxu1  ;;  %v4139_v17 = vadd.f32 %v4138_v45, %v4126_v47 }
 0x28d   : > { %v4152_v53 = vadd.f32 %v4151_v26, %v4139_v17 }
 0x292   : > { %v4164_v2 = vpop.f32.mrf.mxu2  ;;  %v4140_v7 = vpop.f32.mrf.mxu0 }
 0x293   : > { %v4165_v6 = vadd.f32 %v4164_v2, %v4152_v53  ;;  %v4177_v18 = vpop.f32.mrf.mxu3  ;;  %v4153_v19 = vpop.f32.mrf.mxu1 }
 0x295   : > { %v4178_v28 = vadd.f32 %v4177_v18, %v4165_v6 }
 0x297   : > { %v4182_v49 = vmax.f32 %v4178_v28, 0.0 }
 0x299   : > { %v4183_v30 = vpack.c.bf16 %v4182_v49, %v4181_v29 }
 0x29a   : > { %v4166_v50 = vpop.f32.mrf.mxu2 }
 0x29b   : > { %v4185_v51 = vrot.slane %v4183_v30, 3  ;;  %v4179_v52 = vpop.f32.mrf.mxu3 }
 0x29d   : > { %v4189_v33 = vsel %vm4186_vm0, %v4183_v30, %v4185_v51 }
 0x29e   : > { %v4199_v38 = vsel %vm4197_vm6, %v4189_v33, %v4198_v56 }
 0x29f   : > { %4200 = vst [vmem:[%s165_s4] sm:$0x3] %v4199_v38 }
 0x2a0 PF: > { %s13_s12 = sadd.s32 1, %s6839_s12  }
 0x2a1   : > { %p10_p4 = scmp.ge.s32.totalorder %s13_s12, 4  }
 0x2a3   :  { %12 = sbr.rel (!%p10_p4) target bundleno = 1 (0x1), region = 63 }

</bundles_post_ra>
